<compile_context>
chip_gen: v7x
topology: tpu7x:2x2x1
jax: 0.10.0
libtpu: 0.0.40
codegen_flags: <defaults>
</compile_context>

<pallas_src>
import functools

import numpy as np
import jax
import jax.numpy as jnp
from jax.experimental import pallas as pl
from jax.experimental.pallas import tpu as pltpu

NUM_CLASSES = 6
OUT_PAD = 128          # lane-dense padded classifier width
H1 = 512
H2 = 1024
EPS = 1e-5

PARAM_ORDER = ("w1", "w2", "lw1", "lw2", "v1024", "v512", "lb2")


def asl_kernel(x_ref, ahat_ref,
               w1_ref, w2_ref, lw1_ref, lw2_ref,
               v1024_ref, v512_ref, lb2_ref,
               out_ref, *, num_graphs, nodes_per_graph):
    f32 = jnp.float32
    bf16 = jnp.bfloat16

    x = x_ref[...]          # [TN, F]   bf16
    ahat = ahat_ref[...]    # [TN, TN]  bf16 block-diagonal normalized adjacency

    # Packed per-channel vectors (f32).
    t1 = v512_ref[0:1, :]    # fused BN1 shift (+ conv1 bias)   [1, 512]
    lb1 = v512_ref[1:2, :]   # Linear1 bias                     [1, 512]
    t2 = v1024_ref[0:1, :]   # fused BN2 shift (+ conv2 bias)   [1, 1024]
    g1 = v1024_ref[1:2, :]   # LayerNorm1 gamma                 [1, 1024]
    be1 = v1024_ref[2:3, :]  # LayerNorm1 beta                  [1, 1024]

    # ---- GCNConv1 (BN1 scale folded into w1): relu(ahat @ (x @ w1') + t1) ----
    xw = jnp.dot(x, w1_ref[...], preferred_element_type=f32)                 # [TN, 512]
    h = jnp.dot(ahat, xw.astype(bf16), preferred_element_type=f32)           # [TN, 512]
    h = jnp.maximum(h + t1, 0.0)
    # Dropout(p=0.7) is identity in eval mode.

    # ---- GCNConv2 (BN2 scale folded into w2): relu(ahat @ (h @ w2') + t2) ----
    hw = jnp.dot(h.astype(bf16), w2_ref[...], preferred_element_type=f32)    # [TN, 1024]
    h = jnp.dot(ahat, hw.astype(bf16), preferred_element_type=f32)           # [TN, 1024]
    h = jnp.maximum(h + t2, 0.0)

    # ---- LayerNorm1 (per node over channels), one-pass variance, clamped ----
    mu = jnp.mean(h, axis=-1, keepdims=True)
    var = jnp.maximum(jnp.mean(h * h, axis=-1, keepdims=True) - mu * mu, 0.0)
    h = (h - mu) * jax.lax.rsqrt(var + EPS) * g1 + be1

    # ---- global_max_pool: nodes contiguous per graph -> sublane reduce ----
    pooled = jnp.max(h.reshape(num_graphs, nodes_per_graph, H2), axis=1)     # [G, 1024]

    # ---- Linear1 + ReLU ----
    z = jnp.dot(pooled.astype(bf16), lw1_ref[...], preferred_element_type=f32) + lb1
    z = jnp.maximum(z, 0.0)

    # ---- LayerNorm2 (gamma/beta folded into lw2/lb2 on the host), clamped ----
    mu = jnp.mean(z, axis=-1, keepdims=True)
    var = jnp.maximum(jnp.mean(z * z, axis=-1, keepdims=True) - mu * mu, 0.0)
    z = (z - mu) * jax.lax.rsqrt(var + EPS)

    # ---- Linear2 (lane-dense 128-wide padded head) + log_softmax ----
    logits = jnp.dot(z.astype(bf16), lw2_ref[...], preferred_element_type=f32) + lb2_ref[...]
    m = jnp.max(logits, axis=-1, keepdims=True)
    lse = jnp.log(jnp.sum(jnp.exp(logits - m), axis=-1, keepdims=True)) + m
    out_ref[...] = logits - lse


def asl_forward(x, ahat, p, *, num_graphs, nodes_per_graph):
    """x: [TN, F] bf16; ahat: [TN, TN] bf16 block-diagonal. Returns [num_graphs, 6] f32."""
    kernel = functools.partial(asl_kernel,
                               num_graphs=num_graphs,
                               nodes_per_graph=nodes_per_graph)
    vm = pltpu.MemorySpace.VMEM
    out = pl.pallas_call(
        kernel,
        out_shape=jax.ShapeDtypeStruct((num_graphs, OUT_PAD), jnp.float32),
        in_specs=[pl.BlockSpec(memory_space=vm)] * (2 + len(PARAM_ORDER)),
        out_specs=pl.BlockSpec(memory_space=vm),
    )(x, ahat, *[p[k] for k in PARAM_ORDER])
    return out[:, :NUM_CLASSES]


# ----------------------------- host-side glue -------------------------------

def build_graphs(num_graphs, nodes_per_graph):
    """Block-diagonal normalized adjacency D^-1/2 (A+I) D^-1/2 for disjoint graphs."""
    N = num_graphs * nodes_per_graph
    A = np.zeros((N, N), np.float32)
    for g in range(num_graphs):
        off = g * nodes_per_graph
        skip = 2 + (g % 3)
        for i in range(nodes_per_graph):
            j = (i + 1) % nodes_per_graph
            k = (i + skip) % nodes_per_graph
            A[off + i, off + j] = A[off + j, off + i] = 1.0
            A[off + i, off + k] = A[off + k, off + i] = 1.0
    A_tilde = A + np.eye(N, dtype=np.float32)
    d = 1.0 / np.sqrt(A_tilde.sum(axis=1))
    ahat = (d[:, None] * A_tilde) * d[None, :]
    return jnp.asarray(ahat).astype(jnp.bfloat16)


def init_params(key, num_features):
    ks = jax.random.split(key, 20)

    def nrm(k, shape, s=0.1):
        return s * jax.random.normal(k, shape, jnp.float32)

    def bn_fold(conv_w, conv_b, k_g, k_b, k_m, k_v, c):
        # Eval BatchNorm y = (h - mean)*gamma/sqrt(var+eps) + beta with h = ahat@X@W + b
        # => y = ahat @ X @ (W*scale) + shift ; scale = gamma/sqrt(var+eps),
        #    shift = beta + (b - mean)*scale.  Column scale commutes with ahat.
        gamma = 1.0 + nrm(k_g, (1, c))
        beta = nrm(k_b, (1, c))
        mean = nrm(k_m, (1, c))
        var = 0.5 + jax.random.uniform(k_v, (1, c), jnp.float32)
        scale = gamma / jnp.sqrt(var + EPS)
        return conv_w * scale, beta + (conv_b - mean) * scale

    bf16 = jnp.bfloat16
    # GCNConv1 + BatchNorm1
    w1_raw = nrm(ks[0], (num_features, H1))
    b1 = nrm(ks[1], (1, H1))
    w1, t1 = bn_fold(w1_raw, b1, ks[2], ks[3], ks[4], ks[5], H1)
    # GCNConv2 + BatchNorm2
    w2_raw = nrm(ks[6], (H1, H2))
    b2 = nrm(ks[7], (1, H2))
    w2, t2 = bn_fold(w2_raw, b2, ks[8], ks[9], ks[10], ks[11], H2)
    # LayerNorm1 (kept in-kernel; pooling after it is nonlinear)
    g1 = 1.0 + nrm(ks[12], (1, H2))
    be1 = nrm(ks[13], (1, H2))
    # Linear1
    lw1 = nrm(ks[14], (H2, H1))
    lb1 = nrm(ks[15], (1, H1))
    # LayerNorm2 folded into Linear2: z_ln @ lw2 + lb2 == zhat @ (g2^T*lw2) + (be2@lw2 + lb2)
    g2 = 1.0 + nrm(ks[16], (1, H1))
    be2 = nrm(ks[17], (1, H1))
    lw2_raw = nrm(ks[18], (H1, NUM_CLASSES))
    lb2_raw = nrm(ks[19], (1, NUM_CLASSES))
    lw2_f = lw2_raw * g2.reshape(H1, 1)
    lb2_f = lb2_raw + be2 @ lw2_raw
    # Lane-dense padding of the classifier head: 6 -> 128 columns (pad bias = -1e30,
    # which underflows to exactly 0 inside the softmax sum).
    lw2_pad = jnp.zeros((H1, OUT_PAD), jnp.float32).at[:, :NUM_CLASSES].set(lw2_f)
    lb2_pad = jnp.full((1, OUT_PAD), -1e30, jnp.float32).at[:, :NUM_CLASSES].set(lb2_f)

    return {
        "w1": w1.astype(bf16),                               # [F, 512]
        "w2": w2.astype(bf16),                               # [512, 1024]
        "lw1": lw1.astype(bf16),                             # [1024, 512]
        "lw2": lw2_pad.astype(bf16),                         # [512, 128]
        "v1024": jnp.concatenate([t2, g1, be1], axis=0),     # [3, 1024] f32
        "v512": jnp.concatenate([t1, lb1], axis=0),          # [2, 512]  f32
        "lb2": lb2_pad,                                      # [1, 128]  f32
    }


def reference_forward(x, ahat, p, num_graphs, nodes_per_graph):
    """Pure-JAX reference mirroring the kernel math (same folded bf16 params)."""
    f32, bf16 = jnp.float32, jnp.bfloat16
    t1, lb1 = p["v512"][0:1], p["v512"][1:2]
    t2, g1, be1 = p["v1024"][0:1], p["v1024"][1:2], p["v1024"][2:3]

    xw = jnp.dot(x, p["w1"], preferred_element_type=f32)
    h = jnp.dot(ahat, xw.astype(bf16), preferred_element_type=f32)
    h = jnp.maximum(h + t1, 0.0)
    hw = jnp.dot(h.astype(bf16), p["w2"], preferred_element_type=f32)
    h = jnp.dot(ahat, hw.astype(bf16), preferred_element_type=f32)
    h = jnp.maximum(h + t2, 0.0)
    mu = h.mean(-1, keepdims=True)
    var = jnp.maximum((h * h).mean(-1, keepdims=True) - mu * mu, 0.0)
    h = (h - mu) * jax.lax.rsqrt(var + EPS) * g1 + be1
    pooled = jnp.max(h.reshape(num_graphs, nodes_per_graph, H2), axis=1)
    z = jnp.dot(pooled.astype(bf16), p["lw1"], preferred_element_type=f32) + lb1
    z = jnp.maximum(z, 0.0)
    mu = z.mean(-1, keepdims=True)
    var = jnp.maximum((z * z).mean(-1, keepdims=True) - mu * mu, 0.0)
    z = (z - mu) * jax.lax.rsqrt(var + EPS)
    logits = jnp.dot(z.astype(bf16), p["lw2"], preferred_element_type=f32) + p["lb2"]
    return jax.nn.log_softmax(logits, axis=-1)[:, :NUM_CLASSES]


if __name__ == "__main__":
    num_graphs = 8          # graphs in the (single) PyG-style batch
    nodes_per_graph = 16    # -> 128 nodes total: full 128-row M for the dense matmuls
    num_features = 4        # per-node input features

    key = jax.random.PRNGKey(0)
    kx, kp = jax.random.split(key)
    TN = num_graphs * nodes_per_graph

    ahat = build_graphs(num_graphs, nodes_per_graph)                        # [128, 128] bf16
    x = jax.random.normal(kx, (TN, num_features), jnp.float32).astype(jnp.bfloat16)
    params = init_params(kp, num_features)

    out = asl_forward(x, ahat, params,
                      num_graphs=num_graphs, nodes_per_graph=nodes_per_graph)
    out = jax.block_until_ready(out)

    ref = reference_forward(x, ahat, params, num_graphs, nodes_per_graph)
    np.testing.assert_allclose(np.asarray(out), np.asarray(ref), rtol=2e-3, atol=2e-3)
    assert out.shape == (num_graphs, NUM_CLASSES)

    print("KERNEL_OK")
</pallas_src>

<mosaic_0001>
module attributes {stable_mosaic.version = 11 : i64} {
  func.func @asl_kernel(%arg0: memref<128x4xbf16, #tpu.memory_space<vmem>>, %arg1: memref<128x128xbf16, #tpu.memory_space<vmem>>, %arg2: memref<4x512xbf16, #tpu.memory_space<vmem>>, %arg3: memref<512x1024xbf16, #tpu.memory_space<vmem>>, %arg4: memref<1024x512xbf16, #tpu.memory_space<vmem>>, %arg5: memref<512x128xbf16, #tpu.memory_space<vmem>>, %arg6: memref<3x1024xf32, #tpu.memory_space<vmem>>, %arg7: memref<2x512xf32, #tpu.memory_space<vmem>>, %arg8: memref<1x128xf32, #tpu.memory_space<vmem>>, %arg9: memref<8x128xf32, #tpu.memory_space<vmem>>) attributes {dimension_semantics = [], scalar_prefetch = 0 : i64, scratch_operands = 0 : i64, tpu.core_type = #tpu.core_type<tc>} {
    %c0 = arith.constant 0 : index
    %c0_0 = arith.constant 0 : index
    %0 = vector.load %arg0[%c0, %c0_0] : memref<128x4xbf16, #tpu.memory_space<vmem>>, vector<128x4xbf16>
    %c0_1 = arith.constant 0 : index
    %c0_2 = arith.constant 0 : index
    %1 = vector.load %arg1[%c0_1, %c0_2] : memref<128x128xbf16, #tpu.memory_space<vmem>>, vector<128x128xbf16>
    %c0_3 = arith.constant 0 : index
    %c0_4 = arith.constant 0 : index
    %2 = vector.load %arg7[%c0_3, %c0_4] : memref<2x512xf32, #tpu.memory_space<vmem>>, vector<1x512xf32>
    %c1 = arith.constant 1 : index
    %c0_5 = arith.constant 0 : index
    %3 = vector.load %arg7[%c1, %c0_5] : memref<2x512xf32, #tpu.memory_space<vmem>>, vector<1x512xf32>
    %c0_6 = arith.constant 0 : index
    %c0_7 = arith.constant 0 : index
    %4 = vector.load %arg6[%c0_6, %c0_7] : memref<3x1024xf32, #tpu.memory_space<vmem>>, vector<1x1024xf32>
    %c1_8 = arith.constant 1 : index
    %c0_9 = arith.constant 0 : index
    %5 = vector.load %arg6[%c1_8, %c0_9] : memref<3x1024xf32, #tpu.memory_space<vmem>>, vector<1x1024xf32>
    %c2 = arith.constant 2 : index
    %c0_10 = arith.constant 0 : index
    %6 = vector.load %arg6[%c2, %c0_10] : memref<3x1024xf32, #tpu.memory_space<vmem>>, vector<1x1024xf32>
    %c0_11 = arith.constant 0 : index
    %c0_12 = arith.constant 0 : index
    %7 = vector.load %arg2[%c0_11, %c0_12] : memref<4x512xbf16, #tpu.memory_space<vmem>>, vector<4x512xbf16>
    %cst = arith.constant dense<0.000000e+00> : vector<128x512xf32>
    %8 = tpu.matmul %0, %7, %cst {dimension_numbers = #tpu.dot_dimension_numbers<[1], [0], [0], [1], [0, 0, 1, 1], [], []>} : vector<128x4xbf16>, vector<4x512xbf16>, vector<128x512xf32> -> vector<128x512xf32>
    %9 = arith.truncf %8 : vector<128x512xf32> to vector<128x512xbf16>
    %cst_13 = arith.constant dense<0.000000e+00> : vector<128x512xf32>
    %10 = tpu.matmul %1, %9, %cst_13 {dimension_numbers = #tpu.dot_dimension_numbers<[1], [0], [0], [1], [0, 0, 1, 1], [], []>} : vector<128x128xbf16>, vector<128x512xbf16>, vector<128x512xf32> -> vector<128x512xf32>
    %11 = vector.broadcast %2 : vector<1x512xf32> to vector<128x512xf32>
    %12 = arith.addf %10, %11 : vector<128x512xf32>
    %cst_14 = arith.constant 0.000000e+00 : f32
    %13 = vector.broadcast %cst_14 : f32 to vector<128x512xf32>
    %14 = arith.maximumf %12, %13 : vector<128x512xf32>
    %15 = arith.truncf %14 : vector<128x512xf32> to vector<128x512xbf16>
    %c0_15 = arith.constant 0 : index
    %c0_16 = arith.constant 0 : index
    %16 = vector.load %arg3[%c0_15, %c0_16] : memref<512x1024xbf16, #tpu.memory_space<vmem>>, vector<512x1024xbf16>
    %cst_17 = arith.constant dense<0.000000e+00> : vector<128x1024xf32>
    %17 = tpu.matmul %15, %16, %cst_17 {dimension_numbers = #tpu.dot_dimension_numbers<[1], [0], [0], [1], [0, 0, 1, 1], [], []>} : vector<128x512xbf16>, vector<512x1024xbf16>, vector<128x1024xf32> -> vector<128x1024xf32>
    %18 = arith.truncf %17 : vector<128x1024xf32> to vector<128x1024xbf16>
    %cst_18 = arith.constant dense<0.000000e+00> : vector<128x1024xf32>
    %19 = tpu.matmul %1, %18, %cst_18 {dimension_numbers = #tpu.dot_dimension_numbers<[1], [0], [0], [1], [0, 0, 1, 1], [], []>} : vector<128x128xbf16>, vector<128x1024xbf16>, vector<128x1024xf32> -> vector<128x1024xf32>
    %20 = vector.broadcast %4 : vector<1x1024xf32> to vector<128x1024xf32>
    %21 = arith.addf %19, %20 : vector<128x1024xf32>
    %cst_19 = arith.constant 0.000000e+00 : f32
    %22 = vector.broadcast %cst_19 : f32 to vector<128x1024xf32>
    %23 = arith.maximumf %21, %22 : vector<128x1024xf32>
    %cst_20 = arith.constant dense<0.000000e+00> : vector<128xf32>
    %24 = vector.multi_reduction <add>, %23, %cst_20 [1] : vector<128x1024xf32> to vector<128xf32>
    %25 = vector.shape_cast %24 : vector<128xf32> to vector<128x1xf32>
    %cst_21 = arith.constant 1.024000e+03 : f32
    %26 = vector.broadcast %cst_21 : f32 to vector<128x1xf32>
    %27 = arith.divf %25, %26 : vector<128x1xf32>
    %28 = arith.mulf %23, %23 : vector<128x1024xf32>
    %cst_22 = arith.constant dense<0.000000e+00> : vector<128xf32>
    %29 = vector.multi_reduction <add>, %28, %cst_22 [1] : vector<128x1024xf32> to vector<128xf32>
    %30 = vector.shape_cast %29 : vector<128xf32> to vector<128x1xf32>
    %cst_23 = arith.constant 1.024000e+03 : f32
    %31 = vector.broadcast %cst_23 : f32 to vector<128x1xf32>
    %32 = arith.divf %30, %31 : vector<128x1xf32>
    %33 = arith.mulf %27, %27 : vector<128x1xf32>
    %34 = arith.subf %32, %33 : vector<128x1xf32>
    %cst_24 = arith.constant 0.000000e+00 : f32
    %35 = vector.broadcast %cst_24 : f32 to vector<128x1xf32>
    %36 = arith.maximumf %34, %35 : vector<128x1xf32>
    %37 = vector.broadcast %27 : vector<128x1xf32> to vector<128x1024xf32>
    %38 = arith.subf %23, %37 : vector<128x1024xf32>
    %cst_25 = arith.constant 9.99999974E-6 : f32
    %39 = vector.broadcast %cst_25 : f32 to vector<128x1xf32>
    %40 = arith.addf %36, %39 : vector<128x1xf32>
    %41 = math.rsqrt %40 : vector<128x1xf32>
    %42 = vector.broadcast %41 : vector<128x1xf32> to vector<128x1024xf32>
    %43 = arith.mulf %38, %42 : vector<128x1024xf32>
    %44 = vector.broadcast %5 : vector<1x1024xf32> to vector<128x1024xf32>
    %45 = arith.mulf %43, %44 : vector<128x1024xf32>
    %46 = vector.broadcast %6 : vector<1x1024xf32> to vector<128x1024xf32>
    %47 = arith.addf %45, %46 : vector<128x1024xf32>
    %48 = vector.shape_cast %47 : vector<128x1024xf32> to vector<8x16x1024xf32>
    %cst_26 = arith.constant dense<0xFF800000> : vector<8x1024xf32>
    %49 = vector.multi_reduction <maximumf>, %48, %cst_26 [1] : vector<8x16x1024xf32> to vector<8x1024xf32>
    %50 = arith.truncf %49 : vector<8x1024xf32> to vector<8x1024xbf16>
    %c0_27 = arith.constant 0 : index
    %c0_28 = arith.constant 0 : index
    %51 = vector.load %arg4[%c0_27, %c0_28] : memref<1024x512xbf16, #tpu.memory_space<vmem>>, vector<1024x512xbf16>
    %cst_29 = arith.constant dense<0.000000e+00> : vector<8x512xf32>
    %52 = tpu.matmul %50, %51, %cst_29 {dimension_numbers = #tpu.dot_dimension_numbers<[1], [0], [0], [1], [0, 0, 1, 1], [], []>} : vector<8x1024xbf16>, vector<1024x512xbf16>, vector<8x512xf32> -> vector<8x512xf32>
    %53 = vector.broadcast %3 : vector<1x512xf32> to vector<8x512xf32>
    %54 = arith.addf %52, %53 : vector<8x512xf32>
    %cst_30 = arith.constant 0.000000e+00 : f32
    %55 = vector.broadcast %cst_30 : f32 to vector<8x512xf32>
    %56 = arith.maximumf %54, %55 : vector<8x512xf32>
    %cst_31 = arith.constant dense<0.000000e+00> : vector<8xf32>
    %57 = vector.multi_reduction <add>, %56, %cst_31 [1] : vector<8x512xf32> to vector<8xf32>
    %58 = vector.shape_cast %57 : vector<8xf32> to vector<8x1xf32>
    %cst_32 = arith.constant 5.120000e+02 : f32
    %59 = vector.broadcast %cst_32 : f32 to vector<8x1xf32>
    %60 = arith.divf %58, %59 : vector<8x1xf32>
    %61 = arith.mulf %56, %56 : vector<8x512xf32>
    %cst_33 = arith.constant dense<0.000000e+00> : vector<8xf32>
    %62 = vector.multi_reduction <add>, %61, %cst_33 [1] : vector<8x512xf32> to vector<8xf32>
    %63 = vector.shape_cast %62 : vector<8xf32> to vector<8x1xf32>
    %cst_34 = arith.constant 5.120000e+02 : f32
    %64 = vector.broadcast %cst_34 : f32 to vector<8x1xf32>
    %65 = arith.divf %63, %64 : vector<8x1xf32>
    %66 = arith.mulf %60, %60 : vector<8x1xf32>
    %67 = arith.subf %65, %66 : vector<8x1xf32>
    %cst_35 = arith.constant 0.000000e+00 : f32
    %68 = vector.broadcast %cst_35 : f32 to vector<8x1xf32>
    %69 = arith.maximumf %67, %68 : vector<8x1xf32>
    %70 = vector.broadcast %60 : vector<8x1xf32> to vector<8x512xf32>
    %71 = arith.subf %56, %70 : vector<8x512xf32>
    %cst_36 = arith.constant 9.99999974E-6 : f32
    %72 = vector.broadcast %cst_36 : f32 to vector<8x1xf32>
    %73 = arith.addf %69, %72 : vector<8x1xf32>
    %74 = math.rsqrt %73 : vector<8x1xf32>
    %75 = vector.broadcast %74 : vector<8x1xf32> to vector<8x512xf32>
    %76 = arith.mulf %71, %75 : vector<8x512xf32>
    %77 = arith.truncf %76 : vector<8x512xf32> to vector<8x512xbf16>
    %c0_37 = arith.constant 0 : index
    %c0_38 = arith.constant 0 : index
    %78 = vector.load %arg5[%c0_37, %c0_38] : memref<512x128xbf16, #tpu.memory_space<vmem>>, vector<512x128xbf16>
    %cst_39 = arith.constant dense<0.000000e+00> : vector<8x128xf32>
    %79 = tpu.matmul %77, %78, %cst_39 {dimension_numbers = #tpu.dot_dimension_numbers<[1], [0], [0], [1], [0, 0, 1, 1], [], []>} : vector<8x512xbf16>, vector<512x128xbf16>, vector<8x128xf32> -> vector<8x128xf32>
    %c0_40 = arith.constant 0 : index
    %c0_41 = arith.constant 0 : index
    %80 = vector.load %arg8[%c0_40, %c0_41] : memref<1x128xf32, #tpu.memory_space<vmem>>, vector<1x128xf32>
    %81 = vector.broadcast %80 : vector<1x128xf32> to vector<8x128xf32>
    %82 = arith.addf %79, %81 : vector<8x128xf32>
    %cst_42 = arith.constant dense<0xFF800000> : vector<8xf32>
    %83 = vector.multi_reduction <maximumf>, %82, %cst_42 [1] : vector<8x128xf32> to vector<8xf32>
    %84 = vector.shape_cast %83 : vector<8xf32> to vector<8x1xf32>
    %85 = vector.broadcast %84 : vector<8x1xf32> to vector<8x128xf32>
    %86 = arith.subf %82, %85 : vector<8x128xf32>
    %87 = math.exp %86 : vector<8x128xf32>
    %cst_43 = arith.constant dense<0.000000e+00> : vector<8xf32>
    %88 = vector.multi_reduction <add>, %87, %cst_43 [1] : vector<8x128xf32> to vector<8xf32>
    %89 = vector.shape_cast %88 : vector<8xf32> to vector<8x1xf32>
    %90 = math.log %89 : vector<8x1xf32>
    %91 = arith.addf %90, %84 : vector<8x1xf32>
    %92 = vector.broadcast %91 : vector<8x1xf32> to vector<8x128xf32>
    %93 = arith.subf %82, %92 : vector<8x128xf32>
    %c0_44 = arith.constant 0 : index
    %c0_45 = arith.constant 0 : index
    %94 = vector.load %arg9[%c0_44, %c0_45] : memref<8x128xf32, #tpu.memory_space<vmem>>, vector<8x128xf32>
    tpu.vector_store %arg9[%c0_44, %c0_45], %93 {strides = array<i32>} : memref<8x128xf32, #tpu.memory_space<vmem>>, vector<8x128xf32>,
    return
  }
}

</mosaic_0001>

<bundles_post_ra>
// kernel: tpu_custom_call.1
= control target key start
LH: loop header
LB: loop body
LE: loop exit
PB: predicated region body
PF: predicated region fallthrough
CT: control target
= control target key end

     0   :  { %14 = vsyncpa [#allocation3], 0  ;;  %s12576_s0 = inlined_call_operand.vmem [shape: bf16[128,4], index: 0, kind: input, shape index: {}]   ;;  %s12577_s1 = inlined_call_operand.vmem [shape: bf16[128,128], index: 1, kind: input, shape index: {}]   ;;  %s12578_s2 = inlined_call_operand.vmem [shape: bf16[4,512], index: 2, kind: input, shape index: {}]   ;;  %s12579_s3 = inlined_call_operand.hbm [shape: bf16[512,1024], index: 3, kind: input, shape index: {}]   ;;  %s12580_s4 = inlined_call_operand.hbm [shape: bf16[1024,512], index: 4, kind: input, shape index: {}]   ;;  %s12581_s5 = inlined_call_operand.hbm [shape: bf16[512,128], index: 5, kind: input, shape index: {}]   ;;  %s12582_s6 = inlined_call_operand.hbm [shape: f32[3,1024], index: 6, kind: input, shape index: {}]   ;;  %s12583_s7 = inlined_call_operand.vmem [shape: f32[2,512], index: 7, kind: input, shape index: {}]   ;;  %s12584_s8 = inlined_call_operand.vmem [shape: f32[1,128], index: 8, kind: input, shape index: {}]   ;;  %s12585_s9 = inlined_call_operand.hbm [shape: f32[8,128], index: 9, kind: output, shape index: {}]  }
   0x1   :  { %15 = vsyncpa [#allocation6], 0 }
   0x2   :  { %16 = vsyncpa [#allocation9], 0 }
   0x3   :  { %17 = vsyncpa [#allocation4], 0  ;;  %s9527_s30 = smov [#allocation5]   ;;  %s9409_s13 = scalar_lea.hbm %s12580_s4, 32768 }
   0x4   :  { %s41_s10 = sshll.u32 %s9527_s30, 4  ;;  %p9410_p0 = scmp.ne.s32.totalorder %s12580_s4, %s9409_s13  ;;  %s42_s10 = int_to_ptr.vmem [resolvable:$true] %s41_s10 }
   0x5   :  { %p9413_p1 = scmp.lt.u32.totalorder %s9409_s13, %s12580_s4 }
   0x7   :  { %p9415_p2 = pnand %p9413_p1, %p9410_p0 }
   0x9   :  { %9418 = shalt.err (!%p9415_p2)
}
   0xa   :  { %s9419_s18 = scalar_lea.vmem %s42_s10, 32768  ;;  %p9424_p4 = scmp.lt.s32.totalorder %s42_s10, %s42_s10 }
   0xb   :  { %p9420_p3 = scmp.ne.s32.totalorder %s42_s10, %s9419_s18  ;;  %p9425_p5 = scmp.lt.s32.totalorder %s9419_s18, %s9419_s18 }
   0xd   :  { %p9426_p6 = por %p9425_p5, %p9424_p4 }
   0xf   :  { %p9427_p7 = pnand %p9426_p6, %p9420_p3 }
  0x11   :  { %9430 = shalt.err (!%p9427_p7)
}
  0x12   :  { %s9528_s19 = smov 256   ;;  %s9529_s20 = smov 16  }
  0x13   :  { %47 = dma.hbm_to_vmem [thread:$0]  %s12580_s4, 32768, %s42_s10, [#allocation6], %s9528_s19, %s9528_s19, %s9529_s20  }
  0x14   :  { %s9530_s23 = smov [#allocation2]   ;;  %s9431_s27 = scalar_lea.hbm %s12579_s3, 32768 }
  0x15   :  { %s29_s24 = sshll.u32 %s9530_s23, 4  ;;  %p9432_p8 = scmp.ne.s32.totalorder %s12579_s3, %s9431_s27  ;;  %s30_s24 = int_to_ptr.vmem [resolvable:$true] %s29_s24 }
  0x16   :  { %p9435_p9 = scmp.lt.u32.totalorder %s9431_s27, %s12579_s3 }
  0x18   :  { %p9437_p10 = pnand %p9435_p9, %p9432_p8 }
  0x1a   :  { %9440 = shalt.err (!%p9437_p10)
}
  0x1b   :  { %s9441_s12 = scalar_lea.vmem %s30_s24, 32768  ;;  %p9446_p12 = scmp.lt.s32.totalorder %s30_s24, %s30_s24 }
  0x1c   :  { %p9442_p11 = scmp.ne.s32.totalorder %s30_s24, %s9441_s12  ;;  %p9447_p13 = scmp.lt.s32.totalorder %s9441_s12, %s9441_s12 }
  0x1e   :  { %p9448_p0 = por %p9447_p13, %p9446_p12 }
  0x20   :  { %p9449_p1 = pnand %p9448_p0, %p9442_p11 }
  0x22   :  { %9452 = shalt.err (!%p9449_p1)
}
  0x23   :  { %s9531_s4 = smov 512   ;;  %s9532_s10 = smov 32  }
  0x24   :  { %35 = dma.hbm_to_vmem [thread:$0]  %s12579_s3, 32768, %s30_s24, [#allocation3], %s9531_s4, %s9531_s4, %s9532_s10  }
  0x25   :  { %s9533_s15 = smov [#allocation7]   ;;  %s9453_s19 = scalar_lea.hbm %s12581_s5, 4096 }
  0x26   :  { %s53_s16 = sshll.u32 %s9533_s15, 4  ;;  %p9454_p2 = scmp.ne.s32.totalorder %s12581_s5, %s9453_s19  ;;  %s54_s16 = int_to_ptr.vmem [resolvable:$true] %s53_s16 }
  0x27   :  { %p9457_p3 = scmp.lt.u32.totalorder %s9453_s19, %s12581_s5 }
  0x29   :  { %p9459_p4 = pnand %p9457_p3, %p9454_p2 }
  0x2b   :  { %9462 = shalt.err (!%p9459_p4)
}
  0x2c   :  { %s9463_s25 = scalar_lea.vmem %s54_s16, 4096  ;;  %p9468_p6 = scmp.lt.s32.totalorder %s54_s16, %s54_s16 }
  0x2d   :  { %p9464_p5 = scmp.ne.s32.totalorder %s54_s16, %s9463_s25  ;;  %p9469_p7 = scmp.lt.s32.totalorder %s9463_s25, %s9463_s25 }
  0x2f   :  { %p9470_p8 = por %p9469_p7, %p9468_p6 }
  0x31   :  { %p9471_p9 = pnand %p9470_p8, %p9464_p5 }
  0x33   :  { %9474 = shalt.err (!%p9471_p9)
}
  0x34   :  { %s9534_s3 = smov 64   ;;  %s9535_s24 = smov 4  }
  0x35   :  { %59 = dma.hbm_to_vmem [thread:$0]  %s12581_s5, 4096, %s54_s16, [#allocation6], %s9534_s3, %s9534_s3, %s9535_s24  }
  0x36   :  { %s9536_s28 = smov [#allocation8]   ;;  %s9475_s12 = scalar_lea.hbm %s12582_s6, 512 }
  0x37   :  { %s66_s29 = sshll.u32 %s9536_s28, 4  ;;  %p9476_p10 = scmp.ne.s32.totalorder %s12582_s6, %s9475_s12  ;;  %s67_s29 = int_to_ptr.vmem [resolvable:$true] %s66_s29 }
  0x38   :  { %p9479_p11 = scmp.lt.u32.totalorder %s9475_s12, %s12582_s6 }
  0x3a   :  { %p9481_p12 = pnand %p9479_p11, %p9476_p10 }
  0x3c   :  { %9484 = shalt.err (!%p9481_p12)
}
  0x3d   :  { %s9485_s15 = scalar_lea.vmem %s67_s29, 512  ;;  %p9490_p0 = scmp.lt.s32.totalorder %s67_s29, %s67_s29 }
  0x3e   :  { %p9486_p13 = scmp.ne.s32.totalorder %s67_s29, %s9485_s15  ;;  %p9491_p1 = scmp.lt.s32.totalorder %s9485_s15, %s9485_s15 }
  0x40   :  { %p9492_p2 = por %p9491_p1, %p9490_p0 }
  0x42   :  { %p9493_p3 = pnand %p9492_p2, %p9486_p13 }
  0x44   :  { %9496 = shalt.err (!%p9493_p3)
}
  0x45   :  { %69 = dma.hbm_to_vmem [thread:$0]  %s12582_s6, 512, %s67_s29, [#allocation9]  }
  0x46   :  { %9519 = dma.done.wait [#allocation3], 32768  }
  0x47   :  { %9520 = vsyncadd [#allocation3], 4294934528 }
  0x48   :  { %9521 = dma.done.wait [#allocation6], 36864  }
  0x49   :  { %9522 = vsyncadd [#allocation6], 4294930432 }
  0x4a   :  { %9523 = dma.done.wait [#allocation9], 512  }
  0x4b   :  { %9524 = vsyncadd [#allocation9], 4294966784  ;;  %v173_v0 = vlaneseq  ;;  %v9537_v1 = vmov 1983009808   ;;  %v12586_v3 = vmov 0   ;;  %v127_v7 = vld [vmem:[%s12578_s2] sm:$0xff] }
  0x4c   :  { %v171_v2 = vunpack.c.l.s4 %v9537_v1  ;;  %256 = vmatprep.mubr.bf16.mxu0 %v12586_v3  ;;  %369 = vmatprep.mubr.bf16.mxu1 %v12586_v3  ;;  %vm211_vm0 = vcmask 1041408   ;;  %v124_v11 = vld [vmem:[#allocation8 + $0x1] ss:$4 sm:$0xff]  ;;  %v126_v15 = vld [vmem:[#allocation8 + $0x2] ss:$4 sm:$0xff]  ;;  %v169_v26 = vcombine.high %v127_v7, %v127_v7  ;;  %vm186_vm1 = vcmask 31744  }
  0x4d   :  { %v9640_v4 = vshrl.u32 %v173_v0, 7  ;;  %v8928_v25 = vld [vmem:[%s12576_s0] sm:$0xff]   ;;  %v8929_v30 = vld [vmem:[%s12576_s0 + $0x8] sm:$0xff]   ;;  %v8930_v31 = vld [vmem:[%s12576_s0 + $0x10] sm:$0xff]   ;;  %vm6038_vm2 = vcmask 1041409   ;;  %vm6040_vm3 = vcmask 1042434  }
  0x4e   :  { %v172_v5 = vunpack.c.0.s8 %v171_v2  ;;  %v8931_v32 = vld [vmem:[%s12576_s0 + $0x18] sm:$0xff]   ;;  %v8932_v33 = vld [vmem:[%s12576_s0 + $0x20] sm:$0xff]   ;;  %v8933_v34 = vld [vmem:[%s12576_s0 + $0x28] sm:$0xff]   ;;  %vm6042_vm4 = vcmask 1043459   ;;  %vm6044_vm5 = vcmask 1044484   ;;  %vm6046_vm6 = vcmask 1045509  }
  0x4f   :  { %v9647_v9 = vsub.s32 4, %v9640_v4  ;;  %v9650_v10 = vsub.s32 5, %v9640_v4  ;;  %v9653_v13 = vsub.s32 6, %v9640_v4  ;;  %v9656_v14 = vsub.s32 7, %v9640_v4  ;;  %v8934_v35 = vld [vmem:[%s12576_s0 + $0x30] sm:$0xff]   ;;  %v8935_v36 = vld [vmem:[%s12576_s0 + $0x38] sm:$0xff]  }
  0x50   :  { %v175_v6 = vsub.s32 %v172_v5, %v9640_v4  ;;  %vm6048_vm7 = vcmask 1046534   ;;  %vm6050_vm8 = vcmask 1047559  }
  0x51   :  { %12827 = vst [vmem:[#allocation15_spill] sm:$0xff] %v9650_v10  ;;  %12828 = vst [vmem:[#allocation16_spill] sm:$0xff] %v9653_v13  ;;  %v9660_v16 = vrot.slane %v124_v11, %v9647_v9  ;;  %v9663_v17 = vrot.slane %v124_v11, %v9650_v10  ;;  %v9666_v18 = vrot.slane %v124_v11, %v9653_v13 }
  0x52   :  { %v176_v8 = vrot.slane %v127_v7, %v175_v6  ;;  %12829 = vst [vmem:[#allocation17_spill] sm:$0xff] %v9656_v14  ;;  %v9669_v19 = vrot.slane %v124_v11, %v9656_v14  ;;  %v9672_v20 = vrot.slane %v126_v15, %v9647_v9  ;;  %v9675_v21 = vrot.slane %v126_v15, %v9650_v10 }
  0x53   :  { %12830 = vst [vmem:[#allocation18_spill] sm:$0xff] %v9660_v16  ;;  %12831 = vst [vmem:[#allocation19_spill] sm:$0xff] %v9663_v17  ;;  %v9678_v22 = vrot.slane %v126_v15, %v9653_v13  ;;  %v9681_v23 = vrot.slane %v126_v15, %v9656_v14  ;;  %v183_v27 = vrot.slane %v169_v26, %v175_v6 }
  0x54   :  { %v184_v12 = vcombine.high %v176_v8, %v176_v8  ;;  %12832 = vst [vmem:[#allocation20_spill] sm:$0xff] %v9666_v18  ;;  %12833 = vst [vmem:[#allocation21_spill] sm:$0xff] %v9669_v19  ;;  %v213_v24 = vsel %vm211_vm0, %v176_v8, 0 }
  0x55   :  { %12834 = vst [vmem:[#allocation22_spill] sm:$0xff] %v9672_v20  ;;  %12835 = vst [vmem:[#allocation23_spill] sm:$0xff] %v9675_v21  ;;  %v185_v28 = vcombine.high %v183_v27, %v183_v27  ;;  %v219_v29 = vsel %vm211_vm0, %v183_v27, 0 }
  0x56   :  { %8144 = vmatprep.subr.msk.bf16.mxu0 %vm211_vm0, %v184_v12  ;;  %12836 = vst [vmem:[#allocation24_spill] sm:$0xff] %v9678_v22  ;;  %12837 = vst [vmem:[#allocation25_spill] sm:$0xff] %v9681_v23 }
  0x57   :  { %225 = vmatpush1.bf16.msra.mxu0 %v213_v24  ;;  %8153 = vmatprep.subr.msk.bf16.mxu1 %vm211_vm0, %v185_v28 }
  0x58   :  { %338 = vmatpush1.bf16.msra.mxu1 %v219_v29 }
  0x5a   :  { %8145 = vmatmul.mubr.msk.bf16.vlgmr.msra.gmra.mrb[0].mxu0 %vm186_vm1, %v8928_v25 }
  0x5b   :  { %266 = vmatprep.mubr.bf16.mxu0 %v12586_v3  ;;  %8154 = vmatmul.mubr.msk.bf16.vlgmr.msra.gmra.mrb[0].mxu1 %vm186_vm1, %v8928_v25 }
  0x5c   :  { %379 = vmatprep.mubr.bf16.mxu1 %v12586_v3 }
  0x62   :  { %8146 = vmatmul.mubr.msk.bf16.gmra.mrb[4].mxu0 %vm186_vm1, %v8929_v30 }
  0x63   :  { %276 = vmatprep.mubr.bf16.mxu0 %v12586_v3  ;;  %8155 = vmatmul.mubr.msk.bf16.gmra.mrb[4].mxu1 %vm186_vm1, %v8929_v30 }
  0x64   :  { %389 = vmatprep.mubr.bf16.mxu1 %v12586_v3 }
  0x6a   :  { %8147 = vmatmul.mubr.msk.bf16.gmra.mrb[8].mxu0 %vm186_vm1, %v8930_v31 }
  0x6b   :  { %286 = vmatprep.mubr.bf16.mxu0 %v12586_v3  ;;  %8156 = vmatmul.mubr.msk.bf16.gmra.mrb[8].mxu1 %vm186_vm1, %v8930_v31 }
  0x6c   :  { %399 = vmatprep.mubr.bf16.mxu1 %v12586_v3 }
  0x72   :  { %8148 = vmatmul.mubr.msk.bf16.gmra.mrb[12].mxu0 %vm186_vm1, %v8931_v32 }
  0x73   :  { %296 = vmatprep.mubr.bf16.mxu0 %v12586_v3  ;;  %8157 = vmatmul.mubr.msk.bf16.gmra.mrb[12].mxu1 %vm186_vm1, %v8931_v32 }
  0x74   :  { %409 = vmatprep.mubr.bf16.mxu1 %v12586_v3 }
  0x7a   :  { %8149 = vmatmul.mubr.msk.bf16.gmra.mrb[16].mxu0 %vm186_vm1, %v8932_v33 }
  0x7b   :  { %306 = vmatprep.mubr.bf16.mxu0 %v12586_v3  ;;  %8158 = vmatmul.mubr.msk.bf16.gmra.mrb[16].mxu1 %vm186_vm1, %v8932_v33 }
  0x7c   :  { %419 = vmatprep.mubr.bf16.mxu1 %v12586_v3 }
  0x82   :  { %8150 = vmatmul.mubr.msk.bf16.gmra.mrb[20].mxu0 %vm186_vm1, %v8933_v34 }
  0x83   :  { %316 = vmatprep.mubr.bf16.mxu0 %v12586_v3  ;;  %8159 = vmatmul.mubr.msk.bf16.gmra.mrb[20].mxu1 %vm186_vm1, %v8933_v34 }
  0x84   :  { %429 = vmatprep.mubr.bf16.mxu1 %v12586_v3 }
  0x8a   :  { %8151 = vmatmul.mubr.msk.bf16.gmra.mrb[24].mxu0 %vm186_vm1, %v8934_v35 }
  0x8b   :  { %326 = vmatprep.mubr.bf16.mxu0 %v12586_v3  ;;  %8160 = vmatmul.mubr.msk.bf16.gmra.mrb[24].mxu1 %vm186_vm1, %v8934_v35 }
  0x8c   :  { %439 = vmatprep.mubr.bf16.mxu1 %v12586_v3 }
  0x92   :  { %8152 = vmatmul.mubr.msk.bf16.gmra.mrb[28].mxu0 %vm186_vm1, %v8935_v36 }
  0x93   :  { %583 = vmatprep.mubr.bf16.mxu0 %v12586_v3  ;;  %8161 = vmatmul.mubr.msk.bf16.gmra.mrb[28].mxu1 %vm186_vm1, %v8935_v36 }
  0x94   :  { %696 = vmatprep.mubr.bf16.mxu1 %v12586_v3 }
 0x12d   :  { %v258_v37 = vpop.f32.mrb[0].mxu0 }
 0x12e   :  { %v260_v38 = vpop.f32.mrb[1].mxu0  ;;  %v371_v43 = vpop.f32.mrb[0].mxu1 }
 0x12f   :  { %v262_v39 = vpop.f32.mrb[2].mxu0  ;;  %v373_v44 = vpop.f32.mrb[1].mxu1 }
 0x130   :  { %v450_v40 = vpack.c.bf16 %v262_v39, %v258_v37  ;;  %v264_v41 = vpop.f32.mrb[3].mxu0  ;;  %v375_v46 = vpop.f32.mrb[2].mxu1 }
 0x131   :  { %v451_v42 = vpack.c.bf16 %v264_v41, %v260_v38  ;;  %v452_v48 = vpack.c.bf16 %v375_v46, %v371_v43  ;;  %v377_v49 = vpop.f32.mrb[3].mxu1 }
 0x132   :  { %v453_v51 = vpack.c.bf16 %v377_v49, %v373_v44 }
 0x133   :  { %551 = vmatprep.subr.bf16.mxu0 %v451_v42 }
 0x134   :  { %552 = vmatpush1.bf16.msra.mxu0 %v450_v40  ;;  %664 = vmatprep.subr.bf16.mxu1 %v453_v51 }
 0x135   :  { %v268_v45 = vpop.f32.mrb[4].mxu0  ;;  %665 = vmatpush1.bf16.msra.mxu1 %v452_v48 }
 0x136   :  { %v270_v47 = vpop.f32.mrb[5].mxu0  ;;  %v381_v55 = vpop.f32.mrb[4].mxu1 }
 0x137   :  { %v272_v50 = vpop.f32.mrb[6].mxu0  ;;  %v383_v56 = vpop.f32.mrb[5].mxu1 }
 0x138   :  { %v454_v52 = vpack.c.bf16 %v272_v50, %v268_v45  ;;  %v274_v53 = vpop.f32.mrb[7].mxu0  ;;  %v385_v58 = vpop.f32.mrb[6].mxu1 }
 0x139   :  { %v455_v54 = vpack.c.bf16 %v274_v53, %v270_v47  ;;  %v456_v60 = vpack.c.bf16 %v385_v58, %v381_v55  ;;  %v387_v61 = vpop.f32.mrb[7].mxu1 }
 0x13a   :  { %v457_v63 = vpack.c.bf16 %v387_v61, %v383_v56 }
 0x13b   :  { %553 = vmatprep.subr.bf16.mxu0 %v455_v54 }
 0x13c   :  { %554 = vmatpush1.bf16.msra.mxu0 %v454_v52  ;;  %666 = vmatprep.subr.bf16.mxu1 %v457_v63 }
 0x13d   :  { %v278_v57 = vpop.f32.mrb[8].mxu0  ;;  %667 = vmatpush1.bf16.msra.mxu1 %v456_v60 }
 0x13e   :  { %v280_v59 = vpop.f32.mrb[9].mxu0  ;;  %v391_v5 = vpop.f32.mrb[8].mxu1 }
 0x13f   :  { %v282_v62 = vpop.f32.mrb[10].mxu0  ;;  %v393_v6 = vpop.f32.mrb[9].mxu1 }
 0x140   :  { %v458_v0 = vpack.c.bf16 %v282_v62, %v278_v57  ;;  %v284_v1 = vpop.f32.mrb[11].mxu0  ;;  %v395_v8 = vpop.f32.mrb[10].mxu1 }
 0x141   :  { %v459_v2 = vpack.c.bf16 %v284_v1, %v280_v59  ;;  %v460_v12 = vpack.c.bf16 %v395_v8, %v391_v5  ;;  %v397_v15 = vpop.f32.mrb[11].mxu1 }
 0x142   :  { %v461_v25 = vpack.c.bf16 %v397_v15, %v393_v6  ;;  %v877_v15 = vld [vmem:[#allocation2 + $0x20] sm:$0xff] }
 0x143   :  { %555 = vmatprep.subr.bf16.mxu0 %v459_v2 }
 0x144   :  { %556 = vmatpush1.bf16.msra.mxu0 %v458_v0  ;;  %668 = vmatprep.subr.bf16.mxu1 %v461_v25 }
 0x145   :  { %v288_v7 = vpop.f32.mrb[12].mxu0  ;;  %669 = vmatpush1.bf16.msra.mxu1 %v460_v12  ;;  %v873_v12 = vld [vmem:[#allocation2] sm:$0xff] }
 0x146   :  { %v290_v11 = vpop.f32.mrb[13].mxu0  ;;  %v401_v29 = vpop.f32.mrb[12].mxu1 }
 0x147   :  { %v292_v24 = vpop.f32.mrb[14].mxu0  ;;  %v403_v30 = vpop.f32.mrb[13].mxu1 }
 0x148   :  { %v462_v26 = vpack.c.bf16 %v292_v24, %v288_v7  ;;  %v294_v27 = vpop.f32.mrb[15].mxu0  ;;  %v405_v32 = vpop.f32.mrb[14].mxu1 }
 0x149   :  { %v463_v28 = vpack.c.bf16 %v294_v27, %v290_v11  ;;  %v464_v34 = vpack.c.bf16 %v405_v32, %v401_v29  ;;  %v407_v35 = vpop.f32.mrb[15].mxu1  ;;  %v8171_v29 = vcombine.high %v873_v12, %v877_v15  ;;  %v8937_v32 = vld [vmem:[%s12577_s1] sm:$0xff]  }
 0x14a   :  { %v465_v37 = vpack.c.bf16 %v407_v35, %v403_v30  ;;  %v881_v30 = vld [vmem:[#allocation2 + $0x40] sm:$0xff]  ;;  %v8170_v35 = vcombine.low %v873_v12, %v877_v15  ;;  %v906_v15 = vld [vmem:[#allocation2 + $0x108] sm:$0xff] }
 0x14b   :  { %557 = vmatprep.subr.bf16.mxu0 %v463_v28 }
 0x14c   :  { %558 = vmatpush1.bf16.msra.mxu0 %v462_v26  ;;  %670 = vmatprep.subr.bf16.mxu1 %v465_v37  ;;  %v878_v37 = vld [vmem:[#allocation2 + $0x28] sm:$0xff] }
 0x14d   :  { %v298_v31 = vpop.f32.mrb[16].mxu0  ;;  %671 = vmatpush1.bf16.msra.mxu1 %v464_v34 }
 0x14e   :  { %v300_v33 = vpop.f32.mrb[17].mxu0  ;;  %v411_v41 = vpop.f32.mrb[16].mxu1 }
 0x14f   :  { %v302_v36 = vpop.f32.mrb[18].mxu0  ;;  %v413_v42 = vpop.f32.mrb[17].mxu1 }
 0x150   :  { %v466_v38 = vpack.c.bf16 %v302_v36, %v298_v31  ;;  %v304_v39 = vpop.f32.mrb[19].mxu0  ;;  %v415_v44 = vpop.f32.mrb[18].mxu1  ;;  %v885_v31 = vld [vmem:[#allocation2 + $0x60] sm:$0xff]  ;;  %v874_v36 = vld [vmem:[#allocation2 + $0x8] sm:$0xff] }
 0x151   :  { %v467_v40 = vpack.c.bf16 %v304_v39, %v300_v33  ;;  %v468_v46 = vpack.c.bf16 %v415_v44, %v411_v41  ;;  %v417_v47 = vpop.f32.mrb[19].mxu1  ;;  %v8179_v39 = vcombine.high %v881_v30, %v885_v31 }
 0x152   :  { %v469_v49 = vpack.c.bf16 %v417_v47, %v413_v42  ;;  %v889_v42 = vld [vmem:[#allocation2 + $0x80] sm:$0xff]  ;;  %v882_v47 = vld [vmem:[#allocation2 + $0x48] sm:$0xff] }
 0x153   :  { %559 = vmatprep.subr.bf16.mxu0 %v467_v40 }
 0x154   :  { %560 = vmatpush1.bf16.msra.mxu0 %v466_v38  ;;  %672 = vmatprep.subr.bf16.mxu1 %v469_v49 }
 0x155   :  { %v308_v43 = vpop.f32.mrb[20].mxu0  ;;  %673 = vmatpush1.bf16.msra.mxu1 %v468_v46  ;;  %v8178_v46 = vcombine.low %v881_v30, %v885_v31  ;;  %v914_v31 = vld [vmem:[#allocation2 + $0x148] sm:$0xff] }
 0x156   :  { %v310_v45 = vpop.f32.mrb[21].mxu0  ;;  %v421_v53 = vpop.f32.mrb[20].mxu1 }
 0x157   :  { %v312_v48 = vpop.f32.mrb[22].mxu0  ;;  %v423_v54 = vpop.f32.mrb[21].mxu1 }
 0x158   :  { %v470_v50 = vpack.c.bf16 %v312_v48, %v308_v43  ;;  %v314_v51 = vpop.f32.mrb[23].mxu0  ;;  %v425_v56 = vpop.f32.mrb[22].mxu1  ;;  %v893_v43 = vld [vmem:[#allocation2 + $0xa0] sm:$0xff]  ;;  %v886_v48 = vld [vmem:[#allocation2 + $0x68] sm:$0xff] }
 0x159   :  { %v471_v52 = vpack.c.bf16 %v314_v51, %v310_v45  ;;  %v472_v58 = vpack.c.bf16 %v425_v56, %v421_v53  ;;  %v427_v59 = vpop.f32.mrb[23].mxu1  ;;  %v8173_v45 = vcombine.high %v874_v36, %v878_v37  ;;  %v8187_v49 = vcombine.high %v889_v42, %v893_v43  ;;  %v897_v51 = vld [vmem:[#allocation2 + $0xc0] sm:$0xff]  ;;  %v8938_v53 = vld [vmem:[%s12577_s1 + $0x8] sm:$0xff]   ;;  %v890_v56 = vld [vmem:[#allocation2 + $0x88] sm:$0xff] }
 0x15a   :  { %v473_v61 = vpack.c.bf16 %v427_v59, %v423_v54  ;;  %v8181_v54 = vcombine.high %v882_v47, %v886_v48  ;;  %v8180_v59 = vcombine.low %v882_v47, %v886_v48  ;;  %v930_v48 = vld [vmem:[#allocation2 + $0x1c8] sm:$0xff] }
 0x15b   :  { %561 = vmatprep.subr.bf16.mxu0 %v471_v52  ;;  %v901_v52 = vld [vmem:[#allocation2 + $0xe0] sm:$0xff] }
 0x15c   :  { %562 = vmatpush1.bf16.msra.mxu0 %v470_v50  ;;  %674 = vmatprep.subr.bf16.mxu1 %v473_v61  ;;  %v8172_v50 = vcombine.low %v874_v36, %v878_v37  ;;  %v909_v61 = vld [vmem:[#allocation2 + $0x120] sm:$0xff]  ;;  %v8940_v37 = vld [vmem:[%s12577_s1 + $0x18] sm:$0xff]  }
 0x15d   :  { %v318_v55 = vpop.f32.mrb[24].mxu0  ;;  %675 = vmatpush1.bf16.msra.mxu1 %v472_v58  ;;  %v8195_v58 = vcombine.high %v897_v51, %v901_v52  ;;  %v933_v36 = vld [vmem:[#allocation2 + $0x1e0] sm:$0xff] }
 0x15e   :  { %v320_v57 = vpop.f32.mrb[25].mxu0  ;;  %v431_v1 = vpop.f32.mrb[24].mxu1 }
 0x15f   :  { %v322_v60 = vpop.f32.mrb[26].mxu0  ;;  %v433_v2 = vpop.f32.mrb[25].mxu1 }
 0x160   :  { %v474_v62 = vpack.c.bf16 %v322_v60, %v318_v55  ;;  %v324_v63 = vpop.f32.mrb[27].mxu0  ;;  %v435_v6 = vpop.f32.mrb[26].mxu1  ;;  %v8186_v55 = vcombine.low %v889_v42, %v893_v43  ;;  %v905_v60 = vld [vmem:[#allocation2 + $0x100] sm:$0xff] }
 0x161   :  { %v475_v0 = vpack.c.bf16 %v324_v63, %v320_v57  ;;  %v476_v8 = vpack.c.bf16 %v435_v6, %v431_v1  ;;  %v437_v11 = vpop.f32.mrb[27].mxu1  ;;  %v894_v57 = vld [vmem:[#allocation2 + $0xa8] sm:$0xff]  ;;  %v8194_v63 = vcombine.low %v897_v51, %v901_v52  ;;  %v913_v6 = vld [vmem:[#allocation2 + $0x140] sm:$0xff]  ;;  %v8202_v12 = vcombine.low %v905_v60, %v909_v61 }
 0x162   :  { %v477_v25 = vpack.c.bf16 %v437_v11, %v433_v2  ;;  %v902_v1 = vld [vmem:[#allocation2 + $0xe8] sm:$0xff]  ;;  %v8203_v2 = vcombine.high %v905_v60, %v909_v61  ;;  %v945_v52 = vld [vmem:[#allocation2 + $0x240] sm:$0xff] }
 0x163   :  { %563 = vmatprep.subr.bf16.mxu0 %v475_v0  ;;  %v898_v0 = vld [vmem:[#allocation2 + $0xc8] sm:$0xff]  ;;  %v953_v61 = vld [vmem:[#allocation2 + $0x280] sm:$0xff] }
 0x164   :  { %564 = vmatpush1.bf16.msra.mxu0 %v474_v62  ;;  %676 = vmatprep.subr.bf16.mxu1 %v477_v25  ;;  %v8189_v62 = vcombine.high %v890_v56, %v894_v57  ;;  %v8197_v11 = vcombine.high %v898_v0, %v902_v1 }
 0x165   :  { %v328_v5 = vpop.f32.mrb[28].mxu0  ;;  %677 = vmatpush1.bf16.msra.mxu1 %v476_v8  ;;  %v8939_v8 = vld [vmem:[%s12577_s1 + $0x10] sm:$0xff]  }
 0x166   :  { %v330_v7 = vpop.f32.mrb[29].mxu0  ;;  %v441_v33 = vpop.f32.mrb[28].mxu1 }
 0x167   :  { %v332_v24 = vpop.f32.mrb[30].mxu0  ;;  %v443_v34 = vpop.f32.mrb[29].mxu1 }
 0x168   :  { %v478_v26 = vpack.c.bf16 %v332_v24, %v328_v5  ;;  %v334_v27 = vpop.f32.mrb[31].mxu0  ;;  %v445_v38 = vpop.f32.mrb[30].mxu1  ;;  %v8188_v5 = vcombine.low %v890_v56, %v894_v57  ;;  %v910_v24 = vld [vmem:[#allocation2 + $0x128] sm:$0xff] }
 0x169   :  { %v479_v28 = vpack.c.bf16 %v334_v27, %v330_v7  ;;  %v480_v40 = vpack.c.bf16 %v445_v38, %v441_v33  ;;  %v447_v41 = vpop.f32.mrb[31].mxu1  ;;  %v917_v7 = vld [vmem:[#allocation2 + $0x160] sm:$0xff]  ;;  %v938_v57 = vld [vmem:[#allocation2 + $0x208] sm:$0xff] }
 0x16a   :  { %v481_v44 = vpack.c.bf16 %v447_v41, %v443_v34  ;;  %v8211_v25 = vcombine.high %v913_v6, %v917_v7  ;;  %v921_v27 = vld [vmem:[#allocation2 + $0x180] sm:$0xff]  ;;  %v8210_v30 = vcombine.low %v913_v6, %v917_v7  ;;  %v8204_v34 = vcombine.low %v906_v15, %v910_v24  ;;  %v926_v41 = vld [vmem:[#allocation2 + $0x1a8] sm:$0xff] }
 0x16b   :  { %565 = vmatprep.subr.bf16.mxu0 %v479_v28  ;;  %v925_v28 = vld [vmem:[#allocation2 + $0x1a0] sm:$0xff] }
 0x16c   :  { %566 = vmatpush1.bf16.msra.mxu0 %v478_v26  ;;  %678 = vmatprep.subr.bf16.mxu1 %v481_v44  ;;  %v8196_v26 = vcombine.low %v898_v0, %v902_v1  ;;  %v8219_v33 = vcombine.high %v921_v27, %v925_v28  ;;  %v937_v44 = vld [vmem:[#allocation2 + $0x200] sm:$0xff]  ;;  %v946_v1 = vld [vmem:[#allocation2 + $0x248] sm:$0xff] }
 0x16d   :  { %2409 = vmatprep.subr.bf16.mxu0 %v8171_v29  ;;  %679 = vmatpush1.bf16.msra.mxu1 %v480_v40  ;;  %v8205_v29 = vcombine.high %v906_v15, %v910_v24  ;;  %v922_v40 = vld [vmem:[#allocation2 + $0x188] sm:$0xff]  ;;  %v961_v7 = vld [vmem:[#allocation2 + $0x2c0] sm:$0xff] }
 0x16e   :  { %2635 = vmatprep.subr.bf16.mxu1 %v8173_v45  ;;  %v941_v45 = vld [vmem:[#allocation2 + $0x220] sm:$0xff]  ;;  %v8220_v51 = vcombine.low %v922_v40, %v926_v41  ;;  %v954_v24 = vld [vmem:[#allocation2 + $0x288] sm:$0xff] }
 0x16f   :  { %584 = vmatmul.mubr.bf16.vlgmr.msra.gmra.mrb[32].mxu0 %v8937_v32  ;;  %v8234_v56 = vcombine.low %v937_v44, %v941_v45 }
 0x170   :  { %593 = vmatprep.mubr.bf16.mxu0 %v12586_v3  ;;  %2410 = vmatpush1.bf16.msra.mxu0 %v8170_v35  ;;  %v929_v35 = vld [vmem:[#allocation2 + $0x1c0] sm:$0xff] }
 0x171   :  { %2411 = vmatprep.subr.bf16.mxu0 %v8179_v39  ;;  %697 = vmatmul.mubr.bf16.vlgmr.msra.gmra.mrb[32].mxu1 %v8937_v32  ;;  %v918_v32 = vld [vmem:[#allocation2 + $0x168] sm:$0xff]  ;;  %v8218_v39 = vcombine.low %v921_v27, %v925_v28  ;;  %v8227_v42 = vcombine.high %v929_v35, %v933_v36  ;;  %v8226_v47 = vcombine.low %v929_v35, %v933_v36  ;;  %v969_v28 = vld [vmem:[#allocation2 + $0x300] sm:$0xff] }
 0x172   :  { %706 = vmatprep.mubr.bf16.mxu1 %v12586_v3  ;;  %2636 = vmatpush1.bf16.msra.mxu1 %v8172_v50  ;;  %v8213_v38 = vcombine.high %v914_v31, %v918_v32  ;;  %v8212_v43 = vcombine.low %v914_v31, %v918_v32  ;;  %v8235_v50 = vcombine.high %v937_v44, %v941_v45  ;;  %v962_v32 = vld [vmem:[#allocation2 + $0x2c8] sm:$0xff]  ;;  %v977_v36 = vld [vmem:[#allocation2 + $0x340] sm:$0xff] }
 0x173   :  { %2637 = vmatprep.subr.bf16.mxu1 %v8181_v54  ;;  %v8941_v54 = vld [vmem:[%s12577_s1 + $0x20] sm:$0xff]  }
 0x174   :  { %2412 = vmatpush1.bf16.msra.mxu0 %v8178_v46  ;;  %v8221_v46 = vcombine.high %v922_v40, %v926_v41  ;;  %v970_v41 = vld [vmem:[#allocation2 + $0x308] sm:$0xff] }
 0x175   :  { %2413 = vmatprep.subr.bf16.mxu0 %v8187_v49  ;;  %v934_v49 = vld [vmem:[#allocation2 + $0x1e8] sm:$0xff] }
 0x176   :  { %2638 = vmatpush1.bf16.msra.mxu1 %v8180_v59  ;;  %v8228_v60 = vcombine.low %v930_v48, %v934_v49 }
 0x177   :  { %594 = vmatmul.mubr.bf16.gmra.mrb[36].mxu0 %v8938_v53  ;;  %2639 = vmatprep.subr.bf16.mxu1 %v8189_v62  ;;  %v957_v62 = vld [vmem:[#allocation2 + $0x2a0] sm:$0xff] }
 0x178   :  { %603 = vmatprep.mubr.bf16.mxu0 %v12586_v3  ;;  %2414 = vmatpush1.bf16.msra.mxu0 %v8186_v55  ;;  %v8229_v55 = vcombine.high %v930_v48, %v934_v49  ;;  %v8250_v15 = vcombine.low %v953_v61, %v957_v62  ;;  %v982_v48 = vld [vmem:[#allocation2 + $0x368] sm:$0xff] }
 0x179   :  { %2415 = vmatprep.subr.bf16.mxu0 %v8195_v58  ;;  %707 = vmatmul.mubr.bf16.gmra.mrb[36].mxu1 %v8938_v53  ;;  %v949_v53 = vld [vmem:[#allocation2 + $0x260] sm:$0xff]  ;;  %v942_v58 = vld [vmem:[#allocation2 + $0x228] sm:$0xff] }
 0x17a   :  { %716 = vmatprep.mubr.bf16.mxu1 %v12586_v3  ;;  %2640 = vmatpush1.bf16.msra.mxu1 %v8188_v5  ;;  %v8243_v59 = vcombine.high %v945_v52, %v949_v53  ;;  %v8242_v0 = vcombine.low %v945_v52, %v949_v53  ;;  %v8251_v5 = vcombine.high %v953_v61, %v957_v62  ;;  %v985_v53 = vld [vmem:[#allocation2 + $0x380] sm:$0xff] }
 0x17b   :  { %2641 = vmatprep.subr.bf16.mxu1 %v8197_v11  ;;  %v8236_v6 = vcombine.low %v938_v57, %v942_v58  ;;  %v8942_v11 = vld [vmem:[%s12577_s1 + $0x28] sm:$0xff]   ;;  %v993_v61 = vld [vmem:[#allocation2 + $0x3c0] sm:$0xff] }
 0x17c   :  { %2416 = vmatpush1.bf16.msra.mxu0 %v8194_v63  ;;  %v8237_v63 = vcombine.high %v938_v57, %v942_v58  ;;  %v990_v57 = vld [vmem:[#allocation2 + $0x3a8] sm:$0xff]  ;;  %v997_v62 = vld [vmem:[#allocation2 + $0x3e0] sm:$0xff] }
 0x17d   :  { %2417 = vmatprep.subr.bf16.mxu0 %v8203_v2  ;;  %v950_v2 = vld [vmem:[#allocation2 + $0x268] sm:$0xff] }
 0x17e   :  { %2642 = vmatpush1.bf16.msra.mxu1 %v8196_v26  ;;  %v8244_v27 = vcombine.low %v946_v1, %v950_v2 }
 0x17f   :  { %604 = vmatmul.mubr.bf16.gmra.mrb[40].mxu0 %v8939_v8  ;;  %2643 = vmatprep.subr.bf16.mxu1 %v8205_v29  ;;  %v973_v29 = vld [vmem:[#allocation2 + $0x320] sm:$0xff] }
 0x180   :  { %613 = vmatprep.mubr.bf16.mxu0 %v12586_v3  ;;  %2418 = vmatpush1.bf16.msra.mxu0 %v8202_v12  ;;  %v8245_v12 = vcombine.high %v946_v1, %v950_v2  ;;  %v8266_v40 = vcombine.low %v969_v28, %v973_v29  ;;  %v998_v1 = vld [vmem:[#allocation2 + $0x3e8] sm:$0xff]  ;;  %v8290_v2 = vcombine.low %v993_v61, %v997_v62 }
 0x181   :  { %2419 = vmatprep.subr.bf16.mxu0 %v8211_v25  ;;  %717 = vmatmul.mubr.bf16.gmra.mrb[40].mxu1 %v8939_v8  ;;  %v965_v8 = vld [vmem:[#allocation2 + $0x2e0] sm:$0xff]  ;;  %v958_v25 = vld [vmem:[#allocation2 + $0x2a8] sm:$0xff] }
 0x182   :  { %726 = vmatprep.mubr.bf16.mxu1 %v12586_v3  ;;  %2644 = vmatpush1.bf16.msra.mxu1 %v8204_v34  ;;  %v8259_v26 = vcombine.high %v961_v7, %v965_v8  ;;  %v8258_v31 = vcombine.low %v961_v7, %v965_v8  ;;  %v8267_v34 = vcombine.high %v969_v28, %v973_v29  ;;  %v9780_v7 = vld [vmem:[#allocation2 + $0x400] sm:$0xff]  ;;  %v119_v28 = vld [vmem:[%s12583_s7] ss:$2 sm:$0xf]  ;;  %v9803_v29 = vsub.s32 1, %v9640_v4 }
 0x183   :  { %2645 = vmatprep.subr.bf16.mxu1 %v8213_v38  ;;  %v8252_v35 = vcombine.low %v954_v24, %v958_v25  ;;  %v8943_v38 = vld [vmem:[%s12577_s1 + $0x30] sm:$0xff]  }
 0x184   :  { %2420 = vmatpush1.bf16.msra.mxu0 %v8210_v30  ;;  %v8253_v30 = vcombine.high %v954_v24, %v958_v25  ;;  %v9782_v8 = vld [vmem:[#allocation2 + $0x420] sm:$0xff]  ;;  %12839 = vst [vmem:[#allocation27_spill] sm:$0xff] %v9803_v29 }
 0x185   :  { %2421 = vmatprep.subr.bf16.mxu0 %v8219_v33  ;;  %v966_v33 = vld [vmem:[#allocation2 + $0x2e8] sm:$0xff]  ;;  %v8298_v24 = vcombine.low %v9780_v7, %v9782_v8 }
 0x186   :  { %2646 = vmatpush1.bf16.msra.mxu1 %v8212_v43  ;;  %v8260_v44 = vcombine.low %v962_v32, %v966_v33 }
 0x187   :  { %614 = vmatmul.mubr.bf16.gmra.mrb[44].mxu0 %v8940_v37  ;;  %2647 = vmatprep.subr.bf16.mxu1 %v8221_v46 }
 0x188   :  { %623 = vmatprep.mubr.bf16.mxu0 %v12586_v3  ;;  %2422 = vmatpush1.bf16.msra.mxu0 %v8218_v39  ;;  %v8261_v39 = vcombine.high %v962_v32, %v966_v33  ;;  %v9812_v32 = vsub.s32 2, %v9640_v4  ;;  %v9815_v33 = vsub.s32 3, %v9640_v4 }
 0x189   :  { %2423 = vmatprep.subr.bf16.mxu0 %v8227_v42  ;;  %727 = vmatmul.mubr.bf16.gmra.mrb[44].mxu1 %v8940_v37  ;;  %v981_v37 = vld [vmem:[#allocation2 + $0x360] sm:$0xff]  ;;  %v974_v42 = vld [vmem:[#allocation2 + $0x328] sm:$0xff] }
 0x18a   :  { %736 = vmatprep.mubr.bf16.mxu1 %v12586_v3  ;;  %2648 = vmatpush1.bf16.msra.mxu1 %v8220_v51  ;;  %v8275_v43 = vcombine.high %v977_v36, %v981_v37  ;;  %v8269_v45 = vcombine.high %v970_v41, %v974_v42  ;;  %v8274_v46 = vcombine.low %v977_v36, %v981_v37 }
 0x18b   :  { %2649 = vmatprep.subr.bf16.mxu1 %v8229_v55  ;;  %v8268_v49 = vcombine.low %v970_v41, %v974_v42  ;;  %v986_v55 = vld [vmem:[#allocation2 + $0x388] sm:$0xff]  ;;  %12840 = vst [vmem:[#allocation28_spill] sm:$0xff] %v9812_v32  ;;  %12841 = vst [vmem:[#allocation29_spill] sm:$0xff] %v9815_v33  ;;  %v9824_v42 = vrot.slane %v119_v28, %v9815_v33 }
 0x18c   :  { %2424 = vmatpush1.bf16.msra.mxu0 %v8226_v47  ;;  %v978_v47 = vld [vmem:[#allocation2 + $0x348] sm:$0xff] }
 0x18d   :  { %2425 = vmatprep.subr.bf16.mxu0 %v8235_v50  ;;  %v8944_v50 = vld [vmem:[%s12577_s1 + $0x38] sm:$0xff]   ;;  %v8277_v51 = vcombine.high %v978_v47, %v982_v48  ;;  %v8276_v52 = vcombine.low %v978_v47, %v982_v48 }
 0x18e   :  { %2650 = vmatpush1.bf16.msra.mxu1 %v8228_v60  ;;  %v8285_v60 = vcombine.high %v986_v55, %v990_v57 }
 0x18f   :  { %624 = vmatmul.mubr.bf16.gmra.mrb[48].mxu0 %v8941_v54  ;;  %2651 = vmatprep.subr.bf16.mxu1 %v8237_v63  ;;  %v994_v63 = vld [vmem:[#allocation2 + $0x3c8] sm:$0xff] }
 0x190   :  { %633 = vmatprep.mubr.bf16.mxu0 %v12586_v3  ;;  %2426 = vmatpush1.bf16.msra.mxu0 %v8234_v56 }
 0x191   :  { %2427 = vmatprep.subr.bf16.mxu0 %v8243_v59  ;;  %737 = vmatmul.mubr.bf16.gmra.mrb[48].mxu1 %v8941_v54  ;;  %v989_v54 = vld [vmem:[#allocation2 + $0x3a0] sm:$0xff]  ;;  %v8284_v59 = vcombine.low %v986_v55, %v990_v57 }
 0x192   :  { %746 = vmatprep.mubr.bf16.mxu1 %v12586_v3  ;;  %2652 = vmatpush1.bf16.msra.mxu1 %v8236_v6  ;;  %v8283_v56 = vcombine.high %v985_v53, %v989_v54  ;;  %v8282_v58 = vcombine.low %v985_v53, %v989_v54  ;;  %v8293_v6 = vcombine.high %v994_v63, %v998_v1 }
 0x193   :  { %2653 = vmatprep.subr.bf16.mxu1 %v8245_v12  ;;  %v8299_v12 = vcombine.high %v9780_v7, %v9782_v8  ;;  %v9848_v8 = vld [vmem:[#allocation2 + $0x488] sm:$0xff] }
 0x194   :  { %2428 = vmatpush1.bf16.msra.mxu0 %v8242_v0  ;;  %v8291_v0 = vcombine.high %v993_v61, %v997_v62 }
 0x195   :  { %2429 = vmatprep.subr.bf16.mxu0 %v8251_v5  ;;  %v8292_v5 = vcombine.low %v994_v63, %v998_v1  ;;  %v9840_v63 = vld [vmem:[#allocation2 + $0x480] sm:$0xff] }
 0x196   :  { %2654 = vmatpush1.bf16.msra.mxu1 %v8244_v27  ;;  %v9797_v27 = vsub.s32 0, %v9640_v4 }
 0x197   :  { %634 = vmatmul.mubr.bf16.gmra.mrb[52].mxu0 %v8942_v11  ;;  %2655 = vmatprep.subr.bf16.mxu1 %v8253_v30 }
 0x198   :  { %643 = vmatprep.mubr.bf16.mxu0 %v12586_v3  ;;  %2430 = vmatpush1.bf16.msra.mxu0 %v8250_v15  ;;  %v9788_v15 = vld [vmem:[#allocation2 + $0x428] sm:$0xff]  ;;  %12838 = vst [vmem:[#allocation26_spill] sm:$0xff] %v9797_v27  ;;  %v9806_v30 = vrot.slane %v119_v28, %v9797_v27 }
 0x199   :  { %2431 = vmatprep.subr.bf16.mxu0 %v8259_v26  ;;  %747 = vmatmul.mubr.bf16.gmra.mrb[52].mxu1 %v8942_v11  ;;  %v9784_v11 = vld [vmem:[#allocation2 + $0x408] sm:$0xff] }
 0x19a   :  { %756 = vmatprep.mubr.bf16.mxu1 %v12586_v3  ;;  %2656 = vmatpush1.bf16.msra.mxu1 %v8252_v35  ;;  %v8300_v25 = vcombine.low %v9784_v11, %v9788_v15  ;;  %v8301_v26 = vcombine.high %v9784_v11, %v9788_v15  ;;  %v9850_v11 = vld [vmem:[#allocation2 + $0x4a8] sm:$0xff] }
 0x19b   :  { %2657 = vmatprep.subr.bf16.mxu1 %v8261_v39  ;;  %v9820_v39 = vrot.slane %v119_v28, %v9812_v32 }
 0x19c   :  { %2432 = vmatpush1.bf16.msra.mxu0 %v8258_v31  ;;  %v9809_v31 = vrot.slane %v119_v28, %v9803_v29 }
 0x19d   :  { %2433 = vmatprep.subr.bf16.mxu0 %v8267_v34 }
 0x19e   :  { %2658 = vmatpush1.bf16.msra.mxu1 %v8260_v44 }
 0x19f   :  { %644 = vmatmul.mubr.bf16.gmra.mrb[56].mxu0 %v8943_v38  ;;  %2659 = vmatprep.subr.bf16.mxu1 %v8269_v45  ;;  %v9827_v45 = vld [vmem:[#allocation2 + $0x440] sm:$0xff] }
 0x1a0   :  { %653 = vmatprep.mubr.bf16.mxu0 %v12586_v3  ;;  %2434 = vmatpush1.bf16.msra.mxu0 %v8266_v40 }
 0x1a1   :  { %2435 = vmatprep.subr.bf16.mxu0 %v8275_v43  ;;  %757 = vmatmul.mubr.bf16.gmra.mrb[56].mxu1 %v8943_v38 }
 0x1a2   :  { %766 = vmatprep.mubr.bf16.mxu1 %v12586_v3  ;;  %2660 = vmatpush1.bf16.msra.mxu1 %v8268_v49  ;;  %v1010_v49 = vld [vmem:[#allocation2 + $0x448] sm:$0xff] }
 0x1a3   :  { %2661 = vmatprep.subr.bf16.mxu1 %v8277_v51 }
 0x1a4   :  { %2436 = vmatpush1.bf16.msra.mxu0 %v8274_v46  ;;  %v9829_v46 = vld [vmem:[#allocation2 + $0x460] sm:$0xff] }
 0x1a5   :  { %2437 = vmatprep.subr.bf16.mxu0 %v8283_v56  ;;  %v8307_v57 = vcombine.high %v9827_v45, %v9829_v46 }
 0x1a6   :  { %2662 = vmatpush1.bf16.msra.mxu1 %v8276_v52 }
 0x1a7   :  { %654 = vmatmul.mubr.bf16.gmra.mrb[60].mxu0 %v8944_v50  ;;  %2663 = vmatprep.subr.bf16.mxu1 %v8285_v60 }
 0x1a8   :  { %2438 = vmatpush1.bf16.msra.mxu0 %v8282_v58 }
 0x1a9   :  { %767 = vmatmul.mubr.bf16.gmra.mrb[60].mxu1 %v8944_v50  ;;  %2439 = vmatprep.subr.bf16.mxu0 %v8291_v0  ;;  %v1014_v50 = vld [vmem:[#allocation2 + $0x468] sm:$0xff]  ;;  %v9842_v0 = vld [vmem:[#allocation2 + $0x4a0] sm:$0xff] }
 0x1aa   :  { %2664 = vmatpush1.bf16.msra.mxu1 %v8284_v59  ;;  %v8309_v62 = vcombine.high %v1010_v49, %v1014_v50 }
 0x1ab   :  { %2665 = vmatprep.subr.bf16.mxu1 %v8293_v6 }
 0x1ac   :  { %2440 = vmatpush1.bf16.msra.mxu0 %v8290_v2 }
 0x1ad   :  { %2522 = vmatprep.subr.bf16.mxu0 %v8299_v12 }
 0x1ae   :  { %2666 = vmatpush1.bf16.msra.mxu1 %v8292_v5 }
 0x1af   :  { %2748 = vmatprep.subr.bf16.mxu1 %v8301_v26 }
 0x242   :  { %v585_v34 = vpop.f32.mrb[32].mxu0 }
 0x243   :  { %v586_v35 = vadd.f32 %v585_v34, %v9806_v30  ;;  %v587_v36 = vpop.f32.mrb[33].mxu0  ;;  %v8306_v34 = vcombine.low %v9827_v45, %v9829_v46  ;;  %v9865_v45 = vld [vmem:[#allocation2 + $0x4e0] sm:$0xff] }
 0x244   :  { %v588_v37 = vadd.f32 %v587_v36, %v9809_v31  ;;  %v589_v38 = vpop.f32.mrb[34].mxu0  ;;  %v698_v51 = vpop.f32.mrb[32].mxu1 }
 0x245   :  { %v590_v40 = vadd.f32 %v589_v38, %v9806_v30  ;;  %v591_v41 = vpop.f32.mrb[35].mxu0  ;;  %v777_v4 = vmax.f32 %v586_v35, 0.0  ;;  %v699_v53 = vadd.f32 %v698_v51, %v9820_v39  ;;  %v700_v54 = vpop.f32.mrb[33].mxu1  ;;  %v8315_v38 = vcombine.high %v9840_v63, %v9842_v0 }
 0x246   :  { %v592_v43 = vadd.f32 %v591_v41, %v9809_v31  ;;  %v778_v47 = vmax.f32 %v588_v37, 0.0  ;;  %v701_v58 = vadd.f32 %v700_v54, %v9824_v42  ;;  %v702_v59 = vpop.f32.mrb[34].mxu1  ;;  %v8308_v37 = vcombine.low %v1010_v49, %v1014_v50 }
 0x247   :  { %v781_v44 = vmax.f32 %v590_v40, 0.0  ;;  %v779_v1 = vmax.f32 %v699_v53, 0.0  ;;  %v703_v2 = vadd.f32 %v702_v59, %v9820_v39  ;;  %v704_v5 = vpop.f32.mrb[35].mxu1  ;;  %v8314_v53 = vcombine.low %v9840_v63, %v9842_v0 }
 0x248   :  { %v782_v48 = vmax.f32 %v592_v43, 0.0  ;;  %v780_v12 = vmax.f32 %v701_v58, 0.0  ;;  %v705_v15 = vadd.f32 %v704_v5, %v9824_v42  ;;  %v8316_v54 = vcombine.low %v9848_v8, %v9850_v11  ;;  %v9892_v5 = vld [vmem:[#allocation2 + $0x520] sm:$0xff] }
 0x249   :  { %v9831_v52 = vpack.c.bf16 %v781_v44, %v777_v4  ;;  %v783_v35 = vmax.f32 %v703_v2, 0.0  ;;  %v8317_v4 = vcombine.high %v9848_v8, %v9850_v11  ;;  %v9863_v44 = vld [vmem:[#allocation2 + $0x4c0] sm:$0xff] }
 0x24a   :  { %v9834_v55 = vpack.c.bf16 %v782_v48, %v778_v47  ;;  %v595_v56 = vpop.f32.mrb[36].mxu0  ;;  %v784_v40 = vmax.f32 %v705_v15, 0.0  ;;  %v9869_v47 = vld [vmem:[#allocation2 + $0x4c8] sm:$0xff]  ;;  %v9890_v2 = vld [vmem:[#allocation2 + $0x500] sm:$0xff] }
 0x24b   :  { %v596_v60 = vadd.f32 %v595_v56, %v9806_v30  ;;  %v597_v61 = vpop.f32.mrb[37].mxu0  ;;  %v9867_v46 = vpack.c.bf16 %v783_v35, %v779_v1  ;;  %v9871_v48 = vld [vmem:[#allocation2 + $0x4e8] sm:$0xff] }
 0x24c   :  { %v598_v6 = vadd.f32 %v597_v61, %v9809_v31  ;;  %v599_v7 = vpop.f32.mrb[38].mxu0  ;;  %2441 = vmatprep.mubr.bf16.mxu0 %v9834_v55  ;;  %2667 = vmatprep.mubr.bf16.mxu1 %v9834_v55  ;;  %v9873_v49 = vpack.c.bf16 %v784_v40, %v780_v12  ;;  %v708_v50 = vpop.f32.mrb[36].mxu1  ;;  %v8325_v0 = vcombine.high %v9869_v47, %v9871_v48  ;;  %v9898_v15 = vld [vmem:[#allocation2 + $0x508] sm:$0xff] }
 0x24d   :  { %v600_v26 = vadd.f32 %v599_v7, %v9806_v30  ;;  %v601_v28 = vpop.f32.mrb[39].mxu0  ;;  %2442 = vmatmul.mubr.bf16.vlgmr.msra.gmra.mrb[64].mxu0 %v9831_v52  ;;  %2668 = vmatmul.mubr.bf16.vlgmr.msra.gmra.mrb[64].mxu1 %v9831_v52  ;;  %v785_v41 = vmax.f32 %v596_v60, 0.0  ;;  %v709_v56 = vadd.f32 %v708_v50, %v9820_v39  ;;  %v8323_v60 = vcombine.high %v9863_v44, %v9865_v45 }
 0x24e   :  { %v602_v36 = vadd.f32 %v601_v28, %v9809_v31  ;;  %2523 = vmatpush1.bf16.msra.mxu0 %v8298_v24  ;;  %2749 = vmatpush1.bf16.msra.mxu1 %v8300_v25  ;;  %v786_v24 = vmax.f32 %v598_v6, 0.0 }
 0x24f   :  { %v789_v43 = vmax.f32 %v600_v26, 0.0  ;;  %2524 = vmatprep.subr.bf16.mxu0 %v8307_v57  ;;  %2750 = vmatprep.subr.bf16.mxu1 %v8309_v62  ;;  %v710_v57 = vpop.f32.mrb[37].mxu1  ;;  %v787_v6 = vmax.f32 %v709_v56, 0.0  ;;  %v9900_v26 = vld [vmem:[#allocation2 + $0x528] sm:$0xff] }
 0x250   :  { %v790_v25 = vmax.f32 %v602_v36, 0.0  ;;  %v711_v61 = vadd.f32 %v710_v57, %v9824_v42  ;;  %v712_v62 = vpop.f32.mrb[38].mxu1  ;;  %v8333_v50 = vcombine.high %v9898_v15, %v9900_v26 }
 0x251   :  { %v9875_v51 = vpack.c.bf16 %v789_v43, %v785_v41  ;;  %v713_v7 = vadd.f32 %v712_v62, %v9820_v39  ;;  %v714_v8 = vpop.f32.mrb[39].mxu1  ;;  %v8324_v41 = vcombine.low %v9869_v47, %v9871_v48  ;;  %v8331_v43 = vcombine.high %v9890_v2, %v9892_v5  ;;  %v9921_v47 = vld [vmem:[#allocation2 + $0x548] sm:$0xff] }
 0x252   :  { %v9882_v58 = vpack.c.bf16 %v790_v25, %v786_v24  ;;  %v605_v59 = vpop.f32.mrb[40].mxu0  ;;  %2525 = vmatpush1.bf16.msra.mxu0 %v8306_v34  ;;  %2751 = vmatpush1.bf16.msra.mxu1 %v8308_v37  ;;  %v788_v28 = vmax.f32 %v711_v61, 0.0  ;;  %v715_v34 = vadd.f32 %v714_v8, %v9824_v42  ;;  %v8322_v37 = vcombine.low %v9863_v44, %v9865_v45  ;;  %v9915_v44 = vld [vmem:[#allocation2 + $0x540] sm:$0xff]  ;;  %v9923_v48 = vld [vmem:[#allocation2 + $0x568] sm:$0xff] }
 0x253   :  { %v606_v1 = vadd.f32 %v605_v59, %v9806_v30  ;;  %v607_v63 = vpop.f32.mrb[41].mxu0  ;;  %2526 = vmatprep.subr.bf16.mxu0 %v8315_v38  ;;  %2752 = vmatprep.subr.bf16.mxu1 %v8317_v4  ;;  %v791_v38 = vmax.f32 %v713_v7, 0.0  ;;  %v9917_v45 = vld [vmem:[#allocation2 + $0x560] sm:$0xff]  ;;  %v8330_v61 = vcombine.low %v9890_v2, %v9892_v5  ;;  %v8332_v62 = vcombine.low %v9898_v15, %v9900_v26 }
 0x254   :  { %v608_v11 = vadd.f32 %v607_v63, %v9809_v31  ;;  %v609_v12 = vpop.f32.mrb[42].mxu0  ;;  %2451 = vmatprep.mubr.bf16.mxu0 %v9882_v58  ;;  %2677 = vmatprep.mubr.bf16.mxu1 %v9882_v58  ;;  %v792_v4 = vmax.f32 %v715_v34, 0.0  ;;  %v718_v59 = vpop.f32.mrb[40].mxu1  ;;  %v8339_v7 = vcombine.high %v9915_v44, %v9917_v45  ;;  %v8341_v5 = vcombine.high %v9921_v47, %v9923_v48  ;;  %v9942_v15 = vld [vmem:[#allocation2 + $0x580] sm:$0xff] }
 0x255   :  { %v610_v35 = vadd.f32 %v609_v12, %v9806_v30  ;;  %v611_v36 = vpop.f32.mrb[43].mxu0  ;;  %2452 = vmatmul.mubr.bf16.gmra.mrb[68].mxu0 %v9875_v51  ;;  %2678 = vmatmul.mubr.bf16.gmra.mrb[68].mxu1 %v9875_v51  ;;  %v793_v24 = vmax.f32 %v606_v1, 0.0  ;;  %v719_v1 = vadd.f32 %v718_v59, %v9820_v39  ;;  %v720_v63 = vpop.f32.mrb[41].mxu1  ;;  %v9944_v26 = vld [vmem:[#allocation2 + $0x5a0] sm:$0xff] }
 0x256   :  { %v612_v40 = vadd.f32 %v611_v36, %v9809_v31  ;;  %2527 = vmatpush1.bf16.msra.mxu0 %v8314_v53  ;;  %2753 = vmatpush1.bf16.msra.mxu1 %v8316_v54  ;;  %v9919_v53 = vpack.c.bf16 %v791_v38, %v787_v6  ;;  %v794_v54 = vmax.f32 %v608_v11, 0.0  ;;  %v9925_v57 = vpack.c.bf16 %v792_v4, %v788_v28  ;;  %v722_v11 = vpop.f32.mrb[42].mxu1  ;;  %v9950_v38 = vld [vmem:[#allocation2 + $0x588] sm:$0xff] }
 0x257   :  { %v797_v25 = vmax.f32 %v610_v35, 0.0  ;;  %2528 = vmatprep.subr.bf16.mxu0 %v8323_v60  ;;  %2754 = vmatprep.subr.bf16.mxu1 %v8325_v0  ;;  %v721_v8 = vadd.f32 %v720_v63, %v9824_v42  ;;  %v795_v28 = vmax.f32 %v719_v1, 0.0  ;;  %v723_v34 = vadd.f32 %v722_v11, %v9820_v39  ;;  %v724_v35 = vpop.f32.mrb[43].mxu1 }
 0x258   :  { %v798_v56 = vmax.f32 %v612_v40, 0.0  ;;  %v9952_v40 = vld [vmem:[#allocation2 + $0x5a8] sm:$0xff]  ;;  %v8347_v59 = vcombine.high %v9942_v15, %v9944_v26 }
 0x259   :  { %v9927_v60 = vpack.c.bf16 %v797_v25, %v793_v24  ;;  %v8338_v25 = vcombine.low %v9915_v44, %v9917_v45  ;;  %v9967_v44 = vld [vmem:[#allocation2 + $0x5c0] sm:$0xff] }
 0x25a   :  { %v9934_v0 = vpack.c.bf16 %v798_v56, %v794_v54  ;;  %v615_v6 = vpop.f32.mrb[44].mxu0  ;;  %2529 = vmatpush1.bf16.msra.mxu0 %v8322_v37  ;;  %2755 = vmatpush1.bf16.msra.mxu1 %v8324_v41  ;;  %v796_v41 = vmax.f32 %v721_v8, 0.0  ;;  %v8340_v56 = vcombine.low %v9921_v47, %v9923_v48  ;;  %v8349_v8 = vcombine.high %v9950_v38, %v9952_v40  ;;  %v9969_v45 = vld [vmem:[#allocation2 + $0x5e0] sm:$0xff]  ;;  %v9973_v47 = vld [vmem:[#allocation2 + $0x5c8] sm:$0xff] }
 0x25b   :  { %v616_v12 = vadd.f32 %v615_v6, %v9806_v30  ;;  %v617_v2 = vpop.f32.mrb[45].mxu0  ;;  %2530 = vmatprep.subr.bf16.mxu0 %v8331_v43  ;;  %2756 = vmatprep.subr.bf16.mxu1 %v8333_v50  ;;  %v725_v43 = vadd.f32 %v724_v35, %v9824_v42  ;;  %v799_v50 = vmax.f32 %v723_v34, 0.0  ;;  %v9975_v48 = vld [vmem:[#allocation2 + $0x5e8] sm:$0xff]  ;;  %v8348_v34 = vcombine.low %v9950_v38, %v9952_v40  ;;  %v9994_v38 = vld [vmem:[#allocation2 + $0x600] sm:$0xff] }
 0x25c   :  { %v618_v36 = vadd.f32 %v617_v2, %v9809_v31  ;;  %v619_v37 = vpop.f32.mrb[46].mxu0  ;;  %2461 = vmatprep.mubr.bf16.mxu0 %v9934_v0  ;;  %2687 = vmatprep.mubr.bf16.mxu1 %v9934_v0  ;;  %v9996_v40 = vld [vmem:[#allocation2 + $0x620] sm:$0xff] }
 0x25d   :  { %v620_v4 = vadd.f32 %v619_v37, %v9806_v30  ;;  %v621_v24 = vpop.f32.mrb[47].mxu0  ;;  %2462 = vmatmul.mubr.bf16.gmra.mrb[72].mxu0 %v9927_v60  ;;  %2688 = vmatmul.mubr.bf16.gmra.mrb[72].mxu1 %v9927_v60  ;;  %v800_v1 = vmax.f32 %v725_v43, 0.0  ;;  %v801_v63 = vmax.f32 %v616_v12, 0.0  ;;  %v728_v12 = vpop.f32.mrb[44].mxu1 }
 0x25e   :  { %v622_v54 = vadd.f32 %v621_v24, %v9809_v31  ;;  %2531 = vmatpush1.bf16.msra.mxu0 %v8330_v61  ;;  %2757 = vmatpush1.bf16.msra.mxu1 %v8332_v62  ;;  %v9971_v61 = vpack.c.bf16 %v799_v50, %v795_v28  ;;  %v802_v62 = vmax.f32 %v618_v36, 0.0  ;;  %v729_v28 = vadd.f32 %v728_v12, %v9820_v39  ;;  %v730_v35 = vpop.f32.mrb[45].mxu1 }
 0x25f   :  { %v805_v6 = vmax.f32 %v620_v4, 0.0  ;;  %2532 = vmatprep.subr.bf16.mxu0 %v8339_v7  ;;  %2758 = vmatprep.subr.bf16.mxu1 %v8341_v5  ;;  %v9977_v2 = vpack.c.bf16 %v800_v1, %v796_v41  ;;  %v8346_v5 = vcombine.low %v9942_v15, %v9944_v26  ;;  %v8355_v41 = vcombine.high %v9967_v44, %v9969_v45  ;;  %v732_v4 = vpop.f32.mrb[46].mxu1 }
 0x260   :  { %v806_v11 = vmax.f32 %v622_v54, 0.0  ;;  %v731_v43 = vadd.f32 %v730_v35, %v9824_v42  ;;  %v8357_v26 = vcombine.high %v9973_v47, %v9975_v48  ;;  %v733_v50 = vadd.f32 %v732_v4, %v9820_v39  ;;  %v734_v54 = vpop.f32.mrb[47].mxu1 }
 0x261   :  { %v9979_v7 = vpack.c.bf16 %v805_v6, %v801_v63  ;;  %v10004_v63 = vld [vmem:[#allocation2 + $0x628] sm:$0xff]  ;;  %v8354_v12 = vcombine.low %v9967_v44, %v9969_v45  ;;  %v10019_v44 = vld [vmem:[#allocation2 + $0x640] sm:$0xff] }
 0x262   :  { %v9986_v36 = vpack.c.bf16 %v806_v11, %v802_v62  ;;  %v625_v37 = vpop.f32.mrb[48].mxu0  ;;  %2533 = vmatpush1.bf16.msra.mxu0 %v8338_v25  ;;  %2759 = vmatpush1.bf16.msra.mxu1 %v8340_v56  ;;  %v803_v25 = vmax.f32 %v729_v28, 0.0  ;;  %v804_v6 = vmax.f32 %v731_v43, 0.0  ;;  %v807_v28 = vmax.f32 %v733_v50, 0.0  ;;  %v10021_v45 = vld [vmem:[#allocation2 + $0x660] sm:$0xff] }
 0x263   :  { %v626_v24 = vadd.f32 %v625_v37, %v9806_v30  ;;  %v627_v15 = vpop.f32.mrb[49].mxu0  ;;  %2534 = vmatprep.subr.bf16.mxu0 %v8347_v59  ;;  %2760 = vmatprep.subr.bf16.mxu1 %v8349_v8  ;;  %v10002_v59 = vld [vmem:[#allocation2 + $0x608] sm:$0xff]  ;;  %v735_v8 = vadd.f32 %v734_v54, %v9824_v42  ;;  %v8356_v37 = vcombine.low %v9973_v47, %v9975_v48 }
 0x264   :  { %v628_v56 = vadd.f32 %v627_v15, %v9809_v31  ;;  %v629_v1 = vpop.f32.mrb[50].mxu0  ;;  %2471 = vmatprep.mubr.bf16.mxu0 %v9986_v36  ;;  %2697 = vmatprep.mubr.bf16.mxu1 %v9986_v36  ;;  %v8363_v43 = vcombine.high %v9994_v38, %v9996_v40  ;;  %v10025_v47 = vld [vmem:[#allocation2 + $0x648] sm:$0xff] }
 0x265   :  { %v630_v62 = vadd.f32 %v629_v1, %v9806_v30  ;;  %v631_v11 = vpop.f32.mrb[51].mxu0  ;;  %2472 = vmatmul.mubr.bf16.gmra.mrb[76].mxu0 %v9979_v7  ;;  %2698 = vmatmul.mubr.bf16.gmra.mrb[76].mxu1 %v9979_v7  ;;  %v808_v4 = vmax.f32 %v735_v8, 0.0  ;;  %v809_v15 = vmax.f32 %v626_v24, 0.0  ;;  %v8365_v1 = vcombine.high %v10002_v59, %v10004_v63  ;;  %v10027_v48 = vld [vmem:[#allocation2 + $0x668] sm:$0xff]  ;;  %v738_v24 = vpop.f32.mrb[48].mxu1 }
 0x266   :  { %v632_v35 = vadd.f32 %v631_v11, %v9809_v31  ;;  %2535 = vmatpush1.bf16.msra.mxu0 %v8346_v5  ;;  %2761 = vmatpush1.bf16.msra.mxu1 %v8348_v34  ;;  %v10023_v5 = vpack.c.bf16 %v807_v28, %v803_v25  ;;  %v810_v34 = vmax.f32 %v628_v56, 0.0  ;;  %v739_v25 = vadd.f32 %v738_v24, %v9820_v39  ;;  %v740_v11 = vpop.f32.mrb[49].mxu1 }
 0x267   :  { %v813_v54 = vmax.f32 %v630_v62, 0.0  ;;  %2536 = vmatprep.subr.bf16.mxu0 %v8355_v41  ;;  %2762 = vmatprep.subr.bf16.mxu1 %v8357_v26  ;;  %v10029_v8 = vpack.c.bf16 %v808_v4, %v804_v6  ;;  %v8362_v26 = vcombine.low %v9994_v38, %v9996_v40  ;;  %v8364_v62 = vcombine.low %v10002_v59, %v10004_v63  ;;  %v742_v4 = vpop.f32.mrb[50].mxu1  ;;  %v10046_v59 = vld [vmem:[#allocation2 + $0x680] sm:$0xff] }
 0x268   :  { %v814_v50 = vmax.f32 %v632_v35, 0.0  ;;  %v8371_v6 = vcombine.high %v10019_v44, %v10021_v45  ;;  %v741_v35 = vadd.f32 %v740_v11, %v9824_v42  ;;  %v8373_v40 = vcombine.high %v10025_v47, %v10027_v48  ;;  %v10048_v63 = vld [vmem:[#allocation2 + $0x6a0] sm:$0xff] }
 0x269   :  { %v10031_v41 = vpack.c.bf16 %v813_v54, %v809_v15  ;;  %v744_v54 = vpop.f32.mrb[51].mxu1 }
 0x26a   :  { %v10038_v56 = vpack.c.bf16 %v814_v50, %v810_v34  ;;  %v635_v28 = vpop.f32.mrb[52].mxu0  ;;  %2537 = vmatpush1.bf16.msra.mxu0 %v8354_v12  ;;  %2763 = vmatpush1.bf16.msra.mxu1 %v8356_v37  ;;  %v811_v12 = vmax.f32 %v739_v25, 0.0  ;;  %v743_v37 = vadd.f32 %v742_v4, %v9820_v39  ;;  %v812_v24 = vmax.f32 %v741_v35, 0.0 }
 0x26b   :  { %v636_v15 = vadd.f32 %v635_v28, %v9806_v30  ;;  %v637_v38 = vpop.f32.mrb[53].mxu0  ;;  %2538 = vmatprep.subr.bf16.mxu0 %v8363_v43  ;;  %2764 = vmatprep.subr.bf16.mxu1 %v8365_v1  ;;  %v10054_v43 = vld [vmem:[#allocation2 + $0x688] sm:$0xff]  ;;  %v745_v11 = vadd.f32 %v744_v54, %v9824_v42  ;;  %v8370_v4 = vcombine.low %v10019_v44, %v10021_v45  ;;  %v10071_v44 = vld [vmem:[#allocation2 + $0x6c0] sm:$0xff] }
 0x26c   :  { %v638_v34 = vadd.f32 %v637_v38, %v9809_v31  ;;  %v639_v50 = vpop.f32.mrb[54].mxu0  ;;  %2481 = vmatprep.mubr.bf16.mxu0 %v10038_v56  ;;  %2707 = vmatprep.mubr.bf16.mxu1 %v10038_v56  ;;  %v10056_v1 = vld [vmem:[#allocation2 + $0x6a8] sm:$0xff]  ;;  %v815_v38 = vmax.f32 %v743_v37, 0.0  ;;  %v8372_v35 = vcombine.low %v10025_v47, %v10027_v48  ;;  %v8379_v54 = vcombine.high %v10046_v59, %v10048_v63  ;;  %v10073_v45 = vld [vmem:[#allocation2 + $0x6e0] sm:$0xff] }
 0x26d   :  { %v640_v28 = vadd.f32 %v639_v50, %v9806_v30  ;;  %v641_v25 = vpop.f32.mrb[55].mxu0  ;;  %2482 = vmatmul.mubr.bf16.gmra.mrb[80].mxu0 %v10031_v41  ;;  %2708 = vmatmul.mubr.bf16.gmra.mrb[80].mxu1 %v10031_v41  ;;  %v816_v50 = vmax.f32 %v745_v11, 0.0  ;;  %v817_v22 = vmax.f32 %v636_v15, 0.0  ;;  %v8381_v23 = vcombine.high %v10054_v43, %v10056_v1  ;;  %v10077_v47 = vld [vmem:[#allocation2 + $0x6c8] sm:$0xff]  ;;  %v748_v15 = vpop.f32.mrb[52].mxu1 }
 0x26e   :  { %v642_v3 = vadd.f32 %v641_v25, %v9809_v31  ;;  %2539 = vmatpush1.bf16.msra.mxu0 %v8362_v26  ;;  %2765 = vmatpush1.bf16.msra.mxu1 %v8364_v62  ;;  %v10075_v26 = vpack.c.bf16 %v815_v38, %v811_v12  ;;  %v818_v62 = vmax.f32 %v638_v34, 0.0  ;;  %v10079_v48 = vld [vmem:[#allocation2 + $0x6e8] sm:$0xff]  ;;  %v749_v12 = vadd.f32 %v748_v15, %v9820_v39  ;;  %v750_v25 = vpop.f32.mrb[53].mxu1 }
 0x26f   :  { %v821_v18 = vmax.f32 %v640_v28, 0.0  ;;  %2540 = vmatprep.subr.bf16.mxu0 %v8371_v6  ;;  %2766 = vmatprep.subr.bf16.mxu1 %v8373_v40  ;;  %v10081_v11 = vpack.c.bf16 %v816_v50, %v812_v24  ;;  %v8378_v40 = vcombine.low %v10046_v59, %v10048_v63  ;;  %v8380_v28 = vcombine.low %v10054_v43, %v10056_v1  ;;  %v10098_v43 = vld [vmem:[#allocation2 + $0x700] sm:$0xff] }
 0x270   :  { %v822_v37 = vmax.f32 %v642_v3, 0.0  ;;  %v8387_v24 = vcombine.high %v10071_v44, %v10073_v45  ;;  %v8389_v63 = vcombine.high %v10077_v47, %v10079_v48  ;;  %v10100_v1 = vld [vmem:[#allocation2 + $0x720] sm:$0xff] }
 0x271   :  { %v10083_v6 = vpack.c.bf16 %v821_v18, %v817_v22  ;;  %v751_v18 = vadd.f32 %v750_v25, %v9824_v42  ;;  %v752_v22 = vpop.f32.mrb[54].mxu1 }
 0x272   :  { %v10090_v34 = vpack.c.bf16 %v822_v37, %v818_v62  ;;  %v645_v3 = vpop.f32.mrb[56].mxu0  ;;  %2541 = vmatpush1.bf16.msra.mxu0 %v8370_v4  ;;  %2767 = vmatpush1.bf16.msra.mxu1 %v8372_v35  ;;  %v819_v4 = vmax.f32 %v749_v12, 0.0  ;;  %v753_v35 = vadd.f32 %v752_v22, %v9820_v39  ;;  %v754_v50 = vpop.f32.mrb[55].mxu1  ;;  %v8386_v22 = vcombine.low %v10071_v44, %v10073_v45  ;;  %v10123_v44 = vld [vmem:[#allocation2 + $0x740] sm:$0xff] }
 0x273   :  { %v646_v38 = vadd.f32 %v645_v3, %v9806_v30  ;;  %v647_v59 = vpop.f32.mrb[57].mxu0  ;;  %2542 = vmatprep.subr.bf16.mxu0 %v8379_v54  ;;  %2768 = vmatprep.subr.bf16.mxu1 %v8381_v23  ;;  %v10106_v54 = vld [vmem:[#allocation2 + $0x708] sm:$0xff]  ;;  %v820_v15 = vmax.f32 %v751_v18, 0.0  ;;  %v755_v25 = vadd.f32 %v754_v50, %v9824_v42  ;;  %v8388_v18 = vcombine.low %v10077_v47, %v10079_v48  ;;  %v10125_v45 = vld [vmem:[#allocation2 + $0x760] sm:$0xff] }
 0x274   :  { %v648_v62 = vadd.f32 %v647_v59, %v9809_v31  ;;  %v649_v37 = vpop.f32.mrb[58].mxu0  ;;  %2491 = vmatprep.mubr.bf16.mxu0 %v10090_v34  ;;  %2717 = vmatprep.mubr.bf16.mxu1 %v10090_v34  ;;  %v10108_v23 = vld [vmem:[#allocation2 + $0x728] sm:$0xff]  ;;  %v823_v59 = vmax.f32 %v753_v35, 0.0  ;;  %v8395_v50 = vcombine.high %v10098_v43, %v10100_v1 }
 0x275   :  { %v650_v3 = vadd.f32 %v649_v37, %v9806_v30  ;;  %v651_v12 = vpop.f32.mrb[59].mxu0  ;;  %2492 = vmatmul.mubr.bf16.gmra.mrb[84].mxu0 %v10083_v6  ;;  %2718 = vmatmul.mubr.bf16.gmra.mrb[84].mxu1 %v10083_v6  ;;  %v824_v37 = vmax.f32 %v755_v25, 0.0  ;;  %v825_v20 = vmax.f32 %v646_v38, 0.0  ;;  %v8397_v21 = vcombine.high %v10106_v54, %v10108_v23  ;;  %v10129_v47 = vld [vmem:[#allocation2 + $0x748] sm:$0xff]  ;;  %v758_v38 = vpop.f32.mrb[56].mxu1 }
 0x276   :  { %v652_v19 = vadd.f32 %v651_v12, %v9809_v31  ;;  %2543 = vmatpush1.bf16.msra.mxu0 %v8378_v40  ;;  %2769 = vmatpush1.bf16.msra.mxu1 %v8380_v28  ;;  %v10127_v40 = vpack.c.bf16 %v823_v59, %v819_v4  ;;  %v826_v28 = vmax.f32 %v648_v62, 0.0  ;;  %v10131_v48 = vld [vmem:[#allocation2 + $0x768] sm:$0xff]  ;;  %v759_v4 = vadd.f32 %v758_v38, %v9820_v39  ;;  %v760_v12 = vpop.f32.mrb[57].mxu1 }
 0x277   :  { %v829_v16 = vmax.f32 %v650_v3, 0.0  ;;  %2544 = vmatprep.subr.bf16.mxu0 %v8387_v24  ;;  %2770 = vmatprep.subr.bf16.mxu1 %v8389_v63  ;;  %v10133_v25 = vpack.c.bf16 %v824_v37, %v820_v15  ;;  %v8394_v63 = vcombine.low %v10098_v43, %v10100_v1  ;;  %v8396_v3 = vcombine.low %v10106_v54, %v10108_v23  ;;  %v10150_v54 = vld [vmem:[#allocation2 + $0x780] sm:$0xff] }
 0x278   :  { %v830_v35 = vmax.f32 %v652_v19, 0.0  ;;  %v8403_v15 = vcombine.high %v10123_v44, %v10125_v45  ;;  %v8405_v1 = vcombine.high %v10129_v47, %v10131_v48  ;;  %v10152_v23 = vld [vmem:[#allocation2 + $0x7a0] sm:$0xff] }
 0x279   :  { %v10135_v24 = vpack.c.bf16 %v829_v16, %v825_v20  ;;  %v761_v16 = vadd.f32 %v760_v12, %v9824_v42  ;;  %v762_v20 = vpop.f32.mrb[58].mxu1 }
 0x27a   :  { %v10142_v62 = vpack.c.bf16 %v830_v35, %v826_v28  ;;  %v655_v19 = vpop.f32.mrb[60].mxu0  ;;  %2545 = vmatpush1.bf16.msra.mxu0 %v8386_v22  ;;  %2771 = vmatpush1.bf16.msra.mxu1 %v8388_v18  ;;  %v827_v22 = vmax.f32 %v759_v4, 0.0  ;;  %v763_v18 = vadd.f32 %v762_v20, %v9820_v39  ;;  %v764_v37 = vpop.f32.mrb[59].mxu1  ;;  %v8402_v4 = vcombine.low %v10123_v44, %v10125_v45 }
 0x27b   :  { %v656_v59 = vadd.f32 %v655_v19, %v9806_v30  ;;  %v657_v43 = vpop.f32.mrb[61].mxu0  ;;  %2546 = vmatprep.subr.bf16.mxu0 %v8395_v50  ;;  %2772 = vmatprep.subr.bf16.mxu1 %v8397_v21  ;;  %v1114_v50 = vld [vmem:[#allocation2 + $0x788] sm:$0xff]  ;;  %v828_v38 = vmax.f32 %v761_v16, 0.0  ;;  %v765_v12 = vadd.f32 %v764_v37, %v9824_v42  ;;  %v8404_v16 = vcombine.low %v10129_v47, %v10131_v48 }
 0x27c   :  { %v658_v28 = vadd.f32 %v657_v43, %v9809_v31  ;;  %v659_v35 = vpop.f32.mrb[62].mxu0  ;;  %2501 = vmatprep.mubr.bf16.mxu0 %v10142_v62  ;;  %2727 = vmatprep.mubr.bf16.mxu1 %v10142_v62  ;;  %v1118_v21 = vld [vmem:[#allocation2 + $0x7a8] sm:$0xff]  ;;  %v831_v20 = vmax.f32 %v763_v18, 0.0  ;;  %v8411_v37 = vcombine.high %v10150_v54, %v10152_v23  ;;  %v1121_v18 = vld [vmem:[#allocation2 + $0x7c0] sm:$0xff]  ;;  %v8410_v47 = vcombine.low %v10150_v54, %v10152_v23 }
 0x27d   :  { %v660_v19 = vadd.f32 %v659_v35, %v9806_v30  ;;  %v661_v17 = vpop.f32.mrb[63].mxu0  ;;  %2502 = vmatmul.mubr.bf16.gmra.mrb[88].mxu0 %v10135_v24  ;;  %2728 = vmatmul.mubr.bf16.gmra.mrb[88].mxu1 %v10135_v24  ;;  %v832_v30 = vmax.f32 %v765_v12, 0.0  ;;  %v833_v35 = vmax.f32 %v656_v59, 0.0  ;;  %v8413_v13 = vcombine.high %v1114_v50, %v1118_v21  ;;  %v1122_v48 = vld [vmem:[#allocation2 + $0x7c8] sm:$0xff] }
 0x27e   :  { %v662_v43 = vadd.f32 %v661_v17, %v9809_v31  ;;  %2547 = vmatpush1.bf16.msra.mxu0 %v8394_v63  ;;  %2773 = vmatpush1.bf16.msra.mxu1 %v8396_v3  ;;  %v10169_v10 = vpack.c.bf16 %v831_v20, %v827_v22  ;;  %v834_v44 = vmax.f32 %v658_v28, 0.0  ;;  %v1125_v17 = vld [vmem:[#allocation2 + $0x7e0] sm:$0xff]  ;;  %v768_v63 = vpop.f32.mrb[60].mxu1  ;;  %v1126_v59 = vld [vmem:[#allocation2 + $0x7e8] sm:$0xff]  ;;  %v8412_v22 = vcombine.low %v1114_v50, %v1118_v21 }
 0x27f   :  { %v837_v14 = vmax.f32 %v660_v19, 0.0  ;;  %2548 = vmatprep.subr.bf16.mxu0 %v8403_v15  ;;  %2774 = vmatprep.subr.bf16.mxu1 %v8405_v1  ;;  %v10171_v31 = vpack.c.bf16 %v832_v30, %v828_v38  ;;  %v769_v15 = vadd.f32 %v768_v63, %v9820_v39  ;;  %v770_v1 = vpop.f32.mrb[61].mxu1  ;;  %v875_v19 = vld [vmem:[#allocation2 + $0x10] sm:$0xff] }
 0x280   :  { %v838_v45 = vmax.f32 %v662_v43, 0.0  ;;  %v771_v28 = vadd.f32 %v770_v1, %v9824_v42  ;;  %v772_v38 = vpop.f32.mrb[62].mxu1  ;;  %v8421_v43 = vcombine.high %v1122_v48, %v1126_v59  ;;  %v879_v30 = vld [vmem:[#allocation2 + $0x30] sm:$0xff] }
 0x281   :  { %v10173_v3 = vpack.c.bf16 %v837_v14, %v833_v35  ;;  %v8419_v14 = vcombine.high %v1121_v18, %v1125_v17  ;;  %v835_v20 = vmax.f32 %v769_v15, 0.0  ;;  %v773_v54 = vadd.f32 %v772_v38, %v9820_v39  ;;  %v774_v23 = vpop.f32.mrb[63].mxu1  ;;  %v887_v1 = vld [vmem:[#allocation2 + $0x70] sm:$0xff] }
 0x282   :  { %v10178_v12 = vpack.c.bf16 %v838_v45, %v834_v44  ;;  %2549 = vmatpush1.bf16.msra.mxu0 %v8402_v4  ;;  %2775 = vmatpush1.bf16.msra.mxu1 %v8404_v16  ;;  %v876_v4 = vld [vmem:[#allocation2 + $0x18] sm:$0xff]  ;;  %v836_v50 = vmax.f32 %v771_v28, 0.0  ;;  %v775_v21 = vadd.f32 %v774_v23, %v9824_v42  ;;  %v8418_v39 = vcombine.low %v1121_v18, %v1125_v17  ;;  %v883_v42 = vld [vmem:[#allocation2 + $0x50] sm:$0xff] }
 0x283   :  { %2550 = vmatprep.subr.bf16.mxu0 %v8411_v37  ;;  %2776 = vmatprep.subr.bf16.mxu1 %v8413_v13  ;;  %v880_v16 = vld [vmem:[#allocation2 + $0x38] sm:$0xff]  ;;  %v839_v13 = vmax.f32 %v773_v54, 0.0  ;;  %v8420_v37 = vcombine.low %v1122_v48, %v1126_v59  ;;  %v8175_v44 = vcombine.high %v875_v19, %v879_v30  ;;  %v8174_v18 = vcombine.low %v875_v19, %v879_v30  ;;  %v891_v48 = vld [vmem:[#allocation2 + $0x90] sm:$0xff] }
 0x284   :  { %2511 = vmatprep.mubr.bf16.mxu0 %v10178_v12  ;;  %2737 = vmatprep.mubr.bf16.mxu1 %v10178_v12  ;;  %v840_v35 = vmax.f32 %v775_v21, 0.0  ;;  %v8177_v45 = vcombine.high %v876_v4, %v880_v16  ;;  %v884_v28 = vld [vmem:[#allocation2 + $0x58] sm:$0xff]  ;;  %v8176_v17 = vcombine.low %v876_v4, %v880_v16  ;;  %v8183_v59 = vcombine.high %v883_v42, %v887_v1  ;;  %v895_v38 = vld [vmem:[#allocation2 + $0xb0] sm:$0xff] }
 0x285   :  { %2512 = vmatmul.mubr.bf16.gmra.mrb[92].mxu0 %v10173_v3  ;;  %2738 = vmatmul.mubr.bf16.gmra.mrb[92].mxu1 %v10173_v3  ;;  %v10188_v63 = vpack.c.bf16 %v839_v13, %v835_v20  ;;  %v896_v20 = vld [vmem:[#allocation2 + $0xb8] sm:$0xff]  ;;  %v8182_v54 = vcombine.low %v883_v42, %v887_v1  ;;  %v8191_v19 = vcombine.high %v891_v48, %v895_v38  ;;  %v899_v30 = vld [vmem:[#allocation2 + $0xd0] sm:$0xff] }
 0x286   :  { %2551 = vmatpush1.bf16.msra.mxu0 %v8410_v47  ;;  %2777 = vmatpush1.bf16.msra.mxu1 %v8412_v22  ;;  %v10191_v15 = vpack.c.bf16 %v840_v35, %v836_v50  ;;  %v888_v47 = vld [vmem:[#allocation2 + $0x78] sm:$0xff]  ;;  %v903_v4 = vld [vmem:[#allocation2 + $0xf0] sm:$0xff]  ;;  %v8190_v21 = vcombine.low %v891_v48, %v895_v38 }
 0x287   :  { %2552 = vmatprep.subr.bf16.mxu0 %v8419_v14  ;;  %2554 = vmatprep.mubr.bf16.mxu0 %v9873_v49  ;;  %v8185_v22 = vcombine.high %v884_v28, %v888_v47  ;;  %v892_v14 = vld [vmem:[#allocation2 + $0x98] sm:$0xff]  ;;  %v8184_v23 = vcombine.low %v884_v28, %v888_v47  ;;  %v8198_v1 = vcombine.low %v899_v30, %v903_v4  ;;  %v919_v48 = vld [vmem:[#allocation2 + $0x170] sm:$0xff] }
 0x288   :  { %2778 = vmatprep.subr.bf16.mxu1 %v8421_v43  ;;  %2780 = vmatprep.mubr.bf16.mxu1 %v9873_v49  ;;  %v8193_v43 = vcombine.high %v892_v14, %v896_v20  ;;  %v900_v16 = vld [vmem:[#allocation2 + $0xd8] sm:$0xff]  ;;  %v8192_v13 = vcombine.low %v892_v14, %v896_v20  ;;  %v923_v20 = vld [vmem:[#allocation2 + $0x190] sm:$0xff] }
 0x289   :  { %v904_v50 = vld [vmem:[#allocation2 + $0xf8] sm:$0xff] }
 0x28a   :  { %2553 = vmatpush1.bf16.msra.mxu0 %v8418_v39  ;;  %2779 = vmatpush1.bf16.msra.mxu1 %v8420_v37  ;;  %v907_v39 = vld [vmem:[#allocation2 + $0x110] sm:$0xff]  ;;  %v8199_v37 = vcombine.high %v899_v30, %v903_v4  ;;  %v8201_v35 = vcombine.high %v900_v16, %v904_v50  ;;  %v912_v42 = vld [vmem:[#allocation2 + $0x138] sm:$0xff]  ;;  %v8200_v28 = vcombine.low %v900_v16, %v904_v50 }
 0x28b   :  { %2861 = vmatprep.subr.bf16.mxu0 %v8175_v44  ;;  %3087 = vmatprep.subr.bf16.mxu1 %v8177_v45  ;;  %v911_v44 = vld [vmem:[#allocation2 + $0x130] sm:$0xff]  ;;  %v908_v45 = vld [vmem:[#allocation2 + $0x118] sm:$0xff] }
 0x28c   :  { %v8207_v47 = vcombine.high %v907_v39, %v911_v44  ;;  %v8206_v38 = vcombine.low %v907_v39, %v911_v44  ;;  %v8208_v14 = vcombine.low %v908_v45, %v912_v42  ;;  %v928_v30 = vld [vmem:[#allocation2 + $0x1b8] sm:$0xff]  ;;  %v935_v39 = vld [vmem:[#allocation2 + $0x1f0] sm:$0xff] }
 0x28d   :  { %2555 = vmatmul.mubr.bf16.vlgmr.msra.gmra.mrb[64].mxu0 %v9867_v46  ;;  %2781 = vmatmul.mubr.bf16.vlgmr.msra.gmra.mrb[64].mxu1 %v9867_v46 }
 0x28e   :  { %2862 = vmatpush1.bf16.msra.mxu0 %v8174_v18  ;;  %3088 = vmatpush1.bf16.msra.mxu1 %v8176_v17  ;;  %v8209_v18 = vcombine.high %v908_v45, %v912_v42  ;;  %v915_v17 = vld [vmem:[#allocation2 + $0x150] sm:$0xff] }
 0x28f   :  { %2564 = vmatprep.mubr.bf16.mxu0 %v9925_v57  ;;  %2790 = vmatprep.mubr.bf16.mxu1 %v9925_v57  ;;  %v8214_v4 = vcombine.low %v915_v17, %v919_v48  ;;  %v939_v42 = vld [vmem:[#allocation2 + $0x210] sm:$0xff] }
 0x290   :  { %2863 = vmatprep.subr.bf16.mxu0 %v8183_v59  ;;  %3089 = vmatprep.subr.bf16.mxu1 %v8185_v22  ;;  %v916_v59 = vld [vmem:[#allocation2 + $0x158] sm:$0xff] }
 0x291   :  { %v920_v22 = vld [vmem:[#allocation2 + $0x178] sm:$0xff] }
 0x292   :  { %2864 = vmatpush1.bf16.msra.mxu0 %v8182_v54  ;;  %3090 = vmatpush1.bf16.msra.mxu1 %v8184_v23  ;;  %v8215_v54 = vcombine.high %v915_v17, %v919_v48  ;;  %v8217_v23 = vcombine.high %v916_v59, %v920_v22  ;;  %v8216_v16 = vcombine.low %v916_v59, %v920_v22  ;;  %v944_v17 = vld [vmem:[#allocation2 + $0x238] sm:$0xff] }
 0x293   :  { %2865 = vmatprep.subr.bf16.mxu0 %v8191_v19  ;;  %3091 = vmatprep.subr.bf16.mxu1 %v8193_v43  ;;  %v927_v19 = vld [vmem:[#allocation2 + $0x1b0] sm:$0xff]  ;;  %v924_v43 = vld [vmem:[#allocation2 + $0x198] sm:$0xff] }
 0x294   :  { %v8223_v50 = vcombine.high %v923_v20, %v927_v19  ;;  %v8222_v44 = vcombine.low %v923_v20, %v927_v19  ;;  %v8224_v45 = vcombine.low %v924_v43, %v928_v30  ;;  %v951_v20 = vld [vmem:[#allocation2 + $0x270] sm:$0xff] }
 0x295   :  { %2565 = vmatmul.mubr.bf16.gmra.mrb[68].mxu0 %v9919_v53  ;;  %2791 = vmatmul.mubr.bf16.gmra.mrb[68].mxu1 %v9919_v53 }
 0x296   :  { %2866 = vmatpush1.bf16.msra.mxu0 %v8190_v21  ;;  %3092 = vmatpush1.bf16.msra.mxu1 %v8192_v13  ;;  %v8225_v21 = vcombine.high %v924_v43, %v928_v30  ;;  %v931_v13 = vld [vmem:[#allocation2 + $0x1d0] sm:$0xff] }
 0x297   :  { %2574 = vmatprep.mubr.bf16.mxu0 %v9977_v2  ;;  %2800 = vmatprep.mubr.bf16.mxu1 %v9977_v2  ;;  %v8230_v48 = vcombine.low %v931_v13, %v935_v39  ;;  %v955_v30 = vld [vmem:[#allocation2 + $0x290] sm:$0xff] }
 0x298   :  { %2867 = vmatprep.subr.bf16.mxu0 %v8199_v37  ;;  %3093 = vmatprep.subr.bf16.mxu1 %v8201_v35  ;;  %v932_v37 = vld [vmem:[#allocation2 + $0x1d8] sm:$0xff] }
 0x299   :  { %v936_v35 = vld [vmem:[#allocation2 + $0x1f8] sm:$0xff] }
 0x29a   :  { %2868 = vmatpush1.bf16.msra.mxu0 %v8198_v1  ;;  %3094 = vmatpush1.bf16.msra.mxu1 %v8200_v28  ;;  %v8231_v1 = vcombine.high %v931_v13, %v935_v39  ;;  %v8233_v28 = vcombine.high %v932_v37, %v936_v35  ;;  %v8232_v59 = vcombine.low %v932_v37, %v936_v35  ;;  %v960_v13 = vld [vmem:[#allocation2 + $0x2b8] sm:$0xff] }
 0x29b   :  { %2869 = vmatprep.subr.bf16.mxu0 %v8207_v47  ;;  %3095 = vmatprep.subr.bf16.mxu1 %v8209_v18  ;;  %v943_v47 = vld [vmem:[#allocation2 + $0x230] sm:$0xff]  ;;  %v940_v18 = vld [vmem:[#allocation2 + $0x218] sm:$0xff] }
 0x29c   :  { %v8239_v22 = vcombine.high %v939_v42, %v943_v47  ;;  %v8238_v19 = vcombine.low %v939_v42, %v943_v47  ;;  %v8240_v43 = vcombine.low %v940_v18, %v944_v17  ;;  %v967_v42 = vld [vmem:[#allocation2 + $0x2f0] sm:$0xff] }
 0x29d   :  { %2575 = vmatmul.mubr.bf16.gmra.mrb[72].mxu0 %v9971_v61  ;;  %2801 = vmatmul.mubr.bf16.gmra.mrb[72].mxu1 %v9971_v61 }
 0x29e   :  { %2870 = vmatpush1.bf16.msra.mxu0 %v8206_v38  ;;  %3096 = vmatpush1.bf16.msra.mxu1 %v8208_v14  ;;  %v8241_v38 = vcombine.high %v940_v18, %v944_v17  ;;  %v947_v14 = vld [vmem:[#allocation2 + $0x250] sm:$0xff] }
 0x29f   :  { %2584 = vmatprep.mubr.bf16.mxu0 %v10029_v8  ;;  %2810 = vmatprep.mubr.bf16.mxu1 %v10029_v8  ;;  %v8246_v39 = vcombine.low %v947_v14, %v951_v20  ;;  %v971_v17 = vld [vmem:[#allocation2 + $0x310] sm:$0xff] }
 0x2a0   :  { %2871 = vmatprep.subr.bf16.mxu0 %v8215_v54  ;;  %3097 = vmatprep.subr.bf16.mxu1 %v8217_v23  ;;  %v948_v54 = vld [vmem:[#allocation2 + $0x258] sm:$0xff] }
 0x2a1   :  { %v952_v23 = vld [vmem:[#allocation2 + $0x278] sm:$0xff] }
 0x2a2   :  { %2872 = vmatpush1.bf16.msra.mxu0 %v8214_v4  ;;  %3098 = vmatpush1.bf16.msra.mxu1 %v8216_v16  ;;  %v8247_v4 = vcombine.high %v947_v14, %v951_v20  ;;  %v8249_v16 = vcombine.high %v948_v54, %v952_v23  ;;  %v8248_v37 = vcombine.low %v948_v54, %v952_v23  ;;  %v976_v14 = vld [vmem:[#allocation2 + $0x338] sm:$0xff] }
 0x2a3   :  { %2873 = vmatprep.subr.bf16.mxu0 %v8223_v50  ;;  %3099 = vmatprep.subr.bf16.mxu1 %v8225_v21  ;;  %v959_v50 = vld [vmem:[#allocation2 + $0x2b0] sm:$0xff]  ;;  %v956_v21 = vld [vmem:[#allocation2 + $0x298] sm:$0xff] }
 0x2a4   :  { %v8255_v35 = vcombine.high %v955_v30, %v959_v50  ;;  %v8254_v47 = vcombine.low %v955_v30, %v959_v50  ;;  %v8256_v18 = vcombine.low %v956_v21, %v960_v13  ;;  %v983_v30 = vld [vmem:[#allocation2 + $0x370] sm:$0xff] }
 0x2a5   :  { %2585 = vmatmul.mubr.bf16.gmra.mrb[76].mxu0 %v10023_v5  ;;  %2811 = vmatmul.mubr.bf16.gmra.mrb[76].mxu1 %v10023_v5 }
 0x2a6   :  { %2874 = vmatpush1.bf16.msra.mxu0 %v8222_v44  ;;  %3100 = vmatpush1.bf16.msra.mxu1 %v8224_v45  ;;  %v8257_v44 = vcombine.high %v956_v21, %v960_v13  ;;  %v963_v45 = vld [vmem:[#allocation2 + $0x2d0] sm:$0xff] }
 0x2a7   :  { %2594 = vmatprep.mubr.bf16.mxu0 %v10081_v11  ;;  %2820 = vmatprep.mubr.bf16.mxu1 %v10081_v11  ;;  %v8262_v20 = vcombine.low %v963_v45, %v967_v42  ;;  %v987_v13 = vld [vmem:[#allocation2 + $0x390] sm:$0xff] }
 0x2a8   :  { %2875 = vmatprep.subr.bf16.mxu0 %v8231_v1  ;;  %3101 = vmatprep.subr.bf16.mxu1 %v8233_v28  ;;  %v964_v1 = vld [vmem:[#allocation2 + $0x2d8] sm:$0xff] }
 0x2a9   :  { %v968_v28 = vld [vmem:[#allocation2 + $0x2f8] sm:$0xff] }
 0x2aa   :  { %2876 = vmatpush1.bf16.msra.mxu0 %v8230_v48  ;;  %3102 = vmatpush1.bf16.msra.mxu1 %v8232_v59  ;;  %v8263_v48 = vcombine.high %v963_v45, %v967_v42  ;;  %v8265_v59 = vcombine.high %v964_v1, %v968_v28  ;;  %v8264_v54 = vcombine.low %v964_v1, %v968_v28  ;;  %v992_v45 = vld [vmem:[#allocation2 + $0x3b8] sm:$0xff] }
 0x2ab   :  { %2877 = vmatprep.subr.bf16.mxu0 %v8239_v22  ;;  %3103 = vmatprep.subr.bf16.mxu1 %v8241_v38  ;;  %v975_v22 = vld [vmem:[#allocation2 + $0x330] sm:$0xff]  ;;  %v972_v38 = vld [vmem:[#allocation2 + $0x318] sm:$0xff] }
 0x2ac   :  { %v8271_v23 = vcombine.high %v971_v17, %v975_v22  ;;  %v8270_v50 = vcombine.low %v971_v17, %v975_v22  ;;  %v8272_v21 = vcombine.low %v972_v38, %v976_v14  ;;  %v999_v17 = vld [vmem:[#allocation2 + $0x3f0] sm:$0xff] }
 0x2ad   :  { %2595 = vmatmul.mubr.bf16.gmra.mrb[80].mxu0 %v10075_v26  ;;  %2821 = vmatmul.mubr.bf16.gmra.mrb[80].mxu1 %v10075_v26 }
 0x2ae   :  { %2878 = vmatpush1.bf16.msra.mxu0 %v8238_v19  ;;  %3104 = vmatpush1.bf16.msra.mxu1 %v8240_v43  ;;  %v8273_v19 = vcombine.high %v972_v38, %v976_v14  ;;  %v979_v43 = vld [vmem:[#allocation2 + $0x350] sm:$0xff] }
 0x2af   :  { %2604 = vmatprep.mubr.bf16.mxu0 %v10133_v25  ;;  %2830 = vmatprep.mubr.bf16.mxu1 %v10133_v25  ;;  %v8278_v42 = vcombine.low %v979_v43, %v983_v30 }
 0x2b0   :  { %2879 = vmatprep.subr.bf16.mxu0 %v8247_v4  ;;  %3105 = vmatprep.subr.bf16.mxu1 %v8249_v16  ;;  %v980_v4 = vld [vmem:[#allocation2 + $0x358] sm:$0xff] }
 0x2b1   :  { %v984_v16 = vld [vmem:[#allocation2 + $0x378] sm:$0xff] }
 0x2b2   :  { %2880 = vmatpush1.bf16.msra.mxu0 %v8246_v39  ;;  %3106 = vmatpush1.bf16.msra.mxu1 %v8248_v37  ;;  %v8279_v39 = vcombine.high %v979_v43, %v983_v30  ;;  %v8281_v37 = vcombine.high %v980_v4, %v984_v16  ;;  %v8280_v1 = vcombine.low %v980_v4, %v984_v16  ;;  %v1008_v43 = vld [vmem:[#allocation2 + $0x438] sm:$0xff] }
 0x2b3   :  { %2881 = vmatprep.subr.bf16.mxu0 %v8255_v35  ;;  %3107 = vmatprep.subr.bf16.mxu1 %v8257_v44  ;;  %v991_v35 = vld [vmem:[#allocation2 + $0x3b0] sm:$0xff]  ;;  %v988_v44 = vld [vmem:[#allocation2 + $0x398] sm:$0xff] }
 0x2b4   :  { %v8287_v28 = vcombine.high %v987_v13, %v991_v35  ;;  %v8286_v22 = vcombine.low %v987_v13, %v991_v35  ;;  %v8288_v38 = vcombine.low %v988_v44, %v992_v45  ;;  %v1015_v13 = vld [vmem:[#allocation2 + $0x470] sm:$0xff] }
 0x2b5   :  { %2605 = vmatmul.mubr.bf16.gmra.mrb[84].mxu0 %v10127_v40  ;;  %2831 = vmatmul.mubr.bf16.gmra.mrb[84].mxu1 %v10127_v40 }
 0x2b6   :  { %2882 = vmatpush1.bf16.msra.mxu0 %v8254_v47  ;;  %3108 = vmatpush1.bf16.msra.mxu1 %v8256_v18  ;;  %v8289_v47 = vcombine.high %v988_v44, %v992_v45  ;;  %v995_v18 = vld [vmem:[#allocation2 + $0x3d0] sm:$0xff] }
 0x2b7   :  { %2614 = vmatprep.mubr.bf16.mxu0 %v10171_v31  ;;  %2840 = vmatprep.mubr.bf16.mxu1 %v10171_v31  ;;  %v8295_v14 = vcombine.high %v995_v18, %v999_v17  ;;  %v8294_v30 = vcombine.low %v995_v18, %v999_v17 }
 0x2b8   :  { %2883 = vmatprep.subr.bf16.mxu0 %v8263_v48  ;;  %3109 = vmatprep.subr.bf16.mxu1 %v8265_v59  ;;  %v996_v48 = vld [vmem:[#allocation2 + $0x3d8] sm:$0xff] }
 0x2b9   :  { %v1000_v59 = vld [vmem:[#allocation2 + $0x3f8] sm:$0xff] }
 0x2ba   :  { %2884 = vmatpush1.bf16.msra.mxu0 %v8262_v20  ;;  %3110 = vmatpush1.bf16.msra.mxu1 %v8264_v54  ;;  %v8297_v20 = vcombine.high %v996_v48, %v1000_v59  ;;  %v1003_v54 = vld [vmem:[#allocation2 + $0x410] sm:$0xff]  ;;  %v8296_v4 = vcombine.low %v996_v48, %v1000_v59 }
 0x2bb   :  { %2885 = vmatprep.subr.bf16.mxu0 %v8271_v23  ;;  %3111 = vmatprep.subr.bf16.mxu1 %v8273_v19  ;;  %v1007_v23 = vld [vmem:[#allocation2 + $0x430] sm:$0xff]  ;;  %v1004_v19 = vld [vmem:[#allocation2 + $0x418] sm:$0xff] }
 0x2bc   :  { %v8303_v16 = vcombine.high %v1003_v54, %v1007_v23  ;;  %v8302_v35 = vcombine.low %v1003_v54, %v1007_v23  ;;  %v8304_v44 = vcombine.low %v1004_v19, %v1008_v43 }
 0x2bd   :  { %2615 = vmatmul.mubr.bf16.gmra.mrb[88].mxu0 %v10169_v10  ;;  %2841 = vmatmul.mubr.bf16.gmra.mrb[88].mxu1 %v10169_v10 }
 0x2be   :  { %2886 = vmatpush1.bf16.msra.mxu0 %v8270_v50  ;;  %3112 = vmatpush1.bf16.msra.mxu1 %v8272_v21  ;;  %v8305_v50 = vcombine.high %v1004_v19, %v1008_v43  ;;  %v1011_v21 = vld [vmem:[#allocation2 + $0x450] sm:$0xff] }
 0x2bf   :  { %2624 = vmatprep.mubr.bf16.mxu0 %v10191_v15  ;;  %2850 = vmatprep.mubr.bf16.mxu1 %v10191_v15  ;;  %v8311_v45 = vcombine.high %v1011_v21, %v1015_v13  ;;  %v8310_v18 = vcombine.low %v1011_v21, %v1015_v13  ;;  %v1035_v19 = vld [vmem:[#allocation2 + $0x510] sm:$0xff] }
 0x2c0   :  { %2887 = vmatprep.subr.bf16.mxu0 %v8279_v39  ;;  %3113 = vmatprep.subr.bf16.mxu1 %v8281_v37  ;;  %v1012_v39 = vld [vmem:[#allocation2 + $0x458] sm:$0xff]  ;;  %v1039_v43 = vld [vmem:[#allocation2 + $0x530] sm:$0xff] }
 0x2c1   :  { %v1016_v37 = vld [vmem:[#allocation2 + $0x478] sm:$0xff]  ;;  %v8335_v21 = vcombine.high %v1035_v19, %v1039_v43 }
 0x2c2   :  { %2888 = vmatpush1.bf16.msra.mxu0 %v8278_v42  ;;  %3114 = vmatpush1.bf16.msra.mxu1 %v8280_v1  ;;  %v8313_v42 = vcombine.high %v1012_v39, %v1016_v37  ;;  %v1023_v1 = vld [vmem:[#allocation2 + $0x4b0] sm:$0xff]  ;;  %v8312_v17 = vcombine.low %v1012_v39, %v1016_v37 }
 0x2c3   :  { %2889 = vmatprep.subr.bf16.mxu0 %v8287_v28  ;;  %3115 = vmatprep.subr.bf16.mxu1 %v8289_v47  ;;  %v1020_v28 = vld [vmem:[#allocation2 + $0x498] sm:$0xff]  ;;  %v1043_v39 = vld [vmem:[#allocation2 + $0x550] sm:$0xff] }
 0x2c4   :  { %v1024_v47 = vld [vmem:[#allocation2 + $0x4b8] sm:$0xff]  ;;  %v1047_v37 = vld [vmem:[#allocation2 + $0x570] sm:$0xff] }
 0x2c5   :  { %2625 = vmatmul.mubr.bf16.gmra.mrb[92].mxu0 %v10188_v63  ;;  %2851 = vmatmul.mubr.bf16.gmra.mrb[92].mxu1 %v10188_v63  ;;  %v8321_v59 = vcombine.high %v1020_v28, %v1024_v47  ;;  %v8320_v54 = vcombine.low %v1020_v28, %v1024_v47  ;;  %v1052_v28 = vld [vmem:[#allocation2 + $0x598] sm:$0xff] }
 0x2c6   :  { %2890 = vmatpush1.bf16.msra.mxu0 %v8286_v22  ;;  %2893 = vmatprep.mubr.bf16.mxu0 %v9834_v55  ;;  %v1027_v22 = vld [vmem:[#allocation2 + $0x4d0] sm:$0xff]  ;;  %v1056_v47 = vld [vmem:[#allocation2 + $0x5b8] sm:$0xff] }
 0x2c7   :  { %3116 = vmatpush1.bf16.msra.mxu1 %v8288_v38  ;;  %3119 = vmatprep.mubr.bf16.mxu1 %v9834_v55  ;;  %v1019_v55 = vld [vmem:[#allocation2 + $0x490] sm:$0xff] }
 0x2c8   :  { %2891 = vmatprep.subr.bf16.mxu0 %v8295_v14  ;;  %3117 = vmatprep.subr.bf16.mxu1 %v8297_v20  ;;  %v8319_v48 = vcombine.high %v1019_v55, %v1023_v1  ;;  %v1031_v38 = vld [vmem:[#allocation2 + $0x4f0] sm:$0xff]  ;;  %v1028_v14 = vld [vmem:[#allocation2 + $0x4d8] sm:$0xff] }
 0x2c9   :  { %v1032_v20 = vld [vmem:[#allocation2 + $0x4f8] sm:$0xff]  ;;  %v8327_v23 = vcombine.high %v1027_v22, %v1031_v38 }
 0x2ca   :  { %2892 = vmatpush1.bf16.msra.mxu0 %v8294_v30  ;;  %v1036_v30 = vld [vmem:[#allocation2 + $0x518] sm:$0xff] }
 0x2cb   :  { %3118 = vmatpush1.bf16.msra.mxu1 %v8296_v4  ;;  %2974 = vmatprep.subr.bf16.mxu0 %v8303_v16  ;;  %v1040_v4 = vld [vmem:[#allocation2 + $0x538] sm:$0xff]  ;;  %v8326_v16 = vcombine.low %v1027_v22, %v1031_v38  ;;  %v1059_v22 = vld [vmem:[#allocation2 + $0x5d0] sm:$0xff] }
 0x2cc   :  { %3200 = vmatprep.subr.bf16.mxu1 %v8305_v50  ;;  %v8328_v50 = vcombine.low %v1028_v14, %v1032_v20  ;;  %v8337_v13 = vcombine.high %v1036_v30, %v1040_v4  ;;  %v1063_v38 = vld [vmem:[#allocation2 + $0x5f0] sm:$0xff] }
 0x2cd   :  { %2894 = vmatmul.mubr.bf16.vlgmr.msra.gmra.mrb[96].mxu0 %v9831_v52 }
 0x2ce   :  { %3120 = vmatmul.mubr.bf16.vlgmr.msra.gmra.mrb[96].mxu1 %v9831_v52  ;;  %2903 = vmatprep.mubr.bf16.mxu0 %v9882_v58  ;;  %v8318_v52 = vcombine.low %v1019_v55, %v1023_v1  ;;  %v1051_v55 = vld [vmem:[#allocation2 + $0x590] sm:$0xff] }
 0x2cf   :  { %2975 = vmatpush1.bf16.msra.mxu0 %v8302_v35  ;;  %3129 = vmatprep.mubr.bf16.mxu1 %v9882_v58  ;;  %v8329_v58 = vcombine.high %v1028_v14, %v1032_v20  ;;  %v1044_v35 = vld [vmem:[#allocation2 + $0x558] sm:$0xff]  ;;  %v1055_v1 = vld [vmem:[#allocation2 + $0x5b0] sm:$0xff] }
 0x2d0   :  { %3201 = vmatpush1.bf16.msra.mxu1 %v8304_v44  ;;  %2976 = vmatprep.subr.bf16.mxu0 %v8311_v45  ;;  %v1048_v44 = vld [vmem:[#allocation2 + $0x578] sm:$0xff]  ;;  %v8336_v45 = vcombine.low %v1036_v30, %v1040_v4  ;;  %v8358_v30 = vcombine.low %v1059_v22, %v1063_v38 }
 0x2d1   :  { %3202 = vmatprep.subr.bf16.mxu1 %v8313_v42  ;;  %v8343_v42 = vcombine.high %v1043_v39, %v1047_v37  ;;  %v1060_v14 = vld [vmem:[#allocation2 + $0x5d8] sm:$0xff] }
 0x2d2   :  { %v1064_v20 = vld [vmem:[#allocation2 + $0x5f8] sm:$0xff] }
 0x2d3   :  { %2977 = vmatpush1.bf16.msra.mxu0 %v8310_v18  ;;  %v8342_v18 = vcombine.low %v1043_v39, %v1047_v37  ;;  %v8360_v4 = vcombine.low %v1060_v14, %v1064_v20  ;;  %v1076_v39 = vld [vmem:[#allocation2 + $0x658] sm:$0xff] }
 0x2d4   :  { %3203 = vmatpush1.bf16.msra.mxu1 %v8312_v17  ;;  %2978 = vmatprep.subr.bf16.mxu0 %v8319_v48  ;;  %v8344_v17 = vcombine.low %v1044_v35, %v1048_v44  ;;  %v8351_v48 = vcombine.high %v1051_v55, %v1055_v1  ;;  %v1080_v37 = vld [vmem:[#allocation2 + $0x678] sm:$0xff] }
 0x2d5   :  { %2904 = vmatmul.mubr.bf16.gmra.mrb[100].mxu0 %v9875_v51  ;;  %3204 = vmatprep.subr.bf16.mxu1 %v8321_v59  ;;  %v8353_v59 = vcombine.high %v1052_v28, %v1056_v47 }
 0x2d6   :  { %3130 = vmatmul.mubr.bf16.gmra.mrb[100].mxu1 %v9875_v51  ;;  %2913 = vmatprep.mubr.bf16.mxu0 %v9934_v0  ;;  %v8334_v51 = vcombine.low %v1035_v19, %v1039_v43  ;;  %v1068_v19 = vld [vmem:[#allocation2 + $0x618] sm:$0xff] }
 0x2d7   :  { %2979 = vmatpush1.bf16.msra.mxu0 %v8318_v52  ;;  %3139 = vmatprep.mubr.bf16.mxu1 %v9934_v0  ;;  %v8345_v0 = vcombine.high %v1044_v35, %v1048_v44  ;;  %v8352_v52 = vcombine.low %v1052_v28, %v1056_v47  ;;  %v1072_v43 = vld [vmem:[#allocation2 + $0x638] sm:$0xff] }
 0x2d8   :  { %3205 = vmatpush1.bf16.msra.mxu1 %v8320_v54  ;;  %2980 = vmatprep.subr.bf16.mxu0 %v8327_v23  ;;  %v8359_v54 = vcombine.high %v1059_v22, %v1063_v38  ;;  %v1067_v23 = vld [vmem:[#allocation2 + $0x610] sm:$0xff]  ;;  %v8368_v35 = vcombine.low %v1068_v19, %v1072_v43 }
 0x2d9   :  { %3206 = vmatprep.subr.bf16.mxu1 %v8329_v58  ;;  %v1071_v58 = vld [vmem:[#allocation2 + $0x630] sm:$0xff] }
 0x2db   :  { %2981 = vmatpush1.bf16.msra.mxu0 %v8326_v16  ;;  %v8367_v16 = vcombine.high %v1067_v23, %v1071_v58 }
 0x2dc   :  { %3207 = vmatpush1.bf16.msra.mxu1 %v8328_v50  ;;  %2982 = vmatprep.subr.bf16.mxu0 %v8335_v21  ;;  %v8369_v50 = vcombine.high %v1068_v19, %v1072_v43  ;;  %v1075_v21 = vld [vmem:[#allocation2 + $0x650] sm:$0xff] }
 0x2dd   :  { %2914 = vmatmul.mubr.bf16.gmra.mrb[104].mxu0 %v9927_v60  ;;  %3208 = vmatprep.subr.bf16.mxu1 %v8337_v13  ;;  %v1079_v13 = vld [vmem:[#allocation2 + $0x670] sm:$0xff] }
 0x2de   :  { %3140 = vmatmul.mubr.bf16.gmra.mrb[104].mxu1 %v9927_v60  ;;  %2923 = vmatprep.mubr.bf16.mxu0 %v9986_v36  ;;  %v8350_v60 = vcombine.low %v1051_v55, %v1055_v1  ;;  %v8375_v44 = vcombine.high %v1075_v21, %v1079_v13  ;;  %v8374_v55 = vcombine.low %v1075_v21, %v1079_v13  ;;  %v1107_v19 = vld [vmem:[#allocation2 + $0x750] sm:$0xff] }
 0x2df   :  { %2983 = vmatpush1.bf16.msra.mxu0 %v8334_v51  ;;  %3149 = vmatprep.mubr.bf16.mxu1 %v9986_v36  ;;  %v8361_v36 = vcombine.high %v1060_v14, %v1064_v20  ;;  %v1083_v51 = vld [vmem:[#allocation2 + $0x690] sm:$0xff]  ;;  %v8376_v1 = vcombine.low %v1076_v39, %v1080_v37 }
 0x2e0   :  { %3209 = vmatpush1.bf16.msra.mxu1 %v8336_v45  ;;  %2984 = vmatprep.subr.bf16.mxu0 %v8343_v42  ;;  %v1087_v45 = vld [vmem:[#allocation2 + $0x6b0] sm:$0xff]  ;;  %v1084_v42 = vld [vmem:[#allocation2 + $0x698] sm:$0xff] }
 0x2e1   :  { %3210 = vmatprep.subr.bf16.mxu1 %v8345_v0  ;;  %v1088_v0 = vld [vmem:[#allocation2 + $0x6b8] sm:$0xff]  ;;  %v8383_v28 = vcombine.high %v1083_v51, %v1087_v45  ;;  %v1099_v14 = vld [vmem:[#allocation2 + $0x710] sm:$0xff] }
 0x2e2   :  { %v8385_v47 = vcombine.high %v1084_v42, %v1088_v0  ;;  %v8384_v22 = vcombine.low %v1084_v42, %v1088_v0  ;;  %v1103_v20 = vld [vmem:[#allocation2 + $0x730] sm:$0xff]  ;;  %v1124_v42 = vld [vmem:[#allocation2 + $0x7d8] sm:$0xff] }
 0x2e3   :  { %2985 = vmatpush1.bf16.msra.mxu0 %v8342_v18  ;;  %v1091_v18 = vld [vmem:[#allocation2 + $0x6d0] sm:$0xff]  ;;  %v1128_v0 = vld [vmem:[#allocation2 + $0x7f8] sm:$0xff] }
 0x2e4   :  { %3211 = vmatpush1.bf16.msra.mxu1 %v8344_v17  ;;  %2986 = vmatprep.subr.bf16.mxu0 %v8351_v48  ;;  %v1095_v17 = vld [vmem:[#allocation2 + $0x6f0] sm:$0xff]  ;;  %v1092_v48 = vld [vmem:[#allocation2 + $0x6d8] sm:$0xff] }
 0x2e5   :  { %2924 = vmatmul.mubr.bf16.gmra.mrb[108].mxu0 %v9979_v7  ;;  %3212 = vmatprep.subr.bf16.mxu1 %v8353_v59  ;;  %v1096_v59 = vld [vmem:[#allocation2 + $0x6f8] sm:$0xff]  ;;  %v8391_v38 = vcombine.high %v1091_v18, %v1095_v17  ;;  %v1111_v43 = vld [vmem:[#allocation2 + $0x770] sm:$0xff] }
 0x2e6   :  { %3150 = vmatmul.mubr.bf16.gmra.mrb[108].mxu1 %v9979_v7  ;;  %2933 = vmatprep.mubr.bf16.mxu0 %v10038_v56  ;;  %v8366_v7 = vcombine.low %v1067_v23, %v1071_v58  ;;  %v8399_v23 = vcombine.high %v1099_v14, %v1103_v20  ;;  %v1115_v21 = vld [vmem:[#allocation2 + $0x790] sm:$0xff] }
 0x2e7   :  { %2987 = vmatpush1.bf16.msra.mxu0 %v8350_v60  ;;  %3159 = vmatprep.mubr.bf16.mxu1 %v10038_v56  ;;  %v8377_v56 = vcombine.high %v1076_v39, %v1080_v37  ;;  %v1100_v60 = vld [vmem:[#allocation2 + $0x718] sm:$0xff]  ;;  %v1119_v13 = vld [vmem:[#allocation2 + $0x7b0] sm:$0xff] }
 0x2e8   :  { %3213 = vmatpush1.bf16.msra.mxu1 %v8352_v52  ;;  %2988 = vmatprep.subr.bf16.mxu0 %v8359_v54  ;;  %v1104_v52 = vld [vmem:[#allocation2 + $0x738] sm:$0xff]  ;;  %v8390_v54 = vcombine.low %v1091_v18, %v1095_v17 }
 0x2e9   :  { %3214 = vmatprep.subr.bf16.mxu1 %v8361_v36  ;;  %v8392_v36 = vcombine.low %v1092_v48, %v1096_v59  ;;  %v8401_v58 = vcombine.high %v1100_v60, %v1104_v52  ;;  %v1116_v39 = vld [vmem:[#allocation2 + $0x798] sm:$0xff] }
 0x2ea   :  { %v1120_v37 = vld [vmem:[#allocation2 + $0x7b8] sm:$0xff] }
 0x2eb   :  { %2989 = vmatpush1.bf16.msra.mxu0 %v8358_v30  ;;  %v1108_v30 = vld [vmem:[#allocation2 + $0x758] sm:$0xff] }
 0x2ec   :  { %3215 = vmatpush1.bf16.msra.mxu1 %v8360_v4  ;;  %2990 = vmatprep.subr.bf16.mxu0 %v8367_v16  ;;  %v1112_v4 = vld [vmem:[#allocation2 + $0x778] sm:$0xff]  ;;  %v8400_v16 = vcombine.low %v1100_v60, %v1104_v52 }
 0x2ed   :  { %2934 = vmatmul.mubr.bf16.gmra.mrb[112].mxu0 %v10031_v41  ;;  %3216 = vmatprep.subr.bf16.mxu1 %v8369_v50  ;;  %v8407_v50 = vcombine.high %v1107_v19, %v1111_v43 }
 0x2ee   :  { %3160 = vmatmul.mubr.bf16.gmra.mrb[112].mxu1 %v10031_v41  ;;  %2943 = vmatprep.mubr.bf16.mxu0 %v10090_v34  ;;  %v8382_v41 = vcombine.low %v1083_v51, %v1087_v45  ;;  %v1123_v51 = vld [vmem:[#allocation2 + $0x7d0] sm:$0xff] }
 0x2ef   :  { %2991 = vmatpush1.bf16.msra.mxu0 %v8366_v7  ;;  %3169 = vmatprep.mubr.bf16.mxu1 %v10090_v34  ;;  %v8393_v34 = vcombine.high %v1092_v48, %v1096_v59  ;;  %v8406_v7 = vcombine.low %v1107_v19, %v1111_v43  ;;  %v1127_v45 = vld [vmem:[#allocation2 + $0x7f0] sm:$0xff] }
 0x2f0   :  { %3217 = vmatpush1.bf16.msra.mxu1 %v8368_v35  ;;  %2992 = vmatprep.subr.bf16.mxu0 %v8375_v44  ;;  %v8408_v35 = vcombine.low %v1108_v30, %v1112_v4  ;;  %v8415_v44 = vcombine.high %v1115_v21, %v1119_v13 }
 0x2f1   :  { %3218 = vmatprep.subr.bf16.mxu1 %v8377_v56  ;;  %v8417_v56 = vcombine.high %v1116_v39, %v1120_v37 }
 0x2f3   :  { %2993 = vmatpush1.bf16.msra.mxu0 %v8374_v55  ;;  %v8416_v55 = vcombine.low %v1116_v39, %v1120_v37 }
 0x2f4   :  { %3219 = vmatpush1.bf16.msra.mxu1 %v8376_v1  ;;  %2994 = vmatprep.subr.bf16.mxu0 %v8383_v28  ;;  %v8423_v1 = vcombine.high %v1123_v51, %v1127_v45  ;;  %v8422_v28 = vcombine.low %v1123_v51, %v1127_v45 }
 0x2f5   :  { %2944 = vmatmul.mubr.bf16.gmra.mrb[116].mxu0 %v10083_v6  ;;  %3220 = vmatprep.subr.bf16.mxu1 %v8385_v47  ;;  %v8424_v47 = vcombine.low %v1124_v42, %v1128_v0 }
 0x2f6   :  { %3170 = vmatmul.mubr.bf16.gmra.mrb[116].mxu1 %v10083_v6  ;;  %2953 = vmatprep.mubr.bf16.mxu0 %v10142_v62  ;;  %v8398_v6 = vcombine.low %v1099_v14, %v1103_v20 }
 0x2f7   :  { %2995 = vmatpush1.bf16.msra.mxu0 %v8382_v41  ;;  %3179 = vmatprep.mubr.bf16.mxu1 %v10142_v62  ;;  %v8409_v62 = vcombine.high %v1108_v30, %v1112_v4 }
 0x2f8   :  { %3221 = vmatpush1.bf16.msra.mxu1 %v8384_v22  ;;  %2996 = vmatprep.subr.bf16.mxu0 %v8391_v38 }
 0x2f9   :  { %3222 = vmatprep.subr.bf16.mxu1 %v8393_v34 }
 0x2fb   :  { %2997 = vmatpush1.bf16.msra.mxu0 %v8390_v54 }
 0x2fc   :  { %3223 = vmatpush1.bf16.msra.mxu1 %v8392_v36  ;;  %2998 = vmatprep.subr.bf16.mxu0 %v8399_v23 }
 0x2fd   :  { %2954 = vmatmul.mubr.bf16.gmra.mrb[120].mxu0 %v10135_v24  ;;  %3224 = vmatprep.subr.bf16.mxu1 %v8401_v58 }
 0x2fe   :  { %3180 = vmatmul.mubr.bf16.gmra.mrb[120].mxu1 %v10135_v24  ;;  %2963 = vmatprep.mubr.bf16.mxu0 %v10178_v12  ;;  %v8414_v24 = vcombine.low %v1115_v21, %v1119_v13 }
 0x2ff   :  { %2999 = vmatpush1.bf16.msra.mxu0 %v8398_v6  ;;  %3189 = vmatprep.mubr.bf16.mxu1 %v10178_v12  ;;  %v8425_v12 = vcombine.high %v1124_v42, %v1128_v0 }
 0x300   :  { %3225 = vmatpush1.bf16.msra.mxu1 %v8400_v16  ;;  %3000 = vmatprep.subr.bf16.mxu0 %v8407_v50 }
 0x301   :  { %3226 = vmatprep.subr.bf16.mxu1 %v8409_v62 }
 0x303   :  { %3001 = vmatpush1.bf16.msra.mxu0 %v8406_v7 }
 0x304   :  { %3227 = vmatpush1.bf16.msra.mxu1 %v8408_v35  ;;  %3002 = vmatprep.subr.bf16.mxu0 %v8415_v44 }
 0x305   :  { %2964 = vmatmul.mubr.bf16.gmra.mrb[124].mxu0 %v10173_v3  ;;  %3228 = vmatprep.subr.bf16.mxu1 %v8417_v56 }
 0x306   :  { %3190 = vmatmul.mubr.bf16.gmra.mrb[124].mxu1 %v10173_v3  ;;  %3006 = vmatprep.mubr.bf16.mxu0 %v9873_v49 }
 0x307   :  { %3003 = vmatpush1.bf16.msra.mxu0 %v8414_v24  ;;  %3232 = vmatprep.mubr.bf16.mxu1 %v9873_v49 }
 0x308   :  { %3229 = vmatpush1.bf16.msra.mxu1 %v8416_v55  ;;  %3004 = vmatprep.subr.bf16.mxu0 %v8423_v1 }
 0x309   :  { %3230 = vmatprep.subr.bf16.mxu1 %v8425_v12 }
 0x30b   :  { %3005 = vmatpush1.bf16.msra.mxu0 %v8422_v28 }
 0x30c   :  { %3231 = vmatpush1.bf16.msra.mxu1 %v8424_v47 }
 0x30e   :  { %3007 = vmatmul.mubr.bf16.vlgmr.msra.gmra.mrb[96].mxu0 %v9867_v46 }
 0x30f   :  { %3233 = vmatmul.mubr.bf16.vlgmr.msra.gmra.mrb[96].mxu1 %v9867_v46  ;;  %3016 = vmatprep.mubr.bf16.mxu0 %v9925_v57  ;;  %v12842_v46 = vmov 0  }
 0x310   :  { %3242 = vmatprep.mubr.bf16.mxu1 %v9925_v57 }
 0x316   :  { %3017 = vmatmul.mubr.bf16.gmra.mrb[100].mxu0 %v9919_v53 }
 0x317   :  { %3243 = vmatmul.mubr.bf16.gmra.mrb[100].mxu1 %v9919_v53  ;;  %3026 = vmatprep.mubr.bf16.mxu0 %v9977_v2 }
 0x318   :  { %3252 = vmatprep.mubr.bf16.mxu1 %v9977_v2 }
 0x31e   :  { %3027 = vmatmul.mubr.bf16.gmra.mrb[104].mxu0 %v9971_v61 }
 0x31f   :  { %3253 = vmatmul.mubr.bf16.gmra.mrb[104].mxu1 %v9971_v61  ;;  %3036 = vmatprep.mubr.bf16.mxu0 %v10029_v8 }
 0x320   :  { %3262 = vmatprep.mubr.bf16.mxu1 %v10029_v8 }
 0x326   :  { %3037 = vmatmul.mubr.bf16.gmra.mrb[108].mxu0 %v10023_v5 }
 0x327   :  { %3263 = vmatmul.mubr.bf16.gmra.mrb[108].mxu1 %v10023_v5  ;;  %3046 = vmatprep.mubr.bf16.mxu0 %v10081_v11 }
 0x328   :  { %3272 = vmatprep.mubr.bf16.mxu1 %v10081_v11 }
 0x32e   :  { %3047 = vmatmul.mubr.bf16.gmra.mrb[112].mxu0 %v10075_v26 }
 0x32f   :  { %3273 = vmatmul.mubr.bf16.gmra.mrb[112].mxu1 %v10075_v26  ;;  %3056 = vmatprep.mubr.bf16.mxu0 %v10133_v25 }
 0x330   :  { %3282 = vmatprep.mubr.bf16.mxu1 %v10133_v25 }
 0x336   :  { %3057 = vmatmul.mubr.bf16.gmra.mrb[116].mxu0 %v10127_v40 }
 0x337   :  { %3283 = vmatmul.mubr.bf16.gmra.mrb[116].mxu1 %v10127_v40  ;;  %3066 = vmatprep.mubr.bf16.mxu0 %v10171_v31 }
 0x338   :  { %3292 = vmatprep.mubr.bf16.mxu1 %v10171_v31 }
 0x33e   :  { %3067 = vmatmul.mubr.bf16.gmra.mrb[120].mxu0 %v10169_v10 }
 0x33f   :  { %3293 = vmatmul.mubr.bf16.gmra.mrb[120].mxu1 %v10169_v10  ;;  %3076 = vmatprep.mubr.bf16.mxu0 %v10191_v15 }
 0x340   :  { %3302 = vmatprep.mubr.bf16.mxu1 %v10191_v15 }
 0x346   :  { %3077 = vmatmul.mubr.bf16.gmra.mrb[124].mxu0 %v10188_v63 }
 0x347   :  { %3303 = vmatmul.mubr.bf16.gmra.mrb[124].mxu1 %v10188_v63  ;;  %3450 = vmatprep.mubr.bf16.mxu0 %v12842_v46 }
 0x348   :  { %3563 = vmatprep.mubr.bf16.mxu1 %v12842_v46 }
 0x360   :  { %v2556_v49 = vpop.f32.mrb[64].mxu0  ;;  %v2782_v53 = vpop.f32.mrb[64].mxu1 }
 0x361   :  { %v2558_v57 = vpop.f32.mrb[65].mxu0  ;;  %v2784_v61 = vpop.f32.mrb[65].mxu1 }
 0x362   :  { %v2560_v2 = vpop.f32.mrb[66].mxu0  ;;  %v2786_v5 = vpop.f32.mrb[66].mxu1 }
 0x363   :  { %v3313_v8 = vpack.c.bf16 %v2560_v2, %v2556_v49  ;;  %v3315_v10 = vpack.c.bf16 %v2786_v5, %v2782_v53  ;;  %v2562_v26 = vpop.f32.mrb[67].mxu0  ;;  %v2788_v11 = vpop.f32.mrb[67].mxu1 }
 0x364   :  { %v3314_v40 = vpack.c.bf16 %v2562_v26, %v2558_v57  ;;  %v3316_v25 = vpack.c.bf16 %v2788_v11, %v2784_v61 }
 0x366   :  { %3418 = vmatprep.subr.bf16.mxu0 %v3314_v40  ;;  %3531 = vmatprep.subr.bf16.mxu1 %v3316_v25 }
 0x367   :  { %3419 = vmatpush1.bf16.msra.mxu0 %v3313_v8  ;;  %3532 = vmatpush1.bf16.msra.mxu1 %v3315_v10 }
 0x368   :  { %v2566_v31 = vpop.f32.mrb[68].mxu0  ;;  %v2792_v3 = vpop.f32.mrb[68].mxu1 }
 0x369   :  { %v2568_v63 = vpop.f32.mrb[69].mxu0  ;;  %v2794_v15 = vpop.f32.mrb[69].mxu1 }
 0x36a   :  { %v2570_v18 = vpop.f32.mrb[70].mxu0  ;;  %v2796_v17 = vpop.f32.mrb[70].mxu1 }
 0x36b   :  { %v3321_v48 = vpack.c.bf16 %v2570_v18, %v2566_v31  ;;  %v3323_v59 = vpack.c.bf16 %v2796_v17, %v2792_v3  ;;  %v2572_v41 = vpop.f32.mrb[71].mxu0  ;;  %v2798_v22 = vpop.f32.mrb[71].mxu1 }
 0x36c   :  { %v3322_v38 = vpack.c.bf16 %v2572_v41, %v2568_v63  ;;  %v3324_v34 = vpack.c.bf16 %v2798_v22, %v2794_v15 }
 0x36e   :  { %3420 = vmatprep.subr.bf16.mxu0 %v3322_v38  ;;  %3533 = vmatprep.subr.bf16.mxu1 %v3324_v34 }
 0x36f   :  { %3421 = vmatpush1.bf16.msra.mxu0 %v3321_v48  ;;  %3534 = vmatpush1.bf16.msra.mxu1 %v3323_v59 }
 0x370   :  { %v2576_v14 = vpop.f32.mrb[72].mxu0  ;;  %v2802_v20 = vpop.f32.mrb[72].mxu1 }
 0x371   :  { %v2578_v60 = vpop.f32.mrb[73].mxu0  ;;  %v2804_v52 = vpop.f32.mrb[73].mxu1 }
 0x372   :  { %v2580_v54 = vpop.f32.mrb[74].mxu0  ;;  %v2806_v36 = vpop.f32.mrb[74].mxu1 }
 0x373   :  { %v3329_v23 = vpack.c.bf16 %v2580_v54, %v2576_v14  ;;  %v3331_v58 = vpack.c.bf16 %v2806_v36, %v2802_v20  ;;  %v2582_v19 = vpop.f32.mrb[75].mxu0  ;;  %v2808_v43 = vpop.f32.mrb[75].mxu1 }
 0x374   :  { %v3330_v30 = vpack.c.bf16 %v2582_v19, %v2578_v60  ;;  %v3332_v4 = vpack.c.bf16 %v2808_v43, %v2804_v52 }
 0x376   :  { %3422 = vmatprep.subr.bf16.mxu0 %v3330_v30  ;;  %3535 = vmatprep.subr.bf16.mxu1 %v3332_v4 }
 0x377   :  { %3423 = vmatpush1.bf16.msra.mxu0 %v3329_v23  ;;  %3536 = vmatpush1.bf16.msra.mxu1 %v3331_v58 }
 0x378   :  { %v2586_v6 = vpop.f32.mrb[76].mxu0  ;;  %v2812_v16 = vpop.f32.mrb[76].mxu1 }
 0x379   :  { %v2588_v50 = vpop.f32.mrb[77].mxu0  ;;  %v2814_v62 = vpop.f32.mrb[77].mxu1 }
 0x37a   :  { %v2590_v21 = vpop.f32.mrb[78].mxu0  ;;  %v2816_v13 = vpop.f32.mrb[78].mxu1 }
 0x37b   :  { %v3337_v39 = vpack.c.bf16 %v2590_v21, %v2586_v6  ;;  %v3339_v37 = vpack.c.bf16 %v2816_v13, %v2812_v16  ;;  %v2592_v7 = vpop.f32.mrb[79].mxu0  ;;  %v2818_v35 = vpop.f32.mrb[79].mxu1  ;;  %v10310_v21 = vld [vmem:[%s12577_s1 + $0x10] sm:$0xff]   ;;  %v10319_v13 = vld [vmem:[%s12577_s1 + $0x18] sm:$0xff]  }
 0x37c   :  { %v3338_v44 = vpack.c.bf16 %v2592_v7, %v2588_v50  ;;  %v3340_v56 = vpack.c.bf16 %v2818_v35, %v2814_v62  ;;  %v10292_v50 = vld [vmem:[%s12577_s1] sm:$0xff]   ;;  %v10301_v62 = vld [vmem:[%s12577_s1 + $0x8] sm:$0xff]   ;;  %v10346_v7 = vld [vmem:[%s12577_s1 + $0x30] sm:$0xff]  }
 0x37d   :  { %v10355_v35 = vld [vmem:[%s12577_s1 + $0x38] sm:$0xff]  }
 0x37e   :  { %3424 = vmatprep.subr.bf16.mxu0 %v3338_v44  ;;  %3537 = vmatprep.subr.bf16.mxu1 %v3340_v56 }
 0x37f   :  { %3425 = vmatpush1.bf16.msra.mxu0 %v3337_v39  ;;  %3538 = vmatpush1.bf16.msra.mxu1 %v3339_v37  ;;  %v10328_v39 = vld [vmem:[%s12577_s1 + $0x20] sm:$0xff]   ;;  %v10337_v37 = vld [vmem:[%s12577_s1 + $0x28] sm:$0xff]  }
 0x380   :  { %v2596_v51 = vpop.f32.mrb[80].mxu0  ;;  %v2822_v45 = vpop.f32.mrb[80].mxu1 }
 0x381   :  { %v2598_v42 = vpop.f32.mrb[81].mxu0  ;;  %v2824_v0 = vpop.f32.mrb[81].mxu1 }
 0x382   :  { %v2600_v24 = vpop.f32.mrb[82].mxu0  ;;  %v2826_v55 = vpop.f32.mrb[82].mxu1 }
 0x383   :  { %v3345_v1 = vpack.c.bf16 %v2600_v24, %v2596_v51  ;;  %v3347_v12 = vpack.c.bf16 %v2826_v55, %v2822_v45  ;;  %v2602_v28 = vpop.f32.mrb[83].mxu0  ;;  %v2828_v47 = vpop.f32.mrb[83].mxu1 }
 0x384   :  { %v3346_v49 = vpack.c.bf16 %v2602_v28, %v2598_v42  ;;  %v3348_v53 = vpack.c.bf16 %v2828_v47, %v2824_v0 }
 0x386   :  { %3426 = vmatprep.subr.bf16.mxu0 %v3346_v49  ;;  %3539 = vmatprep.subr.bf16.mxu1 %v3348_v53 }
 0x387   :  { %3427 = vmatpush1.bf16.msra.mxu0 %v3345_v1  ;;  %3540 = vmatpush1.bf16.msra.mxu1 %v3347_v12 }
 0x388   :  { %v2606_v57 = vpop.f32.mrb[84].mxu0  ;;  %v2832_v61 = vpop.f32.mrb[84].mxu1 }
 0x389   :  { %v2608_v2 = vpop.f32.mrb[85].mxu0  ;;  %v2834_v5 = vpop.f32.mrb[85].mxu1 }
 0x38a   :  { %v2610_v8 = vpop.f32.mrb[86].mxu0  ;;  %v2836_v10 = vpop.f32.mrb[86].mxu1 }
 0x38b   :  { %v3353_v26 = vpack.c.bf16 %v2610_v8, %v2606_v57  ;;  %v3355_v11 = vpack.c.bf16 %v2836_v10, %v2832_v61  ;;  %v2612_v40 = vpop.f32.mrb[87].mxu0  ;;  %v2838_v25 = vpop.f32.mrb[87].mxu1 }
 0x38c   :  { %v3354_v31 = vpack.c.bf16 %v2612_v40, %v2608_v2  ;;  %v3356_v3 = vpack.c.bf16 %v2838_v25, %v2834_v5 }
 0x38e   :  { %3428 = vmatprep.subr.bf16.mxu0 %v3354_v31  ;;  %3541 = vmatprep.subr.bf16.mxu1 %v3356_v3 }
 0x38f   :  { %3429 = vmatpush1.bf16.msra.mxu0 %v3353_v26  ;;  %3542 = vmatpush1.bf16.msra.mxu1 %v3355_v11 }
 0x390   :  { %v2616_v63 = vpop.f32.mrb[88].mxu0  ;;  %v2842_v15 = vpop.f32.mrb[88].mxu1 }
 0x391   :  { %v2618_v18 = vpop.f32.mrb[89].mxu0  ;;  %v2844_v17 = vpop.f32.mrb[89].mxu1 }
 0x392   :  { %v2620_v48 = vpop.f32.mrb[90].mxu0  ;;  %v2846_v59 = vpop.f32.mrb[90].mxu1 }
 0x393   :  { %v3361_v41 = vpack.c.bf16 %v2620_v48, %v2616_v63  ;;  %v3363_v22 = vpack.c.bf16 %v2846_v59, %v2842_v15  ;;  %v2622_v38 = vpop.f32.mrb[91].mxu0  ;;  %v2848_v34 = vpop.f32.mrb[91].mxu1 }
 0x394   :  { %v3362_v14 = vpack.c.bf16 %v2622_v38, %v2618_v18  ;;  %v3364_v20 = vpack.c.bf16 %v2848_v34, %v2844_v17 }
 0x396   :  { %3430 = vmatprep.subr.bf16.mxu0 %v3362_v14  ;;  %3543 = vmatprep.subr.bf16.mxu1 %v3364_v20 }
 0x397   :  { %3431 = vmatpush1.bf16.msra.mxu0 %v3361_v41  ;;  %3544 = vmatpush1.bf16.msra.mxu1 %v3363_v22 }
 0x398   :  { %v2626_v60 = vpop.f32.mrb[92].mxu0  ;;  %v2852_v52 = vpop.f32.mrb[92].mxu1 }
 0x399   :  { %v2628_v54 = vpop.f32.mrb[93].mxu0  ;;  %v2854_v36 = vpop.f32.mrb[93].mxu1 }
 0x39a   :  { %v2630_v23 = vpop.f32.mrb[94].mxu0  ;;  %v2856_v58 = vpop.f32.mrb[94].mxu1 }
 0x39b   :  { %v3369_v19 = vpack.c.bf16 %v2630_v23, %v2626_v60  ;;  %v3371_v43 = vpack.c.bf16 %v2856_v58, %v2852_v52  ;;  %v2632_v30 = vpop.f32.mrb[95].mxu0  ;;  %v2858_v4 = vpop.f32.mrb[95].mxu1 }
 0x39c   :  { %v3370_v6 = vpack.c.bf16 %v2632_v30, %v2628_v54  ;;  %v3372_v16 = vpack.c.bf16 %v2858_v4, %v2854_v36 }
 0x39e   :  { %3432 = vmatprep.subr.bf16.mxu0 %v3370_v6  ;;  %3545 = vmatprep.subr.bf16.mxu1 %v3372_v16 }
 0x39f   :  { %3433 = vmatpush1.bf16.msra.mxu0 %v3369_v19  ;;  %3546 = vmatpush1.bf16.msra.mxu1 %v3371_v43 }
 0x3a2   :  { %3451 = vmatmul.mubr.bf16.vlgmr.msra.gmra.mrb[128].mxu0 %v10292_v50  ;;  %3564 = vmatmul.mubr.bf16.vlgmr.msra.gmra.mrb[128].mxu1 %v10292_v50 }
 0x3a3   :  { %3460 = vmatprep.mubr.bf16.mxu0 %v12842_v46  ;;  %3573 = vmatprep.mubr.bf16.mxu1 %v12842_v46 }
 0x3aa   :  { %3461 = vmatmul.mubr.bf16.gmra.mrb[132].mxu0 %v10301_v62  ;;  %3574 = vmatmul.mubr.bf16.gmra.mrb[132].mxu1 %v10301_v62 }
 0x3ab   :  { %3470 = vmatprep.mubr.bf16.mxu0 %v12842_v46  ;;  %3583 = vmatprep.mubr.bf16.mxu1 %v12842_v46 }
 0x3b2   :  { %3471 = vmatmul.mubr.bf16.gmra.mrb[136].mxu0 %v10310_v21  ;;  %3584 = vmatmul.mubr.bf16.gmra.mrb[136].mxu1 %v10310_v21 }
 0x3b3   :  { %3480 = vmatprep.mubr.bf16.mxu0 %v12842_v46  ;;  %3593 = vmatprep.mubr.bf16.mxu1 %v12842_v46 }
 0x3ba   :  { %3481 = vmatmul.mubr.bf16.gmra.mrb[140].mxu0 %v10319_v13  ;;  %3594 = vmatmul.mubr.bf16.gmra.mrb[140].mxu1 %v10319_v13 }
 0x3bb   :  { %3490 = vmatprep.mubr.bf16.mxu0 %v12842_v46  ;;  %3603 = vmatprep.mubr.bf16.mxu1 %v12842_v46 }
 0x3c2   :  { %3491 = vmatmul.mubr.bf16.gmra.mrb[144].mxu0 %v10328_v39  ;;  %3604 = vmatmul.mubr.bf16.gmra.mrb[144].mxu1 %v10328_v39 }
 0x3c3   :  { %3500 = vmatprep.mubr.bf16.mxu0 %v12842_v46  ;;  %3613 = vmatprep.mubr.bf16.mxu1 %v12842_v46 }
 0x3ca   :  { %3501 = vmatmul.mubr.bf16.gmra.mrb[148].mxu0 %v10337_v37  ;;  %3614 = vmatmul.mubr.bf16.gmra.mrb[148].mxu1 %v10337_v37 }
 0x3cb   :  { %3510 = vmatprep.mubr.bf16.mxu0 %v12842_v46  ;;  %3623 = vmatprep.mubr.bf16.mxu1 %v12842_v46 }
 0x3d2   :  { %3511 = vmatmul.mubr.bf16.gmra.mrb[152].mxu0 %v10346_v7  ;;  %3624 = vmatmul.mubr.bf16.gmra.mrb[152].mxu1 %v10346_v7 }
 0x3d3   :  { %3520 = vmatprep.mubr.bf16.mxu0 %v12842_v46  ;;  %3633 = vmatprep.mubr.bf16.mxu1 %v12842_v46 }
 0x3da   :  { %3521 = vmatmul.mubr.bf16.gmra.mrb[156].mxu0 %v10355_v35  ;;  %3634 = vmatmul.mubr.bf16.gmra.mrb[156].mxu1 %v10355_v35 }
 0x3db   :  { %3676 = vmatprep.mubr.bf16.mxu0 %v12842_v46  ;;  %3789 = vmatprep.mubr.bf16.mxu1 %v12842_v46 }
 0x3e1   :  { %v3008_v44 = vpop.f32.mrb[96].mxu0 }
 0x3e2   :  { %v3234_v56 = vpop.f32.mrb[96].mxu1  ;;  %v3010_v51 = vpop.f32.mrb[97].mxu0 }
 0x3e3   :  { %v3236_v45 = vpop.f32.mrb[97].mxu1  ;;  %v3012_v42 = vpop.f32.mrb[98].mxu0 }
 0x3e4   :  { %v3317_v0 = vpack.c.bf16 %v3012_v42, %v3008_v44  ;;  %v3238_v24 = vpop.f32.mrb[98].mxu1  ;;  %v3014_v55 = vpop.f32.mrb[99].mxu0 }
 0x3e5   :  { %v3319_v1 = vpack.c.bf16 %v3238_v24, %v3234_v56  ;;  %v3318_v12 = vpack.c.bf16 %v3014_v55, %v3010_v51  ;;  %v3240_v28 = vpop.f32.mrb[99].mxu1 }
 0x3e6   :  { %v3320_v47 = vpack.c.bf16 %v3240_v28, %v3236_v45 }
 0x3e7   :  { %3644 = vmatprep.subr.bf16.mxu0 %v3318_v12 }
 0x3e8   :  { %3757 = vmatprep.subr.bf16.mxu1 %v3320_v47  ;;  %3645 = vmatpush1.bf16.msra.mxu0 %v3317_v0 }
 0x3e9   :  { %3758 = vmatpush1.bf16.msra.mxu1 %v3319_v1  ;;  %v3018_v49 = vpop.f32.mrb[100].mxu0 }
 0x3ea   :  { %v3244_v53 = vpop.f32.mrb[100].mxu1  ;;  %v3020_v57 = vpop.f32.mrb[101].mxu0 }
 0x3eb   :  { %v3246_v61 = vpop.f32.mrb[101].mxu1  ;;  %v3022_v2 = vpop.f32.mrb[102].mxu0 }
 0x3ec   :  { %v3325_v5 = vpack.c.bf16 %v3022_v2, %v3018_v49  ;;  %v3248_v8 = vpop.f32.mrb[102].mxu1  ;;  %v3024_v10 = vpop.f32.mrb[103].mxu0 }
 0x3ed   :  { %v3327_v26 = vpack.c.bf16 %v3248_v8, %v3244_v53  ;;  %v3326_v11 = vpack.c.bf16 %v3024_v10, %v3020_v57  ;;  %v3250_v40 = vpop.f32.mrb[103].mxu1 }
 0x3ee   :  { %v3328_v25 = vpack.c.bf16 %v3250_v40, %v3246_v61 }
 0x3ef   :  { %3646 = vmatprep.subr.bf16.mxu0 %v3326_v11 }
 0x3f0   :  { %3759 = vmatprep.subr.bf16.mxu1 %v3328_v25  ;;  %3647 = vmatpush1.bf16.msra.mxu0 %v3325_v5 }
 0x3f1   :  { %3760 = vmatpush1.bf16.msra.mxu1 %v3327_v26  ;;  %v3028_v31 = vpop.f32.mrb[104].mxu0 }
 0x3f2   :  { %v3254_v3 = vpop.f32.mrb[104].mxu1  ;;  %v3030_v63 = vpop.f32.mrb[105].mxu0 }
 0x3f3   :  { %v3256_v15 = vpop.f32.mrb[105].mxu1  ;;  %v3032_v18 = vpop.f32.mrb[106].mxu0 }
 0x3f4   :  { %v3333_v17 = vpack.c.bf16 %v3032_v18, %v3028_v31  ;;  %v3258_v48 = vpop.f32.mrb[106].mxu1  ;;  %v3034_v59 = vpop.f32.mrb[107].mxu0 }
 0x3f5   :  { %v3335_v41 = vpack.c.bf16 %v3258_v48, %v3254_v3  ;;  %v3334_v22 = vpack.c.bf16 %v3034_v59, %v3030_v63  ;;  %v3260_v38 = vpop.f32.mrb[107].mxu1 }
 0x3f6   :  { %v3336_v34 = vpack.c.bf16 %v3260_v38, %v3256_v15 }
 0x3f7   :  { %3648 = vmatprep.subr.bf16.mxu0 %v3334_v22 }
 0x3f8   :  { %3761 = vmatprep.subr.bf16.mxu1 %v3336_v34  ;;  %3649 = vmatpush1.bf16.msra.mxu0 %v3333_v17 }
 0x3f9   :  { %3762 = vmatpush1.bf16.msra.mxu1 %v3335_v41  ;;  %v3038_v14 = vpop.f32.mrb[108].mxu0 }
 0x3fa   :  { %v3264_v20 = vpop.f32.mrb[108].mxu1  ;;  %v3040_v60 = vpop.f32.mrb[109].mxu0 }
 0x3fb   :  { %v3266_v52 = vpop.f32.mrb[109].mxu1  ;;  %v3042_v54 = vpop.f32.mrb[110].mxu0 }
 0x3fc   :  { %v3341_v36 = vpack.c.bf16 %v3042_v54, %v3038_v14  ;;  %v3268_v23 = vpop.f32.mrb[110].mxu1  ;;  %v3044_v58 = vpop.f32.mrb[111].mxu0 }
 0x3fd   :  { %v3343_v19 = vpack.c.bf16 %v3268_v23, %v3264_v20  ;;  %v3342_v43 = vpack.c.bf16 %v3044_v58, %v3040_v60  ;;  %v3270_v30 = vpop.f32.mrb[111].mxu1 }
 0x3fe   :  { %v3344_v4 = vpack.c.bf16 %v3270_v30, %v3266_v52 }
 0x3ff   :  { %3650 = vmatprep.subr.bf16.mxu0 %v3342_v43 }
 0x400   :  { %3763 = vmatprep.subr.bf16.mxu1 %v3344_v4  ;;  %3651 = vmatpush1.bf16.msra.mxu0 %v3341_v36 }
 0x401   :  { %3764 = vmatpush1.bf16.msra.mxu1 %v3343_v19  ;;  %v3048_v6 = vpop.f32.mrb[112].mxu0 }
 0x402   :  { %v3274_v16 = vpop.f32.mrb[112].mxu1  ;;  %v3050_v44 = vpop.f32.mrb[113].mxu0 }
 0x403   :  { %v3276_v56 = vpop.f32.mrb[113].mxu1  ;;  %v3052_v51 = vpop.f32.mrb[114].mxu0 }
 0x404   :  { %v3349_v45 = vpack.c.bf16 %v3052_v51, %v3048_v6  ;;  %v3278_v42 = vpop.f32.mrb[114].mxu1  ;;  %v3054_v0 = vpop.f32.mrb[115].mxu0 }
 0x405   :  { %v3351_v24 = vpack.c.bf16 %v3278_v42, %v3274_v16  ;;  %v3350_v55 = vpack.c.bf16 %v3054_v0, %v3050_v44  ;;  %v3280_v1 = vpop.f32.mrb[115].mxu1 }
 0x406   :  { %v3352_v12 = vpack.c.bf16 %v3280_v1, %v3276_v56 }
 0x407   :  { %3652 = vmatprep.subr.bf16.mxu0 %v3350_v55 }
 0x408   :  { %3765 = vmatprep.subr.bf16.mxu1 %v3352_v12  ;;  %3653 = vmatpush1.bf16.msra.mxu0 %v3349_v45 }
 0x409   :  { %3766 = vmatpush1.bf16.msra.mxu1 %v3351_v24  ;;  %v3058_v28 = vpop.f32.mrb[116].mxu0 }
 0x40a   :  { %v3284_v47 = vpop.f32.mrb[116].mxu1  ;;  %v3060_v49 = vpop.f32.mrb[117].mxu0 }
 0x40b   :  { %v3286_v53 = vpop.f32.mrb[117].mxu1  ;;  %v3062_v57 = vpop.f32.mrb[118].mxu0 }
 0x40c   :  { %v3357_v61 = vpack.c.bf16 %v3062_v57, %v3058_v28  ;;  %v3288_v2 = vpop.f32.mrb[118].mxu1  ;;  %v3064_v5 = vpop.f32.mrb[119].mxu0 }
 0x40d   :  { %v3359_v8 = vpack.c.bf16 %v3288_v2, %v3284_v47  ;;  %v3358_v10 = vpack.c.bf16 %v3064_v5, %v3060_v49  ;;  %v3290_v26 = vpop.f32.mrb[119].mxu1 }
 0x40e   :  { %v3360_v11 = vpack.c.bf16 %v3290_v26, %v3286_v53 }
 0x40f   :  { %3654 = vmatprep.subr.bf16.mxu0 %v3358_v10 }
 0x410   :  { %3767 = vmatprep.subr.bf16.mxu1 %v3360_v11  ;;  %3655 = vmatpush1.bf16.msra.mxu0 %v3357_v61 }
 0x411   :  { %3768 = vmatpush1.bf16.msra.mxu1 %v3359_v8  ;;  %v3068_v40 = vpop.f32.mrb[120].mxu0 }
 0x412   :  { %v3294_v25 = vpop.f32.mrb[120].mxu1  ;;  %v3070_v31 = vpop.f32.mrb[121].mxu0 }
 0x413   :  { %v3296_v3 = vpop.f32.mrb[121].mxu1  ;;  %v3072_v63 = vpop.f32.mrb[122].mxu0 }
 0x414   :  { %v3365_v15 = vpack.c.bf16 %v3072_v63, %v3068_v40  ;;  %v3298_v18 = vpop.f32.mrb[122].mxu1  ;;  %v3074_v17 = vpop.f32.mrb[123].mxu0 }
 0x415   :  { %v3367_v48 = vpack.c.bf16 %v3298_v18, %v3294_v25  ;;  %v3366_v59 = vpack.c.bf16 %v3074_v17, %v3070_v31  ;;  %v3300_v41 = vpop.f32.mrb[123].mxu1 }
 0x416   :  { %v3368_v22 = vpack.c.bf16 %v3300_v41, %v3296_v3 }
 0x417   :  { %3656 = vmatprep.subr.bf16.mxu0 %v3366_v59 }
 0x418   :  { %3769 = vmatprep.subr.bf16.mxu1 %v3368_v22  ;;  %3657 = vmatpush1.bf16.msra.mxu0 %v3365_v15 }
 0x419   :  { %3770 = vmatpush1.bf16.msra.mxu1 %v3367_v48  ;;  %v3078_v38 = vpop.f32.mrb[124].mxu0 }
 0x41a   :  { %v3304_v34 = vpop.f32.mrb[124].mxu1  ;;  %v3080_v14 = vpop.f32.mrb[125].mxu0 }
 0x41b   :  { %v3306_v20 = vpop.f32.mrb[125].mxu1  ;;  %v3082_v60 = vpop.f32.mrb[126].mxu0 }
 0x41c   :  { %v3373_v52 = vpack.c.bf16 %v3082_v60, %v3078_v38  ;;  %v3308_v54 = vpop.f32.mrb[126].mxu1  ;;  %v3084_v36 = vpop.f32.mrb[127].mxu0 }
 0x41d   :  { %v3375_v23 = vpack.c.bf16 %v3308_v54, %v3304_v34  ;;  %v3374_v58 = vpack.c.bf16 %v3084_v36, %v3080_v14  ;;  %v3310_v19 = vpop.f32.mrb[127].mxu1  ;;  %v122_v34 = vld [vmem:[#allocation8] ss:$4 sm:$0xff] }
 0x41e   :  { %v3376_v43 = vpack.c.bf16 %v3310_v19, %v3306_v20  ;;  %v10490_v60 = vrot.slane %v122_v34, %v9797_v27 }
 0x41f   :  { %3658 = vmatprep.subr.bf16.mxu0 %v3374_v58  ;;  %v10497_v58 = vrot.slane %v122_v34, %v9803_v29 }
 0x420   :  { %3771 = vmatprep.subr.bf16.mxu1 %v3376_v43  ;;  %3659 = vmatpush1.bf16.msra.mxu0 %v3373_v52 }
 0x421   :  { %3772 = vmatpush1.bf16.msra.mxu1 %v3375_v23 }
 0x423   :  { %3677 = vmatmul.mubr.bf16.vlgmr.msra.gmra.mrb[160].mxu0 %v10292_v50 }
 0x424   :  { %3790 = vmatmul.mubr.bf16.vlgmr.msra.gmra.mrb[160].mxu1 %v10292_v50  ;;  %3686 = vmatprep.mubr.bf16.mxu0 %v12842_v46 }
 0x425   :  { %3799 = vmatprep.mubr.bf16.mxu1 %v12842_v46 }
 0x42b   :  { %3687 = vmatmul.mubr.bf16.gmra.mrb[164].mxu0 %v10301_v62 }
 0x42c   :  { %3800 = vmatmul.mubr.bf16.gmra.mrb[164].mxu1 %v10301_v62  ;;  %3696 = vmatprep.mubr.bf16.mxu0 %v12842_v46 }
 0x42d   :  { %3809 = vmatprep.mubr.bf16.mxu1 %v12842_v46 }
 0x433   :  { %3697 = vmatmul.mubr.bf16.gmra.mrb[168].mxu0 %v10310_v21 }
 0x434   :  { %3810 = vmatmul.mubr.bf16.gmra.mrb[168].mxu1 %v10310_v21  ;;  %3706 = vmatprep.mubr.bf16.mxu0 %v12842_v46 }
 0x435   :  { %3819 = vmatprep.mubr.bf16.mxu1 %v12842_v46 }
 0x43b   :  { %3707 = vmatmul.mubr.bf16.gmra.mrb[172].mxu0 %v10319_v13 }
 0x43c   :  { %3820 = vmatmul.mubr.bf16.gmra.mrb[172].mxu1 %v10319_v13  ;;  %3716 = vmatprep.mubr.bf16.mxu0 %v12842_v46 }
 0x43d   :  { %3829 = vmatprep.mubr.bf16.mxu1 %v12842_v46 }
 0x443   :  { %3717 = vmatmul.mubr.bf16.gmra.mrb[176].mxu0 %v10328_v39 }
 0x444   :  { %3830 = vmatmul.mubr.bf16.gmra.mrb[176].mxu1 %v10328_v39  ;;  %3726 = vmatprep.mubr.bf16.mxu0 %v12842_v46 }
 0x445   :  { %3839 = vmatprep.mubr.bf16.mxu1 %v12842_v46 }
 0x44b   :  { %3727 = vmatmul.mubr.bf16.gmra.mrb[180].mxu0 %v10337_v37 }
 0x44c   :  { %3840 = vmatmul.mubr.bf16.gmra.mrb[180].mxu1 %v10337_v37  ;;  %3736 = vmatprep.mubr.bf16.mxu0 %v12842_v46 }
 0x44d   :  { %3849 = vmatprep.mubr.bf16.mxu1 %v12842_v46 }
 0x453   :  { %3737 = vmatmul.mubr.bf16.gmra.mrb[184].mxu0 %v10346_v7 }
 0x454   :  { %3850 = vmatmul.mubr.bf16.gmra.mrb[184].mxu1 %v10346_v7  ;;  %3746 = vmatprep.mubr.bf16.mxu0 %v12842_v46 }
 0x455   :  { %3859 = vmatprep.mubr.bf16.mxu1 %v12842_v46 }
 0x45b   :  { %3747 = vmatmul.mubr.bf16.gmra.mrb[188].mxu0 %v10355_v35 }
 0x45c   :  { %3860 = vmatmul.mubr.bf16.gmra.mrb[188].mxu1 %v10355_v35 }
 0x475   :  { %v10391_v50 = vpop.f32.mrb[128].mxu0  ;;  %v10393_v62 = vpop.f32.mrb[128].mxu1 }
 0x476   :  { %v10395_v21 = vpop.f32.mrb[129].mxu0  ;;  %v10397_v13 = vpop.f32.mrb[129].mxu1 }
 0x477   :  { %v10399_v39 = vpop.f32.mrb[130].mxu0  ;;  %v10401_v37 = vpop.f32.mrb[130].mxu1 }
 0x478   :  { %v10403_v7 = vpop.f32.mrb[131].mxu0  ;;  %v10405_v30 = vpop.f32.mrb[131].mxu1 }
 0x47d   :  { %v10407_v46 = vpop.f32.mrb[132].mxu0  ;;  %v10409_v4 = vpop.f32.mrb[132].mxu1 }
 0x47e   :  { %v10411_v35 = vpop.f32.mrb[133].mxu0  ;;  %v10413_v6 = vpop.f32.mrb[133].mxu1 }
 0x47f   :  { %v10415_v16 = vpop.f32.mrb[134].mxu0  ;;  %v10417_v44 = vpop.f32.mrb[134].mxu1 }
 0x480   :  { %v10419_v56 = vpop.f32.mrb[135].mxu0  ;;  %v10421_v51 = vpop.f32.mrb[135].mxu1 }
 0x485   :  { %v10423_v45 = vpop.f32.mrb[136].mxu0  ;;  %v10425_v42 = vpop.f32.mrb[136].mxu1 }
 0x486   :  { %v10427_v0 = vpop.f32.mrb[137].mxu0  ;;  %v10429_v24 = vpop.f32.mrb[137].mxu1 }
 0x487   :  { %v10431_v55 = vpop.f32.mrb[138].mxu0  ;;  %v10433_v1 = vpop.f32.mrb[138].mxu1 }
 0x488   :  { %v10435_v12 = vpop.f32.mrb[139].mxu0  ;;  %v10437_v28 = vpop.f32.mrb[139].mxu1 }
 0x48d   :  { %v10439_v47 = vpop.f32.mrb[140].mxu0  ;;  %v10441_v49 = vpop.f32.mrb[140].mxu1 }
 0x48e   :  { %v10443_v53 = vpop.f32.mrb[141].mxu0  ;;  %v10445_v57 = vpop.f32.mrb[141].mxu1 }
 0x48f   :  { %v10447_v61 = vpop.f32.mrb[142].mxu0  ;;  %v10449_v2 = vpop.f32.mrb[142].mxu1 }
 0x490   :  { %v10451_v5 = vpop.f32.mrb[143].mxu0  ;;  %v10453_v8 = vpop.f32.mrb[143].mxu1 }
 0x495   :  { %v10455_v10 = vpop.f32.mrb[144].mxu0  ;;  %v10457_v26 = vpop.f32.mrb[144].mxu1 }
 0x496   :  { %v10459_v11 = vpop.f32.mrb[145].mxu0  ;;  %v10461_v40 = vpop.f32.mrb[145].mxu1 }
 0x497   :  { %v10463_v25 = vpop.f32.mrb[146].mxu0  ;;  %v10465_v31 = vpop.f32.mrb[146].mxu1 }
 0x498   :  { %v10467_v3 = vpop.f32.mrb[147].mxu0  ;;  %v10469_v63 = vpop.f32.mrb[147].mxu1 }
 0x49d   :  { %v10471_v15 = vpop.f32.mrb[148].mxu0  ;;  %v10473_v18 = vpop.f32.mrb[148].mxu1 }
 0x49e   :  { %v10475_v17 = vpop.f32.mrb[149].mxu0  ;;  %v10477_v48 = vpop.f32.mrb[149].mxu1 }
 0x49f   :  { %12843 = vst [vmem:[#allocation30_spill] sm:$0xff] %v10477_v48  ;;  %v10479_v59 = vpop.f32.mrb[150].mxu0  ;;  %v10481_v41 = vpop.f32.mrb[150].mxu1 }
 0x4a0   :  { %12844 = vst [vmem:[#allocation31_spill] sm:$0xff] %v10481_v41  ;;  %v10483_v22 = vpop.f32.mrb[151].mxu0  ;;  %v10485_v38 = vpop.f32.mrb[151].mxu1 }
 0x4a1   :  { %12845 = vst [vmem:[#allocation32_spill] sm:$0xff] %v10485_v38 }
 0x4a5   :  { %v3512_v14 = vpop.f32.mrb[152].mxu0  ;;  %v10487_v20 = vpop.f32.mrb[152].mxu1 }
 0x4a6   :  { %12846 = vst [vmem:[#allocation33_spill] sm:$0xff] %v10487_v20  ;;  %v3514_v52 = vpop.f32.mrb[153].mxu0  ;;  %v10492_v54 = vpop.f32.mrb[153].mxu1  ;;  %v10500_v19 = vadd.f32 %v3512_v14, %v10490_v60  ;;  %v10518_v14 = vrot.slane %v122_v34, %v9812_v32  ;;  %v3459_v32 = vadd.f32 %v10403_v7, %v10497_v58 }
 0x4a7   :  { %12847 = vst [vmem:[#allocation34_spill] sm:$0xff] %v10492_v54  ;;  %v3516_v36 = vpop.f32.mrb[154].mxu0  ;;  %v10494_v23 = vpop.f32.mrb[154].mxu1  ;;  %v10505_v20 = vadd.f32 %v3514_v52, %v10497_v58  ;;  %v10523_v52 = vrot.slane %v122_v34, %v9815_v33 }
 0x4a8   :  { %12848 = vst [vmem:[#allocation35_spill] sm:$0xff] %v10494_v23  ;;  %12849 = vst [vmem:[#allocation36_spill] sm:$0xff] %v10500_v19  ;;  %v3518_v43 = vpop.f32.mrb[155].mxu0  ;;  %v10502_v38 = vpop.f32.mrb[155].mxu1  ;;  %v10508_v27 = vadd.f32 %v3516_v36, %v10490_v60  ;;  %v3453_v36 = vadd.f32 %v10391_v50, %v10490_v60 }
 0x4a9   :  { %12850 = vst [vmem:[#allocation37_spill] sm:$0xff] %v10502_v38  ;;  %v10513_v23 = vadd.f32 %v3518_v43, %v10497_v58  ;;  %v3455_v43 = vadd.f32 %v10395_v21, %v10497_v58  ;;  %v3568_v50 = vadd.f32 %v10397_v13, %v10523_v52  ;;  %v3572_v13 = vadd.f32 %v10405_v30, %v10523_v52 }
 0x4aa   :  { %12851 = vst [vmem:[#allocation38_spill] sm:$0xff] %v10508_v27 }
 0x4ab   :  { %12853 = vst [vmem:[#allocation40_spill] sm:$0xff] %v10513_v23  ;;  %v10540_v23 = vmax.f32 %v3453_v36, 0.0  ;;  %v10559_v36 = vmax.f32 %v3459_v32, 0.0  ;;  %v10579_v30 = vmax.f32 %v3568_v50, 0.0 }
 0x4ad   :  { %v3522_v41 = vpop.f32.mrb[156].mxu0  ;;  %v10510_v54 = vpop.f32.mrb[156].mxu1  ;;  %12858 = vst [vmem:[#allocation45_spill] sm:$0xff] %v10540_v23  ;;  %12864 = vst [vmem:[#allocation51_spill] sm:$0xff] %v10559_v36  ;;  %v4159_v32 = vmul.f32 %v10540_v23, %v10540_v23 }
 0x4ae   :  { %12852 = vst [vmem:[#allocation39_spill] sm:$0xff] %v10510_v54  ;;  %v3524_v29 = vpop.f32.mrb[157].mxu0  ;;  %v10515_v48 = vpop.f32.mrb[157].mxu1  ;;  %v10538_v33 = vadd.f32 %v3522_v41, %v10490_v60  ;;  %v10557_v41 = vrot.slane %v122_v34, %v9647_v9  ;;  %12869 = vst [vmem:[#allocation54_spill] sm:$0xff] %v10579_v30 }
 0x4af   :  { %12854 = vst [vmem:[#allocation41_spill] sm:$0xff] %v10515_v48  ;;  %v3526_v19 = vpop.f32.mrb[158].mxu0  ;;  %v10520_v38 = vpop.f32.mrb[158].mxu1  ;;  %v3457_v48 = vadd.f32 %v10399_v39, %v10490_v60  ;;  %v10550_v39 = vmax.f32 %v3455_v43, 0.0 }
 0x4b0   :  { %12855 = vst [vmem:[#allocation42_spill] sm:$0xff] %v10520_v38  ;;  %v3528_v27 = vpop.f32.mrb[159].mxu0  ;;  %v10527_v54 = vpop.f32.mrb[159].mxu1  ;;  %v3566_v38 = vadd.f32 %v10393_v62, %v10518_v14  ;;  %12857 = vst [vmem:[#allocation44_spill] sm:$0xff] %v10538_v33  ;;  %v10548_v21 = vadd.f32 %v3526_v19, %v10490_v60  ;;  %v3570_v62 = vadd.f32 %v10401_v37, %v10518_v14  ;;  %v12865_v19 = vld [vmem:[#allocation15_spill] sm:$0xff] }
 0x4b1   :  { %12856 = vst [vmem:[#allocation43_spill] sm:$0xff] %v10527_v54  ;;  %v10545_v54 = vadd.f32 %v3524_v29, %v10497_v58  ;;  %12861 = vst [vmem:[#allocation48_spill] sm:$0xff] %v10550_v39  ;;  %v10552_v7 = vmax.f32 %v3457_v48, 0.0  ;;  %v3463_v29 = vadd.f32 %v10407_v46, %v10490_v60  ;;  %v3465_v48 = vadd.f32 %v10411_v35, %v10497_v58 }
 0x4b2   :  { %12860 = vst [vmem:[#allocation47_spill] sm:$0xff] %v10548_v21  ;;  %12863 = vst [vmem:[#allocation50_spill] sm:$0xff] %v10557_v41  ;;  %v10566_v21 = vrot.slane %v122_v34, %v12865_v19  ;;  %v3467_v37 = vadd.f32 %v10415_v16, %v10490_v60  ;;  %v10573_v9 = vadd.f32 %v3528_v27, %v10497_v58  ;;  %v10577_v43 = vmax.f32 %v3566_v38, 0.0  ;;  %v12873_v41 = vld [vmem:[#allocation16_spill] sm:$0xff] }
 0x4b3   :  { %12859 = vst [vmem:[#allocation46_spill] sm:$0xff] %v10545_v54  ;;  %12862 = vst [vmem:[#allocation49_spill] sm:$0xff] %v10552_v7  ;;  %v3469_v46 = vadd.f32 %v10419_v56, %v10497_v58  ;;  %v3998_v19 = vadd.f32 %v10550_v39, %v10540_v23  ;;  %v4160_v35 = vmul.f32 %v10550_v39, %v10550_v39  ;;  %v10589_v16 = vmax.f32 %v3570_v62, 0.0 }
 0x4b4   :  { %12866 = vst [vmem:[#allocation15_spill] sm:$0xff] %v10566_v21  ;;  %12867 = vst [vmem:[#allocation52_spill] sm:$0xff] %v10573_v9  ;;  %v4167_v27 = vmul.f32 %v10552_v7, %v10552_v7  ;;  %v4168_v38 = vmul.f32 %v10559_v36, %v10559_v36  ;;  %v10593_v21 = vmax.f32 %v3572_v13, 0.0  ;;  %v10595_v50 = vmax.f32 %v3463_v29, 0.0  ;;  %v12875_v9 = vld [vmem:[#allocation17_spill] sm:$0xff] }
 0x4b5   :  { %12868 = vst [vmem:[#allocation53_spill] sm:$0xff] %v10577_v43  ;;  %12870 = vst [vmem:[#allocation55_spill] sm:$0xff] %v10589_v16  ;;  %v3576_v56 = vadd.f32 %v10409_v4, %v10518_v14  ;;  %v10600_v23 = vrot.slane %v122_v34, %v12873_v41  ;;  %v10603_v39 = vrot.slane %v122_v34, %v12875_v9  ;;  %v10605_v54 = vmax.f32 %v3465_v48, 0.0 }
 0x4b6   :  { %12871 = vst [vmem:[#allocation56_spill] sm:$0xff] %v10593_v21  ;;  %12872 = vst [vmem:[#allocation57_spill] sm:$0xff] %v10595_v50  ;;  %v10607_v62 = vmax.f32 %v3467_v37, 0.0  ;;  %v4161_v33 = vmul.f32 %v10577_v43, %v10577_v43  ;;  %v4162_v13 = vmul.f32 %v10579_v30, %v10579_v30  ;;  %v10613_v29 = vmax.f32 %v3469_v46, 0.0 }
 0x4b7   :  { %12874 = vst [vmem:[#allocation16_spill] sm:$0xff] %v10600_v23  ;;  %12876 = vst [vmem:[#allocation17_spill] sm:$0xff] %v10603_v39  ;;  %v3580_v4 = vadd.f32 %v10417_v44, %v10518_v14  ;;  %v4287_v41 = vadd.f32 %v4160_v35, %v4159_v32  ;;  %v4007_v34 = vadd.f32 %v10559_v36, %v10552_v7  ;;  %v10626_v23 = vmax.f32 %v3576_v56, 0.0 }
 0x4b8   :  { %12877 = vst [vmem:[#allocation58_spill] sm:$0xff] %v10605_v54  ;;  %12878 = vst [vmem:[#allocation59_spill] sm:$0xff] %v10607_v62  ;;  %v3999_v48 = vadd.f32 %v3998_v19, %v10577_v43  ;;  %v4169_v37 = vmul.f32 %v10589_v16, %v10589_v16  ;;  %v4296_v9 = vadd.f32 %v4168_v38, %v4167_v27 }
 0x4b9   :  { %12879 = vst [vmem:[#allocation60_spill] sm:$0xff] %v10613_v29  ;;  %v4170_v39 = vmul.f32 %v10593_v21, %v10593_v21  ;;  %v4175_v46 = vmul.f32 %v10595_v50, %v10595_v50  ;;  %12880 = vst [vmem:[#allocation61_spill] sm:$0xff] %v10626_v23  ;;  %v4016_v44 = vadd.f32 %v10605_v54, %v10595_v50  ;;  %v10640_v56 = vmax.f32 %v3580_v4, 0.0 }
 0x4ba   :  { %v4176_v32 = vmul.f32 %v10605_v54, %v10605_v54  ;;  %v4183_v19 = vmul.f32 %v10607_v62, %v10607_v62  ;;  %v3578_v35 = vadd.f32 %v10413_v6, %v10523_v52  ;;  %v4025_v27 = vadd.f32 %v10613_v29, %v10607_v62 }
 0x4bb   :  { %v4184_v38 = vmul.f32 %v10613_v29, %v10613_v29  ;;  %12881 = vst [vmem:[#allocation62_spill] sm:$0xff] %v10640_v56  ;;  %v3582_v50 = vadd.f32 %v10421_v51, %v10523_v52  ;;  %v4288_v36 = vadd.f32 %v4287_v41, %v4161_v33  ;;  %v10645_v54 = vadd.f32 %v3999_v48, %v10579_v30 }
 0x4bc   :  { %v3473_v7 = vadd.f32 %v10423_v45, %v10490_v60  ;;  %v3475_v6 = vadd.f32 %v10427_v0, %v10497_v58  ;;  %v4008_v62 = vadd.f32 %v4007_v34, %v10589_v16  ;;  %v4297_v43 = vadd.f32 %v4296_v9, %v4169_v37 }
 0x4bd   :  { %v3477_v4 = vadd.f32 %v10431_v55, %v10490_v60  ;;  %v3479_v29 = vadd.f32 %v10435_v12, %v10497_v58  ;;  %v4305_v51 = vadd.f32 %v4176_v32, %v4175_v46  ;;  %v4017_v33 = vadd.f32 %v4016_v44, %v10626_v23 }
 0x4be   :  { %v4177_v41 = vmul.f32 %v10626_v23, %v10626_v23  ;;  %v10659_v48 = vmax.f32 %v3578_v35, 0.0  ;;  %v4314_v45 = vadd.f32 %v4184_v38, %v4183_v19  ;;  %v4026_v0 = vadd.f32 %v4025_v27, %v10640_v56 }
 0x4bf   :  { %v4185_v34 = vmul.f32 %v10640_v56, %v10640_v56  ;;  %v10664_v37 = vmax.f32 %v3582_v50, 0.0  ;;  %v10666_v55 = vadd.f32 %v4288_v36, %v4162_v13  ;;  %v10668_v9 = vmax.f32 %v3473_v7, 0.0 }
 0x4c0   :  { %12882 = vst [vmem:[#allocation63_spill] sm:$0xff] %v10659_v48  ;;  %v10670_v12 = vmax.f32 %v3475_v6, 0.0  ;;  %v3586_v46 = vadd.f32 %v10425_v42, %v10518_v14  ;;  %v10675_v44 = vadd.f32 %v4008_v62, %v10593_v21  ;;  %v10677_v32 = vmax.f32 %v3477_v4, 0.0 }
 0x4c1   :  { %12883 = vst [vmem:[#allocation64_spill] sm:$0xff] %v10664_v37  ;;  %12884 = vst [vmem:[#allocation65_spill] sm:$0xff] %v10668_v9  ;;  %v10679_v19 = vmax.f32 %v3479_v29, 0.0  ;;  %v3588_v50 = vadd.f32 %v10429_v24, %v10523_v52  ;;  %v10683_v35 = vadd.f32 %v4297_v43, %v4170_v39  ;;  %v4306_v36 = vadd.f32 %v4305_v51, %v4177_v41 }
 0x4c2   :  { %12885 = vst [vmem:[#allocation66_spill] sm:$0xff] %v10670_v12  ;;  %12886 = vst [vmem:[#allocation67_spill] sm:$0xff] %v10677_v32  ;;  %v4178_v7 = vmul.f32 %v10659_v48, %v10659_v48  ;;  %v3590_v13 = vadd.f32 %v10433_v1, %v10518_v14  ;;  %v10690_v42 = vadd.f32 %v4017_v33, %v10659_v48  ;;  %v10703_v1 = vmax.f32 %v3586_v46, 0.0 }
 0x4c3   :  { %12887 = vst [vmem:[#allocation68_spill] sm:$0xff] %v10679_v19  ;;  %v4315_v62 = vadd.f32 %v4314_v45, %v4185_v34  ;;  %v10693_v27 = vadd.f32 %v4026_v0, %v10664_v37  ;;  %v4186_v29 = vmul.f32 %v10664_v37, %v10664_v37  ;;  %v4191_v24 = vmul.f32 %v10668_v9, %v10668_v9 }
 0x4c4   :  { %v4034_v39 = vadd.f32 %v10670_v12, %v10668_v9  ;;  %v4192_v43 = vmul.f32 %v10670_v12, %v10670_v12  ;;  %12888 = vst [vmem:[#allocation69_spill] sm:$0xff] %v10703_v1  ;;  %v4199_v38 = vmul.f32 %v10677_v32, %v10677_v32  ;;  %v4200_v6 = vmul.f32 %v10679_v19, %v10679_v19 }
 0x4c5   :  { %v10709_v4 = vmax.f32 %v3588_v50, 0.0  ;;  %v3592_v51 = vadd.f32 %v10437_v28, %v10523_v52  ;;  %v4043_v33 = vadd.f32 %v10679_v19, %v10677_v32  ;;  %v10715_v41 = vmax.f32 %v3590_v13, 0.0 }
 0x4c6   :  { %v3483_v45 = vadd.f32 %v10439_v47, %v10490_v60  ;;  %v3485_v0 = vadd.f32 %v10443_v53, %v10497_v58  ;;  %v10721_v34 = vadd.f32 %v4306_v36, %v4178_v7  ;;  %v10723_v46 = vadd.f32 %v4315_v62, %v4186_v29 }
 0x4c7   :  { %12889 = vst [vmem:[#allocation70_spill] sm:$0xff] %v10709_v4  ;;  %12890 = vst [vmem:[#allocation71_spill] sm:$0xff] %v10715_v41  ;;  %v3487_v50 = vadd.f32 %v10447_v61, %v10490_v60  ;;  %v3489_v28 = vadd.f32 %v10451_v5, %v10497_v58  ;;  %v4323_v12 = vadd.f32 %v4192_v43, %v4191_v24  ;;  %v10738_v7 = vmax.f32 %v3592_v51, 0.0 }
 0x4c8   :  { %v4035_v13 = vadd.f32 %v4034_v39, %v10703_v1  ;;  %v4193_v19 = vmul.f32 %v10703_v1, %v10703_v1  ;;  %v3493_v47 = vadd.f32 %v10455_v10, %v10490_v60  ;;  %v4332_v53 = vadd.f32 %v4200_v6, %v4199_v38 }
 0x4c9   :  { %v10736_v36 = vmul.f32 %v10709_v4, %v10709_v4  ;;  %12891 = vst [vmem:[#allocation72_spill] sm:$0xff] %v10738_v7  ;;  %v3495_v61 = vadd.f32 %v10459_v11, %v10497_v58  ;;  %v10743_v5 = vadd.f32 %v4043_v33, %v10715_v41  ;;  %v10745_v62 = vmax.f32 %v3483_v45, 0.0 }
 0x4ca   :  { %v10747_v29 = vmax.f32 %v3485_v0, 0.0  ;;  %v3596_v10 = vadd.f32 %v10441_v49, %v10518_v14  ;;  %v4201_v24 = vmul.f32 %v10715_v41, %v10715_v41  ;;  %v10753_v39 = vmax.f32 %v3487_v50, 0.0 }
 0x4cb   :  { %12892 = vst [vmem:[#allocation73_spill] sm:$0xff] %v10745_v62  ;;  %v10755_v43 = vmax.f32 %v3489_v28, 0.0  ;;  %v3600_v11 = vadd.f32 %v10449_v2, %v10518_v14  ;;  %v4324_v38 = vadd.f32 %v4323_v12, %v4193_v19  ;;  %v10759_v6 = vmax.f32 %v3493_v47, 0.0 }
 0x4cc   :  { %12893 = vst [vmem:[#allocation74_spill] sm:$0xff] %v10747_v29  ;;  %12894 = vst [vmem:[#allocation75_spill] sm:$0xff] %v10753_v39  ;;  %v3497_v51 = vadd.f32 %v10463_v25, %v10490_v60  ;;  %v3499_v33 = vadd.f32 %v10467_v3, %v10497_v58  ;;  %v10766_v49 = vadd.f32 %v4035_v13, %v10709_v4  ;;  %v10770_v0 = vmax.f32 %v3495_v61, 0.0 }
 0x4cd   :  { %12895 = vst [vmem:[#allocation76_spill] sm:$0xff] %v10755_v43  ;;  %12896 = vst [vmem:[#allocation77_spill] sm:$0xff] %v10759_v6  ;;  %v4202_v45 = vmul.f32 %v10738_v7, %v10738_v7  ;;  %v3606_v2 = vadd.f32 %v10457_v26, %v10518_v14  ;;  %v4207_v12 = vmul.f32 %v10745_v62, %v10745_v62  ;;  %v10778_v19 = vmax.f32 %v3596_v10, 0.0 }
 0x4ce   :  { %12897 = vst [vmem:[#allocation78_spill] sm:$0xff] %v10770_v0  ;;  %v4208_v25 = vmul.f32 %v10747_v29, %v10747_v29  ;;  %v3598_v3 = vadd.f32 %v10445_v57, %v10523_v52  ;;  %v4215_v50 = vmul.f32 %v10753_v39, %v10753_v39  ;;  %v4216_v28 = vmul.f32 %v10755_v43, %v10755_v43 }
 0x4cf   :  { %12898 = vst [vmem:[#allocation79_spill] sm:$0xff] %v10778_v19  ;;  %v10786_v13 = vmax.f32 %v3600_v11, 0.0  ;;  %v3602_v26 = vadd.f32 %v10453_v8, %v10523_v52  ;;  %v4333_v47 = vadd.f32 %v4332_v53, %v4201_v24  ;;  %v4223_v61 = vmul.f32 %v10759_v6, %v10759_v6 }
 0x4d0   :  { %v10792_v10 = vmax.f32 %v3497_v51, 0.0  ;;  %v10794_v41 = vmax.f32 %v3499_v33, 0.0  ;;  %v4224_v57 = vmul.f32 %v10770_v0, %v10770_v0  ;;  %v10798_v1 = vmax.f32 %v3606_v2, 0.0 }
 0x4d1   :  { %12899 = vst [vmem:[#allocation80_spill] sm:$0xff] %v10786_v13  ;;  %v3608_v11 = vadd.f32 %v10461_v40, %v10523_v52  ;;  %v3610_v32 = vadd.f32 %v10465_v31, %v10518_v14  ;;  %v4052_v8 = vadd.f32 %v10747_v29, %v10745_v62  ;;  %v4341_v53 = vadd.f32 %v4208_v25, %v4207_v12 }
 0x4d2   :  { %12900 = vst [vmem:[#allocation81_spill] sm:$0xff] %v10792_v10  ;;  %12901 = vst [vmem:[#allocation82_spill] sm:$0xff] %v10794_v41  ;;  %v4209_v24 = vmul.f32 %v10778_v19, %v10778_v19  ;;  %v10808_v51 = vmax.f32 %v3598_v3, 0.0  ;;  %v4061_v33 = vadd.f32 %v10755_v43, %v10753_v39  ;;  %v4350_v2 = vadd.f32 %v4216_v28, %v4215_v50 }
 0x4d3   :  { %12902 = vst [vmem:[#allocation83_spill] sm:$0xff] %v10798_v1  ;;  %v4217_v4 = vmul.f32 %v10786_v13, %v10786_v13  ;;  %v10814_v40 = vmax.f32 %v3602_v26, 0.0  ;;  %v4070_v31 = vadd.f32 %v10770_v0, %v10759_v6  ;;  %v4231_v12 = vmul.f32 %v10792_v10, %v10792_v10 }
 0x4d4   :  { %12903 = vst [vmem:[#allocation84_spill] sm:$0xff] %v10808_v51  ;;  %v4232_v25 = vmul.f32 %v10794_v41, %v10794_v41  ;;  %v3612_v3 = vadd.f32 %v10469_v63, %v10523_v52  ;;  %v4359_v62 = vadd.f32 %v4224_v57, %v4223_v61  ;;  %v4225_v50 = vmul.f32 %v10798_v1, %v10798_v1 }
 0x4d5   :  { %12904 = vst [vmem:[#allocation85_spill] sm:$0xff] %v10814_v40  ;;  %v10826_v28 = vmax.f32 %v3608_v11, 0.0  ;;  %v10828_v26 = vmax.f32 %v3610_v32, 0.0  ;;  %v4053_v39 = vadd.f32 %v4052_v8, %v10778_v19  ;;  %v4342_v6 = vadd.f32 %v4341_v53, %v4209_v24 }
 0x4d6   :  { %v4210_v0 = vmul.f32 %v10808_v51, %v10808_v51  ;;  %v4079_v43 = vadd.f32 %v10794_v41, %v10792_v10  ;;  %v4062_v29 = vadd.f32 %v4061_v33, %v10786_v13  ;;  %v4218_v63 = vmul.f32 %v10814_v40, %v10814_v40  ;;  %v12934_v10 = vld [vmem:[#allocation44_spill] sm:$0xff] }
 0x4d7   :  { %12905 = vst [vmem:[#allocation86_spill] sm:$0xff] %v10826_v28  ;;  %12906 = vst [vmem:[#allocation87_spill] sm:$0xff] %v10828_v26  ;;  %v3503_v61 = vadd.f32 %v10471_v15, %v10490_v60  ;;  %v3505_v32 = vadd.f32 %v10475_v17, %v10497_v58  ;;  %v4351_v57 = vadd.f32 %v4350_v2, %v4217_v4  ;;  %v10843_v53 = vmax.f32 %v3612_v3, 0.0 }
 0x4d8   :  { %v4368_v11 = vadd.f32 %v4232_v25, %v4231_v12  ;;  %v4071_v8 = vadd.f32 %v4070_v31, %v10798_v1  ;;  %v4360_v24 = vadd.f32 %v4359_v62, %v4225_v50  ;;  %v4226_v19 = vmul.f32 %v10826_v28, %v10826_v28  ;;  %v12914_v50 = vld [vmem:[#allocation32_spill] sm:$0xff] }
 0x4d9   :  { %12907 = vst [vmem:[#allocation88_spill] sm:$0xff] %v10843_v53  ;;  %v4233_v33 = vmul.f32 %v10828_v26, %v10828_v26  ;;  %v3507_v13 = vadd.f32 %v10479_v59, %v10490_v60  ;;  %v10852_v15 = vadd.f32 %v4324_v38, %v10736_v36  ;;  %v10856_v17 = vadd.f32 %v10743_v5, %v10738_v7 }
 0x4da   :  { %v4080_v4 = vadd.f32 %v4079_v43, %v10828_v26  ;;  %v3509_v62 = vadd.f32 %v10483_v22, %v10497_v58  ;;  %v10861_v2 = vadd.f32 %v4333_v47, %v4202_v45  ;;  %v10864_v31 = vadd.f32 %v4053_v39, %v10808_v51 }
 0x4db   :  { %v10866_v12 = vmax.f32 %v3503_v61, 0.0  ;;  %v10868_v59 = vmax.f32 %v3505_v32, 0.0  ;;  %v10870_v60 = vadd.f32 %v4342_v6, %v4210_v0  ;;  %v10873_v36 = vadd.f32 %v4062_v29, %v10814_v40  ;;  %v12912_v0 = vld [vmem:[#allocation30_spill] sm:$0xff]  ;;  %v12915_v32 = vld [vmem:[#allocation36_spill] sm:$0xff] }
 0x4dc   :  { %v10875_v5 = vadd.f32 %v4351_v57, %v4218_v63  ;;  %v10878_v43 = vadd.f32 %v4071_v8, %v10826_v28  ;;  %v10880_v22 = vadd.f32 %v4360_v24, %v4226_v19  ;;  %v4369_v58 = vadd.f32 %v4368_v11, %v4233_v33  ;;  %v12918_v11 = vld [vmem:[#allocation33_spill] sm:$0xff]  ;;  %v12919_v33 = vld [vmem:[#allocation38_spill] sm:$0xff] }
 0x4dd   :  { %12908 = vst [vmem:[#allocation89_spill] sm:$0xff] %v10866_v12  ;;  %12909 = vst [vmem:[#allocation90_spill] sm:$0xff] %v10868_v59  ;;  %v4234_v39 = vmul.f32 %v10843_v53, %v10843_v53  ;;  %v10884_v38 = vmax.f32 %v3507_v13, 0.0  ;;  %v10887_v45 = vadd.f32 %v4080_v4, %v10843_v53  ;;  %v10889_v6 = vmax.f32 %v3509_v62, 0.0  ;;  %v12913_v13 = vld [vmem:[#allocation31_spill] sm:$0xff]  ;;  %v12921_v62 = vld [vmem:[#allocation40_spill] sm:$0xff] }
 0x4de   :  { %v3616_v29 = vadd.f32 %v10473_v18, %v10518_v14  ;;  %v3618_v47 = vadd.f32 %v12912_v0, %v10523_v52  ;;  %v4239_v19 = vmul.f32 %v10866_v12, %v10866_v12  ;;  %v4240_v25 = vmul.f32 %v10868_v59, %v10868_v59 }
 0x4df   :  { %12910 = vst [vmem:[#allocation91_spill] sm:$0xff] %v10884_v38  ;;  %12911 = vst [vmem:[#allocation92_spill] sm:$0xff] %v10889_v6  ;;  %v3620_v3 = vadd.f32 %v12913_v13, %v10518_v14  ;;  %v3622_v63 = vadd.f32 %v12914_v50, %v10523_v52  ;;  %v4088_v61 = vadd.f32 %v10868_v59, %v10866_v12  ;;  %v10906_v18 = vmax.f32 %v12915_v32, 0.0  ;;  %v12923_v13 = vld [vmem:[#allocation35_spill] sm:$0xff] }
 0x4e0   :  { %v10909_v57 = vmax.f32 %v10505_v20, 0.0  ;;  %v3626_v8 = vadd.f32 %v12918_v11, %v10518_v14  ;;  %v4247_v24 = vmul.f32 %v10884_v38, %v10884_v38  ;;  %v10916_v4 = vmax.f32 %v12919_v33, 0.0 }
 0x4e1   :  { %12916 = vst [vmem:[#allocation30_spill] sm:$0xff] %v10906_v18  ;;  %v10919_v0 = vmax.f32 %v12921_v62, 0.0  ;;  %v3630_v50 = vadd.f32 %v12923_v13, %v10518_v14  ;;  %v10923_v32 = vadd.f32 %v4369_v58, %v4234_v39  ;;  %v4248_v20 = vmul.f32 %v10889_v6, %v10889_v6 }
 0x4e2   :  { %12917 = vst [vmem:[#allocation31_spill] sm:$0xff] %v10909_v57  ;;  %12920 = vst [vmem:[#allocation32_spill] sm:$0xff] %v10916_v4  ;;  %v10927_v26 = vmax.f32 %v3616_v29, 0.0  ;;  %v10929_v11 = vmax.f32 %v3618_v47, 0.0  ;;  %v4377_v1 = vadd.f32 %v4240_v25, %v4239_v19  ;;  %v4097_v33 = vadd.f32 %v10889_v6, %v10884_v38  ;;  %v12929_v29 = vld [vmem:[#allocation34_spill] sm:$0xff] }
 0x4e3   :  { %12922 = vst [vmem:[#allocation36_spill] sm:$0xff] %v10919_v0  ;;  %v10933_v53 = vmax.f32 %v3620_v3, 0.0  ;;  %v10935_v62 = vmax.f32 %v3622_v63, 0.0  ;;  %v4255_v13 = vmul.f32 %v10906_v18, %v10906_v18  ;;  %v4256_v58 = vmul.f32 %v10909_v57, %v10909_v57  ;;  %v12931_v63 = vld [vmem:[#allocation37_spill] sm:$0xff] }
 0x4e4   :  { %12924 = vst [vmem:[#allocation33_spill] sm:$0xff] %v10927_v26  ;;  %12925 = vst [vmem:[#allocation38_spill] sm:$0xff] %v10929_v11  ;;  %v10941_v39 = vmax.f32 %v3626_v8, 0.0  ;;  %v3628_v47 = vadd.f32 %v12929_v29, %v10523_v52  ;;  %v4263_v19 = vmul.f32 %v10916_v4, %v10916_v4  ;;  %v4264_v25 = vmul.f32 %v10919_v0, %v10919_v0 }
 0x4e5   :  { %12926 = vst [vmem:[#allocation40_spill] sm:$0xff] %v10933_v53  ;;  %12927 = vst [vmem:[#allocation35_spill] sm:$0xff] %v10935_v62  ;;  %v10949_v3 = vmax.f32 %v3630_v50, 0.0  ;;  %v3632_v28 = vadd.f32 %v12931_v63, %v10523_v52  ;;  %v4386_v40 = vadd.f32 %v4248_v20, %v4247_v24  ;;  %v4089_v38 = vadd.f32 %v4088_v61, %v10927_v26 }
 0x4e6   :  { %12928 = vst [vmem:[#allocation93_spill] sm:$0xff] %v10941_v39  ;;  %v4241_v8 = vmul.f32 %v10927_v26, %v10927_v26  ;;  %v4242_v29 = vmul.f32 %v10929_v11, %v10929_v11  ;;  %v4098_v6 = vadd.f32 %v4097_v33, %v10933_v53  ;;  %v4249_v12 = vmul.f32 %v10933_v53, %v10933_v53 }
 0x4e7   :  { %12930 = vst [vmem:[#allocation34_spill] sm:$0xff] %v10949_v3  ;;  %v4250_v50 = vmul.f32 %v10935_v62, %v10935_v62  ;;  %v4106_v63 = vadd.f32 %v10909_v57, %v10906_v18  ;;  %v4395_v24 = vadd.f32 %v4256_v58, %v4255_v13  ;;  %v4115_v61 = vadd.f32 %v10919_v0, %v10916_v4  ;;  %v12936_v18 = vld [vmem:[#allocation46_spill] sm:$0xff]  ;;  %v12938_v58 = vld [vmem:[#allocation47_spill] sm:$0xff]  ;;  %v12940_v0 = vld [vmem:[#allocation52_spill] sm:$0xff] }
 0x4e8   :  { %v4257_v20 = vmul.f32 %v10941_v39, %v10941_v39  ;;  %v10969_v26 = vmax.f32 %v3628_v47, 0.0  ;;  %v4404_v59 = vadd.f32 %v4264_v25, %v4263_v19  ;;  %v4265_v33 = vmul.f32 %v10949_v3, %v10949_v3  ;;  %v12942_v25 = vld [vmem:[#allocation39_spill] sm:$0xff] }
 0x4e9   :  { %v10973_v53 = vmax.f32 %v3632_v28, 0.0  ;;  %v10976_v41 = vmax.f32 %v12934_v10, 0.0  ;;  %v4378_v51 = vadd.f32 %v4377_v1, %v4241_v8  ;;  %v10979_v13 = vmax.f32 %v12936_v18, 0.0  ;;  %v12943_v18 = vld [vmem:[#allocation41_spill] sm:$0xff] }
 0x4ea   :  { %12932 = vst [vmem:[#allocation37_spill] sm:$0xff] %v10969_v26  ;;  %v10982_v4 = vmax.f32 %v12938_v58, 0.0  ;;  %v10985_v57 = vmax.f32 %v12940_v0, 0.0  ;;  %v10988_v47 = vadd.f32 %v4089_v38, %v10929_v11  ;;  %v4387_v19 = vadd.f32 %v4386_v40, %v4249_v12  ;;  %v12944_v58 = vld [vmem:[#allocation42_spill] sm:$0xff] }
 0x4eb   :  { %12933 = vst [vmem:[#allocation94_spill] sm:$0xff] %v10973_v53  ;;  %12935 = vst [vmem:[#allocation44_spill] sm:$0xff] %v10976_v41  ;;  %v4107_v28 = vadd.f32 %v4106_v63, %v10941_v39  ;;  %v3636_v10 = vadd.f32 %v12942_v25, %v10518_v14  ;;  %v4396_v7 = vadd.f32 %v4395_v24, %v4257_v20 }
 0x4ec   :  { %12937 = vst [vmem:[#allocation46_spill] sm:$0xff] %v10979_v13  ;;  %12939 = vst [vmem:[#allocation47_spill] sm:$0xff] %v10982_v4  ;;  %v4258_v1 = vmul.f32 %v10969_v26, %v10969_v26  ;;  %v3638_v8 = vadd.f32 %v12943_v18, %v10523_v52  ;;  %v3640_v0 = vadd.f32 %v12944_v58, %v10518_v14  ;;  %v12945_v14 = vld [vmem:[#allocation43_spill] sm:$0xff] }
 0x4ed   :  { %12941 = vst [vmem:[#allocation52_spill] sm:$0xff] %v10985_v57  ;;  %v4116_v9 = vadd.f32 %v4115_v61, %v10949_v3  ;;  %v4405_v38 = vadd.f32 %v4404_v59, %v4265_v33  ;;  %v4266_v40 = vmul.f32 %v10973_v53, %v10973_v53  ;;  %v4271_v12 = vmul.f32 %v10976_v41, %v10976_v41 }
 0x4ee   :  { %v4272_v63 = vmul.f32 %v10979_v13, %v10979_v13  ;;  %v4279_v24 = vmul.f32 %v10982_v4, %v10982_v4  ;;  %v4280_v20 = vmul.f32 %v10985_v57, %v10985_v57  ;;  %v3642_v25 = vadd.f32 %v12945_v14, %v10523_v52  ;;  %v12949_v14 = vld [vmem:[#allocation50_spill] sm:$0xff] }
 0x4ef   :  { %v11012_v61 = vadd.f32 %v4378_v51, %v4242_v29  ;;  %v11015_v59 = vadd.f32 %v4098_v6, %v10935_v62  ;;  %v4124_v33 = vadd.f32 %v10979_v13, %v10976_v41  ;;  %v11019_v18 = vmax.f32 %v3636_v10, 0.0 }
 0x4f0   :  { %v11021_v58 = vadd.f32 %v4387_v19, %v4250_v50  ;;  %v11024_v3 = vadd.f32 %v4107_v28, %v10969_v26  ;;  %v11026_v39 = vmax.f32 %v3638_v8, 0.0  ;;  %v11028_v11 = vmax.f32 %v3640_v0, 0.0 }
 0x4f1   :  { %12946 = vst [vmem:[#allocation39_spill] sm:$0xff] %v11019_v18  ;;  %v11030_v52 = vadd.f32 %v4396_v7, %v4258_v1  ;;  %v11033_v51 = vadd.f32 %v4116_v9, %v10973_v53  ;;  %v11035_v6 = vadd.f32 %v4405_v38, %v4266_v40  ;;  %v4133_v29 = vadd.f32 %v10985_v57, %v10982_v4  ;;  %v12951_v1 = vld [vmem:[#allocation15_spill] sm:$0xff]  ;;  %v12952_v53 = vld [vmem:[#allocation16_spill] sm:$0xff] }
 0x4f2   :  { %12947 = vst [vmem:[#allocation41_spill] sm:$0xff] %v11026_v39  ;;  %12948 = vst [vmem:[#allocation42_spill] sm:$0xff] %v11028_v11  ;;  %v4413_v50 = vadd.f32 %v4272_v63, %v4271_v12  ;;  %v4422_v19 = vadd.f32 %v4280_v20, %v4279_v24  ;;  %v11040_v26 = vmax.f32 %v3642_v25, 0.0  ;;  %v4125_v7 = vadd.f32 %v4124_v33, %v11019_v18 }
 0x4f3   :  { %v4273_v9 = vmul.f32 %v11019_v18, %v11019_v18  ;;  %v4274_v12 = vmul.f32 %v11026_v39, %v11026_v39  ;;  %v4281_v63 = vmul.f32 %v11028_v11, %v11028_v11 }
 0x4f4   :  { %12950 = vst [vmem:[#allocation43_spill] sm:$0xff] %v11040_v26  ;;  %v11067_v23 = vadd.f32 %v4125_v7, %v11026_v39 }
 0x4f5   :  { %v4414_v37 = vadd.f32 %v4413_v50, %v4273_v9 }
 0x4f6   :  { %v3678_v10 = vpop.f32.mrb[160].mxu0 }
 0x4f7   :  { %v3679_v28 = vadd.f32 %v3678_v10, %v12949_v14  ;;  %v3680_v8 = vpop.f32.mrb[161].mxu0  ;;  %v3791_v0 = vpop.f32.mrb[160].mxu1  ;;  %v4134_v10 = vadd.f32 %v4133_v29, %v11028_v11  ;;  %v11071_v29 = vmul.f32 %v11040_v26, %v11040_v26 }
 0x4f8   :  { %v3681_v38 = vadd.f32 %v3680_v8, %v12951_v1  ;;  %v3682_v40 = vpop.f32.mrb[162].mxu0  ;;  %v3792_v62 = vadd.f32 %v3791_v0, %v12952_v53  ;;  %v3793_v4 = vpop.f32.mrb[161].mxu1  ;;  %v12955_v0 = vld [vmem:[#allocation17_spill] sm:$0xff] }
 0x4f9   :  { %v11051_v24 = vmax.f32 %v3679_v28, 0.0  ;;  %v3683_v20 = vadd.f32 %v3682_v40, %v12949_v14  ;;  %v3684_v25 = vpop.f32.mrb[163].mxu0  ;;  %v3795_v33 = vpop.f32.mrb[162].mxu1  ;;  %v3794_v57 = vadd.f32 %v3793_v4, %v12955_v0  ;;  %v11075_v4 = vadd.f32 %v4422_v19, %v4281_v63 }
 0x4fa   :  { %v11055_v18 = vmax.f32 %v3681_v38, 0.0  ;;  %v3685_v8 = vadd.f32 %v3684_v25, %v12951_v1  ;;  %v3797_v41 = vpop.f32.mrb[163].mxu1  ;;  %v11063_v28 = vmax.f32 %v3792_v62, 0.0  ;;  %v3796_v40 = vadd.f32 %v3795_v33, %v12952_v53 }
 0x4fb   :  { %12953 = vst [vmem:[#allocation50_spill] sm:$0xff] %v11051_v24  ;;  %v4001_v13 = vadd.f32 %v10645_v54, %v11051_v24  ;;  %v11061_v56 = vmax.f32 %v3683_v20, 0.0  ;;  %12959 = vst [vmem:[#allocation96_spill] sm:$0xff] %v11075_v4  ;;  %v4163_v50 = vmul.f32 %v11051_v24, %v11051_v24  ;;  %v11085_v7 = vadd.f32 %v4134_v10, %v11040_v26 }
 0x4fc   :  { %12954 = vst [vmem:[#allocation15_spill] sm:$0xff] %v11055_v18  ;;  %12957 = vst [vmem:[#allocation17_spill] sm:$0xff] %v11063_v28  ;;  %v11073_v38 = vmax.f32 %v3685_v8, 0.0  ;;  %v11087_v9 = vmax.f32 %v3794_v57, 0.0  ;;  %v3798_v19 = vadd.f32 %v3797_v41, %v12955_v0  ;;  %v4164_v63 = vmul.f32 %v11055_v18, %v11055_v18 }
 0x4fd   :  { %12956 = vst [vmem:[#allocation16_spill] sm:$0xff] %v11061_v56  ;;  %v4010_v54 = vadd.f32 %v10675_v44, %v11061_v56  ;;  %v4171_v62 = vmul.f32 %v11061_v56, %v11061_v56  ;;  %v4002_v20 = vadd.f32 %v4001_v13, %v11055_v18  ;;  %v11092_v44 = vmax.f32 %v3796_v40, 0.0 }
 0x4fe   :  { %12958 = vst [vmem:[#allocation95_spill] sm:$0xff] %v11073_v38  ;;  %12960 = vst [vmem:[#allocation97_spill] sm:$0xff] %v11087_v9  ;;  %v3688_v25 = vpop.f32.mrb[164].mxu0  ;;  %v4172_v10 = vmul.f32 %v11073_v38, %v11073_v38  ;;  %v11106_v16 = vmax.f32 %v3798_v19, 0.0  ;;  %v4290_v30 = vadd.f32 %v10666_v55, %v4163_v50 }
 0x4ff   :  { %12961 = vst [vmem:[#allocation98_spill] sm:$0xff] %v11092_v44  ;;  %v3689_v33 = vadd.f32 %v3688_v25, %v12949_v14  ;;  %v3690_v8 = vpop.f32.mrb[165].mxu0  ;;  %v3801_v13 = vpop.f32.mrb[164].mxu1  ;;  %v4003_v56 = vadd.f32 %v4002_v20, %v11063_v28  ;;  %v4299_v26 = vadd.f32 %v10683_v35, %v4171_v62  ;;  %v4011_v20 = vadd.f32 %v4010_v54, %v11073_v38 }
 0x500   :  { %v3691_v57 = vadd.f32 %v3690_v8, %v12951_v1  ;;  %v3692_v24 = vpop.f32.mrb[166].mxu0  ;;  %v3802_v11 = vadd.f32 %v3801_v13, %v12952_v53  ;;  %v3803_v41 = vpop.f32.mrb[165].mxu1  ;;  %12963 = vst [vmem:[#allocation100_spill] sm:$0xff] %v11106_v16  ;;  %v11112_v35 = vadd.f32 %v4414_v37, %v4274_v12  ;;  %v4173_v19 = vmul.f32 %v11092_v44, %v11092_v44 }
 0x501   :  { %v11101_v39 = vmax.f32 %v3689_v33, 0.0  ;;  %v3693_v40 = vadd.f32 %v3692_v24, %v12949_v14  ;;  %v3694_v25 = vpop.f32.mrb[167].mxu0  ;;  %v4004_v48 = vadd.f32 %v4003_v56, %v11087_v9  ;;  %v3805_v18 = vpop.f32.mrb[166].mxu1  ;;  %v3804_v56 = vadd.f32 %v3803_v41, %v12955_v0 }
 0x502   :  { %v11108_v21 = vmax.f32 %v3691_v57, 0.0  ;;  %v3695_v8 = vadd.f32 %v3694_v25, %v12951_v1  ;;  %v3807_v13 = vpop.f32.mrb[167].mxu1  ;;  %12965 = vst [vmem:[#allocation102_spill] sm:$0xff] %v11112_v35  ;;  %v11119_v54 = vmax.f32 %v3802_v11, 0.0  ;;  %v4165_v33 = vmul.f32 %v11063_v28, %v11063_v28 }
 0x503   :  { %12962 = vst [vmem:[#allocation99_spill] sm:$0xff] %v11101_v39  ;;  %v4019_v24 = vadd.f32 %v10690_v42, %v11101_v39  ;;  %v11116_v62 = vmax.f32 %v3693_v40, 0.0  ;;  %4005 = vadd.xlane.f32.xlu0 %v4004_v48  ;;  %v4166_v37 = vmul.f32 %v11087_v9, %v11087_v9  ;;  %v4300_v12 = vadd.f32 %v4299_v26, %v4172_v10 }
 0x504   :  { %12964 = vst [vmem:[#allocation101_spill] sm:$0xff] %v11108_v21  ;;  %12967 = vst [vmem:[#allocation104_spill] sm:$0xff] %v11119_v54  ;;  %v11129_v42 = vmax.f32 %v3695_v8, 0.0  ;;  %v4012_v50 = vadd.f32 %v4011_v20, %v11092_v44  ;;  %v3806_v48 = vadd.f32 %v3805_v18, %v12952_v53  ;;  %v4174_v57 = vmul.f32 %v11106_v16, %v11106_v16 }
 0x505   :  { %12966 = vst [vmem:[#allocation103_spill] sm:$0xff] %v11116_v62  ;;  %v4028_v55 = vadd.f32 %v10693_v27, %v11116_v62  ;;  %v4020_v41 = vadd.f32 %v4019_v24, %v11108_v21  ;;  %v4291_v40 = vadd.f32 %v4290_v30, %v4164_v63  ;;  %v11136_v25 = vmax.f32 %v3804_v56, 0.0 }
 0x506   :  { %12968 = vst [vmem:[#allocation105_spill] sm:$0xff] %v11129_v42  ;;  %v3698_v11 = vpop.f32.mrb[168].mxu0  ;;  %v4301_v27 = vadd.f32 %v4300_v12, %v4173_v19  ;;  %v4013_v8 = vadd.f32 %v4012_v50, %v11106_v16  ;;  %v3808_v10 = vadd.f32 %v3807_v13, %v12955_v0  ;;  %v4179_v13 = vmul.f32 %v11101_v39, %v11101_v39 }
 0x507   :  { %12969 = vst [vmem:[#allocation106_spill] sm:$0xff] %v11136_v25  ;;  %v3699_v28 = vadd.f32 %v3698_v11, %v12949_v14  ;;  %v3700_v9 = vpop.f32.mrb[169].mxu0  ;;  %v3811_v26 = vpop.f32.mrb[168].mxu1  ;;  %v4021_v38 = vadd.f32 %v4020_v41, %v11119_v54  ;;  %v4292_v35 = vadd.f32 %v4291_v40, %v4165_v33  ;;  %v4029_v12 = vadd.f32 %v4028_v55, %v11129_v42 }
 0x508   :  { %v3701_v18 = vadd.f32 %v3700_v9, %v12951_v1  ;;  %v3702_v20 = vpop.f32.mrb[170].mxu0  ;;  %v3813_v44 = vpop.f32.mrb[169].mxu1  ;;  %v4302_v24 = vadd.f32 %v4301_v27, %v4174_v57  ;;  %4014 = vadd.xlane.f32.xlu0 %v4013_v8  ;;  %v3812_v56 = vadd.f32 %v3811_v26, %v12952_v53  ;;  %v4180_v57 = vmul.f32 %v11108_v21, %v11108_v21 }
 0x509   :  { %v3703_v30 = vadd.f32 %v3702_v20, %v12949_v14  ;;  %v3704_v63 = vpop.f32.mrb[171].mxu0  ;;  %v3815_v19 = vpop.f32.mrb[170].mxu1  ;;  %v11148_v50 = vmax.f32 %v3699_v28, 0.0  ;;  %v3814_v11 = vadd.f32 %v3813_v44, %v12955_v0  ;;  %v4187_v41 = vmul.f32 %v11116_v62, %v11116_v62 }
 0x50a   :  { %v3705_v9 = vadd.f32 %v3704_v63, %v12951_v1  ;;  %v3817_v33 = vpop.f32.mrb[171].mxu1  ;;  %v11156_v40 = vmax.f32 %v3806_v48, 0.0  ;;  %4303 = vadd.xlane.f32.xlu1 %v4302_v24  ;;  %v4022_v55 = vadd.f32 %v4021_v38, %v11136_v25  ;;  %v4188_v28 = vmul.f32 %v11129_v42, %v11129_v42 }
 0x50b   :  { %12970 = vst [vmem:[#allocation107_spill] sm:$0xff] %v11148_v50  ;;  %v11161_v27 = vmax.f32 %v3701_v18, 0.0  ;;  %v11163_v8 = vmax.f32 %v3703_v30, 0.0  ;;  %v4293_v44 = vadd.f32 %v4292_v35, %v4166_v37  ;;  %v11165_v26 = vmax.f32 %v3808_v10, 0.0 }
 0x50c   :  { %12971 = vst [vmem:[#allocation108_spill] sm:$0xff] %v11156_v40  ;;  %v11167_v20 = vmax.f32 %v3705_v9, 0.0  ;;  %v11169_v63 = vmax.f32 %v3812_v56, 0.0  ;;  %v4030_v48 = vadd.f32 %v4029_v12, %v11156_v40  ;;  %v4037_v24 = vadd.f32 %v10766_v49, %v11148_v50 }
 0x50d   :  { %12972 = vst [vmem:[#allocation109_spill] sm:$0xff] %v11161_v27  ;;  %12973 = vst [vmem:[#allocation110_spill] sm:$0xff] %v11163_v8  ;;  %v11176_v38 = vmul.f32 %v11148_v50, %v11148_v50  ;;  %v11178_v18 = vmax.f32 %v3814_v11, 0.0  ;;  %4294 = vadd.xlane.f32.xlu0 %v4293_v44  ;;  %v3816_v35 = vadd.f32 %v3815_v19, %v12952_v53 }
 0x50e   :  { %12974 = vst [vmem:[#allocation111_spill] sm:$0xff] %v11165_v26  ;;  %12975 = vst [vmem:[#allocation112_spill] sm:$0xff] %v11167_v20  ;;  %v3708_v37 = vpop.f32.mrb[172].mxu0  ;;  %4023 = vadd.xlane.f32.xlu1 %v4022_v55  ;;  %v3818_v30 = vadd.f32 %v3817_v33, %v12955_v0  ;;  %v4181_v12 = vmul.f32 %v11119_v54, %v11119_v54  ;;  %v4308_v49 = vadd.f32 %v10721_v34, %v4179_v13 }
 0x50f   :  { %12976 = vst [vmem:[#allocation113_spill] sm:$0xff] %v11169_v63  ;;  %12977 = vst [vmem:[#allocation114_spill] sm:$0xff] %v11178_v18  ;;  %v3709_v10 = vadd.f32 %v3708_v37, %v12949_v14  ;;  %v3710_v56 = vpop.f32.mrb[173].mxu0  ;;  %v3821_v9 = vpop.f32.mrb[172].mxu1  ;;  %v11188_v11 = vmul.f32 %v11161_v27, %v11161_v27  ;;  %v4046_v19 = vadd.f32 %v10856_v17, %v11163_v8  ;;  %v11203_v17 = vmax.f32 %v3816_v35, 0.0 }
 0x510   :  { %v11194_v55 = vmul.f32 %v11163_v8, %v11163_v8  ;;  %v3711_v33 = vadd.f32 %v3710_v56, %v12951_v1  ;;  %v3712_v44 = vpop.f32.mrb[174].mxu0  ;;  %v3823_v37 = vpop.f32.mrb[173].mxu1  ;;  %v11199_v54 = vmul.f32 %v11167_v20, %v11167_v20  ;;  %v4031_v34 = vadd.f32 %v4030_v48, %v11165_v26 }
 0x511   :  { %v4309_v13 = vadd.f32 %v4308_v49, %v4180_v57  ;;  %v3714_v16 = vpop.f32.mrb[175].mxu0  ;;  %v3822_v50 = vadd.f32 %v3821_v9, %v12952_v53  ;;  %v3825_v62 = vpop.f32.mrb[174].mxu1  ;;  %12978 = vst [vmem:[#allocation115_spill] sm:$0xff] %v11203_v17  ;;  %v11205_v39 = vmax.f32 %v3709_v10, 0.0  ;;  %v3713_v8 = vadd.f32 %v3712_v44, %v12949_v14 }
 0x512   :  { %v4317_v56 = vadd.f32 %v10723_v46, %v4187_v41  ;;  %v3827_v42 = vpop.f32.mrb[175].mxu1  ;;  %v11209_v21 = vmax.f32 %v3818_v30, 0.0  ;;  %v11211_v4 = vmax.f32 %v3711_v33, 0.0  ;;  %4032 = vadd.xlane.f32.xlu1 %v4031_v34  ;;  %v4182_v57 = vmul.f32 %v11136_v25, %v11136_v25 }
 0x513   :  { %12979 = vst [vmem:[#allocation116_spill] sm:$0xff] %v11205_v39  ;;  %v4310_v48 = vadd.f32 %v4309_v13, %v4181_v12  ;;  %v3715_v49 = vadd.f32 %v3714_v16, %v12951_v1  ;;  %v4189_v35 = vmul.f32 %v11156_v40, %v11156_v40  ;;  %v4190_v10 = vmul.f32 %v11165_v26, %v11165_v26 }
 0x514   :  { %12980 = vst [vmem:[#allocation117_spill] sm:$0xff] %v11209_v21  ;;  %12981 = vst [vmem:[#allocation118_spill] sm:$0xff] %v11211_v4  ;;  %v4318_v9 = vadd.f32 %v4317_v56, %v4188_v28  ;;  %v11220_v41 = vmax.f32 %v3822_v50, 0.0  ;;  %v3824_v30 = vadd.f32 %v3823_v37, %v12955_v0  ;;  %v4038_v33 = vadd.f32 %v4037_v24, %v11161_v27 }
 0x515   :  { %v4311_v46 = vadd.f32 %v4310_v48, %v4182_v57  ;;  %v4055_v44 = vadd.f32 %v10864_v31, %v11205_v39  ;;  %v11228_v16 = vmul.f32 %v11205_v39, %v11205_v39  ;;  %v11230_v12 = vmax.f32 %v3713_v8, 0.0 }
 0x516   :  { %12982 = vst [vmem:[#allocation119_spill] sm:$0xff] %v11220_v41  ;;  %v4319_v34 = vadd.f32 %v4318_v9, %v4189_v35  ;;  %v3718_v13 = vpop.f32.mrb[176].mxu0  ;;  %v11234_v28 = vmul.f32 %v11211_v4, %v11211_v4  ;;  %v4039_v50 = vadd.f32 %v4038_v33, %v11169_v63  ;;  %v4047_v31 = vadd.f32 %v4046_v19, %v11167_v20 }
 0x517   :  { %12983 = vst [vmem:[#allocation120_spill] sm:$0xff] %v11230_v12  ;;  %4312 = vadd.xlane.f32.xlu0 %v4311_v46  ;;  %v3719_v24 = vadd.f32 %v3718_v13, %v12949_v14  ;;  %v3720_v37 = vpop.f32.mrb[177].mxu0  ;;  %v3831_v56 = vpop.f32.mrb[176].mxu1  ;;  %v11239_v57 = vmax.f32 %v3715_v49, 0.0  ;;  %v3826_v8 = vadd.f32 %v3825_v62, %v12952_v53  ;;  %v3828_v33 = vadd.f32 %v3827_v42, %v12955_v0 }
 0x518   :  { %v4320_v48 = vadd.f32 %v4319_v34, %v4190_v10  ;;  %v3721_v35 = vadd.f32 %v3720_v37, %v12951_v1  ;;  %v3722_v9 = vpop.f32.mrb[178].mxu0  ;;  %v3833_v40 = vpop.f32.mrb[177].mxu1  ;;  %v4040_v26 = vadd.f32 %v4039_v50, %v11178_v18  ;;  %v4048_v13 = vadd.f32 %v4047_v31, %v11203_v17 }
 0x519   :  { %12984 = vst [vmem:[#allocation121_spill] sm:$0xff] %v11239_v57  ;;  %v11244_v46 = vmax.f32 %v3719_v24, 0.0  ;;  %v3724_v25 = vpop.f32.mrb[179].mxu0  ;;  %v3835_v19 = vpop.f32.mrb[178].mxu1  ;;  %v4197_v62 = vmul.f32 %v11169_v63, %v11169_v63  ;;  %v4326_v10 = vadd.f32 %v10852_v15, %v11176_v38  ;;  %v3723_v34 = vadd.f32 %v3722_v9, %v12949_v14 }
 0x51a   :  { %4321 = vadd.xlane.f32.xlu1 %v4320_v48  ;;  %v11248_v49 = vmax.f32 %v3721_v35, 0.0  ;;  %v3837_v50 = vpop.f32.mrb[179].mxu1  ;;  %v4064_v24 = vadd.f32 %v10873_v36, %v11230_v12  ;;  %v11259_v42 = vmul.f32 %v11230_v12, %v11230_v12  ;;  %v11261_v37 = vmax.f32 %v3824_v30, 0.0 }
 0x51b   :  { %12985 = vst [vmem:[#allocation122_spill] sm:$0xff] %v11244_v46  ;;  %4041 = vadd.xlane.f32.xlu0 %v4040_v26  ;;  %v3725_v31 = vadd.f32 %v3724_v25, %v12951_v1  ;;  %v4049_v48 = vadd.f32 %v4048_v13, %v11209_v21  ;;  %v4198_v15 = vmul.f32 %v11178_v18, %v11178_v18  ;;  %v11273_v9 = vmax.f32 %v3826_v8, 0.0 }
 0x51c   :  { %12986 = vst [vmem:[#allocation123_spill] sm:$0xff] %v11248_v49  ;;  %12987 = vst [vmem:[#allocation124_spill] sm:$0xff] %v11261_v37  ;;  %v4327_v38 = vadd.f32 %v4326_v10, %v11188_v11  ;;  %v3832_v35 = vadd.f32 %v3831_v56, %v12952_v53  ;;  %v11271_v36 = vmul.f32 %v11239_v57, %v11239_v57  ;;  %v11277_v30 = vmax.f32 %v3828_v33, 0.0 }
 0x51d   :  { %12988 = vst [vmem:[#allocation125_spill] sm:$0xff] %v11273_v9  ;;  %v4073_v26 = vadd.f32 %v10878_v43, %v11244_v46  ;;  %v11281_v25 = vmul.f32 %v11244_v46, %v11244_v46  ;;  %v11285_v11 = vmul.f32 %v11248_v49, %v11248_v49  ;;  %v11287_v13 = vmax.f32 %v3723_v34, 0.0 }
 0x51e   :  { %12989 = vst [vmem:[#allocation126_spill] sm:$0xff] %v11277_v30  ;;  %4050 = vadd.xlane.f32.xlu1 %v4049_v48  ;;  %v4328_v56 = vadd.f32 %v4327_v38, %v4197_v62  ;;  %v3728_v10 = vpop.f32.mrb[180].mxu0  ;;  %v11289_v8 = vmax.f32 %v3725_v31, 0.0  ;;  %v4205_v43 = vmul.f32 %v11203_v17, %v11203_v17  ;;  %v4335_v33 = vadd.f32 %v10861_v2, %v11194_v55 }
 0x51f   :  { %12990 = vst [vmem:[#allocation127_spill] sm:$0xff] %v11287_v13  ;;  %v4056_v63 = vadd.f32 %v4055_v44, %v11211_v4  ;;  %v3730_v18 = vpop.f32.mrb[181].mxu0  ;;  %v3841_v46 = vpop.f32.mrb[180].mxu1  ;;  %v11296_v39 = vmax.f32 %v3832_v35, 0.0  ;;  %v3834_v62 = vadd.f32 %v3833_v40, %v12955_v0  ;;  %v3729_v34 = vadd.f32 %v3728_v10, %v12949_v14 }
 0x520   :  { %12991 = vst [vmem:[#allocation128_spill] sm:$0xff] %v11289_v8  ;;  %v4329_v12 = vadd.f32 %v4328_v56, %v4198_v15  ;;  %v3732_v48 = vpop.f32.mrb[182].mxu0  ;;  %v3843_v31 = vpop.f32.mrb[181].mxu1  ;;  %v4336_v38 = vadd.f32 %v4335_v33, %v11199_v54  ;;  %v3836_v20 = vadd.f32 %v3835_v19, %v12952_v53  ;;  %v4065_v2 = vadd.f32 %v4064_v24, %v11239_v57 }
 0x521   :  { %12992 = vst [vmem:[#allocation129_spill] sm:$0xff] %v11296_v39  ;;  %v4057_v17 = vadd.f32 %v4056_v63, %v11220_v41  ;;  %v3734_v55 = vpop.f32.mrb[183].mxu0  ;;  %v3845_v44 = vpop.f32.mrb[182].mxu1  ;;  %v4082_v15 = vadd.f32 %v10887_v45, %v11287_v13  ;;  %v11308_v40 = vmul.f32 %v11287_v13, %v11287_v13  ;;  %v4206_v35 = vmul.f32 %v11209_v21, %v11209_v21 }
 0x522   :  { %4330 = vadd.xlane.f32.xlu0 %v4329_v12  ;;  %v3838_v54 = vadd.f32 %v3837_v50, %v12955_v0  ;;  %v3847_v63 = vpop.f32.mrb[183].mxu1  ;;  %v4337_v56 = vadd.f32 %v4336_v38, %v4205_v43  ;;  %v11314_v24 = vmax.f32 %v3729_v34, 0.0  ;;  %v3731_v12 = vadd.f32 %v3730_v18, %v12951_v1 }
 0x523   :  { %v4058_v19 = vadd.f32 %v4057_v17, %v11261_v37  ;;  %v11319_v45 = vmul.f32 %v11289_v8, %v11289_v8  ;;  %v11321_v10 = vmax.f32 %v3834_v62, 0.0  ;;  %v4213_v33 = vmul.f32 %v11220_v41, %v11220_v41 }
 0x524   :  { %12993 = vst [vmem:[#allocation130_spill] sm:$0xff] %v11314_v24  ;;  %v4344_v50 = vadd.f32 %v10870_v60, %v11228_v16  ;;  %v4338_v21 = vadd.f32 %v4337_v56, %v4206_v35  ;;  %v11327_v43 = vmax.f32 %v3836_v20, 0.0  ;;  %v4066_v17 = vadd.f32 %v4065_v2, %v11273_v9 }
 0x525   :  { %12994 = vst [vmem:[#allocation131_spill] sm:$0xff] %v11321_v10  ;;  %v3733_v34 = vadd.f32 %v3732_v48, %v12949_v14  ;;  %v11331_v18 = vmax.f32 %v3838_v54, 0.0  ;;  %v4214_v62 = vmul.f32 %v11261_v37, %v11261_v37  ;;  %v3735_v41 = vadd.f32 %v3734_v55, %v12951_v1 }
 0x526   :  { %12995 = vst [vmem:[#allocation132_spill] sm:$0xff] %v11327_v43  ;;  %4059 = vadd.xlane.f32.xlu0 %v4058_v19  ;;  %v4345_v38 = vadd.f32 %v4344_v50, %v11234_v28  ;;  %v3738_v13 = vpop.f32.mrb[184].mxu0  ;;  %4339 = vadd.xlane.f32.xlu1 %v4338_v21  ;;  %v11339_v60 = vadd.f32 %v10988_v47, %v11314_v24  ;;  %v11341_v20 = vmax.f32 %v3731_v12, 0.0 }
 0x527   :  { %12996 = vst [vmem:[#allocation133_spill] sm:$0xff] %v11331_v18  ;;  %v4221_v16 = vmul.f32 %v11273_v9, %v11273_v9  ;;  %v4353_v48 = vadd.f32 %v10875_v5, %v11259_v42  ;;  %v3740_v2 = vpop.f32.mrb[185].mxu0  ;;  %v3851_v35 = vpop.f32.mrb[184].mxu1  ;;  %v11349_v28 = vmul.f32 %v11314_v24, %v11314_v24  ;;  %v3842_v21 = vadd.f32 %v3841_v46, %v12952_v53 }
 0x528   :  { %12997 = vst [vmem:[#allocation134_spill] sm:$0xff] %v11341_v20  ;;  %v4346_v55 = vadd.f32 %v4345_v38, %v4213_v33  ;;  %v4074_v47 = vadd.f32 %v4073_v26, %v11248_v49  ;;  %v3742_v54 = vpop.f32.mrb[186].mxu0  ;;  %v3853_v56 = vpop.f32.mrb[185].mxu1  ;;  %v4067_v19 = vadd.f32 %v4066_v17, %v11277_v30  ;;  %v11354_v12 = vmax.f32 %v3733_v34, 0.0 }
 0x529   :  { %v3844_v50 = vadd.f32 %v3843_v31, %v12955_v0  ;;  %v4354_v5 = vadd.f32 %v4353_v48, %v11271_v36  ;;  %v3744_v42 = vpop.f32.mrb[187].mxu0  ;;  %v11358_v9 = vpop.f32.mrb[186].mxu1  ;;  %v11360_v24 = vmax.f32 %v3735_v41, 0.0  ;;  %v4222_v46 = vmul.f32 %v11277_v30, %v11277_v30 }
 0x52a   :  { %12998 = vst [vmem:[#allocation135_spill] sm:$0xff] %v11354_v12  ;;  %v4347_v37 = vadd.f32 %v4346_v55, %v4214_v62  ;;  %v4075_v26 = vadd.f32 %v4074_v47, %v11296_v39  ;;  %v11365_v33 = vpop.f32.mrb[187].mxu1  ;;  %4068 = vadd.xlane.f32.xlu1 %v4067_v19  ;;  %v3846_v34 = vadd.f32 %v3845_v44, %v12952_v53  ;;  %v11374_v41 = vmax.f32 %v3842_v21, 0.0 }
 0x52b   :  { %12999 = vst [vmem:[#allocation136_spill] sm:$0xff] %v11360_v24  ;;  %v4355_v17 = vadd.f32 %v4354_v5, %v4221_v16  ;;  %v3739_v31 = vadd.f32 %v3738_v13, %v12949_v14  ;;  %v4083_v36 = vadd.f32 %v4082_v15, %v11289_v8  ;;  %v11372_v62 = vmul.f32 %v11341_v20, %v11341_v20 }
 0x52c   :  { %4348 = vadd.xlane.f32.xlu0 %v4347_v37  ;;  %13000 = vst [vmem:[#allocation137_spill] sm:$0xff] %v11374_v41  ;;  %v4076_v38 = vadd.f32 %v4075_v26, %v11321_v10  ;;  %v3848_v48 = vadd.f32 %v3847_v63, %v12955_v0  ;;  %v11378_v55 = vmax.f32 %v3844_v50, 0.0  ;;  %v3741_v44 = vadd.f32 %v3740_v2, %v12951_v1 }
 0x52d   :  { %v4356_v16 = vadd.f32 %v4355_v17, %v4222_v46  ;;  %v4084_v13 = vadd.f32 %v4083_v36, %v11327_v43  ;;  %v4100_v15 = vadd.f32 %v11015_v59, %v11354_v12  ;;  %v11386_v47 = vmul.f32 %v11354_v12, %v11354_v12 }
 0x52e   :  { %13001 = vst [vmem:[#allocation138_spill] sm:$0xff] %v11378_v55  ;;  %v4229_v37 = vmul.f32 %v11296_v39, %v11296_v39  ;;  %v4362_v63 = vadd.f32 %v10880_v22, %v11281_v25  ;;  %v3748_v21 = vpop.f32.mrb[188].mxu0  ;;  %v11394_v19 = vmul.f32 %v11360_v24, %v11360_v24  ;;  %v11396_v2 = vmax.f32 %v3846_v34, 0.0 }
 0x52f   :  { %4357 = vadd.xlane.f32.xlu1 %v4356_v16  ;;  %v11398_v50 = vmax.f32 %v3739_v31, 0.0  ;;  %v3743_v59 = vadd.f32 %v3742_v54, %v12949_v14  ;;  %v3750_v5 = vpop.f32.mrb[189].mxu0  ;;  %v3861_v46 = vpop.f32.mrb[188].mxu1  ;;  %v11401_v26 = vmax.f32 %v3848_v48, 0.0  ;;  %v4230_v22 = vmul.f32 %v11321_v10, %v11321_v10 }
 0x530   :  { %13002 = vst [vmem:[#allocation139_spill] sm:$0xff] %v11396_v2  ;;  %4077 = vadd.xlane.f32.xlu0 %v4076_v38  ;;  %v4363_v25 = vadd.f32 %v4362_v63, %v11285_v11  ;;  %v3745_v17 = vadd.f32 %v3744_v42, %v12951_v1  ;;  %v3752_v36 = vpop.f32.mrb[190].mxu0  ;;  %v3863_v16 = vpop.f32.mrb[189].mxu1  ;;  %v11407_v34 = vmax.f32 %v3741_v44, 0.0  ;;  %v4085_v31 = vadd.f32 %v4084_v13, %v11331_v18 }
 0x531   :  { %13003 = vst [vmem:[#allocation140_spill] sm:$0xff] %v11398_v50  ;;  %13004 = vst [vmem:[#allocation141_spill] sm:$0xff] %v11401_v26  ;;  %v4237_v54 = vmul.f32 %v11327_v43, %v11327_v43  ;;  %v4371_v38 = vadd.f32 %v10923_v32, %v11308_v40  ;;  %v3754_v48 = vpop.f32.mrb[191].mxu0  ;;  %v11414_v39 = vpop.f32.mrb[190].mxu1  ;;  %v3852_v11 = vadd.f32 %v3851_v35, %v12952_v53  ;;  %v11426_v32 = vmax.f32 %v3743_v59, 0.0 }
 0x532   :  { %13005 = vst [vmem:[#allocation142_spill] sm:$0xff] %v11407_v34  ;;  %v4364_v10 = vadd.f32 %v4363_v25, %v4229_v37  ;;  %v3854_v42 = vadd.f32 %v3853_v56, %v12955_v0  ;;  %v4092_v44 = vadd.f32 %v11339_v60, %v11341_v20  ;;  %v11420_v63 = vpop.f32.mrb[191].mxu1  ;;  %v4109_v13 = vadd.f32 %v11024_v3, %v11398_v50 }
 0x533   :  { %v4259_v43 = vmul.f32 %v11398_v50, %v11398_v50  ;;  %4086 = vadd.xlane.f32.xlu1 %v4085_v31  ;;  %13006 = vst [vmem:[#allocation143_spill] sm:$0xff] %v11426_v32  ;;  %v4372_v40 = vadd.f32 %v4371_v38, %v11319_v45  ;;  %v11429_v35 = vmax.f32 %v3745_v17, 0.0  ;;  %v3749_v60 = vadd.f32 %v3748_v21, %v12949_v14 }
 0x534   :  { %v4365_v37 = vadd.f32 %v4364_v10, %v4230_v22  ;;  %v4093_v56 = vadd.f32 %v4092_v44, %v11374_v41  ;;  %v4238_v25 = vmul.f32 %v11331_v18, %v11331_v18  ;;  %v3751_v3 = vadd.f32 %v3750_v5, %v12951_v1 }
 0x535   :  { %13007 = vst [vmem:[#allocation144_spill] sm:$0xff] %v11429_v35  ;;  %v4373_v30 = vadd.f32 %v4372_v40, %v4237_v54  ;;  %v4101_v50 = vadd.f32 %v4100_v15, %v11360_v24  ;;  %v4260_v59 = vmul.f32 %v11407_v34, %v11407_v34  ;;  %v11439_v45 = vmax.f32 %v3852_v11, 0.0 }
 0x536   :  { %4366 = vadd.xlane.f32.xlu0 %v4365_v37  ;;  %v11441_v10 = vmax.f32 %v3854_v42, 0.0  ;;  %v4094_v22 = vadd.f32 %v4093_v56, %v11378_v55  ;;  %v4118_v21 = vadd.f32 %v11033_v51, %v11426_v32  ;;  %v4267_v17 = vmul.f32 %v11426_v32, %v11426_v32  ;;  %v13060_v32 = vld [vmem:[#allocation68_spill] sm:$0xff] }
 0x537   :  { %13008 = vst [vmem:[#allocation145_spill] sm:$0xff] %v11439_v45  ;;  %v4374_v31 = vadd.f32 %v4373_v30, %v4238_v25  ;;  %v4102_v5 = vadd.f32 %v4101_v50, %v11396_v2  ;;  %v3856_v15 = vadd.f32 %v11358_v9, %v12952_v53  ;;  %v11451_v54 = vmax.f32 %v3749_v60, 0.0 }
 0x538   :  { %13009 = vst [vmem:[#allocation146_spill] sm:$0xff] %v11441_v10  ;;  %v4245_v38 = vmul.f32 %v11374_v41, %v11374_v41  ;;  %v4380_v11 = vadd.f32 %v11012_v61, %v11349_v28  ;;  %v4268_v51 = vmul.f32 %v11429_v35, %v11429_v35  ;;  %v3858_v30 = vadd.f32 %v11365_v33, %v12955_v0 }
 0x539   :  { %13010 = vst [vmem:[#allocation147_spill] sm:$0xff] %v11451_v54  ;;  %4375 = vadd.xlane.f32.xlu1 %v4374_v31  ;;  %v11461_v42 = vmax.f32 %v3751_v3, 0.0  ;;  %v3753_v50 = vadd.f32 %v3752_v36, %v12949_v14  ;;  %v4103_v9 = vadd.f32 %v4102_v5, %v11401_v26  ;;  %v4246_v44 = vmul.f32 %v11378_v55, %v11378_v55 }
 0x53a   :  { %4095 = vadd.xlane.f32.xlu0 %v4094_v22  ;;  %v4381_v40 = vadd.f32 %v4380_v11, %v11372_v62  ;;  %v3755_v61 = vadd.f32 %v3754_v48, %v12951_v1  ;;  %v3862_v37 = vadd.f32 %v3861_v46, %v12952_v53  ;;  %v4253_v33 = vmul.f32 %v11396_v2, %v11396_v2  ;;  %v13049_v2 = vld [vmem:[#allocation64_spill] sm:$0xff] }
 0x53b   :  { %13011 = vst [vmem:[#allocation148_spill] sm:$0xff] %v11461_v42  ;;  %v11469_v28 = vmax.f32 %v3753_v50, 0.0  ;;  %v4389_v14 = vadd.f32 %v11021_v58, %v11386_v47  ;;  %v11476_v36 = vmax.f32 %v3856_v15, 0.0  ;;  %v4127_v56 = vadd.f32 %v11067_v23, %v11451_v54 }
 0x53c   :  { %v4382_v60 = vadd.f32 %v4381_v40, %v4245_v38  ;;  %v4110_v62 = vadd.f32 %v4109_v13, %v11407_v34  ;;  %v4275_v1 = vmul.f32 %v11451_v54, %v11451_v54  ;;  %v4276_v46 = vmul.f32 %v11461_v42, %v11461_v42 }
 0x53d   :  { %13012 = vst [vmem:[#allocation149_spill] sm:$0xff] %v11469_v28  ;;  %13013 = vst [vmem:[#allocation150_spill] sm:$0xff] %v11476_v36  ;;  %4104 = vadd.xlane.f32.xlu1 %v4103_v9  ;;  %v3864_v48 = vadd.f32 %v3863_v16, %v12955_v0  ;;  %v4390_v25 = vadd.f32 %v4389_v14, %v11394_v19  ;;  %v11487_v47 = vmax.f32 %v3755_v61, 0.0  ;;  %v11494_v22 = vmax.f32 %v3862_v37, 0.0  ;;  %v13016_v37 = vld [vmem:[#allocation96_spill] sm:$0xff] }
 0x53e   :  { %v4383_v58 = vadd.f32 %v4382_v60, %v4246_v44  ;;  %v4254_v23 = vmul.f32 %v11401_v26, %v11401_v26  ;;  %v4111_v3 = vadd.f32 %v4110_v62, %v11439_v45  ;;  %v4136_v13 = vadd.f32 %v11085_v7, %v11469_v28 }
 0x53f   :  { %13014 = vst [vmem:[#allocation151_spill] sm:$0xff] %v11487_v47  ;;  %13015 = vst [vmem:[#allocation152_spill] sm:$0xff] %v11494_v22  ;;  %v4391_v31 = vadd.f32 %v4390_v25, %v4253_v33  ;;  %v4119_v5 = vadd.f32 %v4118_v21, %v11429_v35  ;;  %v4283_v19 = vmul.f32 %v11469_v28, %v11469_v28  ;;  %v11516_v33 = vmax.f32 %v3864_v48, 0.0 }
 0x540   :  { %4384 = vadd.xlane.f32.xlu0 %v4383_v58  ;;  %v4112_v16 = vadd.f32 %v4111_v3, %v11441_v10  ;;  %v4261_v15 = vmul.f32 %v11439_v45, %v11439_v45  ;;  %v4398_v38 = vadd.f32 %v11030_v52, %v4259_v43  ;;  %v3866_v7 = vadd.f32 %v11414_v39, %v12952_v53  ;;  %v13019_v53 = vld [vmem:[#allocation102_spill] sm:$0xff]  ;;  %v13048_v45 = vld [vmem:[#allocation60_spill] sm:$0xff] }
 0x541   :  { %v4392_v11 = vadd.f32 %v4391_v31, %v4254_v23  ;;  %v4120_v50 = vadd.f32 %v4119_v5, %v11476_v36  ;;  %v4262_v21 = vmul.f32 %v11441_v10, %v11441_v10  ;;  %v4269_v44 = vmul.f32 %v11476_v36, %v11476_v36  ;;  %13018 = vst [vmem:[#allocation153_spill] sm:$0xff] %v11516_v33 }
 0x542   :  { %v4399_v9 = vadd.f32 %v4398_v38, %v4260_v59  ;;  %v4407_v40 = vadd.f32 %v11035_v6, %v4267_v17  ;;  %v4128_v61 = vadd.f32 %v4127_v56, %v11461_v42  ;;  %v4424_v52 = vadd.f32 %v13016_v37, %v11071_v29  ;;  %v8954_v37 = vld [vmem:[#allocation5 + $0x28] ss:$16 sps:$4 sm:$0xff]  }
 0x543   :  { %v11514_v43 = vmax.f32 %v3858_v30, 0.0  ;;  %4393 = vadd.xlane.f32.xlu1 %v4392_v11  ;;  %v4416_v39 = vadd.f32 %v13019_v53, %v4275_v1  ;;  %v4284_v59 = vmul.f32 %v11487_v47, %v11487_v47  ;;  %v11522_v17 = vmax.f32 %v3866_v7, 0.0  ;;  %v8947_v7 = vld [vmem:[#allocation5 + $0x4] ss:$16 sps:$4 sm:$0xff]   ;;  %v8962_v53 = vld [vmem:[#allocation5 + $0x4c] ss:$16 sps:$4 sm:$0xff]  }
 0x544   :  { %4113 = vadd.xlane.f32.xlu0 %v4112_v16  ;;  %v4400_v14 = vadd.f32 %v4399_v9, %v4261_v15  ;;  %v4408_v60 = vadd.f32 %v4407_v40, %v4268_v51  ;;  %v4129_v6 = vadd.f32 %v4128_v61, %v11494_v22  ;;  %v4137_v29 = vadd.f32 %v4136_v13, %v11487_v47  ;;  %v8948_v9 = vld [vmem:[#allocation5 + $0x8] ss:$16 sps:$4 sm:$0xff]   ;;  %v8956_v40 = vld [vmem:[#allocation5 + $0x2c] ss:$16 sps:$4 sm:$0xff]   ;;  %v8951_v61 = vld [vmem:[#allocation5 + $0x20] ss:$16 sps:$4 sm:$0xff]  }
 0x545   :  { %13017 = vst [vmem:[#allocation96_spill] sm:$0xff] %v11514_v43  ;;  %13020 = vst [vmem:[#allocation102_spill] sm:$0xff] %v11522_v17  ;;  %v4121_v56 = vadd.f32 %v4120_v50, %v11514_v43  ;;  %v4425_v30 = vadd.f32 %v4424_v52, %v4283_v19  ;;  %v4277_v1 = vmul.f32 %v11494_v22, %v11494_v22  ;;  %v8950_v50 = vld [vmem:[#allocation5 + $0xc] ss:$16 sps:$4 sm:$0xff]   ;;  %7397 = vmatprep.subr.bf16.mxu0 %v8947_v7  ;;  %v8959_v52 = vld [vmem:[#allocation5 + $0x44] ss:$16 sps:$4 sm:$0xff]  }
 0x546   :  { %v4401_v62 = vadd.f32 %v4400_v14, %v4262_v21  ;;  %v4409_v48 = vadd.f32 %v4408_v60, %v4269_v44  ;;  %v4417_v25 = vadd.f32 %v4416_v39, %v4276_v46  ;;  %v3868_v58 = vadd.f32 %v11420_v63, %v12955_v0  ;;  %v8945_v21 = vld [vmem:[#allocation5] ss:$16 sps:$4 sm:$0xff]   ;;  %7561 = vmatprep.subr.bf16.mxu1 %v8950_v50  ;;  %v8953_v44 = vld [vmem:[#allocation5 + $0x24] ss:$16 sps:$4 sm:$0xff]   ;;  %v8968_v60 = vld [vmem:[#allocation5 + $0x6c] ss:$16 sps:$4 sm:$0xff]  }
 0x547   :  { %4122 = vadd.xlane.f32.xlu1 %v4121_v56  ;;  %v4270_v51 = vmul.f32 %v11514_v43, %v11514_v43  ;;  %v4130_v23 = vadd.f32 %v4129_v6, %v11516_v33  ;;  %v4138_v13 = vadd.f32 %v4137_v29, %v11522_v17  ;;  %v4285_v31 = vmul.f32 %v11522_v17, %v11522_v17  ;;  %v8957_v39 = vld [vmem:[#allocation5 + $0x40] ss:$16 sps:$4 sm:$0xff]   ;;  %v8965_v14 = vld [vmem:[#allocation5 + $0x64] ss:$16 sps:$4 sm:$0xff]   ;;  %v8966_v56 = vld [vmem:[#allocation5 + $0x68] ss:$16 sps:$4 sm:$0xff]  }
 0x548   :  { %4402 = vadd.xlane.f32.xlu0 %v4401_v62  ;;  %v4426_v5 = vadd.f32 %v4425_v30, %v4284_v59  ;;  %v4278_v46 = vmul.f32 %v11516_v33, %v11516_v33  ;;  %v4418_v19 = vadd.f32 %v4417_v25, %v4277_v1  ;;  %v11538_v16 = vmax.f32 %v3868_v58, 0.0  ;;  %7398 = vmatpush1.bf16.msra.mxu0 %v8945_v21  ;;  %v8960_v59 = vld [vmem:[#allocation5 + $0x48] ss:$16 sps:$4 sm:$0xff]   ;;  %v8963_v6 = vld [vmem:[#allocation5 + $0x60] ss:$16 sps:$4 sm:$0xff]  }
 0x549   :  { %v4410_v3 = vadd.f32 %v4409_v48, %v4270_v51  ;;  %7562 = vmatpush1.bf16.msra.mxu1 %v8948_v9  ;;  %7399 = vmatprep.subr.bf16.mxu0 %v8953_v44  ;;  %v8971_v29 = vld [vmem:[#allocation5 + $0x84] ss:$16 sps:$4 sm:$0xff]   ;;  %v8974_v30 = vld [vmem:[#allocation5 + $0x8c] ss:$16 sps:$4 sm:$0xff]   ;;  %v8969_v62 = vld [vmem:[#allocation5 + $0x80] ss:$16 sps:$4 sm:$0xff]  }
 0x54a   :  { %13021 = vst [vmem:[#allocation154_spill] sm:$0xff] %v11538_v16  ;;  %v4139_v0 = vadd.f32 %v4138_v13, %v11538_v16  ;;  %v4427_v63 = vadd.f32 %v4426_v5, %v4285_v31  ;;  %v4419_v15 = vadd.f32 %v4418_v19, %v4278_v46  ;;  %v4286_v38 = vmul.f32 %v11538_v16, %v11538_v16  ;;  %v8972_v48 = vld [vmem:[#allocation5 + $0x88] ss:$16 sps:$4 sm:$0xff]   ;;  %v8977_v1 = vld [vmem:[#allocation5 + $0xa4] ss:$16 sps:$4 sm:$0xff]  }
 0x54b   :  { %4411 = vadd.xlane.f32.xlu1 %v4410_v3  ;;  %7563 = vmatprep.subr.bf16.mxu1 %v8956_v40  ;;  %v8980_v25 = vld [vmem:[#allocation5 + $0xac] ss:$16 sps:$4 sm:$0xff]   ;;  %v8975_v58 = vld [vmem:[#allocation5 + $0xa0] ss:$16 sps:$4 sm:$0xff]   ;;  %v8978_v51 = vld [vmem:[#allocation5 + $0xa8] ss:$16 sps:$4 sm:$0xff]  }
 0x54c   :  { %4131 = vadd.xlane.f32.xlu0 %v4130_v23  ;;  %v4428_v11 = vadd.f32 %v4427_v63, %v4286_v38  ;;  %7400 = vmatpush1.bf16.msra.mxu0 %v8951_v61  ;;  %v8981_v23 = vld [vmem:[#allocation5 + $0xc0] ss:$16 sps:$4 sm:$0xff]   ;;  %v8983_v3 = vld [vmem:[#allocation5 + $0xc4] ss:$16 sps:$4 sm:$0xff]   ;;  %v8984_v13 = vld [vmem:[#allocation5 + $0xc8] ss:$16 sps:$4 sm:$0xff]  }
 0x54d   :  { %7564 = vmatpush1.bf16.msra.mxu1 %v8954_v37  ;;  %7401 = vmatprep.subr.bf16.mxu0 %v8959_v52  ;;  %v8986_v31 = vld [vmem:[#allocation5 + $0xcc] ss:$16 sps:$4 sm:$0xff]   ;;  %v8989_v5 = vld [vmem:[#allocation5 + $0xe4] ss:$16 sps:$4 sm:$0xff]   ;;  %v8987_v19 = vld [vmem:[#allocation5 + $0xe0] ss:$16 sps:$4 sm:$0xff]  }
 0x54e   :  { %7565 = vmatprep.subr.bf16.mxu1 %v8962_v53  ;;  %v8992_v46 = vld [vmem:[#allocation5 + $0xec] ss:$16 sps:$4 sm:$0xff]   ;;  %v8995_v63 = vld [vmem:[#allocation5 + $0x104] ss:$16 sps:$4 sm:$0xff]   ;;  %v8993_v38 = vld [vmem:[#allocation5 + $0x100] ss:$16 sps:$4 sm:$0xff]  }
 0x54f   :  { %4140 = vadd.xlane.f32.xlu1 %v4139_v0  ;;  %v8990_v0 = vld [vmem:[#allocation5 + $0xe8] ss:$16 sps:$4 sm:$0xff]   ;;  %v9001_v7 = vld [vmem:[#allocation5 + $0x124] ss:$16 sps:$4 sm:$0xff]   ;;  %v9004_v50 = vld [vmem:[#allocation5 + $0x12c] ss:$16 sps:$4 sm:$0xff]  }
 0x550   :  { %4420 = vadd.xlane.f32.xlu0 %v4419_v15  ;;  %7402 = vmatpush1.bf16.msra.mxu0 %v8957_v39  ;;  %v8998_v15 = vld [vmem:[#allocation5 + $0x10c] ss:$16 sps:$4 sm:$0xff]   ;;  %v8999_v21 = vld [vmem:[#allocation5 + $0x120] ss:$16 sps:$4 sm:$0xff]   ;;  %v9002_v9 = vld [vmem:[#allocation5 + $0x128] ss:$16 sps:$4 sm:$0xff]  }
 0x551   :  { %7566 = vmatpush1.bf16.msra.mxu1 %v8960_v59  ;;  %7403 = vmatprep.subr.bf16.mxu0 %v8965_v14  ;;  %v9007_v44 = vld [vmem:[#allocation5 + $0x144] ss:$16 sps:$4 sm:$0xff]   ;;  %v9010_v40 = vld [vmem:[#allocation5 + $0x14c] ss:$16 sps:$4 sm:$0xff]   ;;  %v9005_v61 = vld [vmem:[#allocation5 + $0x140] ss:$16 sps:$4 sm:$0xff]  }
 0x552   :  { %7567 = vmatprep.subr.bf16.mxu1 %v8968_v60  ;;  %v9008_v37 = vld [vmem:[#allocation5 + $0x148] ss:$16 sps:$4 sm:$0xff]   ;;  %v9013_v52 = vld [vmem:[#allocation5 + $0x164] ss:$16 sps:$4 sm:$0xff]   ;;  %v9016_v53 = vld [vmem:[#allocation5 + $0x16c] ss:$16 sps:$4 sm:$0xff]  }
 0x553   :  { %4429 = vadd.xlane.f32.xlu1 %v4428_v11  ;;  %v8996_v11 = vld [vmem:[#allocation5 + $0x108] ss:$16 sps:$4 sm:$0xff]   ;;  %v9011_v39 = vld [vmem:[#allocation5 + $0x160] ss:$16 sps:$4 sm:$0xff]   ;;  %v9019_v14 = vld [vmem:[#allocation5 + $0x184] ss:$16 sps:$4 sm:$0xff]  }
 0x554   :  { %7404 = vmatpush1.bf16.msra.mxu0 %v8963_v6  ;;  %v9014_v59 = vld [vmem:[#allocation5 + $0x168] ss:$16 sps:$4 sm:$0xff]   ;;  %v9022_v60 = vld [vmem:[#allocation5 + $0x18c] ss:$16 sps:$4 sm:$0xff]   ;;  %v9017_v6 = vld [vmem:[#allocation5 + $0x180] ss:$16 sps:$4 sm:$0xff]  }
 0x555   :  { %7568 = vmatpush1.bf16.msra.mxu1 %v8966_v56  ;;  %7405 = vmatprep.subr.bf16.mxu0 %v8971_v29  ;;  %v9020_v56 = vld [vmem:[#allocation5 + $0x188] ss:$16 sps:$4 sm:$0xff]   ;;  %v9025_v29 = vld [vmem:[#allocation5 + $0x1a4] ss:$16 sps:$4 sm:$0xff]  }
 0x556   :  { %7569 = vmatprep.subr.bf16.mxu1 %v8974_v30  ;;  %v9028_v30 = vld [vmem:[#allocation5 + $0x1ac] ss:$16 sps:$4 sm:$0xff]  }
 0x558   :  { %7406 = vmatpush1.bf16.msra.mxu0 %v8969_v62  ;;  %v9023_v62 = vld [vmem:[#allocation5 + $0x1a0] ss:$16 sps:$4 sm:$0xff]  }
 0x559   :  { %7570 = vmatpush1.bf16.msra.mxu1 %v8972_v48  ;;  %7407 = vmatprep.subr.bf16.mxu0 %v8977_v1  ;;  %v9026_v48 = vld [vmem:[#allocation5 + $0x1a8] ss:$16 sps:$4 sm:$0xff]   ;;  %v9031_v1 = vld [vmem:[#allocation5 + $0x1c4] ss:$16 sps:$4 sm:$0xff]  }
 0x55a   :  { %7571 = vmatprep.subr.bf16.mxu1 %v8980_v25  ;;  %v9034_v25 = vld [vmem:[#allocation5 + $0x1cc] ss:$16 sps:$4 sm:$0xff]  }
 0x55c   :  { %7408 = vmatpush1.bf16.msra.mxu0 %v8975_v58  ;;  %v9029_v58 = vld [vmem:[#allocation5 + $0x1c0] ss:$16 sps:$4 sm:$0xff]  }
 0x55d   :  { %7572 = vmatpush1.bf16.msra.mxu1 %v8978_v51  ;;  %7409 = vmatprep.subr.bf16.mxu0 %v8983_v3  ;;  %v9032_v51 = vld [vmem:[#allocation5 + $0x1c8] ss:$16 sps:$4 sm:$0xff]   ;;  %v9040_v3 = vld [vmem:[#allocation5 + $0x1ec] ss:$16 sps:$4 sm:$0xff]  }
 0x55e   :  { %7573 = vmatprep.subr.bf16.mxu1 %v8986_v31  ;;  %v9038_v31 = vld [vmem:[#allocation5 + $0x1e8] ss:$16 sps:$4 sm:$0xff]  }
 0x560   :  { %7410 = vmatpush1.bf16.msra.mxu0 %v8981_v23  ;;  %v9037_v23 = vld [vmem:[#allocation5 + $0x1e4] ss:$16 sps:$4 sm:$0xff]  }
 0x561   :  { %7574 = vmatpush1.bf16.msra.mxu1 %v8984_v13  ;;  %7411 = vmatprep.subr.bf16.mxu0 %v8989_v5  ;;  %v9035_v13 = vld [vmem:[#allocation5 + $0x1e0] ss:$16 sps:$4 sm:$0xff]   ;;  %v9043_v5 = vld [vmem:[#allocation5 + $0x204] ss:$16 sps:$4 sm:$0xff]  }
 0x562   :  { %7575 = vmatprep.subr.bf16.mxu1 %v8992_v46 }
 0x564   :  { %7412 = vmatpush1.bf16.msra.mxu0 %v8987_v19  ;;  %v9046_v19 = vld [vmem:[#allocation5 + $0x20c] ss:$16 sps:$4 sm:$0xff]  }
 0x565   :  { %7576 = vmatpush1.bf16.msra.mxu1 %v8990_v0  ;;  %7413 = vmatprep.subr.bf16.mxu0 %v8995_v63 }
 0x566   :  { %7577 = vmatprep.subr.bf16.mxu1 %v8998_v15 }
 0x568   :  { %7414 = vmatpush1.bf16.msra.mxu0 %v8993_v38 }
 0x569   :  { %7578 = vmatpush1.bf16.msra.mxu1 %v8996_v11  ;;  %7415 = vmatprep.subr.bf16.mxu0 %v9001_v7 }
 0x56a   :  { %7579 = vmatprep.subr.bf16.mxu1 %v9004_v50 }
 0x56c   :  { %7416 = vmatpush1.bf16.msra.mxu0 %v8999_v21 }
 0x56d   :  { %7580 = vmatpush1.bf16.msra.mxu1 %v9002_v9  ;;  %7417 = vmatprep.subr.bf16.mxu0 %v9007_v44 }
 0x56e   :  { %7581 = vmatprep.subr.bf16.mxu1 %v9010_v40 }
 0x570   :  { %7418 = vmatpush1.bf16.msra.mxu0 %v9005_v61 }
 0x571   :  { %7582 = vmatpush1.bf16.msra.mxu1 %v9008_v37  ;;  %7419 = vmatprep.subr.bf16.mxu0 %v9013_v52 }
 0x572   :  { %7583 = vmatprep.subr.bf16.mxu1 %v9016_v53 }
 0x574   :  { %7420 = vmatpush1.bf16.msra.mxu0 %v9011_v39  ;;  %v9407_v39 = vld [vmem:[#allocation8 + $0x1] ss:$4 sm:$0xff] }
 0x575   :  { %7584 = vmatpush1.bf16.msra.mxu1 %v9014_v59  ;;  %7421 = vmatprep.subr.bf16.mxu0 %v9019_v14  ;;  %v13024_v59 = vld [vmem:[#allocation26_spill] sm:$0xff] }
 0x576   :  { %7585 = vmatprep.subr.bf16.mxu1 %v9022_v60  ;;  %v11552_v14 = vrot.slane %v9407_v39, %v13024_v59 }
 0x578   :  { %7422 = vmatpush1.bf16.msra.mxu0 %v9017_v6 }
 0x579   :  { %7586 = vmatpush1.bf16.msra.mxu1 %v9020_v56  ;;  %7423 = vmatprep.subr.bf16.mxu0 %v9025_v29  ;;  %v13026_v56 = vld [vmem:[#allocation27_spill] sm:$0xff] }
 0x57a   :  { %7587 = vmatprep.subr.bf16.mxu1 %v9028_v30  ;;  %v11557_v29 = vrot.slane %v9407_v39, %v13026_v56  ;;  %v13027_v30 = vld [vmem:[#allocation28_spill] sm:$0xff] }
 0x57c   :  { %7424 = vmatpush1.bf16.msra.mxu0 %v9023_v62  ;;  %v11560_v62 = vrot.slane %v9407_v39, %v13027_v30 }
 0x57d   :  { %7588 = vmatpush1.bf16.msra.mxu1 %v9026_v48  ;;  %7425 = vmatprep.subr.bf16.mxu0 %v9031_v1  ;;  %v13029_v48 = vld [vmem:[#allocation29_spill] sm:$0xff] }
 0x57e   :  { %7589 = vmatprep.subr.bf16.mxu1 %v9034_v25  ;;  %13028 = vst [vmem:[#allocation158_spill] sm:$0xff] %v11560_v62  ;;  %v11563_v1 = vrot.slane %v9407_v39, %v13029_v48 }
 0x580   :  { %7426 = vmatpush1.bf16.msra.mxu0 %v9029_v58  ;;  %13030 = vst [vmem:[#allocation159_spill] sm:$0xff] %v11563_v1  ;;  %v9408_v58 = vld [vmem:[#allocation8 + $0x2] ss:$4 sm:$0xff] }
 0x581   :  { %7590 = vmatpush1.bf16.msra.mxu1 %v9032_v51  ;;  %7427 = vmatprep.subr.bf16.mxu0 %v9037_v23  ;;  %v11566_v51 = vrot.slane %v9408_v58, %v13024_v59  ;;  %v11569_v23 = vrot.slane %v9408_v58, %v13026_v56 }
 0x582   :  { %7591 = vmatprep.subr.bf16.mxu1 %v9040_v3  ;;  %v11572_v3 = vrot.slane %v9408_v58, %v13027_v30 }
 0x584   :  { %7428 = vmatpush1.bf16.msra.mxu0 %v9035_v13  ;;  %13031 = vst [vmem:[#allocation160_spill] sm:$0xff] %v11572_v3  ;;  %v11575_v13 = vrot.slane %v9408_v58, %v13029_v48  ;;  %v13041_v58 = vld [vmem:[#allocation57_spill] sm:$0xff] }
 0x585   :  { %7592 = vmatpush1.bf16.msra.mxu1 %v9038_v31  ;;  %7438 = vmatprep.subr.bf16.mxu0 %v9043_v5  ;;  %v13033_v31 = vld [vmem:[#allocation45_spill] sm:$0xff] }
 0x586   :  { %7602 = vmatprep.subr.bf16.mxu1 %v9046_v19  ;;  %13032 = vst [vmem:[#allocation161_spill] sm:$0xff] %v11575_v13 }
 0x590   :  { %v4006_v46 = vpop.xlane.xlu0 %4005 }
 0x591   :  { %v11545_v15 = vmul.f32 0.0009765625, %v4006_v46 }
 0x593   :  { %13023 = vst [vmem:[#allocation156_spill] sm:$0xff] %v11545_v15  ;;  %v4447_v44 = vmul.f32 %v11545_v15, %v11545_v15  ;;  %v4495_v5 = vsub.f32 %v13033_v31, %v11545_v15 }
 0x595   :  { %v4015_v0 = vpop.xlane.xlu0 %4014 }
 0x596   :  { %v11543_v63 = vmul.f32 0.0009765625, %v4015_v0  ;;  %v13034_v0 = vld [vmem:[#allocation48_spill] sm:$0xff] }
 0x597   :  { %v4304_v38 = vpop.xlane.xlu1 %4303 }
 0x598   :  { %13022 = vst [vmem:[#allocation155_spill] sm:$0xff] %v11543_v63  ;;  %v4432_v11 = vmul.f32 0.0009765625, %v4304_v38  ;;  %v4448_v7 = vmul.f32 %v11543_v63, %v11543_v63  ;;  %v4496_v38 = vsub.f32 %v13034_v0, %v11545_v15 }
 0x59a   :  { %v4464_v50 = vsub.f32 %v4432_v11, %v4448_v7  ;;  %v4295_v21 = vpop.xlane.xlu0 %4294 }
 0x59b   :  { %v4024_v9 = vpop.xlane.xlu1 %4023  ;;  %v4431_v40 = vmul.f32 0.0009765625, %v4295_v21 }
 0x59c   :  { %v4480_v61 = vmax.f32 %v4464_v50, 0.0  ;;  %v11554_v60 = vmul.f32 0.0009765625, %v4024_v9  ;;  %v13035_v50 = vld [vmem:[#allocation54_spill] sm:$0xff]  ;;  %v13036_v9 = vld [vmem:[#allocation53_spill] sm:$0xff] }
 0x59d   :  { %v4463_v37 = vsub.f32 %v4431_v40, %v4447_v44  ;;  %v4498_v21 = vsub.f32 %v13035_v50, %v11545_v15  ;;  %v13037_v40 = vld [vmem:[#allocation49_spill] sm:$0xff]  ;;  %v13042_v50 = vld [vmem:[#allocation58_spill] sm:$0xff] }
 0x59e   :  { %v4624_v52 = vadd.f32 1e-05, %v4480_v61  ;;  %13025 = vst [vmem:[#allocation157_spill] sm:$0xff] %v11554_v60  ;;  %v4449_v11 = vmul.f32 %v11554_v60, %v11554_v60  ;;  %v4503_v61 = vsub.f32 %v13037_v40, %v11543_v63 }
 0x59f   :  { %v4479_v53 = vmax.f32 %v4463_v37, 0.0  ;;  %v4033_v6 = vpop.xlane.xlu1 %4032  ;;  %v13038_v37 = vld [vmem:[#allocation51_spill] sm:$0xff] }
 0x5a0   :  { %9361 = vrsqrt.f32 %v4624_v52  ;;  %v11579_v46 = vmul.f32 0.0009765625, %v4033_v6  ;;  %v4504_v52 = vsub.f32 %v13038_v37, %v11543_v63  ;;  %v13040_v6 = vld [vmem:[#allocation55_spill] sm:$0xff] }
 0x5a1   :  { %v4623_v25 = vadd.f32 1e-05, %v4479_v53  ;;  %v13039_v53 = vld [vmem:[#allocation56_spill] sm:$0xff] }
 0x5a2   :  { %v4506_v39 = vsub.f32 %v13039_v53, %v11543_v63  ;;  %v4450_v37 = vmul.f32 %v11579_v46, %v11579_v46  ;;  %v13044_v53 = vld [vmem:[#allocation63_spill] sm:$0xff] }
 0x5a3   :  { %9363 = vrsqrt.f32 %v4623_v25 }
 0x5a4   :  { %v4313_v19 = vpop.xlane.xlu0 %4312 }
 0x5a5   :  { %v4433_v7 = vmul.f32 0.0009765625, %v4313_v19 }
 0x5a7   :  { %v4465_v19 = vsub.f32 %v4433_v7, %v4449_v11  ;;  %v4322_v0 = vpop.xlane.xlu1 %4321  ;;  %v13046_v11 = vld [vmem:[#allocation59_spill] sm:$0xff] }
 0x5a8   :  { %v4434_v56 = vmul.f32 0.0009765625, %v4322_v0  ;;  %v4042_v30 = vpop.xlane.xlu0 %4041 }
 0x5a9   :  { %v4481_v31 = vmax.f32 %v4465_v19, 0.0  ;;  %v11611_v22 = vmul.f32 0.0009765625, %v4042_v30  ;;  %v13052_v19 = vld [vmem:[#allocation65_spill] sm:$0xff]  ;;  %v13056_v30 = vld [vmem:[#allocation70_spill] sm:$0xff] }
 0x5aa   :  { %v4466_v36 = vsub.f32 %v4434_v56, %v4450_v37  ;;  %v11621_v17 = vpop.eup %9361  ;;  %v13058_v37 = vld [vmem:[#allocation67_spill] sm:$0xff] }
 0x5ab   :  { %13051 = vst [vmem:[#allocation45_spill] sm:$0xff] %v11621_v17  ;;  %v4625_v33 = vadd.f32 1e-05, %v4481_v31  ;;  %v4051_v7 = vpop.xlane.xlu1 %4050  ;;  %v4451_v40 = vmul.f32 %v11611_v22, %v11611_v22  ;;  %v4663_v0 = vmul.f32 %v11621_v17, %v4503_v61  ;;  %v4664_v16 = vmul.f32 %v11621_v17, %v4504_v52  ;;  %v13055_v31 = vld [vmem:[#allocation66_spill] sm:$0xff] }
 0x5ac   :  { %v4482_v43 = vmax.f32 %v4466_v36, 0.0  ;;  %v11630_v41 = vmul.f32 0.0009765625, %v4051_v7  ;;  %v4666_v55 = vmul.f32 %v11621_v17, %v4506_v39 }
 0x5ad   :  { %9365 = vrsqrt.f32 %v4625_v33  ;;  %v11638_v18 = vpop.eup %9363  ;;  %v4833_v54 = vmul.f32 %v11557_v29, %v4664_v16  ;;  %v4832_v39 = vmul.f32 %v11552_v14, %v4663_v0 }
 0x5ae   :  { %13054 = vst [vmem:[#allocation48_spill] sm:$0xff] %v11630_v41  ;;  %13057 = vst [vmem:[#allocation54_spill] sm:$0xff] %v11638_v18  ;;  %v4626_v28 = vadd.f32 1e-05, %v4482_v43  ;;  %v4452_v36 = vmul.f32 %v11630_v41, %v11630_v41  ;;  %v4656_v10 = vmul.f32 %v11638_v18, %v4496_v38  ;;  %v4655_v26 = vmul.f32 %v11638_v18, %v4495_v5  ;;  %v13061_v38 = vld [vmem:[#allocation72_spill] sm:$0xff] }
 0x5af   :  { %v4331_v7 = vpop.xlane.xlu0 %4330  ;;  %v4658_v12 = vmul.f32 %v11638_v18, %v4498_v21  ;;  %v5002_v33 = vadd.f32 %v11569_v23, %v4833_v54  ;;  %v5001_v5 = vadd.f32 %v11566_v51, %v4832_v39  ;;  %v4835_v0 = vmul.f32 %v11563_v1, %v4666_v55 }
 0x5b0   :  { %9367 = vrsqrt.f32 %v4626_v28  ;;  %v4435_v43 = vmul.f32 0.0009765625, %v4331_v7  ;;  %v4825_v56 = vmul.f32 %v11557_v29, %v4656_v10  ;;  %v4824_v44 = vmul.f32 %v11552_v14, %v4655_v26 }
 0x5b1   :  { %v4827_v28 = vmul.f32 %v11563_v1, %v4658_v12  ;;  %v13063_v26 = vsub.f32 %v13036_v9, %v11545_v15  ;;  %v13067_v55 = vsub.f32 %v13040_v6, %v11543_v63  ;;  %v11683_v9 = vadd.f32 %v11575_v13, %v4835_v0 }
 0x5b2   :  { %v4467_v48 = vsub.f32 %v4435_v43, %v4451_v40  ;;  %v4994_v61 = vadd.f32 %v11569_v23, %v4825_v56  ;;  %v4993_v21 = vadd.f32 %v11566_v51, %v4824_v44  ;;  %v13074_v0 = vsub.f32 %v13042_v50, %v11554_v60 }
 0x5b3   :  { %v4060_v7 = vpop.xlane.xlu0 %4059  ;;  %v11669_v16 = vmul.f32 %v11638_v18, %v13063_v26  ;;  %v4340_v39 = vpop.xlane.xlu1 %4339  ;;  %v11674_v12 = vadd.f32 %v11575_v13, %v4827_v28  ;;  %v11680_v44 = vmul.f32 %v11621_v17, %v13067_v55  ;;  %13069 = vst [vmem:[#allocation55_spill] sm:$0xff] %v11683_v9  ;;  %v13071_v18 = vld [vmem:[#allocation73_spill] sm:$0xff] }
 0x5b4   :  { %v4483_v40 = vmax.f32 %v4467_v48, 0.0  ;;  %v11671_v43 = vmul.f32 0.0009765625, %v4060_v7  ;;  %v4436_v56 = vmul.f32 0.0009765625, %v4340_v39  ;;  %v5128_v54 = vmax.f32 %v4994_v61, %v5002_v33  ;;  %v13070_v7 = vld [vmem:[#allocation74_spill] sm:$0xff] }
 0x5b5   :  { %13064 = vst [vmem:[#allocation53_spill] sm:$0xff] %v11669_v16  ;;  %13066 = vst [vmem:[#allocation51_spill] sm:$0xff] %v11674_v12  ;;  %v5121_v47 = vmax.f32 %v4993_v21, %v5001_v5 }
 0x5b6   :  { %13065 = vst [vmem:[#allocation49_spill] sm:$0xff] %v11671_v43  ;;  %13068 = vst [vmem:[#allocation56_spill] sm:$0xff] %v11680_v44  ;;  %v4627_v26 = vadd.f32 1e-05, %v4483_v40  ;;  %v4453_v48 = vmul.f32 %v11671_v43, %v11671_v43  ;;  %v4468_v55 = vsub.f32 %v4436_v56, %v4452_v36  ;;  %v5129_v17 = vrot.slane %v5128_v54, 4 }
 0x5b7   :  { %v11691_v6 = vpop.eup %9365  ;;  %v5122_v39 = vrot.slane %v5121_v47, 4  ;;  %v4069_v5 = vpop.xlane.xlu1 %4068  ;;  %v13075_v40 = vsub.f32 %v13041_v58, %v11554_v60  ;;  %v13076_v36 = vsub.f32 %v13044_v53, %v11554_v60 }
 0x5b8   :  { %13072 = vst [vmem:[#allocation57_spill] sm:$0xff] %v11691_v6  ;;  %9369 = vrsqrt.f32 %v4627_v26  ;;  %v4672_v21 = vmul.f32 %v11691_v6, %v13074_v0  ;;  %v4484_v28 = vmax.f32 %v4468_v55, 0.0  ;;  %v11707_v63 = vmul.f32 0.0009765625, %v4069_v5  ;;  %v13078_v55 = vld [vmem:[#allocation76_spill] sm:$0xff] }
 0x5b9   :  { %v4671_v15 = vmul.f32 %v11691_v6, %v13075_v40  ;;  %v4674_v56 = vmul.f32 %v11691_v6, %v13076_v36  ;;  %v4349_v26 = vpop.xlane.xlu0 %4348  ;;  %v5130_v33 = vmax.f32 %v5128_v54, %v5129_v17  ;;  %v5123_v42 = vmax.f32 %v5121_v47, %v5122_v39  ;;  %v13080_v36 = vld [vmem:[#allocation75_spill] sm:$0xff] }
 0x5ba   :  { %v11709_v35 = vpop.eup %9367  ;;  %v4437_v50 = vmul.f32 0.0009765625, %v4349_v26  ;;  %v4841_v0 = vmul.f32 %v11557_v29, %v4672_v21  ;;  %v4628_v34 = vadd.f32 1e-05, %v4484_v28  ;;  %v4454_v53 = vmul.f32 %v11707_v63, %v11707_v63 }
 0x5bb   :  { %v4840_v58 = vmul.f32 %v11552_v14, %v4671_v15  ;;  %v11714_v40 = vmul.f32 %v11563_v1, %v4674_v56  ;;  %v13079_v47 = vsub.f32 %v13048_v45, %v11579_v46  ;;  %v5131_v15 = vrot.slane %v5130_v33, 2 }
 0x5bc   :  { %v4469_v54 = vsub.f32 %v4437_v50, %v4453_v48  ;;  %v4358_v39 = vpop.xlane.xlu1 %4357  ;;  %v5010_v21 = vadd.f32 %v11569_v23, %v4841_v0  ;;  %9371 = vrsqrt.f32 %v4628_v34  ;;  %v13081_v5 = vsub.f32 %v13046_v11, %v11579_v46  ;;  %v13082_v11 = vld [vmem:[#allocation78_spill] sm:$0xff] }
 0x5bd   :  { %13077 = vst [vmem:[#allocation58_spill] sm:$0xff] %v11714_v40  ;;  %v4680_v17 = vmul.f32 %v11709_v35, %v13079_v47  ;;  %v4438_v28 = vmul.f32 0.0009765625, %v4358_v39  ;;  %v4078_v26 = vpop.xlane.xlu0 %4077  ;;  %v5132_v48 = vmax.f32 %v5130_v33, %v5131_v15  ;;  %v5009_v50 = vadd.f32 %v11566_v51, %v4840_v58  ;;  %v13083_v58 = vld [vmem:[#allocation77_spill] sm:$0xff] }
 0x5be   :  { %v4679_v45 = vmul.f32 %v11709_v35, %v13081_v5  ;;  %v4485_v20 = vmax.f32 %v4469_v54, 0.0  ;;  %v11732_v47 = vmul.f32 0.0009765625, %v4078_v26  ;;  %v5124_v39 = vrot.slane %v5123_v42, 2 }
 0x5bf   :  { %v4849_v24 = vmul.f32 %v11557_v29, %v4680_v17  ;;  %v4470_v0 = vsub.f32 %v4438_v28, %v4454_v53  ;;  %v5133_v54 = vrot.slane %v5132_v48, 1 }
 0x5c0   :  { %v4848_v34 = vmul.f32 %v11552_v14, %v4679_v45  ;;  %v4629_v56 = vadd.f32 1e-05, %v4485_v20  ;;  %v4087_v49 = vpop.xlane.xlu1 %4086  ;;  %v4455_v17 = vmul.f32 %v11732_v47, %v11732_v47  ;;  %v5125_v28 = vmax.f32 %v5123_v42, %v5124_v39 }
 0x5c1   :  { %v5018_v8 = vadd.f32 %v11569_v23, %v4849_v24  ;;  %v4486_v26 = vmax.f32 %v4470_v0, 0.0  ;;  %v11741_v57 = vmul.f32 0.0009765625, %v4087_v49  ;;  %v5134_v15 = vmax.f32 %v5132_v48, %v5133_v54  ;;  %v13084_v0 = vld [vmem:[#allocation82_spill] sm:$0xff]  ;;  %v13086_v48 = vld [vmem:[#allocation81_spill] sm:$0xff] }
 0x5c2   :  { %v11745_v24 = vpop.eup %9369  ;;  %9373 = vrsqrt.f32 %v4629_v56  ;;  %v5017_v20 = vadd.f32 %v11566_v51, %v4848_v34  ;;  %v13087_v39 = vsub.f32 %v13052_v19, %v11611_v22 }
 0x5c3   :  { %v5184_v33 = vmax.f32 %v5010_v21, %v5018_v8  ;;  %v4630_v45 = vadd.f32 1e-05, %v4486_v26  ;;  %v4367_v4 = vpop.xlane.xlu0 %4366  ;;  %v4456_v5 = vmul.f32 %v11741_v57, %v11741_v57  ;;  %v13085_v8 = vsub.f32 %v13055_v31, %v11611_v22 }
 0x5c4   :  { %v4439_v53 = vmul.f32 0.0009765625, %v4367_v4  ;;  %v5570_v56 = vpack.c.bf16 %v5134_v15, %v5134_v15  ;;  %v4687_v54 = vmul.f32 %v11745_v24, %v13087_v39  ;;  %v5126_v26 = vrot.slane %v5125_v28, 1 }
 0x5c5   :  { %v4688_v21 = vmul.f32 %v11745_v24, %v13085_v8  ;;  %v5185_v27 = vrot.slane %v5184_v33, 4  ;;  %9375 = vrsqrt.f32 %v4630_v45  ;;  %v5177_v4 = vmax.f32 %v5009_v50, %v5017_v20 }
 0x5c6   :  { %v4471_v49 = vsub.f32 %v4439_v53, %v4455_v17  ;;  %v4376_v3 = vpop.xlane.xlu1 %4375  ;;  %v11763_v44 = vunpack.c.l.b16 %v5570_v56  ;;  %v11765_v8 = vpop.eup %9371  ;;  %v11769_v34 = vmax.f32 %v5125_v28, %v5126_v26  ;;  %v13089_v17 = vsub.f32 %v13060_v32, %v11630_v41  ;;  %v13091_v32 = vld [vmem:[#allocation90_spill] sm:$0xff]  ;;  %v13092_v26 = vld [vmem:[#allocation89_spill] sm:$0xff] }
 0x5c7   :  { %v4857_v42 = vmul.f32 %v11557_v29, %v4688_v21  ;;  %v5186_v31 = vmax.f32 %v5184_v33, %v5185_v27  ;;  %13088 = vst [vmem:[#allocation63_spill] sm:$0xff] %v11765_v8  ;;  %v4440_v15 = vmul.f32 0.0009765625, %v4376_v3  ;;  %v4096_v10 = vpop.xlane.xlu0 %4095  ;;  %v4856_v21 = vmul.f32 %v11552_v14, %v4687_v54 }
 0x5c8   :  { %v4487_v19 = vmax.f32 %v4471_v49, 0.0  ;;  %v11771_v52 = vmul.f32 0.0009765625, %v4096_v10  ;;  %v4696_v27 = vmul.f32 %v11765_v8, %v13089_v17  ;;  %v13090_v3 = vsub.f32 %v13058_v37, %v11630_v41 }
 0x5c9   :  { %v5026_v45 = vadd.f32 %v11569_v23, %v4857_v42  ;;  %v5187_v33 = vrot.slane %v5186_v31, 2  ;;  %v4472_v50 = vsub.f32 %v4440_v15, %v4456_v5  ;;  %v11782_v20 = vadd.f32 %v11566_v51, %v4856_v21 }
 0x5ca   :  { %v4695_v53 = vmul.f32 %v11765_v8, %v13090_v3  ;;  %v5178_v28 = vrot.slane %v5177_v4, 4  ;;  %v4631_v56 = vadd.f32 1e-05, %v4487_v19  ;;  %v4105_v49 = vpop.xlane.xlu1 %4104  ;;  %v4457_v10 = vmul.f32 %v11771_v52, %v11771_v52 }
 0x5cb   :  { %v4865_v39 = vmul.f32 %v11557_v29, %v4696_v27  ;;  %v4488_v5 = vmax.f32 %v4472_v50, 0.0  ;;  %v11789_v54 = vmul.f32 0.0009765625, %v4105_v49  ;;  %v5188_v37 = vmax.f32 %v5186_v31, %v5187_v33  ;;  %v13094_v50 = vld [vmem:[#allocation92_spill] sm:$0xff] }
 0x5cc   :  { %v11793_v21 = vpop.eup %9373  ;;  %9377 = vrsqrt.f32 %v4631_v56  ;;  %v4864_v17 = vmul.f32 %v11552_v14, %v4695_v53  ;;  %v11797_v3 = vmax.f32 %v5177_v4, %v5178_v28  ;;  %v13095_v33 = vsub.f32 %v13070_v7, %v11671_v43  ;;  %v13096_v4 = vld [vmem:[#allocation91_spill] sm:$0xff] }
 0x5cd   :  { %13093 = vst [vmem:[#allocation59_spill] sm:$0xff] %v11793_v21  ;;  %v5034_v19 = vadd.f32 %v11569_v23, %v4865_v39  ;;  %v4632_v59 = vadd.f32 1e-05, %v4488_v5  ;;  %v4385_v42 = vpop.xlane.xlu0 %4384  ;;  %v4458_v27 = vmul.f32 %v11789_v54, %v11789_v54  ;;  %v5189_v39 = vrot.slane %v5188_v37, 1 }
 0x5ce   :  { %v4704_v49 = vmul.f32 %v11793_v21, %v13095_v33  ;;  %v4441_v56 = vmul.f32 0.0009765625, %v4385_v42  ;;  %v13098_v31 = vsub.f32 %v13071_v18, %v11671_v43  ;;  %v11817_v7 = vadd.f32 %v11566_v51, %v4864_v17 }
 0x5cf   :  { %v5240_v15 = vmax.f32 %v5026_v45, %v5034_v19  ;;  %v11809_v28 = vpop.eup %9375  ;;  %9379 = vrsqrt.f32 %v4632_v59  ;;  %v13099_v45 = vsub.f32 %v13078_v55, %v11707_v63  ;;  %v5190_v53 = vmax.f32 %v5188_v37, %v5189_v39 }
 0x5d0   :  { %13097 = vst [vmem:[#allocation60_spill] sm:$0xff] %v11809_v28  ;;  %v4873_v5 = vmul.f32 %v11557_v29, %v4704_v49  ;;  %v4703_v6 = vmul.f32 %v11793_v21, %v13098_v31  ;;  %v4473_v33 = vsub.f32 %v4441_v56, %v4457_v10  ;;  %v4394_v42 = vpop.xlane.xlu1 %4393  ;;  %v13100_v18 = vsub.f32 %v13080_v36, %v11707_v63 }
 0x5d1   :  { %v4712_v19 = vmul.f32 %v11809_v28, %v13099_v45  ;;  %v5241_v60 = vrot.slane %v5240_v15, 4  ;;  %v4442_v59 = vmul.f32 0.0009765625, %v4394_v42  ;;  %v4114_v25 = vpop.xlane.xlu0 %4113  ;;  %v5578_v37 = vpack.c.bf16 %v5190_v53, %v5190_v53 }
 0x5d2   :  { %v5042_v49 = vadd.f32 %v11569_v23, %v4873_v5  ;;  %v4711_v31 = vmul.f32 %v11809_v28, %v13100_v18  ;;  %v4872_v17 = vmul.f32 %v11552_v14, %v4703_v6  ;;  %v4489_v10 = vmax.f32 %v4473_v33, 0.0  ;;  %v13101_v6 = vld [vmem:[#allocation31_spill] sm:$0xff] }
 0x5d3   :  { %v11829_v56 = vmul.f32 0.0009765625, %v4114_v25  ;;  %v4881_v55 = vmul.f32 %v11557_v29, %v4712_v19  ;;  %v5242_v62 = vmax.f32 %v5240_v15, %v5241_v60  ;;  %v4474_v45 = vsub.f32 %v4442_v59, %v4458_v27 }
 0x5d4   :  { %v11833_v39 = vmul.f32 %v11552_v14, %v4711_v31  ;;  %v11836_v5 = vadd.f32 %v11566_v51, %v4872_v17  ;;  %v4633_v42 = vadd.f32 1e-05, %v4489_v10  ;;  %v4123_v36 = vpop.xlane.xlu1 %4122  ;;  %v5983_v53 = vunpack.c.l.b16 %v5578_v37  ;;  %v13103_v10 = vld [vmem:[#allocation30_spill] sm:$0xff] }
 0x5d5   :  { %v4459_v18 = vmul.f32 %v11829_v56, %v11829_v56  ;;  %v5050_v33 = vadd.f32 %v11569_v23, %v4881_v55  ;;  %v4490_v19 = vmax.f32 %v4474_v45, 0.0  ;;  %v11843_v60 = vmul.f32 0.0009765625, %v4123_v36  ;;  %v4403_v15 = vpop.xlane.xlu0 %4402  ;;  %v13104_v55 = vld [vmem:[#allocation36_spill] sm:$0xff] }
 0x5d6   :  { %v5243_v27 = vrot.slane %v5242_v62, 2  ;;  %v11845_v59 = vpop.eup %9377  ;;  %9381 = vrsqrt.f32 %v4633_v42  ;;  %v4443_v31 = vmul.f32 0.0009765625, %v4403_v15  ;;  %v13105_v36 = vsub.f32 %v13082_v11, %v11732_v47  ;;  %v13106_v45 = vld [vmem:[#allocation32_spill] sm:$0xff] }
 0x5d7   :  { %13102 = vst [vmem:[#allocation64_spill] sm:$0xff] %v11845_v59  ;;  %v5296_v17 = vmax.f32 %v5042_v49, %v5050_v33  ;;  %v4634_v12 = vadd.f32 1e-05, %v4490_v19  ;;  %v4460_v25 = vmul.f32 %v11843_v60, %v11843_v60  ;;  %v6052_v49 = vsel %vm6038_vm2, %v5983_v53, %v11763_v44 }
 0x5d8   :  { %v4720_v37 = vmul.f32 %v11845_v59, %v13105_v36  ;;  %v4475_v9 = vsub.f32 %v4443_v31, %v4459_v18  ;;  %v4412_v13 = vpop.xlane.xlu1 %4411  ;;  %v5244_v42 = vmax.f32 %v5242_v62, %v5243_v27  ;;  %v13107_v62 = vsub.f32 %v13084_v0, %v11741_v57 }
 0x5d9   :  { %v5297_v15 = vrot.slane %v5296_v17, 4  ;;  %v11859_v33 = vpop.eup %9379  ;;  %9383 = vrsqrt.f32 %v4634_v12  ;;  %v4444_v19 = vmul.f32 0.0009765625, %v4412_v13  ;;  %v4132_v16 = vpop.xlane.xlu0 %4131  ;;  %v13108_v53 = vsub.f32 %v13083_v58, %v11732_v47 }
 0x5da   :  { %v4889_v40 = vmul.f32 %v11557_v29, %v4720_v37  ;;  %v4491_v1 = vmax.f32 %v4475_v9, 0.0  ;;  %v11864_v36 = vmul.f32 0.0009765625, %v4132_v16  ;;  %v4728_v18 = vmul.f32 %v11859_v33, %v13107_v62  ;;  %v13109_v9 = vld [vmem:[#allocation46_spill] sm:$0xff] }
 0x5db   :  { %v5245_v44 = vrot.slane %v5244_v42, 1  ;;  %v4476_v27 = vsub.f32 %v4444_v19, %v4460_v25  ;;  %v5298_v13 = vmax.f32 %v5296_v17, %v5297_v15  ;;  %v4719_v31 = vmul.f32 %v11845_v59, %v13108_v53 }
 0x5dc   :  { %v5058_v12 = vadd.f32 %v11569_v23, %v4889_v40  ;;  %v4635_v37 = vadd.f32 1e-05, %v4491_v1  ;;  %v4141_v11 = vpop.xlane.xlu1 %4140  ;;  %v4461_v16 = vmul.f32 %v11864_v36, %v11864_v36  ;;  %v4897_v62 = vmul.f32 %v11557_v29, %v4728_v18  ;;  %v13110_v1 = vld [vmem:[#allocation44_spill] sm:$0xff] }
 0x5dd   :  { %v4492_v28 = vmax.f32 %v4476_v27, 0.0  ;;  %v11880_v25 = vmul.f32 0.0009765625, %v4141_v11  ;;  %v4421_v40 = vpop.xlane.xlu0 %4420  ;;  %v5246_v17 = vmax.f32 %v5244_v42, %v5245_v44  ;;  %v5299_v15 = vrot.slane %v5298_v13, 2  ;;  %v13111_v18 = vld [vmem:[#allocation52_spill] sm:$0xff] }
 0x5de   :  { %9385 = vrsqrt.f32 %v4635_v37  ;;  %v4445_v58 = vmul.f32 0.0009765625, %v4421_v40  ;;  %v5066_v19 = vadd.f32 %v11569_v23, %v4897_v62  ;;  %v13113_v62 = vld [vmem:[#allocation47_spill] sm:$0xff] }
 0x5df   :  { %v4636_v59 = vadd.f32 1e-05, %v4492_v28  ;;  %v4462_v0 = vmul.f32 %v11880_v25, %v11880_v25  ;;  %v5300_v11 = vmax.f32 %v5298_v13, %v5299_v15  ;;  %v5586_v40 = vpack.c.bf16 %v5246_v17, %v5246_v17 }
 0x5e0   :  { %v11889_v21 = vpop.eup %9381  ;;  %v4477_v42 = vsub.f32 %v4445_v58, %v4461_v16  ;;  %v4430_v44 = vpop.xlane.xlu1 %4429  ;;  %v5352_v37 = vmax.f32 %v5058_v12, %v5066_v19  ;;  %v4615_v43 = vsub.f32 %v13113_v62, %v11880_v25  ;;  %v13114_v28 = vsub.f32 %v13091_v32, %v11771_v52 }
 0x5e1   :  { %13112 = vst [vmem:[#allocation65_spill] sm:$0xff] %v11889_v21  ;;  %9387 = vrsqrt.f32 %v4636_v59  ;;  %v4446_v61 = vmul.f32 0.0009765625, %v4430_v44  ;;  %v5301_v8 = vrot.slane %v5300_v11, 1  ;;  %v5991_v13 = vunpack.c.l.b16 %v5586_v40 }
 0x5e2   :  { %v4736_v53 = vmul.f32 %v11889_v21, %v13114_v28  ;;  %v4493_v41 = vmax.f32 %v4477_v42, 0.0  ;;  %v5353_v27 = vrot.slane %v5352_v37, 4  ;;  %v13115_v16 = vsub.f32 %v13086_v48, %v11741_v57 }
 0x5e3   :  { %v11901_v17 = vpop.eup %9383  ;;  %v4478_v15 = vsub.f32 %v4446_v61, %v4462_v0  ;;  %v5302_v58 = vmax.f32 %v5300_v11, %v5301_v8  ;;  %v13117_v32 = vsub.f32 %v13092_v26, %v11771_v52  ;;  %v13118_v42 = vsub.f32 %v13094_v50, %v11789_v54 }
 0x5e4   :  { %v4727_v12 = vmul.f32 %v11859_v33, %v13115_v16  ;;  %13116 = vst [vmem:[#allocation66_spill] sm:$0xff] %v11901_v17  ;;  %v4905_v59 = vmul.f32 %v11557_v29, %v4736_v53  ;;  %v4637_v44 = vadd.f32 1e-05, %v4493_v41  ;;  %v5354_v48 = vmax.f32 %v5352_v37, %v5353_v27 }
 0x5e5   :  { %v4735_v19 = vmul.f32 %v11889_v21, %v13117_v32  ;;  %v4744_v40 = vmul.f32 %v11901_v17, %v13118_v42  ;;  %v6053_v28 = vsel %vm6040_vm3, %v5991_v13, %v6052_v49  ;;  %v4494_v16 = vmax.f32 %v4478_v15, 0.0 }
 0x5e6   :  { %v5074_v61 = vadd.f32 %v11569_v23, %v4905_v59  ;;  %v5594_v0 = vpack.c.bf16 %v5302_v58, %v5302_v58  ;;  %v13119_v8 = vsub.f32 %v13096_v4, %v11789_v54  ;;  %9389 = vrsqrt.f32 %v4637_v44 }
 0x5e7   :  { %v4913_v41 = vmul.f32 %v11557_v29, %v4744_v40  ;;  %v5355_v53 = vrot.slane %v5354_v48, 2  ;;  %v4888_v50 = vmul.f32 %v11552_v14, %v4719_v31  ;;  %v4638_v11 = vadd.f32 1e-05, %v4494_v16 }
 0x5e8   :  { %v4743_v26 = vmul.f32 %v11901_v17, %v13119_v8  ;;  %v5999_v32 = vunpack.c.l.b16 %v5594_v0  ;;  %v4896_v49 = vmul.f32 %v11552_v14, %v4727_v12  ;;  %v4904_v27 = vmul.f32 %v11552_v14, %v4735_v19  ;;  %v11922_v37 = vpop.eup %9385 }
 0x5e9   :  { %13120 = vst [vmem:[#allocation70_spill] sm:$0xff] %v11922_v37  ;;  %v5082_v13 = vadd.f32 %v11569_v23, %v4913_v41  ;;  %v5356_v4 = vmax.f32 %v5354_v48, %v5355_v53  ;;  %v5049_v59 = vadd.f32 %v11566_v51, %v11833_v39  ;;  %9391 = vrsqrt.f32 %v4638_v11 }
 0x5ea   :  { %v4912_v15 = vmul.f32 %v11552_v14, %v4743_v26  ;;  %v13121_v31 = vsub.f32 %v13101_v6, %v11829_v56  ;;  %v6054_v12 = vsel %vm6042_vm4, %v5999_v32, %v6053_v28  ;;  %v13122_v19 = vsub.f32 %v13103_v10, %v11829_v56 }
 0x5eb   :  { %v5357_v42 = vrot.slane %v5356_v4, 1  ;;  %v5408_v40 = vmax.f32 %v5074_v61, %v5082_v13  ;;  %v5057_v48 = vadd.f32 %v11566_v51, %v4888_v50  ;;  %v5065_v16 = vadd.f32 %v11566_v51, %v4896_v49  ;;  %v11939_v39 = vpop.eup %9387 }
 0x5ec   :  { %v4752_v58 = vmul.f32 %v11922_v37, %v13121_v31  ;;  %v4751_v44 = vmul.f32 %v11922_v37, %v13122_v19  ;;  %13123 = vst [vmem:[#allocation67_spill] sm:$0xff] %v11939_v39  ;;  %v5073_v8 = vadd.f32 %v11566_v51, %v4904_v27  ;;  %v5081_v28 = vadd.f32 %v11566_v51, %v4912_v15 }
 0x5ed   :  { %v13124_v10 = vsub.f32 %v13104_v55, %v11843_v60  ;;  %v5358_v61 = vmax.f32 %v5356_v4, %v5357_v42  ;;  %v5409_v41 = vrot.slane %v5408_v40, 4  ;;  %v13125_v53 = vsub.f32 %v13106_v45, %v11843_v60 }
 0x5ee   :  { %v4921_v0 = vmul.f32 %v11557_v29, %v4752_v58  ;;  %v4920_v6 = vmul.f32 %v11552_v14, %v4751_v44  ;;  %v5180_v49 = vrot.slane %v11797_v3, 2  ;;  %v5233_v27 = vmax.f32 %v11782_v20, %v11817_v7 }
 0x5ef   :  { %v4760_v26 = vmul.f32 %v11939_v39, %v13124_v10  ;;  %v4759_v50 = vmul.f32 %v11939_v39, %v13125_v53  ;;  %v5410_v13 = vmax.f32 %v5408_v40, %v5409_v41  ;;  %v5602_v15 = vpack.c.bf16 %v5358_v61, %v5358_v61 }
 0x5f0   :  { %v5090_v11 = vadd.f32 %v11569_v23, %v4921_v0  ;;  %v5089_v32 = vadd.f32 %v11566_v51, %v4920_v6  ;;  %v5181_v31 = vmax.f32 %v11797_v3, %v5180_v49  ;;  %v5234_v45 = vrot.slane %v5233_v27, 4  ;;  %v11962_v44 = vpop.eup %9389 }
 0x5f1   :  { %v4929_v55 = vmul.f32 %v11557_v29, %v4760_v26  ;;  %v4928_v4 = vmul.f32 %v11552_v14, %v4759_v50  ;;  %v5289_v58 = vmax.f32 %v11836_v5, %v5049_v59  ;;  %v5345_v19 = vmax.f32 %v5057_v48, %v5065_v16  ;;  %13126 = vst [vmem:[#allocation68_spill] sm:$0xff] %v11962_v44 }
 0x5f2   :  { %v5411_v0 = vrot.slane %v5410_v13, 2  ;;  %v6007_v6 = vunpack.c.l.b16 %v5602_v15  ;;  %v13127_v7 = vsub.f32 %v13109_v9, %v11864_v36  ;;  %v13128_v3 = vsub.f32 %v13110_v1, %v11864_v36 }
 0x5f3   :  { %v5098_v42 = vadd.f32 %v11569_v23, %v4929_v55  ;;  %v5097_v20 = vadd.f32 %v11566_v51, %v4928_v4  ;;  %v5182_v59 = vrot.slane %v5181_v31, 1  ;;  %v5235_v48 = vmax.f32 %v5233_v27, %v5234_v45  ;;  %v11975_v41 = vpop.eup %9391 }
 0x5f4   :  { %v4768_v40 = vmul.f32 %v11962_v44, %v13127_v7  ;;  %v4767_v5 = vmul.f32 %v11962_v44, %v13128_v3  ;;  %v5412_v16 = vmax.f32 %v5410_v13, %v5411_v0  ;;  %v6055_v26 = vsel %vm6044_vm5, %v6007_v6, %v6054_v12  ;;  %13129 = vst [vmem:[#allocation72_spill] sm:$0xff] %v11975_v41 }
 0x5f5   :  { %v5464_v10 = vmax.f32 %v5090_v11, %v5098_v42  ;;  %v5290_v61 = vrot.slane %v5289_v58, 4  ;;  %v11979_v50 = vmax.f32 %v5181_v31, %v5182_v59  ;;  %v5236_v49 = vrot.slane %v5235_v48, 2 }
 0x5f6   :  { %v4937_v53 = vmul.f32 %v11557_v29, %v4768_v40  ;;  %v4936_v9 = vmul.f32 %v11552_v14, %v4767_v5  ;;  %v13130_v1 = vsub.f32 %v13111_v18, %v11880_v25  ;;  %v5413_v27 = vrot.slane %v5412_v16, 1 }
 0x5f7   :  { %v5465_v13 = vrot.slane %v5464_v10, 4  ;;  %v4775_v12 = vmul.f32 %v11975_v41, %v4615_v43  ;;  %v5237_v4 = vmax.f32 %v5235_v48, %v5236_v49  ;;  %v5291_v31 = vmax.f32 %v5289_v58, %v5290_v61 }
 0x5f8   :  { %v4776_v55 = vmul.f32 %v11975_v41, %v13130_v1  ;;  %v5106_v11 = vadd.f32 %v11569_v23, %v4937_v53  ;;  %v5105_v15 = vadd.f32 %v11566_v51, %v4936_v9  ;;  %v5414_v42 = vmax.f32 %v5412_v16, %v5413_v27 }
 0x5f9   :  { %v5466_v0 = vmax.f32 %v5464_v10, %v5465_v13  ;;  %v4944_v18 = vmul.f32 %v11552_v14, %v4775_v12  ;;  %v5238_v6 = vrot.slane %v5237_v4, 1  ;;  %v5292_v7 = vrot.slane %v5291_v31, 2 }
 0x5fa   :  { %v4945_v45 = vmul.f32 %v11557_v29, %v4776_v55  ;;  %v5346_v40 = vrot.slane %v5345_v19, 4  ;;  %v5401_v3 = vmax.f32 %v5073_v8, %v5081_v28  ;;  %v5610_v43 = vpack.c.bf16 %v5414_v42, %v5414_v42 }
 0x5fb   :  { %v5467_v5 = vrot.slane %v5466_v0, 2  ;;  %v5113_v59 = vadd.f32 %v11566_v51, %v4944_v18  ;;  %v5239_v53 = vmax.f32 %v5237_v4, %v5238_v6  ;;  %v5293_v48 = vmax.f32 %v5291_v31, %v5292_v7 }
 0x5fc   :  { %v5114_v62 = vadd.f32 %v11569_v23, %v4945_v45  ;;  %v5347_v58 = vmax.f32 %v5345_v19, %v5346_v40  ;;  %v5402_v61 = vrot.slane %v5401_v3, 4  ;;  %v6015_v10 = vunpack.c.l.b16 %v5610_v43 }
 0x5fd   :  { %v5468_v29 = vmax.f32 %v5466_v0, %v5467_v5  ;;  %v5457_v9 = vmax.f32 %v5089_v32, %v5097_v20  ;;  %v5294_v14 = vrot.slane %v5293_v48, 1  ;;  %v5513_v55 = vmax.f32 %v5105_v15, %v5113_v59 }
 0x5fe   :  { %v5520_v16 = vmax.f32 %v5106_v11, %v5114_v62  ;;  %v5348_v49 = vrot.slane %v5347_v58, 2  ;;  %v5403_v1 = vmax.f32 %v5401_v3, %v5402_v61  ;;  %v6056_v23 = vsel %vm6046_vm6, %v6015_v10, %v6055_v26 }
 0x5ff   :  { %v5469_v8 = vrot.slane %v5468_v29, 1  ;;  %v5458_v27 = vrot.slane %v5457_v9, 4  ;;  %v5295_v13 = vmax.f32 %v5293_v48, %v5294_v14  ;;  %v5514_v4 = vrot.slane %v5513_v55, 4 }
 0x600   :  { %v5521_v28 = vrot.slane %v5520_v16, 4  ;;  %v5349_v51 = vmax.f32 %v5347_v58, %v5348_v49  ;;  %v5404_v12 = vrot.slane %v5403_v1, 2  ;;  %v5569_v11 = vpack.c.bf16 %v11769_v34, %v11769_v34 }
 0x601   :  { %v5470_v31 = vmax.f32 %v5468_v29, %v5469_v8  ;;  %v5459_v45 = vmax.f32 %v5457_v9, %v5458_v27  ;;  %v5515_v42 = vmax.f32 %v5513_v55, %v5514_v4  ;;  %v5577_v15 = vpack.c.bf16 %v11979_v50, %v11979_v50  ;;  %v13131_v27 = vld [vmem:[#allocation85_spill] sm:$0xff] }
 0x602   :  { %v5522_v19 = vmax.f32 %v5520_v16, %v5521_v28  ;;  %v5350_v32 = vrot.slane %v5349_v51, 1  ;;  %v5405_v20 = vmax.f32 %v5403_v1, %v5404_v12  ;;  %v5585_v6 = vpack.c.bf16 %v5239_v53, %v5239_v53 }
 0x603   :  { %v5618_v18 = vpack.c.bf16 %v5470_v31, %v5470_v31  ;;  %v5460_v26 = vrot.slane %v5459_v45, 2  ;;  %v5516_v3 = vrot.slane %v5515_v42, 2  ;;  %v5593_v62 = vpack.c.bf16 %v5295_v13, %v5295_v13  ;;  %v13132_v31 = vld [vmem:[#allocation86_spill] sm:$0xff] }
 0x604   :  { %v5523_v0 = vrot.slane %v5522_v19, 2  ;;  %v5351_v7 = vmax.f32 %v5349_v51, %v5350_v32  ;;  %v5406_v40 = vrot.slane %v5405_v20, 1  ;;  %v5974_v48 = vunpack.c.l.b16 %v5569_v11  ;;  %v13133_v32 = vld [vmem:[#allocation88_spill] sm:$0xff] }
 0x605   :  { %v6023_v43 = vunpack.c.l.b16 %v5618_v18  ;;  %v5461_v59 = vmax.f32 %v5459_v45, %v5460_v26  ;;  %v5517_v58 = vmax.f32 %v5515_v42, %v5516_v3  ;;  %v5982_v29 = vunpack.c.l.b16 %v5577_v15  ;;  %v13135_v26 = vld [vmem:[#allocation35_spill] sm:$0xff] }
 0x606   :  { %v5524_v5 = vmax.f32 %v5522_v19, %v5523_v0  ;;  %v5407_v34 = vmax.f32 %v5405_v20, %v5406_v40  ;;  %v5601_v61 = vpack.c.bf16 %v5351_v7, %v5351_v7  ;;  %v5990_v9 = vunpack.c.l.b16 %v5585_v6  ;;  %v13134_v0 = vld [vmem:[#allocation38_spill] sm:$0xff] }
 0x607   :  { %v6057_v50 = vsel %vm6048_vm7, %v6023_v43, %v6056_v23  ;;  %v5462_v10 = vrot.slane %v5461_v59, 1  ;;  %v5518_v14 = vrot.slane %v5517_v58, 1  ;;  %v5998_v49 = vunpack.c.l.b16 %v5593_v62  ;;  %v13136_v62 = vld [vmem:[#allocation37_spill] sm:$0xff] }
 0x608   :  { %v5525_v16 = vrot.slane %v5524_v5, 1  ;;  %v5609_v53 = vpack.c.bf16 %v5407_v34, %v5407_v34  ;;  %v6006_v1 = vunpack.c.l.b16 %v5601_v61  ;;  %v6039_v28 = vsel %vm6038_vm2, %v5982_v29, %v5974_v48  ;;  %v13138_v34 = vld [vmem:[#allocation41_spill] sm:$0xff]  ;;  %v13139_v61 = vld [vmem:[#allocation43_spill] sm:$0xff] }
 0x609   :  { %v5463_v8 = vmax.f32 %v5461_v59, %v5462_v10  ;;  %v4554_v13 = vsub.f32 %v13131_v27, %v11707_v63  ;;  %v5519_v51 = vmax.f32 %v5517_v58, %v5518_v14  ;;  %v6041_v4 = vsel %vm6040_vm3, %v5990_v9, %v6039_v28  ;;  %v13137_v59 = vld [vmem:[#allocation94_spill] sm:$0xff]  ;;  %v13142_v27 = vld [vmem:[#allocation48_spill] sm:$0xff] }
 0x60a   :  { %v5526_v55 = vmax.f32 %v5524_v5, %v5525_v16  ;;  %v6014_v12 = vunpack.c.l.b16 %v5609_v53  ;;  %v4562_v23 = vsub.f32 %v13132_v31, %v11732_v47  ;;  %v6043_v11 = vsel %vm6042_vm4, %v5998_v49, %v6041_v4  ;;  %v13145_v4 = vld [vmem:[#allocation84_spill] sm:$0xff]  ;;  %v13146_v31 = vld [vmem:[#allocation49_spill] sm:$0xff] }
 0x60b   :  { %v5617_v45 = vpack.c.bf16 %v5463_v8, %v5463_v8  ;;  %v4570_v20 = vsub.f32 %v13133_v32, %v11741_v57  ;;  %v5625_v42 = vpack.c.bf16 %v5519_v51, %v5519_v51  ;;  %v6045_v15 = vsel %vm6044_vm5, %v6006_v1, %v6043_v11  ;;  %v9044_v8 = vld [vmem:[#allocation5 + $0x208] ss:$16 sps:$4 sm:$0xff]   ;;  %v13149_v32 = vld [vmem:[#allocation60_spill] sm:$0xff] }
 0x60c   :  { %v5626_v19 = vpack.c.bf16 %v5526_v55, %v5526_v55  ;;  %v4578_v18 = vsub.f32 %v13134_v0, %v11771_v52  ;;  %v4586_v6 = vsub.f32 %v13135_v26, %v11789_v54  ;;  %v6047_v3 = vsel %vm6046_vm6, %v6014_v12, %v6045_v15  ;;  %v9041_v55 = vld [vmem:[#allocation5 + $0x200] ss:$16 sps:$4 sm:$0xff]   ;;  %v13144_v51 = vld [vmem:[#allocation63_spill] sm:$0xff]  ;;  %v9049_v26 = vld [vmem:[#allocation5 + $0x224] ss:$16 sps:$4 sm:$0xff]  }
 0x60d   :  { %v6022_v40 = vunpack.c.l.b16 %v5617_v45  ;;  %v4594_v5 = vsub.f32 %v13136_v62, %v11829_v56  ;;  %v6030_v43 = vunpack.c.l.b16 %v5625_v42  ;;  %v4602_v48 = vsub.f32 %v13137_v59, %v11843_v60  ;;  %v13150_v42 = vld [vmem:[#allocation64_spill] sm:$0xff] }
 0x60e   :  { %v6031_v7 = vunpack.c.l.b16 %v5626_v19  ;;  %v4610_v58 = vsub.f32 %v13138_v34, %v11864_v36  ;;  %v4618_v29 = vsub.f32 %v13139_v61, %v11880_v25  ;;  %v13140_v9 = vsub.f32 %v13049_v2, %v11579_v46  ;;  %v13148_v19 = vld [vmem:[#allocation59_spill] sm:$0xff] }
 0x60f   :  { %v6049_v10 = vsel %vm6048_vm7, %v6022_v40, %v6047_v3  ;;  %v13141_v53 = vsub.f32 %v13056_v30, %v11611_v22  ;;  %v13147_v2 = vsub.f32 %v13145_v4, %v13146_v31  ;;  %v4714_v30 = vmul.f32 %v13149_v32, %v4554_v13  ;;  %v9052_v3 = vld [vmem:[#allocation5 + $0x22c] ss:$16 sps:$4 sm:$0xff]  }
 0x610   :  { %v6058_v16 = vsel %vm6050_vm8, %v6031_v7, %v6057_v50  ;;  %v4682_v14 = vmul.f32 %v11709_v35, %v13140_v9  ;;  %v6051_v28 = vsel %vm6050_vm8, %v6030_v43, %v6049_v10  ;;  %v13143_v50 = vsub.f32 %v13061_v38, %v13142_v27 }
 0x611   :  { %v4690_v49 = vmul.f32 %v11745_v24, %v13141_v53  ;;  %v6102_v1 = vpack.c.b16 %v6058_v16, %v6058_v16  ;;  %v4706_v45 = vmul.f32 %v13148_v19, %v13147_v2  ;;  %v6101_v11 = vpack.c.b16 %v6051_v28, %v6051_v28 }
 0x612   :  { %v4698_v12 = vmul.f32 %v13144_v51, %v13143_v50  ;;  %v4722_v15 = vmul.f32 %v13150_v42, %v4562_v23  ;;  %v4730_v0 = vmul.f32 %v11859_v33, %v4570_v20  ;;  %v4738_v7 = vmul.f32 %v11889_v21, %v4578_v18  ;;  %v13151_v20 = vld [vmem:[#allocation159_spill] sm:$0xff] }
 0x613   :  { %7429 = vmatprep.mubr.bf16.mxu0 %v6102_v1  ;;  %7593 = vmatprep.mubr.bf16.mxu1 %v6102_v1  ;;  %v4746_v38 = vmul.f32 %v11901_v17, %v4586_v6  ;;  %v4754_v40 = vmul.f32 %v11922_v37, %v4594_v5  ;;  %v4762_v62 = vmul.f32 %v11939_v39, %v4602_v48  ;;  %v9047_v6 = vld [vmem:[#allocation5 + $0x220] ss:$16 sps:$4 sm:$0xff]   ;;  %v9058_v50 = vld [vmem:[#allocation5 + $0x24c] ss:$16 sps:$4 sm:$0xff]  }
 0x614   :  { %7430 = vmatmul.mubr.bf16.vlgmr.msra.gmra.mrb[192].mxu0 %v6101_v11  ;;  %7594 = vmatmul.mubr.bf16.vlgmr.msra.gmra.mrb[192].mxu1 %v6101_v11  ;;  %v4770_v13 = vmul.f32 %v11962_v44, %v4610_v58  ;;  %v4778_v23 = vmul.f32 %v11975_v41, %v4618_v29  ;;  %v4851_v43 = vmul.f32 %v13151_v20, %v4682_v14  ;;  %v9050_v58 = vld [vmem:[#allocation5 + $0x228] ss:$16 sps:$4 sm:$0xff]   ;;  %v9055_v14 = vld [vmem:[#allocation5 + $0x244] ss:$16 sps:$4 sm:$0xff]   ;;  %v9053_v11 = vld [vmem:[#allocation5 + $0x240] ss:$16 sps:$4 sm:$0xff]  }
 0x615   :  { %7439 = vmatpush1.bf16.msra.mxu0 %v9041_v55  ;;  %7603 = vmatpush1.bf16.msra.mxu1 %v9044_v8  ;;  %v4859_v59 = vmul.f32 %v13151_v20, %v4690_v49  ;;  %v4867_v18 = vmul.f32 %v13151_v20, %v4698_v12  ;;  %v4875_v5 = vmul.f32 %v13151_v20, %v4706_v45  ;;  %v13152_v1 = vld [vmem:[#allocation58_spill] sm:$0xff]  ;;  %v13153_v55 = vld [vmem:[#allocation161_spill] sm:$0xff] }
 0x616   :  { %v4883_v34 = vmul.f32 %v13151_v20, %v4714_v30  ;;  %v4891_v61 = vmul.f32 %v13151_v20, %v4722_v15  ;;  %v4899_v48 = vmul.f32 %v13151_v20, %v4730_v0  ;;  %7440 = vmatprep.subr.bf16.mxu0 %v9049_v26  ;;  %v4907_v29 = vmul.f32 %v13151_v20, %v4738_v7  ;;  %v9056_v7 = vld [vmem:[#allocation5 + $0x248] ss:$16 sps:$4 sm:$0xff]  }
 0x617   :  { %v4915_v16 = vmul.f32 %v13151_v20, %v4746_v38  ;;  %v4923_v10 = vmul.f32 %v13151_v20, %v4754_v40  ;;  %v4931_v9 = vmul.f32 %v13151_v20, %v4762_v62  ;;  %7604 = vmatprep.subr.bf16.mxu1 %v9052_v3  ;;  %v4939_v53 = vmul.f32 %v13151_v20, %v4770_v13  ;;  %v9061_v38 = vld [vmem:[#allocation5 + $0x264] ss:$16 sps:$4 sm:$0xff]  }
 0x618   :  { %v4947_v49 = vmul.f32 %v13151_v20, %v4778_v23  ;;  %v5012_v8 = vadd.f32 %v13153_v55, %v13152_v1  ;;  %v5020_v28 = vadd.f32 %v13153_v55, %v4851_v43  ;;  %v5028_v12 = vadd.f32 %v13153_v55, %v4859_v59  ;;  %v9064_v23 = vld [vmem:[#allocation5 + $0x26c] ss:$16 sps:$4 sm:$0xff]  }
 0x619   :  { %v5036_v4 = vadd.f32 %v13153_v55, %v4867_v18  ;;  %v5044_v2 = vadd.f32 %v13153_v55, %v4875_v5  ;;  %v5052_v45 = vadd.f32 %v13153_v55, %v4883_v34  ;;  %7441 = vmatpush1.bf16.msra.mxu0 %v9047_v6  ;;  %v5060_v30 = vadd.f32 %v13153_v55, %v4891_v61  ;;  %v13154_v20 = vld [vmem:[#allocation55_spill] sm:$0xff] }
 0x61a   :  { %v5068_v15 = vadd.f32 %v13153_v55, %v4899_v48  ;;  %v5076_v0 = vadd.f32 %v13153_v55, %v4907_v29  ;;  %v5084_v26 = vadd.f32 %v13153_v55, %v4915_v16  ;;  %7605 = vmatpush1.bf16.msra.mxu1 %v9050_v58  ;;  %v5092_v40 = vadd.f32 %v13153_v55, %v4923_v10  ;;  %v13155_v43 = vld [vmem:[#allocation51_spill] sm:$0xff]  ;;  %v9059_v29 = vld [vmem:[#allocation5 + $0x260] ss:$16 sps:$4 sm:$0xff]  }
 0x61b   :  { %v5100_v3 = vadd.f32 %v13153_v55, %v4931_v9  ;;  %v5108_v62 = vadd.f32 %v13153_v55, %v4939_v53  ;;  %v5116_v13 = vadd.f32 %v13153_v55, %v4947_v49  ;;  %7442 = vmatprep.subr.bf16.mxu0 %v9055_v14  ;;  %v5142_v59 = vmax.f32 %v13155_v43, %v13154_v20  ;;  %v9062_v16 = vld [vmem:[#allocation5 + $0x268] ss:$16 sps:$4 sm:$0xff]   ;;  %v9067_v14 = vld [vmem:[#allocation5 + $0x284] ss:$16 sps:$4 sm:$0xff]  }
 0x61c   :  { %v5198_v18 = vmax.f32 %v5012_v8, %v5020_v28  ;;  %v5254_v6 = vmax.f32 %v5028_v12, %v5036_v4  ;;  %v5310_v5 = vmax.f32 %v5044_v2, %v5052_v45  ;;  %7606 = vmatprep.subr.bf16.mxu1 %v9058_v50  ;;  %v5366_v34 = vmax.f32 %v5060_v30, %v5068_v15  ;;  %v9070_v50 = vld [vmem:[#allocation5 + $0x28c] ss:$16 sps:$4 sm:$0xff]  }
 0x61d   :  { %v5422_v61 = vmax.f32 %v5076_v0, %v5084_v26  ;;  %v5478_v48 = vmax.f32 %v5092_v40, %v5100_v3  ;;  %v5534_v58 = vmax.f32 %v5108_v62, %v5116_v13  ;;  %7443 = vmatpush1.bf16.msra.mxu0 %v9053_v11  ;;  %v5143_v10 = vrot.slane %v5142_v59, 4  ;;  %v9065_v26 = vld [vmem:[#allocation5 + $0x280] ss:$16 sps:$4 sm:$0xff]   ;;  %v9068_v40 = vld [vmem:[#allocation5 + $0x288] ss:$16 sps:$4 sm:$0xff]  }
 0x61e   :  { %v5199_v9 = vrot.slane %v5198_v18, 4  ;;  %v5255_v53 = vrot.slane %v5254_v6, 4  ;;  %v5311_v49 = vrot.slane %v5310_v5, 4  ;;  %7607 = vmatpush1.bf16.msra.mxu1 %v9056_v7  ;;  %7444 = vmatprep.subr.bf16.mxu0 %v9061_v38  ;;  %v5367_v1 = vrot.slane %v5366_v34, 4  ;;  %v9073_v13 = vld [vmem:[#allocation5 + $0x2a4] ss:$16 sps:$4 sm:$0xff]  }
 0x61f   :  { %v5423_v55 = vrot.slane %v5422_v61, 4  ;;  %v5479_v8 = vrot.slane %v5478_v48, 4  ;;  %v5535_v28 = vrot.slane %v5534_v58, 4  ;;  %7608 = vmatprep.subr.bf16.mxu1 %v9064_v23  ;;  %v5144_v12 = vmax.f32 %v5142_v59, %v5143_v10 }
 0x620   :  { %v5200_v4 = vmax.f32 %v5198_v18, %v5199_v9  ;;  %v5256_v2 = vmax.f32 %v5254_v6, %v5255_v53  ;;  %v5312_v45 = vmax.f32 %v5310_v5, %v5311_v49  ;;  %v5368_v11 = vmax.f32 %v5366_v34, %v5367_v1  ;;  %v9076_v18 = vld [vmem:[#allocation5 + $0x2ac] ss:$16 sps:$4 sm:$0xff]   ;;  %v9071_v9 = vld [vmem:[#allocation5 + $0x2a0] ss:$16 sps:$4 sm:$0xff]   ;;  %v9074_v1 = vld [vmem:[#allocation5 + $0x2a8] ss:$16 sps:$4 sm:$0xff]  }
 0x621   :  { %v5424_v30 = vmax.f32 %v5422_v61, %v5423_v55  ;;  %v5480_v15 = vmax.f32 %v5478_v48, %v5479_v8  ;;  %v5536_v0 = vmax.f32 %v5534_v58, %v5535_v28  ;;  %7445 = vmatpush1.bf16.msra.mxu0 %v9059_v29  ;;  %v5145_v7 = vrot.slane %v5144_v12, 2 }
 0x622   :  { %v5201_v38 = vrot.slane %v5200_v4, 2  ;;  %v5257_v3 = vrot.slane %v5256_v2, 2  ;;  %v5313_v62 = vrot.slane %v5312_v45, 2  ;;  %7609 = vmatpush1.bf16.msra.mxu1 %v9062_v16  ;;  %7446 = vmatprep.subr.bf16.mxu0 %v9067_v14  ;;  %v5369_v23 = vrot.slane %v5368_v11, 2 }
 0x623   :  { %v5425_v20 = vrot.slane %v5424_v30, 2  ;;  %v5481_v43 = vrot.slane %v5480_v15, 2  ;;  %v5537_v59 = vrot.slane %v5536_v0, 2  ;;  %7610 = vmatprep.subr.bf16.mxu1 %v9070_v50  ;;  %v5146_v6 = vmax.f32 %v5144_v12, %v5145_v7  ;;  %v9079_v12 = vld [vmem:[#allocation5 + $0x2c4] ss:$16 sps:$4 sm:$0xff]  }
 0x624   :  { %v5202_v5 = vmax.f32 %v5200_v4, %v5201_v38  ;;  %v5258_v34 = vmax.f32 %v5256_v2, %v5257_v3  ;;  %v5314_v61 = vmax.f32 %v5312_v45, %v5313_v62  ;;  %v5370_v48 = vmax.f32 %v5368_v11, %v5369_v23  ;;  %v9077_v38 = vld [vmem:[#allocation5 + $0x2c0] ss:$16 sps:$4 sm:$0xff]   ;;  %v9080_v23 = vld [vmem:[#allocation5 + $0x2c8] ss:$16 sps:$4 sm:$0xff]  }
 0x625   :  { %v5426_v58 = vmax.f32 %v5424_v30, %v5425_v20  ;;  %v5482_v29 = vmax.f32 %v5480_v15, %v5481_v43  ;;  %v5538_v10 = vmax.f32 %v5536_v0, %v5537_v59  ;;  %7447 = vmatpush1.bf16.msra.mxu0 %v9065_v26  ;;  %v5147_v53 = vrot.slane %v5146_v6, 1  ;;  %v9082_v30 = vld [vmem:[#allocation5 + $0x2cc] ss:$16 sps:$4 sm:$0xff]   ;;  %v9085_v20 = vld [vmem:[#allocation5 + $0x2e4] ss:$16 sps:$4 sm:$0xff]  }
 0x626   :  { %v5203_v16 = vrot.slane %v5202_v5, 1  ;;  %v5259_v49 = vrot.slane %v5258_v34, 1  ;;  %v5315_v14 = vrot.slane %v5314_v61, 1  ;;  %7611 = vmatpush1.bf16.msra.mxu1 %v9068_v40  ;;  %7448 = vmatprep.subr.bf16.mxu0 %v9073_v13  ;;  %v5371_v55 = vrot.slane %v5370_v48, 1 }
 0x627   :  { %v5427_v8 = vrot.slane %v5426_v58, 1  ;;  %v5483_v28 = vrot.slane %v5482_v29, 1  ;;  %v5539_v50 = vrot.slane %v5538_v10, 1  ;;  %7612 = vmatprep.subr.bf16.mxu1 %v9076_v18  ;;  %v5148_v4 = vmax.f32 %v5146_v6, %v5147_v53  ;;  %v9083_v53 = vld [vmem:[#allocation5 + $0x2e0] ss:$16 sps:$4 sm:$0xff]  }
 0x628   :  { %v5204_v2 = vmax.f32 %v5202_v5, %v5203_v16  ;;  %v5260_v45 = vmax.f32 %v5258_v34, %v5259_v49  ;;  %v5316_v11 = vmax.f32 %v5314_v61, %v5315_v14  ;;  %v5372_v15 = vmax.f32 %v5370_v48, %v5371_v55  ;;  %v9088_v5 = vld [vmem:[#allocation5 + $0x2ec] ss:$16 sps:$4 sm:$0xff]   ;;  %v13157_v49 = vld [vmem:[#allocation158_spill] sm:$0xff] }
 0x629   :  { %v5428_v0 = vmax.f32 %v5426_v58, %v5427_v8  ;;  %v5484_v26 = vmax.f32 %v5482_v29, %v5483_v28  ;;  %v5540_v7 = vmax.f32 %v5538_v10, %v5539_v50  ;;  %7449 = vmatpush1.bf16.msra.mxu0 %v9071_v9  ;;  %v5572_v40 = vpack.c.bf16 %v5148_v4, %v5148_v4  ;;  %v13156_v16 = vld [vmem:[#allocation53_spill] sm:$0xff]  ;;  %v9091_v28 = vld [vmem:[#allocation5 + $0x304] ss:$16 sps:$4 sm:$0xff]   ;;  %v13158_v50 = vld [vmem:[#allocation79_spill] sm:$0xff] }
 0x62a   :  { %v5580_v3 = vpack.c.bf16 %v5204_v2, %v5204_v2  ;;  %v5588_v62 = vpack.c.bf16 %v5260_v45, %v5260_v45  ;;  %v5596_v13 = vpack.c.bf16 %v5316_v11, %v5316_v11  ;;  %7613 = vmatpush1.bf16.msra.mxu1 %v9074_v1  ;;  %v5604_v43 = vpack.c.bf16 %v5372_v15, %v5372_v15  ;;  %v9086_v8 = vld [vmem:[#allocation5 + $0x2e8] ss:$16 sps:$4 sm:$0xff]   ;;  %v13159_v4 = vld [vmem:[#allocation80_spill] sm:$0xff]  ;;  %v9094_v11 = vld [vmem:[#allocation5 + $0x30c] ss:$16 sps:$4 sm:$0xff]  }
 0x62b   :  { %v5612_v59 = vpack.c.bf16 %v5428_v0, %v5428_v0  ;;  %v5620_v18 = vpack.c.bf16 %v5484_v26, %v5484_v26  ;;  %v5628_v6 = vpack.c.bf16 %v5540_v7, %v5540_v7  ;;  %7450 = vmatprep.subr.bf16.mxu0 %v9079_v12  ;;  %v5977_v34 = vunpack.c.l.b16 %v5572_v40  ;;  %7614 = vmatprep.subr.bf16.mxu1 %v9082_v30  ;;  %v13160_v30 = vld [vmem:[#allocation83_spill] sm:$0xff]  ;;  %v13162_v7 = vld [vmem:[#allocation33_spill] sm:$0xff] }
 0x62c   :  { %v5985_v61 = vunpack.c.l.b16 %v5580_v3  ;;  %v5993_v48 = vunpack.c.l.b16 %v5588_v62  ;;  %v6001_v58 = vunpack.c.l.b16 %v5596_v13  ;;  %v6009_v29 = vunpack.c.l.b16 %v5604_v43  ;;  %v13161_v0 = vld [vmem:[#allocation87_spill] sm:$0xff]  ;;  %v13163_v3 = vld [vmem:[#allocation40_spill] sm:$0xff]  ;;  %v13164_v13 = vld [vmem:[#allocation93_spill] sm:$0xff] }
 0x62d   :  { %v6017_v10 = vunpack.c.l.b16 %v5612_v59  ;;  %v6025_v9 = vunpack.c.l.b16 %v5620_v18  ;;  %7451 = vmatpush1.bf16.msra.mxu0 %v9077_v38  ;;  %v12084_v14 = vmul.f32 %v13157_v49, %v13156_v16  ;;  %v6033_v1 = vunpack.c.l.b16 %v5628_v6  ;;  %v9089_v18 = vld [vmem:[#allocation5 + $0x300] ss:$16 sps:$4 sm:$0xff]   ;;  %v13166_v6 = vld [vmem:[#allocation39_spill] sm:$0xff] }
 0x62e   :  { %v6066_v55 = vsel %vm6038_vm2, %v5985_v61, %v5977_v34  ;;  %7615 = vmatpush1.bf16.msra.mxu1 %v9080_v23  ;;  %7452 = vmatprep.subr.bf16.mxu0 %v9085_v20  ;;  %v4545_v12 = vsub.f32 %v13158_v50, %v13146_v31  ;;  %v4553_v2 = vsub.f32 %v13159_v4, %v11707_v63  ;;  %v13165_v20 = vld [vmem:[#allocation34_spill] sm:$0xff] }
 0x62f   :  { %v6067_v45 = vsel %vm6040_vm3, %v5993_v48, %v6066_v55  ;;  %7616 = vmatprep.subr.bf16.mxu1 %v9088_v5  ;;  %v4561_v15 = vsub.f32 %v13160_v30, %v11732_v47  ;;  %v4569_v26 = vsub.f32 %v13161_v0, %v11741_v57  ;;  %v4577_v38 = vsub.f32 %v13162_v7, %v11771_v52  ;;  %v13167_v34 = vld [vmem:[#allocation42_spill] sm:$0xff]  ;;  %v13168_v48 = vld [vmem:[#allocation61_spill] sm:$0xff] }
 0x630   :  { %v6068_v40 = vsel %vm6042_vm4, %v6001_v58, %v6067_v45  ;;  %v4585_v62 = vsub.f32 %v13163_v3, %v11789_v54  ;;  %v4593_v23 = vsub.f32 %v13164_v13, %v11829_v56  ;;  %v4601_v43 = vsub.f32 %v13165_v20, %v11843_v60  ;;  %v13169_v58 = vld [vmem:[#allocation157_spill] sm:$0xff]  ;;  %v9097_v30 = vld [vmem:[#allocation5 + $0x324] ss:$16 sps:$4 sm:$0xff]   ;;  %v13176_v20 = vld [vmem:[#allocation71_spill] sm:$0xff] }
 0x631   :  { %v6069_v59 = vsel %vm6044_vm5, %v6009_v29, %v6068_v40  ;;  %7453 = vmatpush1.bf16.msra.mxu0 %v9083_v53  ;;  %v4609_v5 = vsub.f32 %v13166_v6, %v11864_v36  ;;  %v4617_v61 = vsub.f32 %v13167_v34, %v11880_v25  ;;  %v13170_v16 = vsub.f32 %v13168_v48, %v13169_v58  ;;  %v13171_v55 = vld [vmem:[#allocation57_spill] sm:$0xff]  ;;  %v13172_v29 = vld [vmem:[#allocation62_spill] sm:$0xff] }
 0x632   :  { %v6070_v4 = vsel %vm6046_vm6, %v6017_v10, %v6069_v59  ;;  %7617 = vmatpush1.bf16.msra.mxu1 %v9086_v8  ;;  %7454 = vmatprep.subr.bf16.mxu0 %v9091_v28  ;;  %v9092_v45 = vld [vmem:[#allocation5 + $0x308] ss:$16 sps:$4 sm:$0xff]   ;;  %v13173_v53 = vsub.f32 %v13172_v29, %v11579_v46  ;;  %v13177_v10 = vsub.f32 %v13176_v20, %v13142_v27  ;;  %v9100_v34 = vld [vmem:[#allocation5 + $0x32c] ss:$16 sps:$4 sm:$0xff]  }
 0x633   :  { %v4673_v50 = vmul.f32 %v13171_v55, %v13170_v16  ;;  %v13174_v7 = vld [vmem:[#allocation69_spill] sm:$0xff]  ;;  %v6071_v13 = vsel %vm6048_vm7, %v6025_v9, %v6070_v4  ;;  %7618 = vmatprep.subr.bf16.mxu1 %v9094_v11  ;;  %v4705_v28 = vmul.f32 %v13148_v19, %v4545_v12  ;;  %v4713_v59 = vmul.f32 %v13149_v32, %v4553_v2  ;;  %v9095_v11 = vld [vmem:[#allocation5 + $0x320] ss:$16 sps:$4 sm:$0xff]  }
 0x634   :  { %v4681_v0 = vmul.f32 %v11709_v35, %v13173_v53  ;;  %v13175_v40 = vsub.f32 %v13174_v7, %v11611_v22  ;;  %v4697_v8 = vmul.f32 %v13144_v51, %v13177_v10  ;;  %v6072_v6 = vsel %vm6050_vm8, %v6033_v1, %v6071_v13  ;;  %v9098_v2 = vld [vmem:[#allocation5 + $0x328] ss:$16 sps:$4 sm:$0xff]   ;;  %v9103_v1 = vld [vmem:[#allocation5 + $0x344] ss:$16 sps:$4 sm:$0xff]  }
 0x635   :  { %v4721_v48 = vmul.f32 %v13150_v42, %v4561_v15  ;;  %v4729_v16 = vmul.f32 %v11859_v33, %v4569_v26  ;;  %v4737_v29 = vmul.f32 %v11889_v21, %v4577_v38  ;;  %v6104_v9 = vpack.c.b16 %v6072_v6, %v6072_v6  ;;  %7455 = vmatpush1.bf16.msra.mxu0 %v9089_v18  ;;  %v13178_v26 = vld [vmem:[#allocation56_spill] sm:$0xff]  ;;  %v9106_v18 = vld [vmem:[#allocation5 + $0x34c] ss:$16 sps:$4 sm:$0xff]  }
 0x636   :  { %v4689_v3 = vmul.f32 %v11745_v24, %v13175_v40  ;;  %v4745_v4 = vmul.f32 %v11901_v17, %v4585_v62  ;;  %v4753_v53 = vmul.f32 %v11922_v37, %v4593_v23  ;;  %v4761_v12 = vmul.f32 %v11939_v39, %v4601_v43  ;;  %7619 = vmatpush1.bf16.msra.mxu1 %v9092_v45  ;;  %v9101_v40 = vld [vmem:[#allocation5 + $0x340] ss:$16 sps:$4 sm:$0xff]   ;;  %v9109_v10 = vld [vmem:[#allocation5 + $0x364] ss:$16 sps:$4 sm:$0xff]   ;;  %v9112_v6 = vld [vmem:[#allocation5 + $0x36c] ss:$16 sps:$4 sm:$0xff]  }
 0x637   :  { %7456 = vmatprep.subr.bf16.mxu0 %v9097_v30  ;;  %v4769_v7 = vmul.f32 %v11962_v44, %v4609_v5  ;;  %v4777_v15 = vmul.f32 %v11975_v41, %v4617_v61  ;;  %v4834_v38 = vmul.f32 %v13157_v49, %v13178_v26  ;;  %7470 = vmatprep.mubr.bf16.mxu0 %v6104_v9  ;;  %v9115_v26 = vld [vmem:[#allocation5 + $0x384] ss:$16 sps:$4 sm:$0xff]  }
 0x638   :  { %7634 = vmatprep.mubr.bf16.mxu1 %v6104_v9  ;;  %v4842_v62 = vmul.f32 %v13157_v49, %v4673_v50  ;;  %v4850_v23 = vmul.f32 %v13157_v49, %v4681_v0  ;;  %v4858_v43 = vmul.f32 %v13157_v49, %v4689_v3  ;;  %7620 = vmatprep.subr.bf16.mxu1 %v9100_v34  ;;  %v9104_v3 = vld [vmem:[#allocation5 + $0x348] ss:$16 sps:$4 sm:$0xff]   ;;  %v13179_v34 = vld [vmem:[#allocation160_spill] sm:$0xff] }
 0x639   :  { %v4866_v45 = vmul.f32 %v13157_v49, %v4697_v8  ;;  %v4874_v30 = vmul.f32 %v13157_v49, %v4705_v28  ;;  %v4882_v5 = vmul.f32 %v13157_v49, %v4713_v59  ;;  %v4890_v61 = vmul.f32 %v13157_v49, %v4721_v48  ;;  %7457 = vmatpush1.bf16.msra.mxu0 %v9095_v11 }
 0x63a   :  { %v4898_v13 = vmul.f32 %v13157_v49, %v4729_v16  ;;  %v4906_v20 = vmul.f32 %v13157_v49, %v4737_v29  ;;  %v4914_v50 = vmul.f32 %v13157_v49, %v4745_v4  ;;  %v4922_v0 = vmul.f32 %v13157_v49, %v4753_v53  ;;  %7621 = vmatpush1.bf16.msra.mxu1 %v9098_v2 }
 0x63b   :  { %7458 = vmatprep.subr.bf16.mxu0 %v9103_v1  ;;  %v4930_v8 = vmul.f32 %v13157_v49, %v4761_v12  ;;  %v4938_v28 = vmul.f32 %v13157_v49, %v4769_v7  ;;  %v4946_v59 = vmul.f32 %v13157_v49, %v4777_v15  ;;  %7622 = vmatprep.subr.bf16.mxu1 %v9106_v18  ;;  %v9107_v49 = vld [vmem:[#allocation5 + $0x360] ss:$16 sps:$4 sm:$0xff]   ;;  %v9110_v15 = vld [vmem:[#allocation5 + $0x368] ss:$16 sps:$4 sm:$0xff]  }
 0x63c   :  { %v4995_v48 = vadd.f32 %v13179_v34, %v12084_v14  ;;  %v5003_v16 = vadd.f32 %v13179_v34, %v4834_v38  ;;  %v5011_v29 = vadd.f32 %v13179_v34, %v4842_v62  ;;  %v5019_v9 = vadd.f32 %v13179_v34, %v4850_v23  ;;  %v9118_v23 = vld [vmem:[#allocation5 + $0x38c] ss:$16 sps:$4 sm:$0xff]  }
 0x63d   :  { %v5027_v11 = vadd.f32 %v13179_v34, %v4858_v43  ;;  %v5035_v4 = vadd.f32 %v13179_v34, %v4866_v45  ;;  %v5043_v53 = vadd.f32 %v13179_v34, %v4874_v30  ;;  %v5051_v12 = vadd.f32 %v13179_v34, %v4882_v5  ;;  %7459 = vmatpush1.bf16.msra.mxu0 %v9101_v40 }
 0x63e   :  { %v5059_v2 = vadd.f32 %v13179_v34, %v4890_v61  ;;  %v5067_v14 = vadd.f32 %v13179_v34, %v4898_v13  ;;  %v5075_v1 = vadd.f32 %v13179_v34, %v4906_v20  ;;  %v5083_v7 = vadd.f32 %v13179_v34, %v4914_v50  ;;  %7623 = vmatpush1.bf16.msra.mxu1 %v9104_v3  ;;  %v9113_v61 = vld [vmem:[#allocation5 + $0x380] ss:$16 sps:$4 sm:$0xff]   ;;  %v9116_v3 = vld [vmem:[#allocation5 + $0x388] ss:$16 sps:$4 sm:$0xff]  }
 0x63f   :  { %7460 = vmatprep.subr.bf16.mxu0 %v9109_v10  ;;  %v5091_v38 = vadd.f32 %v13179_v34, %v4922_v0  ;;  %v5099_v18 = vadd.f32 %v13179_v34, %v4930_v8  ;;  %v5107_v62 = vadd.f32 %v13179_v34, %v4938_v28  ;;  %7624 = vmatprep.subr.bf16.mxu1 %v9112_v6  ;;  %v9121_v28 = vld [vmem:[#allocation5 + $0x3a4] ss:$16 sps:$4 sm:$0xff]  }
 0x640   :  { %v5115_v43 = vadd.f32 %v13179_v34, %v4946_v59  ;;  %v5135_v45 = vmax.f32 %v4995_v48, %v5003_v16  ;;  %v5191_v30 = vmax.f32 %v5011_v29, %v5019_v9  ;;  %v5247_v5 = vmax.f32 %v5027_v11, %v5035_v4  ;;  %v9124_v48 = vld [vmem:[#allocation5 + $0x3ac] ss:$16 sps:$4 sm:$0xff]   ;;  %v9119_v4 = vld [vmem:[#allocation5 + $0x3a0] ss:$16 sps:$4 sm:$0xff]  }
 0x641   :  { %v5303_v40 = vmax.f32 %v5043_v53, %v5051_v12  ;;  %v5359_v13 = vmax.f32 %v5059_v2, %v5067_v14  ;;  %v5415_v20 = vmax.f32 %v5075_v1, %v5083_v7  ;;  %v5471_v50 = vmax.f32 %v5091_v38, %v5099_v18  ;;  %7461 = vmatpush1.bf16.msra.mxu0 %v9107_v49  ;;  %v9122_v14 = vld [vmem:[#allocation5 + $0x3a8] ss:$16 sps:$4 sm:$0xff]   ;;  %v9127_v38 = vld [vmem:[#allocation5 + $0x3c4] ss:$16 sps:$4 sm:$0xff]  }
 0x642   :  { %v5136_v10 = vrot.slane %v5135_v45, 4  ;;  %v5192_v0 = vrot.slane %v5191_v30, 4  ;;  %v5248_v41 = vrot.slane %v5247_v5, 4  ;;  %v5527_v8 = vmax.f32 %v5107_v62, %v5115_v43  ;;  %7625 = vmatpush1.bf16.msra.mxu1 %v9110_v15  ;;  %7462 = vmatprep.subr.bf16.mxu0 %v9115_v26 }
 0x643   :  { %v5304_v6 = vrot.slane %v5303_v40, 4  ;;  %v5360_v44 = vrot.slane %v5359_v13, 4  ;;  %v5416_v59 = vrot.slane %v5415_v20, 4  ;;  %v5472_v34 = vrot.slane %v5471_v50, 4  ;;  %7626 = vmatprep.subr.bf16.mxu1 %v9118_v23 }
 0x644   :  { %v5137_v16 = vmax.f32 %v5135_v45, %v5136_v10  ;;  %v5193_v29 = vmax.f32 %v5191_v30, %v5192_v0  ;;  %v5249_v9 = vmax.f32 %v5247_v5, %v5248_v41  ;;  %v5528_v11 = vrot.slane %v5527_v8, 4  ;;  %v9130_v41 = vld [vmem:[#allocation5 + $0x3cc] ss:$16 sps:$4 sm:$0xff]   ;;  %v9128_v10 = vld [vmem:[#allocation5 + $0x3c8] ss:$16 sps:$4 sm:$0xff]  }
 0x645   :  { %v5305_v53 = vmax.f32 %v5303_v40, %v5304_v6  ;;  %v5361_v12 = vmax.f32 %v5359_v13, %v5360_v44  ;;  %v5417_v49 = vmax.f32 %v5415_v20, %v5416_v59  ;;  %v5473_v2 = vmax.f32 %v5471_v50, %v5472_v34  ;;  %7463 = vmatpush1.bf16.msra.mxu0 %v9113_v61  ;;  %v9125_v40 = vld [vmem:[#allocation5 + $0x3c0] ss:$16 sps:$4 sm:$0xff]   ;;  %v9133_v6 = vld [vmem:[#allocation5 + $0x3e4] ss:$16 sps:$4 sm:$0xff]  }
 0x646   :  { %v5138_v1 = vrot.slane %v5137_v16, 2  ;;  %v5194_v7 = vrot.slane %v5193_v29, 2  ;;  %v5250_v15 = vrot.slane %v5249_v9, 2  ;;  %v5529_v26 = vmax.f32 %v5527_v8, %v5528_v11  ;;  %7627 = vmatpush1.bf16.msra.mxu1 %v9116_v3  ;;  %7464 = vmatprep.subr.bf16.mxu0 %v9121_v28 }
 0x647   :  { %v5306_v18 = vrot.slane %v5305_v53, 2  ;;  %v5362_v62 = vrot.slane %v5361_v12, 2  ;;  %v5418_v23 = vrot.slane %v5417_v49, 2  ;;  %v5474_v43 = vrot.slane %v5473_v2, 2  ;;  %7628 = vmatprep.subr.bf16.mxu1 %v9124_v48 }
 0x648   :  { %v5139_v45 = vmax.f32 %v5137_v16, %v5138_v1  ;;  %v5195_v30 = vmax.f32 %v5193_v29, %v5194_v7  ;;  %v5251_v44 = vmax.f32 %v5249_v9, %v5250_v15  ;;  %v5530_v5 = vrot.slane %v5529_v26, 2  ;;  %v9136_v29 = vld [vmem:[#allocation5 + $0x3ec] ss:$16 sps:$4 sm:$0xff]   ;;  %v9131_v7 = vld [vmem:[#allocation5 + $0x3e0] ss:$16 sps:$4 sm:$0xff]  }
 0x649   :  { %v5307_v61 = vmax.f32 %v5305_v53, %v5306_v18  ;;  %v5363_v13 = vmax.f32 %v5361_v12, %v5362_v62  ;;  %v5419_v20 = vmax.f32 %v5417_v49, %v5418_v23  ;;  %v5475_v50 = vmax.f32 %v5473_v2, %v5474_v43  ;;  %7465 = vmatpush1.bf16.msra.mxu0 %v9119_v4  ;;  %v9134_v18 = vld [vmem:[#allocation5 + $0x3e8] ss:$16 sps:$4 sm:$0xff]  }
 0x64a   :  { %v5140_v3 = vrot.slane %v5139_v45, 1  ;;  %v5196_v0 = vrot.slane %v5195_v30, 1  ;;  %v5252_v8 = vrot.slane %v5251_v44, 1  ;;  %v5531_v28 = vmax.f32 %v5529_v26, %v5530_v5  ;;  %7629 = vmatpush1.bf16.msra.mxu1 %v9122_v14  ;;  %7466 = vmatprep.subr.bf16.mxu0 %v9127_v38 }
 0x64b   :  { %v5308_v59 = vrot.slane %v5307_v61, 1  ;;  %v5364_v34 = vrot.slane %v5363_v13, 1  ;;  %v5420_v48 = vrot.slane %v5419_v20, 1  ;;  %v5476_v16 = vrot.slane %v5475_v50, 1  ;;  %7630 = vmatprep.subr.bf16.mxu1 %v9130_v41  ;;  %v9139_v41 = vld [vmem:[#allocation5 + $0x404] ss:$16 sps:$4 sm:$0xff]  }
 0x64c   :  { %v5141_v9 = vmax.f32 %v5139_v45, %v5140_v3  ;;  %v5197_v11 = vmax.f32 %v5195_v30, %v5196_v0  ;;  %v5253_v53 = vmax.f32 %v5251_v44, %v5252_v8  ;;  %v5532_v12 = vrot.slane %v5531_v28, 1 }
 0x64d   :  { %v5309_v49 = vmax.f32 %v5307_v61, %v5308_v59  ;;  %v5365_v4 = vmax.f32 %v5363_v13, %v5364_v34  ;;  %v5421_v2 = vmax.f32 %v5419_v20, %v5420_v48  ;;  %v5477_v1 = vmax.f32 %v5475_v50, %v5476_v16  ;;  %7467 = vmatpush1.bf16.msra.mxu0 %v9125_v40  ;;  %v9142_v61 = vld [vmem:[#allocation5 + $0x40c] ss:$16 sps:$4 sm:$0xff]   ;;  %v13182_v48 = vld [vmem:[#allocation112_spill] sm:$0xff] }
 0x64e   :  { %v5533_v15 = vmax.f32 %v5531_v28, %v5532_v12  ;;  %v5571_v14 = vpack.c.bf16 %v5141_v9, %v5141_v9  ;;  %v5579_v26 = vpack.c.bf16 %v5197_v11, %v5197_v11  ;;  %v5587_v38 = vpack.c.bf16 %v5253_v53, %v5253_v53  ;;  %7631 = vmatpush1.bf16.msra.mxu1 %v9128_v10  ;;  %v13180_v50 = vld [vmem:[#allocation105_spill] sm:$0xff] }
 0x64f   :  { %7468 = vmatprep.subr.bf16.mxu0 %v9133_v6  ;;  %v5595_v62 = vpack.c.bf16 %v5309_v49, %v5309_v49  ;;  %v5603_v23 = vpack.c.bf16 %v5365_v4, %v5365_v4  ;;  %v5611_v43 = vpack.c.bf16 %v5421_v2, %v5421_v2  ;;  %7632 = vmatprep.subr.bf16.mxu1 %v9136_v29  ;;  %v13181_v28 = vld [vmem:[#allocation109_spill] sm:$0xff]  ;;  %v13183_v29 = vld [vmem:[#allocation118_spill] sm:$0xff]  ;;  %v13185_v49 = vld [vmem:[#allocation123_spill] sm:$0xff] }
 0x650   :  { %v5619_v45 = vpack.c.bf16 %v5477_v1, %v5477_v1  ;;  %v5627_v30 = vpack.c.bf16 %v5533_v15, %v5533_v15  ;;  %v5976_v44 = vunpack.c.l.b16 %v5571_v14  ;;  %v5984_v5 = vunpack.c.l.b16 %v5579_v26  ;;  %v13184_v53 = vld [vmem:[#allocation121_spill] sm:$0xff]  ;;  %v13186_v2 = vld [vmem:[#allocation128_spill] sm:$0xff]  ;;  %v13187_v15 = vld [vmem:[#allocation134_spill] sm:$0xff] }
 0x651   :  { %v5992_v13 = vunpack.c.l.b16 %v5587_v38  ;;  %v6000_v40 = vunpack.c.l.b16 %v5595_v62  ;;  %v6008_v20 = vunpack.c.l.b16 %v5603_v23  ;;  %v4524_v3 = vsub.f32 %v13180_v50, %v11579_v46  ;;  %7469 = vmatpush1.bf16.msra.mxu0 %v9131_v7  ;;  %v13188_v26 = vld [vmem:[#allocation136_spill] sm:$0xff]  ;;  %v13196_v50 = vld [vmem:[#allocation54_spill] sm:$0xff] }
 0x652   :  { %v6016_v10 = vunpack.c.l.b16 %v5611_v43  ;;  %v6024_v0 = vunpack.c.l.b16 %v5619_v45  ;;  %v6059_v8 = vsel %vm6038_vm2, %v5984_v5, %v5976_v44  ;;  %v4532_v6 = vsub.f32 %v13181_v28, %v11611_v22  ;;  %7633 = vmatpush1.bf16.msra.mxu1 %v9134_v18  ;;  %7479 = vmatprep.subr.bf16.mxu0 %v9139_v41  ;;  %v13189_v18 = vld [vmem:[#allocation142_spill] sm:$0xff]  ;;  %v13190_v43 = vld [vmem:[#allocation144_spill] sm:$0xff]  ;;  %v13192_v44 = vld [vmem:[#allocation151_spill] sm:$0xff] }
 0x653   :  { %v6032_v59 = vunpack.c.l.b16 %v5627_v30  ;;  %v6060_v34 = vsel %vm6040_vm3, %v5992_v13, %v6059_v8  ;;  %v4540_v16 = vsub.f32 %v13182_v48, %v13142_v27  ;;  %v4548_v9 = vsub.f32 %v13183_v29, %v13146_v31  ;;  %7643 = vmatprep.subr.bf16.mxu1 %v9142_v61  ;;  %v13191_v45 = vld [vmem:[#allocation148_spill] sm:$0xff]  ;;  %v13193_v13 = vld [vmem:[#allocation15_spill] sm:$0xff] }
 0x654   :  { %v6061_v11 = vsel %vm6042_vm4, %v6000_v40, %v6060_v34  ;;  %v4556_v12 = vsub.f32 %v13184_v53, %v11707_v63  ;;  %v4564_v4 = vsub.f32 %v13185_v49, %v11732_v47  ;;  %v4572_v1 = vsub.f32 %v13186_v2, %v11741_v57  ;;  %v13194_v40 = vld [vmem:[#allocation156_spill] sm:$0xff]  ;;  %v13197_v28 = vld [vmem:[#allocation95_spill] sm:$0xff] }
 0x655   :  { %v6062_v7 = vsel %vm6044_vm5, %v6008_v20, %v6061_v11  ;;  %v4580_v14 = vsub.f32 %v13187_v15, %v11771_v52  ;;  %v4588_v38 = vsub.f32 %v13188_v26, %v11789_v54  ;;  %v4596_v62 = vsub.f32 %v13189_v18, %v11829_v56  ;;  %v13198_v34 = vld [vmem:[#allocation155_spill] sm:$0xff]  ;;  %v13201_v11 = vld [vmem:[#allocation101_spill] sm:$0xff] }
 0x656   :  { %v6063_v23 = vsel %vm6046_vm6, %v6016_v10, %v6062_v7  ;;  %v4604_v41 = vsub.f32 %v13190_v43, %v11843_v60  ;;  %v4612_v30 = vsub.f32 %v13191_v45, %v11864_v36  ;;  %v4620_v5 = vsub.f32 %v13192_v44, %v11880_v25  ;;  %v13200_v10 = vld [vmem:[#allocation45_spill] sm:$0xff]  ;;  %v9137_v7 = vld [vmem:[#allocation5 + $0x400] ss:$16 sps:$4 sm:$0xff]  }
 0x657   :  { %v6064_v61 = vsel %vm6048_vm7, %v6024_v0, %v6063_v23  ;;  %v13195_v20 = vsub.f32 %v13193_v13, %v13194_v40  ;;  %v13199_v48 = vsub.f32 %v13197_v28, %v13198_v34  ;;  %v13202_v53 = vsub.f32 %v13201_v11, %v13169_v58  ;;  %v9140_v23 = vld [vmem:[#allocation5 + $0x408] ss:$16 sps:$4 sm:$0xff]  }
 0x658   :  { %v6065_v2 = vsel %vm6050_vm8, %v6032_v59, %v6064_v61  ;;  %v4684_v0 = vmul.f32 %v11709_v35, %v4524_v3  ;;  %v4692_v15 = vmul.f32 %v11745_v24, %v4532_v6  ;;  %v4700_v26 = vmul.f32 %v13144_v51, %v4540_v16  ;;  %v9145_v61 = vld [vmem:[#allocation5 + $0x424] ss:$16 sps:$4 sm:$0xff]  }
 0x659   :  { %v4660_v8 = vmul.f32 %v13196_v50, %v13195_v20  ;;  %v4668_v29 = vmul.f32 %v13200_v10, %v13199_v48  ;;  %v4676_v49 = vmul.f32 %v13171_v55, %v13202_v53  ;;  %v6103_v18 = vpack.c.b16 %v6065_v2, %v6065_v2  ;;  %v13203_v16 = vld [vmem:[#allocation68_spill] sm:$0xff] }
 0x65a   :  { %v4708_v43 = vmul.f32 %v13148_v19, %v4548_v9  ;;  %v4716_v45 = vmul.f32 %v13149_v32, %v4556_v12  ;;  %v4724_v44 = vmul.f32 %v13150_v42, %v4564_v4  ;;  %v4732_v13 = vmul.f32 %v11859_v33, %v4572_v1  ;;  %v13204_v9 = vld [vmem:[#allocation72_spill] sm:$0xff]  ;;  %v9148_v12 = vld [vmem:[#allocation5 + $0x42c] ss:$16 sps:$4 sm:$0xff]  }
 0x65b   :  { %v4740_v20 = vmul.f32 %v11889_v21, %v4580_v14  ;;  %v4748_v59 = vmul.f32 %v11901_v17, %v4588_v38  ;;  %v4756_v3 = vmul.f32 %v11922_v37, %v4596_v62  ;;  %7471 = vmatmul.mubr.bf16.vlgmr.msra.gmra.mrb[192].mxu0 %v6103_v18  ;;  %7635 = vmatmul.mubr.bf16.vlgmr.msra.gmra.mrb[192].mxu1 %v6103_v18  ;;  %v13205_v4 = vld [vmem:[#allocation19_spill] sm:$0xff]  ;;  %v9143_v62 = vld [vmem:[#allocation5 + $0x420] ss:$16 sps:$4 sm:$0xff]  }
 0x65c   :  { %v4764_v6 = vmul.f32 %v11939_v39, %v4604_v41  ;;  %v4772_v28 = vmul.f32 %v13203_v16, %v4612_v30  ;;  %v4780_v48 = vmul.f32 %v13204_v9, %v4620_v5  ;;  %7480 = vmatpush1.bf16.msra.mxu0 %v9137_v7  ;;  %v4829_v11 = vmul.f32 %v13205_v4, %v4660_v8  ;;  %v9146_v5 = vld [vmem:[#allocation5 + $0x428] ss:$16 sps:$4 sm:$0xff]  }
 0x65d   :  { %v4837_v1 = vmul.f32 %v13205_v4, %v4668_v29  ;;  %v4845_v14 = vmul.f32 %v13205_v4, %v4676_v49  ;;  %v4853_v38 = vmul.f32 %v13205_v4, %v4684_v0  ;;  %v4861_v53 = vmul.f32 %v13205_v4, %v4692_v15  ;;  %7644 = vmatpush1.bf16.msra.mxu1 %v9140_v23  ;;  %v9151_v0 = vld [vmem:[#allocation5 + $0x444] ss:$16 sps:$4 sm:$0xff]   ;;  %v9154_v23 = vld [vmem:[#allocation5 + $0x44c] ss:$16 sps:$4 sm:$0xff]   ;;  %v9158_v37 = vld [vmem:[#allocation5 + $0x468] ss:$16 sps:$4 sm:$0xff]  }
 0x65e   :  { %v4869_v2 = vmul.f32 %v13205_v4, %v4700_v26  ;;  %v4877_v41 = vmul.f32 %v13205_v4, %v4708_v43  ;;  %v4885_v30 = vmul.f32 %v13205_v4, %v4716_v45  ;;  %v4893_v7 = vmul.f32 %v13205_v4, %v4724_v44  ;;  %7481 = vmatprep.subr.bf16.mxu0 %v9145_v61  ;;  %v13206_v45 = vld [vmem:[#allocation23_spill] sm:$0xff]  ;;  %v9149_v61 = vld [vmem:[#allocation5 + $0x440] ss:$16 sps:$4 sm:$0xff]  }
 0x65f   :  { %v4901_v8 = vmul.f32 %v13205_v4, %v4732_v13  ;;  %v4909_v29 = vmul.f32 %v13205_v4, %v4740_v20  ;;  %v4917_v49 = vmul.f32 %v13205_v4, %v4748_v59  ;;  %v4925_v15 = vmul.f32 %v13205_v4, %v4756_v3  ;;  %7645 = vmatprep.subr.bf16.mxu1 %v9148_v12  ;;  %v9152_v12 = vld [vmem:[#allocation5 + $0x448] ss:$16 sps:$4 sm:$0xff]  }
 0x660   :  { %v4933_v26 = vmul.f32 %v13205_v4, %v4764_v6  ;;  %v4941_v18 = vmul.f32 %v13205_v4, %v4772_v28  ;;  %v4949_v43 = vmul.f32 %v13205_v4, %v4780_v48  ;;  %v4998_v44 = vadd.f32 %v13206_v45, %v4829_v11  ;;  %7482 = vmatpush1.bf16.msra.mxu0 %v9143_v62  ;;  %v9160_v62 = vld [vmem:[#allocation5 + $0x46c] ss:$16 sps:$4 sm:$0xff]  }
 0x661   :  { %v5006_v13 = vadd.f32 %v13206_v45, %v4837_v1  ;;  %v5014_v20 = vadd.f32 %v13206_v45, %v4845_v14  ;;  %v5022_v59 = vadd.f32 %v13206_v45, %v4853_v38  ;;  %v5030_v3 = vadd.f32 %v13206_v45, %v4861_v53  ;;  %7646 = vmatpush1.bf16.msra.mxu1 %v9146_v5  ;;  %v9157_v38 = vld [vmem:[#allocation5 + $0x464] ss:$16 sps:$4 sm:$0xff]  }
 0x662   :  { %v5038_v6 = vadd.f32 %v13206_v45, %v4869_v2  ;;  %v5046_v28 = vadd.f32 %v13206_v45, %v4877_v41  ;;  %v5054_v48 = vadd.f32 %v13206_v45, %v4885_v30  ;;  %v5062_v4 = vadd.f32 %v13206_v45, %v4893_v7  ;;  %7483 = vmatprep.subr.bf16.mxu0 %v9151_v0 }
 0x663   :  { %v5070_v11 = vadd.f32 %v13206_v45, %v4901_v8  ;;  %v5078_v1 = vadd.f32 %v13206_v45, %v4909_v29  ;;  %v5086_v14 = vadd.f32 %v13206_v45, %v4917_v49  ;;  %v5094_v53 = vadd.f32 %v13206_v45, %v4925_v15  ;;  %7647 = vmatprep.subr.bf16.mxu1 %v9154_v23  ;;  %v9155_v29 = vld [vmem:[#allocation5 + $0x460] ss:$16 sps:$4 sm:$0xff]   ;;  %v9163_v15 = vld [vmem:[#allocation5 + $0x484] ss:$16 sps:$4 sm:$0xff]  }
 0x664   :  { %v5102_v2 = vadd.f32 %v13206_v45, %v4933_v26  ;;  %v5110_v41 = vadd.f32 %v13206_v45, %v4941_v18  ;;  %v5118_v30 = vadd.f32 %v13206_v45, %v4949_v43  ;;  %v5156_v5 = vmax.f32 %v4998_v44, %v5006_v13  ;;  %7484 = vmatpush1.bf16.msra.mxu0 %v9149_v61  ;;  %v9166_v43 = vld [vmem:[#allocation5 + $0x48c] ss:$16 sps:$4 sm:$0xff]  }
 0x665   :  { %v5212_v7 = vmax.f32 %v5014_v20, %v5022_v59  ;;  %v5268_v9 = vmax.f32 %v5030_v3, %v5038_v6  ;;  %v5324_v8 = vmax.f32 %v5046_v28, %v5054_v48  ;;  %v5380_v16 = vmax.f32 %v5062_v4, %v5070_v11  ;;  %7648 = vmatpush1.bf16.msra.mxu1 %v9152_v12  ;;  %v9161_v6 = vld [vmem:[#allocation5 + $0x480] ss:$16 sps:$4 sm:$0xff]   ;;  %v9164_v11 = vld [vmem:[#allocation5 + $0x488] ss:$16 sps:$4 sm:$0xff]  }
 0x666   :  { %v5436_v49 = vmax.f32 %v5078_v1, %v5086_v14  ;;  %v5492_v0 = vmax.f32 %v5094_v53, %v5102_v2  ;;  %v5548_v39 = vmax.f32 %v5110_v41, %v5118_v30  ;;  %v5157_v17 = vrot.slane %v5156_v5, 4  ;;  %7485 = vmatprep.subr.bf16.mxu0 %v9157_v38  ;;  %7649 = vmatprep.subr.bf16.mxu1 %v9160_v62  ;;  %v9169_v1 = vld [vmem:[#allocation5 + $0x4a4] ss:$16 sps:$4 sm:$0xff]   ;;  %v9172_v2 = vld [vmem:[#allocation5 + $0x4ac] ss:$16 sps:$4 sm:$0xff]  }
 0x667   :  { %v5213_v26 = vrot.slane %v5212_v7, 4  ;;  %v5269_v21 = vrot.slane %v5268_v9, 4  ;;  %v5325_v18 = vrot.slane %v5324_v8, 4  ;;  %v5381_v23 = vrot.slane %v5380_v16, 4 }
 0x668   :  { %v5437_v45 = vrot.slane %v5436_v49, 4  ;;  %v5493_v44 = vrot.slane %v5492_v0, 4  ;;  %v5549_v13 = vrot.slane %v5548_v39, 4  ;;  %v5158_v20 = vmax.f32 %v5156_v5, %v5157_v17  ;;  %7486 = vmatpush1.bf16.msra.mxu0 %v9155_v29 }
 0x669   :  { %v5214_v59 = vmax.f32 %v5212_v7, %v5213_v26  ;;  %v5270_v61 = vmax.f32 %v5268_v9, %v5269_v21  ;;  %v5326_v3 = vmax.f32 %v5324_v8, %v5325_v18  ;;  %v5382_v28 = vmax.f32 %v5380_v16, %v5381_v23  ;;  %7650 = vmatpush1.bf16.msra.mxu1 %v9158_v37  ;;  %v9175_v23 = vld [vmem:[#allocation5 + $0x4c4] ss:$16 sps:$4 sm:$0xff]  }
 0x66a   :  { %v5438_v48 = vmax.f32 %v5436_v49, %v5437_v45  ;;  %v5494_v12 = vmax.f32 %v5492_v0, %v5493_v44  ;;  %v5550_v4 = vmax.f32 %v5548_v39, %v5549_v13  ;;  %v5159_v14 = vrot.slane %v5158_v20, 2  ;;  %7487 = vmatprep.subr.bf16.mxu0 %v9163_v15  ;;  %7651 = vmatprep.subr.bf16.mxu1 %v9166_v43  ;;  %v9167_v39 = vld [vmem:[#allocation5 + $0x4a0] ss:$16 sps:$4 sm:$0xff]   ;;  %v9170_v0 = vld [vmem:[#allocation5 + $0x4a8] ss:$16 sps:$4 sm:$0xff]  }
 0x66b   :  { %v5215_v38 = vrot.slane %v5214_v59, 2  ;;  %v5271_v62 = vrot.slane %v5270_v61, 2  ;;  %v5327_v53 = vrot.slane %v5326_v3, 2  ;;  %v5383_v17 = vrot.slane %v5382_v28, 2 }
 0x66c   :  { %v5439_v41 = vrot.slane %v5438_v48, 2  ;;  %v5495_v21 = vrot.slane %v5494_v12, 2  ;;  %v5551_v9 = vrot.slane %v5550_v4, 2  ;;  %v5160_v30 = vmax.f32 %v5158_v20, %v5159_v14  ;;  %7488 = vmatpush1.bf16.msra.mxu0 %v9161_v6 }
 0x66d   :  { %v5216_v5 = vmax.f32 %v5214_v59, %v5215_v38  ;;  %v5272_v16 = vmax.f32 %v5270_v61, %v5271_v62  ;;  %v5328_v7 = vmax.f32 %v5326_v3, %v5327_v53  ;;  %v5384_v37 = vmax.f32 %v5382_v28, %v5383_v17  ;;  %7652 = vmatpush1.bf16.msra.mxu1 %v9164_v11  ;;  %v9178_v59 = vld [vmem:[#allocation5 + $0x4cc] ss:$16 sps:$4 sm:$0xff]   ;;  %v9176_v38 = vld [vmem:[#allocation5 + $0x4c8] ss:$16 sps:$4 sm:$0xff]  }
 0x66e   :  { %v5440_v8 = vmax.f32 %v5438_v48, %v5439_v41  ;;  %v5496_v29 = vmax.f32 %v5494_v12, %v5495_v21  ;;  %v5552_v49 = vmax.f32 %v5550_v4, %v5551_v9  ;;  %v5161_v26 = vrot.slane %v5160_v30, 1  ;;  %7489 = vmatprep.subr.bf16.mxu0 %v9169_v1  ;;  %7653 = vmatprep.subr.bf16.mxu1 %v9172_v2  ;;  %v9173_v48 = vld [vmem:[#allocation5 + $0x4c0] ss:$16 sps:$4 sm:$0xff]   ;;  %v9181_v1 = vld [vmem:[#allocation5 + $0x4e4] ss:$16 sps:$4 sm:$0xff]  }
 0x66f   :  { %v5217_v15 = vrot.slane %v5216_v5, 1  ;;  %v5273_v18 = vrot.slane %v5272_v16, 1  ;;  %v5329_v43 = vrot.slane %v5328_v7, 1  ;;  %v5385_v45 = vrot.slane %v5384_v37, 1  ;;  %v9184_v41 = vld [vmem:[#allocation5 + $0x4ec] ss:$16 sps:$4 sm:$0xff]  }
 0x670   :  { %v5441_v44 = vrot.slane %v5440_v8, 1  ;;  %v5497_v13 = vrot.slane %v5496_v29, 1  ;;  %v5553_v20 = vrot.slane %v5552_v49, 1  ;;  %v5162_v61 = vmax.f32 %v5160_v30, %v5161_v26  ;;  %7490 = vmatpush1.bf16.msra.mxu0 %v9167_v39 }
 0x671   :  { %v5218_v3 = vmax.f32 %v5216_v5, %v5217_v15  ;;  %v5274_v6 = vmax.f32 %v5272_v16, %v5273_v18  ;;  %v5330_v28 = vmax.f32 %v5328_v7, %v5329_v43  ;;  %v5386_v12 = vmax.f32 %v5384_v37, %v5385_v45  ;;  %7654 = vmatpush1.bf16.msra.mxu1 %v9170_v0  ;;  %v9182_v15 = vld [vmem:[#allocation5 + $0x4e8] ss:$16 sps:$4 sm:$0xff]   ;;  %v9187_v18 = vld [vmem:[#allocation5 + $0x504] ss:$16 sps:$4 sm:$0xff]  }
 0x672   :  { %v5442_v4 = vmax.f32 %v5440_v8, %v5441_v44  ;;  %v5498_v11 = vmax.f32 %v5496_v29, %v5497_v13  ;;  %v5554_v14 = vmax.f32 %v5552_v49, %v5553_v20  ;;  %v5574_v62 = vpack.c.bf16 %v5162_v61, %v5162_v61  ;;  %7491 = vmatprep.subr.bf16.mxu0 %v9175_v23  ;;  %v9179_v8 = vld [vmem:[#allocation5 + $0x4e0] ss:$16 sps:$4 sm:$0xff]   ;;  %v9190_v23 = vld [vmem:[#allocation5 + $0x50c] ss:$16 sps:$4 sm:$0xff]  }
 0x673   :  { %v5582_v53 = vpack.c.bf16 %v5218_v3, %v5218_v3  ;;  %v5590_v2 = vpack.c.bf16 %v5274_v6, %v5274_v6  ;;  %v5598_v17 = vpack.c.bf16 %v5330_v28, %v5330_v28  ;;  %v5606_v21 = vpack.c.bf16 %v5386_v12, %v5386_v12  ;;  %7655 = vmatprep.subr.bf16.mxu1 %v9178_v59  ;;  %v13207_v45 = vld [vmem:[#allocation50_spill] sm:$0xff]  ;;  %v13208_v13 = vld [vmem:[#allocation16_spill] sm:$0xff]  ;;  %v13209_v59 = vld [vmem:[#allocation99_spill] sm:$0xff] }
 0x674   :  { %v5614_v9 = vpack.c.bf16 %v5442_v4, %v5442_v4  ;;  %v5622_v30 = vpack.c.bf16 %v5498_v11, %v5498_v11  ;;  %v5630_v5 = vpack.c.bf16 %v5554_v14, %v5554_v14  ;;  %v5979_v16 = vunpack.c.l.b16 %v5574_v62  ;;  %7492 = vmatpush1.bf16.msra.mxu0 %v9173_v48  ;;  %v13210_v6 = vld [vmem:[#allocation103_spill] sm:$0xff]  ;;  %v13212_v4 = vld [vmem:[#allocation110_spill] sm:$0xff] }
 0x675   :  { %v5987_v7 = vunpack.c.l.b16 %v5582_v53  ;;  %v5995_v39 = vunpack.c.l.b16 %v5590_v2  ;;  %v6003_v37 = vunpack.c.l.b16 %v5598_v17  ;;  %v6011_v29 = vunpack.c.l.b16 %v5606_v21  ;;  %7656 = vmatpush1.bf16.msra.mxu1 %v9176_v38  ;;  %7493 = vmatprep.subr.bf16.mxu0 %v9181_v1  ;;  %v13211_v48 = vld [vmem:[#allocation107_spill] sm:$0xff]  ;;  %v9185_v38 = vld [vmem:[#allocation5 + $0x500] ss:$16 sps:$4 sm:$0xff]  }
 0x676   :  { %v6019_v49 = vunpack.c.l.b16 %v5614_v9  ;;  %v6027_v0 = vunpack.c.l.b16 %v5622_v30  ;;  %v6035_v26 = vunpack.c.l.b16 %v5630_v5  ;;  %7657 = vmatprep.subr.bf16.mxu1 %v9184_v41  ;;  %v4499_v44 = vsub.f32 %v13207_v45, %v13194_v40  ;;  %v13213_v1 = vld [vmem:[#allocation116_spill] sm:$0xff]  ;;  %v13215_v17 = vld [vmem:[#allocation122_spill] sm:$0xff]  ;;  %v9188_v9 = vld [vmem:[#allocation5 + $0x508] ss:$16 sps:$4 sm:$0xff]  }
 0x677   :  { %v6080_v43 = vsel %vm6038_vm2, %v5987_v7, %v5979_v16  ;;  %v4507_v20 = vsub.f32 %v13208_v13, %v13198_v34  ;;  %v4515_v61 = vsub.f32 %v13209_v59, %v13169_v58  ;;  %v4523_v28 = vsub.f32 %v13210_v6, %v11579_v46  ;;  %v13214_v53 = vld [vmem:[#allocation120_spill] sm:$0xff]  ;;  %v13216_v5 = vld [vmem:[#allocation127_spill] sm:$0xff]  ;;  %v13217_v7 = vld [vmem:[#allocation130_spill] sm:$0xff] }
 0x678   :  { %v6081_v3 = vsel %vm6040_vm3, %v5995_v39, %v6080_v43  ;;  %v4531_v12 = vsub.f32 %v13211_v48, %v11611_v22  ;;  %v4539_v11 = vsub.f32 %v13212_v4, %v13142_v27  ;;  %7494 = vmatpush1.bf16.msra.mxu0 %v9179_v8  ;;  %v4547_v62 = vsub.f32 %v13213_v1, %v13146_v31  ;;  %v9193_v30 = vld [vmem:[#allocation5 + $0x524] ss:$16 sps:$4 sm:$0xff]   ;;  %v9196_v8 = vld [vmem:[#allocation5 + $0x52c] ss:$16 sps:$4 sm:$0xff]  }
 0x679   :  { %v6082_v14 = vsel %vm6042_vm4, %v6003_v37, %v6081_v3  ;;  %v4555_v2 = vsub.f32 %v13214_v53, %v11707_v63  ;;  %v4563_v41 = vsub.f32 %v13215_v17, %v11732_v47  ;;  %7658 = vmatpush1.bf16.msra.mxu1 %v9182_v15  ;;  %7495 = vmatprep.subr.bf16.mxu0 %v9187_v18  ;;  %v13218_v43 = vld [vmem:[#allocation135_spill] sm:$0xff]  ;;  %v13219_v13 = vld [vmem:[#allocation140_spill] sm:$0xff]  ;;  %v13222_v48 = vld [vmem:[#allocation149_spill] sm:$0xff] }
 0x67a   :  { %v6083_v21 = vsel %vm6044_vm5, %v6011_v29, %v6082_v14  ;;  %v4571_v16 = vsub.f32 %v13216_v5, %v11741_v57  ;;  %v4579_v39 = vsub.f32 %v13217_v7, %v11771_v52  ;;  %7659 = vmatprep.subr.bf16.mxu1 %v9190_v23  ;;  %v4587_v45 = vsub.f32 %v13218_v43, %v11789_v54  ;;  %v13220_v15 = vld [vmem:[#allocation143_spill] sm:$0xff]  ;;  %v9191_v14 = vld [vmem:[#allocation5 + $0x520] ss:$16 sps:$4 sm:$0xff]   ;;  %v9199_v5 = vld [vmem:[#allocation5 + $0x544] ss:$16 sps:$4 sm:$0xff]  }
 0x67b   :  { %v6084_v37 = vsel %vm6046_vm6, %v6019_v49, %v6083_v21  ;;  %v4595_v29 = vsub.f32 %v13219_v13, %v11829_v56  ;;  %v4603_v18 = vsub.f32 %v13220_v15, %v11843_v60  ;;  %v13221_v3 = vld [vmem:[#allocation147_spill] sm:$0xff]  ;;  %v4619_v4 = vsub.f32 %v13222_v48, %v11880_v25  ;;  %v13225_v13 = vld [vmem:[#allocation70_spill] sm:$0xff] }
 0x67c   :  { %v6085_v59 = vsel %vm6048_vm7, %v6027_v0, %v6084_v37  ;;  %v4611_v6 = vsub.f32 %v13221_v3, %v11864_v36  ;;  %v4659_v49 = vmul.f32 %v13196_v50, %v4499_v44  ;;  %7496 = vmatpush1.bf16.msra.mxu0 %v9185_v38  ;;  %v4667_v1 = vmul.f32 %v13200_v10, %v4507_v20  ;;  %v9194_v0 = vld [vmem:[#allocation5 + $0x528] ss:$16 sps:$4 sm:$0xff]   ;;  %v9202_v44 = vld [vmem:[#allocation5 + $0x54c] ss:$16 sps:$4 sm:$0xff]   ;;  %v13228_v3 = vld [vmem:[#allocation72_spill] sm:$0xff] }
 0x67d   :  { %v6086_v23 = vsel %vm6050_vm8, %v6035_v26, %v6085_v59  ;;  %v4675_v53 = vmul.f32 %v13171_v55, %v4515_v61  ;;  %v4683_v17 = vmul.f32 %v11709_v35, %v4523_v28  ;;  %7660 = vmatpush1.bf16.msra.mxu1 %v9188_v9  ;;  %7497 = vmatprep.subr.bf16.mxu0 %v9193_v30  ;;  %v13223_v28 = vld [vmem:[#allocation65_spill] sm:$0xff]  ;;  %v13224_v30 = vld [vmem:[#allocation66_spill] sm:$0xff]  ;;  %v13227_v59 = vld [vmem:[#allocation68_spill] sm:$0xff] }
 0x67e   :  { %v6106_v21 = vpack.c.b16 %v6086_v23, %v6086_v23  ;;  %v4691_v7 = vmul.f32 %v11745_v24, %v4531_v12  ;;  %v4699_v37 = vmul.f32 %v13144_v51, %v4539_v11  ;;  %7661 = vmatprep.subr.bf16.mxu1 %v9196_v8  ;;  %v4707_v26 = vmul.f32 %v13148_v19, %v4547_v62  ;;  %v9197_v11 = vld [vmem:[#allocation5 + $0x540] ss:$16 sps:$4 sm:$0xff]   ;;  %v13226_v8 = vld [vmem:[#allocation67_spill] sm:$0xff]  ;;  %v9205_v23 = vld [vmem:[#allocation5 + $0x564] ss:$16 sps:$4 sm:$0xff]  }
 0x67f   :  { %v4715_v38 = vmul.f32 %v13149_v32, %v4555_v2  ;;  %v4723_v20 = vmul.f32 %v13150_v42, %v4563_v41  ;;  %v4731_v61 = vmul.f32 %v11859_v33, %v4571_v16  ;;  %v4739_v9 = vmul.f32 %v13223_v28, %v4579_v39  ;;  %v13229_v48 = vld [vmem:[#allocation18_spill] sm:$0xff]  ;;  %v9200_v16 = vld [vmem:[#allocation5 + $0x548] ss:$16 sps:$4 sm:$0xff]  }
 0x680   :  { %7511 = vmatprep.mubr.bf16.mxu0 %v6106_v21  ;;  %7675 = vmatprep.mubr.bf16.mxu1 %v6106_v21  ;;  %v4747_v43 = vmul.f32 %v13224_v30, %v4587_v45  ;;  %v4755_v12 = vmul.f32 %v13225_v13, %v4595_v29  ;;  %v4763_v15 = vmul.f32 %v13226_v8, %v4603_v18 }
 0x681   :  { %7498 = vmatpush1.bf16.msra.mxu0 %v9191_v14  ;;  %v4771_v62 = vmul.f32 %v13227_v59, %v4611_v6  ;;  %v4779_v2 = vmul.f32 %v13228_v3, %v4619_v4  ;;  %v4828_v41 = vmul.f32 %v13229_v48, %v4659_v49  ;;  %7662 = vmatpush1.bf16.msra.mxu1 %v9194_v0  ;;  %v9208_v14 = vld [vmem:[#allocation5 + $0x56c] ss:$16 sps:$4 sm:$0xff]  }
 0x682   :  { %7499 = vmatprep.subr.bf16.mxu0 %v9199_v5  ;;  %v4836_v39 = vmul.f32 %v13229_v48, %v4667_v1  ;;  %v4844_v45 = vmul.f32 %v13229_v48, %v4675_v53  ;;  %v4852_v29 = vmul.f32 %v13229_v48, %v4683_v17  ;;  %7663 = vmatprep.subr.bf16.mxu1 %v9202_v44  ;;  %v9203_v17 = vld [vmem:[#allocation5 + $0x560] ss:$16 sps:$4 sm:$0xff]  }
 0x683   :  { %v4860_v18 = vmul.f32 %v13229_v48, %v4691_v7  ;;  %v4868_v6 = vmul.f32 %v13229_v48, %v4699_v37  ;;  %v4876_v4 = vmul.f32 %v13229_v48, %v4707_v26  ;;  %v4884_v49 = vmul.f32 %v13229_v48, %v4715_v38  ;;  %v9206_v26 = vld [vmem:[#allocation5 + $0x568] ss:$16 sps:$4 sm:$0xff]   ;;  %v9211_v38 = vld [vmem:[#allocation5 + $0x584] ss:$16 sps:$4 sm:$0xff]  }
 0x684   :  { %v4892_v21 = vmul.f32 %v13229_v48, %v4723_v20  ;;  %v4900_v0 = vmul.f32 %v13229_v48, %v4731_v61  ;;  %v4908_v1 = vmul.f32 %v13229_v48, %v4739_v9  ;;  %v4916_v53 = vmul.f32 %v13229_v48, %v4747_v43  ;;  %v13230_v20 = vld [vmem:[#allocation22_spill] sm:$0xff] }
 0x685   :  { %7500 = vmatpush1.bf16.msra.mxu0 %v9197_v11  ;;  %v4924_v5 = vmul.f32 %v13229_v48, %v4755_v12  ;;  %v4932_v7 = vmul.f32 %v13229_v48, %v4763_v15  ;;  %v4940_v37 = vmul.f32 %v13229_v48, %v4771_v62  ;;  %v4948_v44 = vmul.f32 %v13229_v48, %v4779_v2  ;;  %v9214_v11 = vld [vmem:[#allocation5 + $0x58c] ss:$16 sps:$4 sm:$0xff]  }
 0x686   :  { %7664 = vmatpush1.bf16.msra.mxu1 %v9200_v16  ;;  %7501 = vmatprep.subr.bf16.mxu0 %v9205_v23  ;;  %v4997_v61 = vadd.f32 %v13230_v20, %v4828_v41  ;;  %v5005_v9 = vadd.f32 %v13230_v20, %v4836_v39  ;;  %v5013_v43 = vadd.f32 %v13230_v20, %v4844_v45  ;;  %v9209_v39 = vld [vmem:[#allocation5 + $0x580] ss:$16 sps:$4 sm:$0xff]  }
 0x687   :  { %7665 = vmatprep.subr.bf16.mxu1 %v9208_v14  ;;  %v5021_v12 = vadd.f32 %v13230_v20, %v4852_v29  ;;  %v5029_v15 = vadd.f32 %v13230_v20, %v4860_v18  ;;  %v5037_v62 = vadd.f32 %v13230_v20, %v4868_v6  ;;  %v5045_v2 = vadd.f32 %v13230_v20, %v4876_v4  ;;  %v9212_v6 = vld [vmem:[#allocation5 + $0x588] ss:$16 sps:$4 sm:$0xff]   ;;  %v9217_v4 = vld [vmem:[#allocation5 + $0x5a4] ss:$16 sps:$4 sm:$0xff]  }
 0x688   :  { %v5053_v48 = vadd.f32 %v13230_v20, %v4884_v49  ;;  %v5061_v16 = vadd.f32 %v13230_v20, %v4892_v21  ;;  %v5069_v41 = vadd.f32 %v13230_v20, %v4900_v0  ;;  %v5077_v23 = vadd.f32 %v13230_v20, %v4908_v1  ;;  %v9220_v1 = vld [vmem:[#allocation5 + $0x5ac] ss:$16 sps:$4 sm:$0xff]  }
 0x689   :  { %7502 = vmatpush1.bf16.msra.mxu0 %v9203_v17  ;;  %v5085_v45 = vadd.f32 %v13230_v20, %v4916_v53  ;;  %v5093_v29 = vadd.f32 %v13230_v20, %v4924_v5  ;;  %v5101_v14 = vadd.f32 %v13230_v20, %v4932_v7  ;;  %v5109_v18 = vadd.f32 %v13230_v20, %v4940_v37  ;;  %v9215_v37 = vld [vmem:[#allocation5 + $0x5a0] ss:$16 sps:$4 sm:$0xff]  }
 0x68a   :  { %7666 = vmatpush1.bf16.msra.mxu1 %v9206_v26  ;;  %7503 = vmatprep.subr.bf16.mxu0 %v9211_v38  ;;  %v5117_v49 = vadd.f32 %v13230_v20, %v4948_v44  ;;  %v5149_v21 = vmax.f32 %v4997_v61, %v5005_v9  ;;  %v5205_v0 = vmax.f32 %v5013_v43, %v5021_v12  ;;  %v9218_v44 = vld [vmem:[#allocation5 + $0x5a8] ss:$16 sps:$4 sm:$0xff]   ;;  %v9223_v20 = vld [vmem:[#allocation5 + $0x5c4] ss:$16 sps:$4 sm:$0xff]   ;;  %v9226_v12 = vld [vmem:[#allocation5 + $0x5cc] ss:$16 sps:$4 sm:$0xff]  }
 0x68b   :  { %7667 = vmatprep.subr.bf16.mxu1 %v9214_v11  ;;  %v5261_v17 = vmax.f32 %v5029_v15, %v5037_v62  ;;  %v5317_v3 = vmax.f32 %v5045_v2, %v5053_v48  ;;  %v5373_v59 = vmax.f32 %v5061_v16, %v5069_v41  ;;  %v5429_v53 = vmax.f32 %v5077_v23, %v5085_v45  ;;  %v9221_v45 = vld [vmem:[#allocation5 + $0x5c0] ss:$16 sps:$4 sm:$0xff]  }
 0x68c   :  { %v5150_v8 = vrot.slane %v5149_v21, 4  ;;  %v5206_v5 = vrot.slane %v5205_v0, 4  ;;  %v5485_v13 = vmax.f32 %v5093_v29, %v5101_v14  ;;  %v5541_v7 = vmax.f32 %v5109_v18, %v5117_v49 }
 0x68d   :  { %7504 = vmatpush1.bf16.msra.mxu0 %v9209_v39  ;;  %v5262_v26 = vrot.slane %v5261_v17, 4  ;;  %v5318_v38 = vrot.slane %v5317_v3, 4  ;;  %v5374_v30 = vrot.slane %v5373_v59, 4  ;;  %v5430_v28 = vrot.slane %v5429_v53, 4 }
 0x68e   :  { %7668 = vmatpush1.bf16.msra.mxu1 %v9212_v6  ;;  %7505 = vmatprep.subr.bf16.mxu0 %v9217_v4  ;;  %v5151_v61 = vmax.f32 %v5149_v21, %v5150_v8  ;;  %v5207_v9 = vmax.f32 %v5205_v0, %v5206_v5  ;;  %v5486_v43 = vrot.slane %v5485_v13, 4  ;;  %v5542_v11 = vrot.slane %v5541_v7, 4  ;;  %v9224_v8 = vld [vmem:[#allocation5 + $0x5c8] ss:$16 sps:$4 sm:$0xff]   ;;  %v9229_v4 = vld [vmem:[#allocation5 + $0x5e4] ss:$16 sps:$4 sm:$0xff]  }
 0x68f   :  { %7669 = vmatprep.subr.bf16.mxu1 %v9220_v1  ;;  %v5263_v15 = vmax.f32 %v5261_v17, %v5262_v26  ;;  %v5319_v62 = vmax.f32 %v5317_v3, %v5318_v38  ;;  %v5375_v2 = vmax.f32 %v5373_v59, %v5374_v30  ;;  %v5431_v48 = vmax.f32 %v5429_v53, %v5430_v28  ;;  %v9232_v28 = vld [vmem:[#allocation5 + $0x5ec] ss:$16 sps:$4 sm:$0xff]  }
 0x690   :  { %v5152_v16 = vrot.slane %v5151_v61, 2  ;;  %v5208_v41 = vrot.slane %v5207_v9, 2  ;;  %v5487_v23 = vmax.f32 %v5485_v13, %v5486_v43  ;;  %v5543_v39 = vmax.f32 %v5541_v7, %v5542_v11 }
 0x691   :  { %7506 = vmatpush1.bf16.msra.mxu0 %v9215_v37  ;;  %v5264_v29 = vrot.slane %v5263_v15, 2  ;;  %v5320_v14 = vrot.slane %v5319_v62, 2  ;;  %v5376_v18 = vrot.slane %v5375_v2, 2  ;;  %v5432_v6 = vrot.slane %v5431_v48, 2  ;;  %v9227_v37 = vld [vmem:[#allocation5 + $0x5e0] ss:$16 sps:$4 sm:$0xff]  }
 0x692   :  { %7670 = vmatpush1.bf16.msra.mxu1 %v9218_v44  ;;  %7507 = vmatprep.subr.bf16.mxu0 %v9223_v20  ;;  %v5153_v49 = vmax.f32 %v5151_v61, %v5152_v16  ;;  %v5209_v21 = vmax.f32 %v5207_v9, %v5208_v41  ;;  %v5488_v0 = vrot.slane %v5487_v23, 2  ;;  %v5544_v3 = vrot.slane %v5543_v39, 2  ;;  %v9230_v61 = vld [vmem:[#allocation5 + $0x5e8] ss:$16 sps:$4 sm:$0xff]   ;;  %v9238_v41 = vld [vmem:[#allocation5 + $0x60c] ss:$16 sps:$4 sm:$0xff]  }
 0x693   :  { %7671 = vmatprep.subr.bf16.mxu1 %v9226_v12  ;;  %v5265_v30 = vmax.f32 %v5263_v15, %v5264_v29  ;;  %v5321_v59 = vmax.f32 %v5319_v62, %v5320_v14  ;;  %v5377_v13 = vmax.f32 %v5375_v2, %v5376_v18  ;;  %v5433_v1 = vmax.f32 %v5431_v48, %v5432_v6  ;;  %v9235_v15 = vld [vmem:[#allocation5 + $0x604] ss:$16 sps:$4 sm:$0xff]  }
 0x694   :  { %v5154_v17 = vrot.slane %v5153_v49, 1  ;;  %v5210_v53 = vrot.slane %v5209_v21, 1  ;;  %v5489_v5 = vmax.f32 %v5487_v23, %v5488_v0  ;;  %v5545_v7 = vmax.f32 %v5543_v39, %v5544_v3 }
 0x695   :  { %7508 = vmatpush1.bf16.msra.mxu0 %v9221_v45  ;;  %v5266_v26 = vrot.slane %v5265_v30, 1  ;;  %v5322_v38 = vrot.slane %v5321_v59, 1  ;;  %v5378_v44 = vrot.slane %v5377_v13, 1  ;;  %v5434_v20 = vrot.slane %v5433_v1, 1 }
 0x696   :  { %7672 = vmatpush1.bf16.msra.mxu1 %v9224_v8  ;;  %7509 = vmatprep.subr.bf16.mxu0 %v9229_v4  ;;  %v5155_v9 = vmax.f32 %v5153_v49, %v5154_v17  ;;  %v5211_v43 = vmax.f32 %v5209_v21, %v5210_v53  ;;  %v5490_v11 = vrot.slane %v5489_v5, 1  ;;  %v5546_v12 = vrot.slane %v5545_v7, 1  ;;  %v13231_v53 = vld [vmem:[#allocation97_spill] sm:$0xff] }
 0x697   :  { %7673 = vmatprep.subr.bf16.mxu1 %v9232_v28  ;;  %v5267_v62 = vmax.f32 %v5265_v30, %v5266_v26  ;;  %v5323_v2 = vmax.f32 %v5321_v59, %v5322_v38  ;;  %v5379_v48 = vmax.f32 %v5377_v13, %v5378_v44  ;;  %v5435_v16 = vmax.f32 %v5433_v1, %v5434_v20  ;;  %v13233_v38 = vld [vmem:[#allocation106_spill] sm:$0xff]  ;;  %v13234_v20 = vld [vmem:[#allocation111_spill] sm:$0xff] }
 0x698   :  { %v5491_v23 = vmax.f32 %v5489_v5, %v5490_v11  ;;  %v5547_v39 = vmax.f32 %v5545_v7, %v5546_v12  ;;  %v5573_v45 = vpack.c.bf16 %v5155_v9, %v5155_v9  ;;  %v5581_v29 = vpack.c.bf16 %v5211_v43, %v5211_v43  ;;  %v13235_v43 = vld [vmem:[#allocation114_spill] sm:$0xff]  ;;  %v13236_v12 = vld [vmem:[#allocation117_spill] sm:$0xff] }
 0x699   :  { %7510 = vmatpush1.bf16.msra.mxu0 %v9227_v37  ;;  %v5589_v14 = vpack.c.bf16 %v5267_v62, %v5267_v62  ;;  %v5597_v18 = vpack.c.bf16 %v5323_v2, %v5323_v2  ;;  %v5605_v6 = vpack.c.bf16 %v5379_v48, %v5379_v48  ;;  %v5613_v8 = vpack.c.bf16 %v5435_v16, %v5435_v16  ;;  %v13232_v37 = vld [vmem:[#allocation100_spill] sm:$0xff]  ;;  %v13238_v16 = vld [vmem:[#allocation126_spill] sm:$0xff] }
 0x69a   :  { %7674 = vmatpush1.bf16.msra.mxu1 %v9230_v61  ;;  %v5621_v4 = vpack.c.bf16 %v5491_v23, %v5491_v23  ;;  %v5629_v49 = vpack.c.bf16 %v5547_v39, %v5547_v39  ;;  %v5978_v21 = vunpack.c.l.b16 %v5573_v45  ;;  %v5986_v0 = vunpack.c.l.b16 %v5581_v29  ;;  %7520 = vmatprep.subr.bf16.mxu0 %v9235_v15  ;;  %v13237_v62 = vld [vmem:[#allocation124_spill] sm:$0xff]  ;;  %v13239_v23 = vld [vmem:[#allocation131_spill] sm:$0xff]  ;;  %v13240_v45 = vld [vmem:[#allocation133_spill] sm:$0xff] }
 0x69b   :  { %v5994_v3 = vunpack.c.l.b16 %v5589_v14  ;;  %v6002_v28 = vunpack.c.l.b16 %v5597_v18  ;;  %v6010_v30 = vunpack.c.l.b16 %v5605_v6  ;;  %v6018_v59 = vunpack.c.l.b16 %v5613_v8  ;;  %7684 = vmatprep.subr.bf16.mxu1 %v9238_v41  ;;  %v13241_v18 = vld [vmem:[#allocation138_spill] sm:$0xff]  ;;  %v13242_v8 = vld [vmem:[#allocation141_spill] sm:$0xff] }
 0x69c   :  { %v6026_v13 = vunpack.c.l.b16 %v5621_v4  ;;  %v6034_v1 = vunpack.c.l.b16 %v5629_v49  ;;  %v6073_v17 = vsel %vm6038_vm2, %v5986_v0, %v5978_v21  ;;  %v4502_v5 = vsub.f32 %v13231_v53, %v13194_v40  ;;  %v13243_v49 = vld [vmem:[#allocation146_spill] sm:$0xff] }
 0x69d   :  { %v6074_v7 = vsel %vm6040_vm3, %v5994_v3, %v6073_v17  ;;  %v4510_v26 = vsub.f32 %v13232_v37, %v13198_v34  ;;  %v4518_v44 = vsub.f32 %v13233_v38, %v13169_v58  ;;  %v4526_v61 = vsub.f32 %v13234_v20, %v11579_v46  ;;  %v13244_v3 = vld [vmem:[#allocation96_spill] sm:$0xff]  ;;  %v13246_v53 = vld [vmem:[#allocation154_spill] sm:$0xff] }
 0x69e   :  { %v6075_v9 = vsel %vm6042_vm4, %v6002_v28, %v6074_v7  ;;  %v4534_v11 = vsub.f32 %v13235_v43, %v11611_v22  ;;  %v4542_v15 = vsub.f32 %v13236_v12, %v13142_v27  ;;  %v4550_v2 = vsub.f32 %v13237_v62, %v13146_v31  ;;  %v9233_v37 = vld [vmem:[#allocation5 + $0x600] ss:$16 sps:$4 sm:$0xff]  }
 0x69f   :  { %v6076_v48 = vsel %vm6044_vm5, %v6010_v30, %v6075_v9  ;;  %v4558_v41 = vsub.f32 %v13238_v16, %v11707_v63  ;;  %v4566_v39 = vsub.f32 %v13239_v23, %v11732_v47  ;;  %v4574_v29 = vsub.f32 %v13240_v45, %v11741_v57  ;;  %v13245_v30 = vld [vmem:[#allocation153_spill] sm:$0xff]  ;;  %v9241_v45 = vld [vmem:[#allocation5 + $0x624] ss:$16 sps:$4 sm:$0xff]  }
 0x6a0   :  { %v6077_v14 = vsel %vm6046_vm6, %v6018_v59, %v6076_v48  ;;  %v4582_v6 = vsub.f32 %v13241_v18, %v11771_v52  ;;  %v4590_v4 = vsub.f32 %v13242_v8, %v11789_v54  ;;  %v4598_v21 = vsub.f32 %v13243_v49, %v11829_v56 }
 0x6a1   :  { %v6078_v0 = vsel %vm6048_vm7, %v6026_v13, %v6077_v14  ;;  %v4606_v28 = vsub.f32 %v13244_v3, %v11843_v60  ;;  %v4614_v17 = vsub.f32 %v13245_v30, %v11864_v36  ;;  %v4622_v59 = vsub.f32 %v13246_v53, %v11880_v25  ;;  %v9236_v13 = vld [vmem:[#allocation5 + $0x608] ss:$16 sps:$4 sm:$0xff]   ;;  %v13248_v14 = vld [vmem:[#allocation66_spill] sm:$0xff] }
 0x6a2   :  { %v6079_v7 = vsel %vm6050_vm8, %v6034_v1, %v6078_v0  ;;  %v4662_v38 = vmul.f32 %v13196_v50, %v4502_v5  ;;  %v4670_v20 = vmul.f32 %v13200_v10, %v4510_v26  ;;  %v4678_v9 = vmul.f32 %v13171_v55, %v4518_v44  ;;  %v13247_v26 = vld [vmem:[#allocation65_spill] sm:$0xff] }
 0x6a3   :  { %v6105_v43 = vpack.c.b16 %v6079_v7, %v6079_v7  ;;  %v4686_v12 = vmul.f32 %v11709_v35, %v4526_v61  ;;  %v4694_v62 = vmul.f32 %v11745_v24, %v4534_v11  ;;  %v4702_v48 = vmul.f32 %v13144_v51, %v4542_v15  ;;  %v13249_v61 = vld [vmem:[#allocation70_spill] sm:$0xff]  ;;  %v9244_v11 = vld [vmem:[#allocation5 + $0x62c] ss:$16 sps:$4 sm:$0xff]  }
 0x6a4   :  { %v4710_v16 = vmul.f32 %v13148_v19, %v4550_v2  ;;  %v4718_v23 = vmul.f32 %v13149_v32, %v4558_v41  ;;  %v4726_v1 = vmul.f32 %v13150_v42, %v4566_v39  ;;  %v4734_v5 = vmul.f32 %v11859_v33, %v4574_v29  ;;  %v13250_v15 = vld [vmem:[#allocation67_spill] sm:$0xff]  ;;  %v13251_v2 = vld [vmem:[#allocation68_spill] sm:$0xff]  ;;  %v13253_v39 = vld [vmem:[#allocation21_spill] sm:$0xff] }
 0x6a5   :  { %7512 = vmatmul.mubr.bf16.vlgmr.msra.gmra.mrb[192].mxu0 %v6105_v43  ;;  %7676 = vmatmul.mubr.bf16.vlgmr.msra.gmra.mrb[192].mxu1 %v6105_v43  ;;  %v4742_v44 = vmul.f32 %v13247_v26, %v4582_v6  ;;  %v4750_v18 = vmul.f32 %v13248_v14, %v4590_v4  ;;  %v4758_v8 = vmul.f32 %v13249_v61, %v4598_v21  ;;  %v13252_v41 = vld [vmem:[#allocation72_spill] sm:$0xff]  ;;  %v9242_v21 = vld [vmem:[#allocation5 + $0x628] ss:$16 sps:$4 sm:$0xff]  }
 0x6a6   :  { %7521 = vmatpush1.bf16.msra.mxu0 %v9233_v37  ;;  %v4766_v49 = vmul.f32 %v13250_v15, %v4606_v28  ;;  %v4774_v0 = vmul.f32 %v13251_v2, %v4614_v17  ;;  %v4782_v3 = vmul.f32 %v13252_v41, %v4622_v59  ;;  %v4831_v30 = vmul.f32 %v13253_v39, %v4662_v38  ;;  %v9239_v29 = vld [vmem:[#allocation5 + $0x620] ss:$16 sps:$4 sm:$0xff]   ;;  %v9247_v38 = vld [vmem:[#allocation5 + $0x644] ss:$16 sps:$4 sm:$0xff]  }
 0x6a7   :  { %v4839_v53 = vmul.f32 %v13253_v39, %v4670_v20  ;;  %v4847_v7 = vmul.f32 %v13253_v39, %v4678_v9  ;;  %v4855_v6 = vmul.f32 %v13253_v39, %v4686_v12  ;;  %v4863_v4 = vmul.f32 %v13253_v39, %v4694_v62  ;;  %7685 = vmatpush1.bf16.msra.mxu1 %v9236_v13  ;;  %v9250_v13 = vld [vmem:[#allocation5 + $0x64c] ss:$16 sps:$4 sm:$0xff]  }
 0x6a8   :  { %v4871_v37 = vmul.f32 %v13253_v39, %v4702_v48  ;;  %v4879_v28 = vmul.f32 %v13253_v39, %v4710_v16  ;;  %v4887_v17 = vmul.f32 %v13253_v39, %v4718_v23  ;;  %v4895_v59 = vmul.f32 %v13253_v39, %v4726_v1  ;;  %7522 = vmatprep.subr.bf16.mxu0 %v9241_v45  ;;  %v13254_v23 = vld [vmem:[#allocation25_spill] sm:$0xff]  ;;  %v9245_v45 = vld [vmem:[#allocation5 + $0x640] ss:$16 sps:$4 sm:$0xff]  }
 0x6a9   :  { %v4903_v20 = vmul.f32 %v13253_v39, %v4734_v5  ;;  %v4911_v9 = vmul.f32 %v13253_v39, %v4742_v44  ;;  %v4919_v43 = vmul.f32 %v13253_v39, %v4750_v18  ;;  %v4927_v12 = vmul.f32 %v13253_v39, %v4758_v8  ;;  %7686 = vmatprep.subr.bf16.mxu1 %v9244_v11  ;;  %v9248_v11 = vld [vmem:[#allocation5 + $0x648] ss:$16 sps:$4 sm:$0xff]  }
 0x6aa   :  { %v4935_v62 = vmul.f32 %v13253_v39, %v4766_v49  ;;  %v4943_v48 = vmul.f32 %v13253_v39, %v4774_v0  ;;  %v4951_v16 = vmul.f32 %v13253_v39, %v4782_v3  ;;  %v5000_v1 = vadd.f32 %v13254_v23, %v4831_v30  ;;  %7523 = vmatpush1.bf16.msra.mxu0 %v9239_v29  ;;  %v9253_v30 = vld [vmem:[#allocation5 + $0x664] ss:$16 sps:$4 sm:$0xff]   ;;  %v9256_v29 = vld [vmem:[#allocation5 + $0x66c] ss:$16 sps:$4 sm:$0xff]  }
 0x6ab   :  { %v5008_v5 = vadd.f32 %v13254_v23, %v4839_v53  ;;  %v5016_v44 = vadd.f32 %v13254_v23, %v4847_v7  ;;  %v5024_v18 = vadd.f32 %v13254_v23, %v4855_v6  ;;  %v5032_v8 = vadd.f32 %v13254_v23, %v4863_v4  ;;  %7687 = vmatpush1.bf16.msra.mxu1 %v9242_v21 }
 0x6ac   :  { %v5040_v49 = vadd.f32 %v13254_v23, %v4871_v37  ;;  %v5048_v0 = vadd.f32 %v13254_v23, %v4879_v28  ;;  %v5056_v3 = vadd.f32 %v13254_v23, %v4887_v17  ;;  %v5064_v39 = vadd.f32 %v13254_v23, %v4895_v59  ;;  %7524 = vmatprep.subr.bf16.mxu0 %v9247_v38  ;;  %v9251_v59 = vld [vmem:[#allocation5 + $0x660] ss:$16 sps:$4 sm:$0xff]  }
 0x6ad   :  { %v5072_v53 = vadd.f32 %v13254_v23, %v4903_v20  ;;  %v5080_v7 = vadd.f32 %v13254_v23, %v4911_v9  ;;  %v5088_v6 = vadd.f32 %v13254_v23, %v4919_v43  ;;  %v5096_v4 = vadd.f32 %v13254_v23, %v4927_v12  ;;  %7688 = vmatprep.subr.bf16.mxu1 %v9250_v13  ;;  %v9254_v9 = vld [vmem:[#allocation5 + $0x668] ss:$16 sps:$4 sm:$0xff]   ;;  %v9259_v13 = vld [vmem:[#allocation5 + $0x684] ss:$16 sps:$4 sm:$0xff]  }
 0x6ae   :  { %v5104_v21 = vadd.f32 %v13254_v23, %v4935_v62  ;;  %v5112_v37 = vadd.f32 %v13254_v23, %v4943_v48  ;;  %v5120_v28 = vadd.f32 %v13254_v23, %v4951_v16  ;;  %v5170_v17 = vmax.f32 %v5000_v1, %v5008_v5  ;;  %7525 = vmatpush1.bf16.msra.mxu0 %v9245_v45  ;;  %v9262_v62 = vld [vmem:[#allocation5 + $0x68c] ss:$16 sps:$4 sm:$0xff]  }
 0x6af   :  { %v5226_v38 = vmax.f32 %v5016_v44, %v5024_v18  ;;  %v5282_v41 = vmax.f32 %v5032_v8, %v5040_v49  ;;  %v5338_v2 = vmax.f32 %v5048_v0, %v5056_v3  ;;  %v5394_v20 = vmax.f32 %v5064_v39, %v5072_v53  ;;  %7689 = vmatpush1.bf16.msra.mxu1 %v9248_v11  ;;  %v9257_v18 = vld [vmem:[#allocation5 + $0x680] ss:$16 sps:$4 sm:$0xff]   ;;  %v9260_v3 = vld [vmem:[#allocation5 + $0x688] ss:$16 sps:$4 sm:$0xff]  }
 0x6b0   :  { %v5171_v15 = vrot.slane %v5170_v17, 4  ;;  %v5450_v43 = vmax.f32 %v5080_v7, %v5088_v6  ;;  %v5506_v61 = vmax.f32 %v5096_v4, %v5104_v21  ;;  %v5562_v12 = vmax.f32 %v5112_v37, %v5120_v28  ;;  %7526 = vmatprep.subr.bf16.mxu0 %v9253_v30  ;;  %7690 = vmatprep.subr.bf16.mxu1 %v9256_v29  ;;  %v9265_v7 = vld [vmem:[#allocation5 + $0x6a4] ss:$16 sps:$4 sm:$0xff]   ;;  %v9268_v6 = vld [vmem:[#allocation5 + $0x6ac] ss:$16 sps:$4 sm:$0xff]  }
 0x6b1   :  { %v5227_v48 = vrot.slane %v5226_v38, 4  ;;  %v5283_v14 = vrot.slane %v5282_v41, 4  ;;  %v5339_v16 = vrot.slane %v5338_v2, 4  ;;  %v5395_v23 = vrot.slane %v5394_v20, 4 }
 0x6b2   :  { %v5172_v1 = vmax.f32 %v5170_v17, %v5171_v15  ;;  %v5451_v45 = vrot.slane %v5450_v43, 4  ;;  %v5507_v5 = vrot.slane %v5506_v61, 4  ;;  %v5563_v44 = vrot.slane %v5562_v12, 4  ;;  %7527 = vmatpush1.bf16.msra.mxu0 %v9251_v59 }
 0x6b3   :  { %v5228_v8 = vmax.f32 %v5226_v38, %v5227_v48  ;;  %v5284_v11 = vmax.f32 %v5282_v41, %v5283_v14  ;;  %v5340_v49 = vmax.f32 %v5338_v2, %v5339_v16  ;;  %v5396_v0 = vmax.f32 %v5394_v20, %v5395_v23  ;;  %7691 = vmatpush1.bf16.msra.mxu1 %v9254_v9  ;;  %v9263_v2 = vld [vmem:[#allocation5 + $0x6a0] ss:$16 sps:$4 sm:$0xff]   ;;  %v9271_v48 = vld [vmem:[#allocation5 + $0x6c4] ss:$16 sps:$4 sm:$0xff]  }
 0x6b4   :  { %v5173_v39 = vrot.slane %v5172_v1, 2  ;;  %v5452_v30 = vmax.f32 %v5450_v43, %v5451_v45  ;;  %v5508_v29 = vmax.f32 %v5506_v61, %v5507_v5  ;;  %v5564_v53 = vmax.f32 %v5562_v12, %v5563_v44  ;;  %7528 = vmatprep.subr.bf16.mxu0 %v9259_v13  ;;  %7692 = vmatprep.subr.bf16.mxu1 %v9262_v62  ;;  %v9266_v61 = vld [vmem:[#allocation5 + $0x6a8] ss:$16 sps:$4 sm:$0xff]   ;;  %v9274_v5 = vld [vmem:[#allocation5 + $0x6cc] ss:$16 sps:$4 sm:$0xff]  }
 0x6b5   :  { %v5229_v15 = vrot.slane %v5228_v8, 2  ;;  %v5285_v4 = vrot.slane %v5284_v11, 2  ;;  %v5341_v21 = vrot.slane %v5340_v49, 2  ;;  %v5397_v37 = vrot.slane %v5396_v0, 2 }
 0x6b6   :  { %v5174_v28 = vmax.f32 %v5172_v1, %v5173_v39  ;;  %v5453_v17 = vrot.slane %v5452_v30, 2  ;;  %v5509_v59 = vrot.slane %v5508_v29, 2  ;;  %v5565_v14 = vrot.slane %v5564_v53, 2  ;;  %7529 = vmatpush1.bf16.msra.mxu0 %v9257_v18 }
 0x6b7   :  { %v5230_v41 = vmax.f32 %v5228_v8, %v5229_v15  ;;  %v5286_v38 = vmax.f32 %v5284_v11, %v5285_v4  ;;  %v5342_v20 = vmax.f32 %v5340_v49, %v5341_v21  ;;  %v5398_v9 = vmax.f32 %v5396_v0, %v5397_v37  ;;  %7693 = vmatpush1.bf16.msra.mxu1 %v9260_v3  ;;  %v9269_v49 = vld [vmem:[#allocation5 + $0x6c0] ss:$16 sps:$4 sm:$0xff]   ;;  %v9280_v21 = vld [vmem:[#allocation5 + $0x6ec] ss:$16 sps:$4 sm:$0xff]  }
 0x6b8   :  { %v5175_v43 = vrot.slane %v5174_v28, 1  ;;  %v5454_v12 = vmax.f32 %v5452_v30, %v5453_v17  ;;  %v5510_v13 = vmax.f32 %v5508_v29, %v5509_v59  ;;  %v5566_v62 = vmax.f32 %v5564_v53, %v5565_v14  ;;  %7530 = vmatprep.subr.bf16.mxu0 %v9265_v7  ;;  %7694 = vmatprep.subr.bf16.mxu1 %v9268_v6  ;;  %v9272_v29 = vld [vmem:[#allocation5 + $0x6c8] ss:$16 sps:$4 sm:$0xff]   ;;  %v9277_v53 = vld [vmem:[#allocation5 + $0x6e4] ss:$16 sps:$4 sm:$0xff]  }
 0x6b9   :  { %v5231_v16 = vrot.slane %v5230_v41, 1  ;;  %v5287_v23 = vrot.slane %v5286_v38, 1  ;;  %v5343_v1 = vrot.slane %v5342_v20, 1  ;;  %v5399_v45 = vrot.slane %v5398_v9, 1 }
 0x6ba   :  { %v5176_v44 = vmax.f32 %v5174_v28, %v5175_v43  ;;  %v5455_v18 = vrot.slane %v5454_v12, 1  ;;  %v5511_v8 = vrot.slane %v5510_v13, 1  ;;  %v5567_v11 = vrot.slane %v5566_v62, 1  ;;  %7531 = vmatpush1.bf16.msra.mxu0 %v9263_v2 }
 0x6bb   :  { %v5232_v0 = vmax.f32 %v5230_v41, %v5231_v16  ;;  %v5288_v3 = vmax.f32 %v5286_v38, %v5287_v23  ;;  %v5344_v39 = vmax.f32 %v5342_v20, %v5343_v1  ;;  %v5400_v30 = vmax.f32 %v5398_v9, %v5399_v45  ;;  %7695 = vmatpush1.bf16.msra.mxu1 %v9266_v61  ;;  %v9275_v38 = vld [vmem:[#allocation5 + $0x6e0] ss:$16 sps:$4 sm:$0xff]   ;;  %v9286_v23 = vld [vmem:[#allocation5 + $0x70c] ss:$16 sps:$4 sm:$0xff]  }
 0x6bc   :  { %v5456_v7 = vmax.f32 %v5454_v12, %v5455_v18  ;;  %v5512_v6 = vmax.f32 %v5510_v13, %v5511_v8  ;;  %v5568_v15 = vmax.f32 %v5566_v62, %v5567_v11  ;;  %v5576_v4 = vpack.c.bf16 %v5176_v44, %v5176_v44  ;;  %7532 = vmatprep.subr.bf16.mxu0 %v9271_v48  ;;  %v9278_v12 = vld [vmem:[#allocation5 + $0x6e8] ss:$16 sps:$4 sm:$0xff]   ;;  %v9283_v13 = vld [vmem:[#allocation5 + $0x704] ss:$16 sps:$4 sm:$0xff]  }
 0x6bd   :  { %v5584_v37 = vpack.c.bf16 %v5232_v0, %v5232_v0  ;;  %v5592_v28 = vpack.c.bf16 %v5288_v3, %v5288_v3  ;;  %v5600_v17 = vpack.c.bf16 %v5344_v39, %v5344_v39  ;;  %v5608_v59 = vpack.c.bf16 %v5400_v30, %v5400_v30  ;;  %7696 = vmatprep.subr.bf16.mxu1 %v9274_v5  ;;  %v13255_v1 = vld [vmem:[#allocation17_spill] sm:$0xff]  ;;  %v13256_v44 = vld [vmem:[#allocation98_spill] sm:$0xff]  ;;  %v13257_v8 = vld [vmem:[#allocation104_spill] sm:$0xff] }
 0x6be   :  { %v5616_v14 = vpack.c.bf16 %v5456_v7, %v5456_v7  ;;  %v5624_v2 = vpack.c.bf16 %v5512_v6, %v5512_v6  ;;  %v5632_v41 = vpack.c.bf16 %v5568_v15, %v5568_v15  ;;  %7533 = vmatpush1.bf16.msra.mxu0 %v9269_v49  ;;  %v5981_v20 = vunpack.c.l.b16 %v5576_v4  ;;  %v13258_v49 = vld [vmem:[#allocation108_spill] sm:$0xff]  ;;  %v13259_v30 = vld [vmem:[#allocation113_spill] sm:$0xff]  ;;  %v13261_v7 = vld [vmem:[#allocation119_spill] sm:$0xff] }
 0x6bf   :  { %v5989_v9 = vunpack.c.l.b16 %v5584_v37  ;;  %v5997_v61 = vunpack.c.l.b16 %v5592_v28  ;;  %v6005_v43 = vunpack.c.l.b16 %v5600_v17  ;;  %7697 = vmatpush1.bf16.msra.mxu1 %v9272_v29  ;;  %7534 = vmatprep.subr.bf16.mxu0 %v9277_v53  ;;  %v6013_v62 = vunpack.c.l.b16 %v5608_v59  ;;  %v9281_v39 = vld [vmem:[#allocation5 + $0x700] ss:$16 sps:$4 sm:$0xff]   ;;  %v13262_v4 = vld [vmem:[#allocation125_spill] sm:$0xff] }
 0x6c0   :  { %v6021_v48 = vunpack.c.l.b16 %v5616_v14  ;;  %v6029_v16 = vunpack.c.l.b16 %v5624_v2  ;;  %7698 = vmatprep.subr.bf16.mxu1 %v9280_v21  ;;  %v4501_v45 = vsub.f32 %v13255_v1, %v13194_v40  ;;  %v4509_v18 = vsub.f32 %v13256_v44, %v13198_v34  ;;  %v13260_v40 = vld [vmem:[#allocation115_spill] sm:$0xff]  ;;  %v13263_v37 = vld [vmem:[#allocation129_spill] sm:$0xff]  ;;  %v13264_v17 = vld [vmem:[#allocation132_spill] sm:$0xff] }
 0x6c1   :  { %v6094_v5 = vsel %vm6038_vm2, %v5989_v9, %v5981_v20  ;;  %v4517_v11 = vsub.f32 %v13257_v8, %v13169_v58  ;;  %v4525_v0 = vsub.f32 %v13258_v49, %v11579_v46  ;;  %v4533_v29 = vsub.f32 %v13259_v30, %v11611_v22  ;;  %v9284_v58 = vld [vmem:[#allocation5 + $0x708] ss:$16 sps:$4 sm:$0xff]   ;;  %v9289_v46 = vld [vmem:[#allocation5 + $0x724] ss:$16 sps:$4 sm:$0xff]   ;;  %v9298_v1 = vld [vmem:[#allocation5 + $0x74c] ss:$16 sps:$4 sm:$0xff]  }
 0x6c2   :  { %v6095_v3 = vsel %vm6040_vm3, %v5997_v61, %v6094_v5  ;;  %7535 = vmatpush1.bf16.msra.mxu0 %v9275_v38  ;;  %v4541_v53 = vsub.f32 %v13260_v40, %v13142_v27  ;;  %v4549_v6 = vsub.f32 %v13261_v7, %v13146_v31  ;;  %v6037_v34 = vunpack.c.l.b16 %v5632_v41  ;;  %v9292_v27 = vld [vmem:[#allocation5 + $0x72c] ss:$16 sps:$4 sm:$0xff]   ;;  %v13269_v61 = vld [vmem:[#allocation152_spill] sm:$0xff]  ;;  %v13272_v8 = vld [vmem:[#allocation70_spill] sm:$0xff] }
 0x6c3   :  { %v6096_v15 = vsel %vm6042_vm4, %v6005_v43, %v6095_v3  ;;  %7699 = vmatpush1.bf16.msra.mxu1 %v9278_v12  ;;  %7536 = vmatprep.subr.bf16.mxu0 %v9283_v13  ;;  %v4557_v21 = vsub.f32 %v13262_v4, %v11707_v63  ;;  %v4565_v28 = vsub.f32 %v13263_v37, %v11732_v47  ;;  %v13265_v59 = vld [vmem:[#allocation137_spill] sm:$0xff]  ;;  %v13266_v2 = vld [vmem:[#allocation139_spill] sm:$0xff]  ;;  %v13268_v47 = vld [vmem:[#allocation150_spill] sm:$0xff] }
 0x6c4   :  { %v6097_v22 = vsel %vm6044_vm5, %v6013_v62, %v6096_v15  ;;  %7700 = vmatprep.subr.bf16.mxu1 %v9286_v23  ;;  %v4573_v31 = vsub.f32 %v13264_v17, %v11741_v57  ;;  %v4581_v14 = vsub.f32 %v13265_v59, %v11771_v52  ;;  %v4589_v41 = vsub.f32 %v13266_v2, %v11789_v54  ;;  %v13267_v63 = vld [vmem:[#allocation145_spill] sm:$0xff]  ;;  %v13270_v57 = vld [vmem:[#allocation102_spill] sm:$0xff]  ;;  %v13273_v49 = vld [vmem:[#allocation67_spill] sm:$0xff] }
 0x6c5   :  { %v6098_v38 = vsel %vm6046_vm6, %v6021_v48, %v6097_v22  ;;  %v4597_v20 = vsub.f32 %v13267_v63, %v11829_v56  ;;  %v4605_v9 = vsub.f32 %v13268_v47, %v11843_v60  ;;  %v4613_v43 = vsub.f32 %v13269_v61, %v11864_v36  ;;  %v9287_v56 = vld [vmem:[#allocation5 + $0x720] ss:$16 sps:$4 sm:$0xff]   ;;  %v9290_v48 = vld [vmem:[#allocation5 + $0x728] ss:$16 sps:$4 sm:$0xff]   ;;  %v9304_v30 = vld [vmem:[#allocation5 + $0x76c] ss:$16 sps:$4 sm:$0xff]  }
 0x6c6   :  { %v6099_v12 = vsel %vm6048_vm7, %v6029_v16, %v6098_v38  ;;  %7537 = vmatpush1.bf16.msra.mxu0 %v9281_v39  ;;  %v4621_v52 = vsub.f32 %v13270_v57, %v11880_v25  ;;  %v4661_v13 = vmul.f32 %v13196_v50, %v4501_v45  ;;  %v4669_v54 = vmul.f32 %v13200_v10, %v4509_v18  ;;  %v9295_v16 = vld [vmem:[#allocation5 + $0x744] ss:$16 sps:$4 sm:$0xff]   ;;  %v9299_v37 = vld [vmem:[#allocation5 + $0x760] ss:$16 sps:$4 sm:$0xff]   ;;  %v9310_v59 = vld [vmem:[#allocation5 + $0x78c] ss:$16 sps:$4 sm:$0xff]  }
 0x6c7   :  { %v6100_v62 = vsel %vm6050_vm8, %v6037_v34, %v6099_v12  ;;  %7701 = vmatpush1.bf16.msra.mxu1 %v9284_v58  ;;  %7538 = vmatprep.subr.bf16.mxu0 %v9289_v46  ;;  %v4677_v60 = vmul.f32 %v13171_v55, %v4517_v11  ;;  %v4685_v36 = vmul.f32 %v11709_v35, %v4525_v0  ;;  %v13271_v35 = vld [vmem:[#allocation66_spill] sm:$0xff]  ;;  %v13274_v0 = vld [vmem:[#allocation68_spill] sm:$0xff] }
 0x6c8   :  { %v6108_v23 = vpack.c.b16 %v6100_v62, %v6100_v62  ;;  %7702 = vmatprep.subr.bf16.mxu1 %v9292_v27  ;;  %v4693_v25 = vmul.f32 %v11745_v24, %v4533_v29  ;;  %v4701_v50 = vmul.f32 %v13144_v51, %v4541_v53  ;;  %v4709_v10 = vmul.f32 %v13148_v19, %v4549_v6  ;;  %v9293_v51 = vld [vmem:[#allocation5 + $0x740] ss:$16 sps:$4 sm:$0xff]   ;;  %v9296_v19 = vld [vmem:[#allocation5 + $0x748] ss:$16 sps:$4 sm:$0xff]  }
 0x6c9   :  { %v4717_v45 = vmul.f32 %v13149_v32, %v4557_v21  ;;  %v4725_v5 = vmul.f32 %v13150_v42, %v4565_v28  ;;  %v4733_v44 = vmul.f32 %v11859_v33, %v4573_v31  ;;  %v4741_v55 = vmul.f32 %v13247_v26, %v4581_v14  ;;  %v13275_v3 = vld [vmem:[#allocation72_spill] sm:$0xff]  ;;  %v9302_v28 = vld [vmem:[#allocation5 + $0x768] ss:$16 sps:$4 sm:$0xff]  }
 0x6ca   :  { %7552 = vmatprep.mubr.bf16.mxu0 %v6108_v23  ;;  %7716 = vmatprep.mubr.bf16.mxu1 %v6108_v23  ;;  %v4749_v18 = vmul.f32 %v13271_v35, %v4589_v41  ;;  %v4757_v11 = vmul.f32 %v13272_v8, %v4597_v20  ;;  %v4765_v24 = vmul.f32 %v13273_v49, %v4605_v9  ;;  %v13276_v39 = vld [vmem:[#allocation20_spill] sm:$0xff] }
 0x6cb   :  { %7539 = vmatpush1.bf16.msra.mxu0 %v9287_v56  ;;  %7703 = vmatpush1.bf16.msra.mxu1 %v9290_v48  ;;  %v4773_v32 = vmul.f32 %v13274_v0, %v4613_v43  ;;  %v4781_v42 = vmul.f32 %v13275_v3, %v4621_v52  ;;  %v4830_v33 = vmul.f32 %v13276_v39, %v4661_v13  ;;  %v9301_v26 = vld [vmem:[#allocation5 + $0x764] ss:$16 sps:$4 sm:$0xff]   ;;  %v9305_v52 = vld [vmem:[#allocation5 + $0x780] ss:$16 sps:$4 sm:$0xff]   ;;  %v9308_v13 = vld [vmem:[#allocation5 + $0x788] ss:$16 sps:$4 sm:$0xff]  }
 0x6cc   :  { %7540 = vmatprep.subr.bf16.mxu0 %v9295_v16  ;;  %7704 = vmatprep.subr.bf16.mxu1 %v9298_v1  ;;  %v4838_v29 = vmul.f32 %v13276_v39, %v4669_v54  ;;  %v4846_v40 = vmul.f32 %v13276_v39, %v4677_v60  ;;  %v4854_v53 = vmul.f32 %v13276_v39, %v4685_v36  ;;  %v9307_v31 = vld [vmem:[#allocation5 + $0x784] ss:$16 sps:$4 sm:$0xff]   ;;  %v9316_v60 = vld [vmem:[#allocation5 + $0x7ac] ss:$16 sps:$4 sm:$0xff]  }
 0x6cd   :  { %v4862_v7 = vmul.f32 %v13276_v39, %v4693_v25  ;;  %v4870_v6 = vmul.f32 %v13276_v39, %v4701_v50  ;;  %v4878_v34 = vmul.f32 %v13276_v39, %v4709_v10  ;;  %v4886_v15 = vmul.f32 %v13276_v39, %v4717_v45  ;;  %v13277_v2 = vld [vmem:[#allocation24_spill] sm:$0xff] }
 0x6ce   :  { %v4894_v58 = vmul.f32 %v13276_v39, %v4725_v5  ;;  %v4902_v46 = vmul.f32 %v13276_v39, %v4733_v44  ;;  %v4910_v4 = vmul.f32 %v13276_v39, %v4741_v55  ;;  %v4918_v21 = vmul.f32 %v13276_v39, %v4749_v18  ;;  %v9313_v48 = vld [vmem:[#allocation5 + $0x7a4] ss:$16 sps:$4 sm:$0xff]   ;;  %v9311_v45 = vld [vmem:[#allocation5 + $0x7a0] ss:$16 sps:$4 sm:$0xff]   ;;  %v9314_v5 = vld [vmem:[#allocation5 + $0x7a8] ss:$16 sps:$4 sm:$0xff]  }
 0x6cf   :  { %7541 = vmatpush1.bf16.msra.mxu0 %v9293_v51  ;;  %7705 = vmatpush1.bf16.msra.mxu1 %v9296_v19  ;;  %v4926_v22 = vmul.f32 %v13276_v39, %v4757_v11  ;;  %v4934_v27 = vmul.f32 %v13276_v39, %v4765_v24  ;;  %v4942_v17 = vmul.f32 %v13276_v39, %v4773_v32  ;;  %v9319_v8 = vld [vmem:[#allocation5 + $0x7c4] ss:$16 sps:$4 sm:$0xff]   ;;  %v9322_v19 = vld [vmem:[#allocation5 + $0x7cc] ss:$16 sps:$4 sm:$0xff]  }
 0x6d0   :  { %7542 = vmatprep.subr.bf16.mxu0 %v9301_v26  ;;  %7706 = vmatprep.subr.bf16.mxu1 %v9304_v30  ;;  %v4950_v14 = vmul.f32 %v13276_v39, %v4781_v42  ;;  %v4999_v41 = vadd.f32 %v13277_v2, %v4830_v33  ;;  %v5007_v38 = vadd.f32 %v13277_v2, %v4838_v29  ;;  %v9317_v29 = vld [vmem:[#allocation5 + $0x7c0] ss:$16 sps:$4 sm:$0xff]  }
 0x6d1   :  { %v5015_v63 = vadd.f32 %v13277_v2, %v4846_v40  ;;  %v5023_v20 = vadd.f32 %v13277_v2, %v4854_v53  ;;  %v5031_v47 = vadd.f32 %v13277_v2, %v4862_v7  ;;  %v5039_v9 = vadd.f32 %v13277_v2, %v4870_v6  ;;  %v9320_v40 = vld [vmem:[#allocation5 + $0x7c8] ss:$16 sps:$4 sm:$0xff]  }
 0x6d2   :  { %v5047_v61 = vadd.f32 %v13277_v2, %v4878_v34  ;;  %v5055_v43 = vadd.f32 %v13277_v2, %v4886_v15  ;;  %v5063_v12 = vadd.f32 %v13277_v2, %v4894_v58  ;;  %v5071_v57 = vadd.f32 %v13277_v2, %v4902_v46  ;;  %v9325_v15 = vld [vmem:[#allocation5 + $0x7e4] ss:$16 sps:$4 sm:$0xff]  }
 0x6d3   :  { %7543 = vmatpush1.bf16.msra.mxu0 %v9299_v37  ;;  %7707 = vmatpush1.bf16.msra.mxu1 %v9302_v28  ;;  %v5079_v54 = vadd.f32 %v13277_v2, %v4910_v4  ;;  %v5087_v62 = vadd.f32 %v13277_v2, %v4918_v21  ;;  %v5095_v56 = vadd.f32 %v13277_v2, %v4926_v22  ;;  %v9328_v37 = vld [vmem:[#allocation5 + $0x7ec] ss:$16 sps:$4 sm:$0xff]  }
 0x6d4   :  { %7544 = vmatprep.subr.bf16.mxu0 %v9307_v31  ;;  %7708 = vmatprep.subr.bf16.mxu1 %v9310_v59  ;;  %v5103_v36 = vadd.f32 %v13277_v2, %v4934_v27  ;;  %v5111_v23 = vadd.f32 %v13277_v2, %v4942_v17  ;;  %v5119_v16 = vadd.f32 %v13277_v2, %v4950_v14 }
 0x6d5   :  { %v5163_v1 = vmax.f32 %v4999_v41, %v5007_v38  ;;  %v5219_v25 = vmax.f32 %v5015_v63, %v5023_v20  ;;  %v5275_v50 = vmax.f32 %v5031_v47, %v5039_v9  ;;  %v5331_v10 = vmax.f32 %v5047_v61, %v5055_v43  ;;  %v9323_v41 = vld [vmem:[#allocation5 + $0x7e0] ss:$16 sps:$4 sm:$0xff]   ;;  %v9326_v9 = vld [vmem:[#allocation5 + $0x7e8] ss:$16 sps:$4 sm:$0xff]  }
 0x6d6   :  { %v5387_v44 = vmax.f32 %v5063_v12, %v5071_v57  ;;  %v5443_v55 = vmax.f32 %v5079_v54, %v5087_v62  ;;  %v5499_v35 = vmax.f32 %v5095_v56, %v5103_v36  ;;  %v5555_v18 = vmax.f32 %v5111_v23, %v5119_v16 }
 0x6d7   :  { %7545 = vmatpush1.bf16.msra.mxu0 %v9305_v52  ;;  %7709 = vmatpush1.bf16.msra.mxu1 %v9308_v13  ;;  %v5164_v11 = vrot.slane %v5163_v1, 4  ;;  %v5220_v49 = vrot.slane %v5219_v25, 4  ;;  %v5276_v24 = vrot.slane %v5275_v50, 4  ;;  %v5332_v51 = vrot.slane %v5331_v10, 4 }
 0x6d8   :  { %7546 = vmatprep.subr.bf16.mxu0 %v9313_v48  ;;  %7710 = vmatprep.subr.bf16.mxu1 %v9316_v60  ;;  %v5388_v0 = vrot.slane %v5387_v44, 4  ;;  %v5444_v32 = vrot.slane %v5443_v55, 4  ;;  %v5500_v3 = vrot.slane %v5499_v35, 4  ;;  %v5556_v42 = vrot.slane %v5555_v18, 4 }
 0x6d9   :  { %v5165_v39 = vmax.f32 %v5163_v1, %v5164_v11  ;;  %v5221_v33 = vmax.f32 %v5219_v25, %v5220_v49  ;;  %v5277_v26 = vmax.f32 %v5275_v50, %v5276_v24  ;;  %v5333_v30 = vmax.f32 %v5331_v10, %v5332_v51 }
 0x6da   :  { %v5389_v53 = vmax.f32 %v5387_v44, %v5388_v0  ;;  %v5445_v7 = vmax.f32 %v5443_v55, %v5444_v32  ;;  %v5501_v6 = vmax.f32 %v5499_v35, %v5500_v3  ;;  %v5557_v34 = vmax.f32 %v5555_v18, %v5556_v42 }
 0x6db   :  { %7547 = vmatpush1.bf16.msra.mxu0 %v9311_v45  ;;  %7711 = vmatpush1.bf16.msra.mxu1 %v9314_v5  ;;  %v5166_v58 = vrot.slane %v5165_v39, 2  ;;  %v5222_v46 = vrot.slane %v5221_v33, 2  ;;  %v5278_v4 = vrot.slane %v5277_v26, 2  ;;  %v5334_v21 = vrot.slane %v5333_v30, 2 }
 0x6dc   :  { %7548 = vmatprep.subr.bf16.mxu0 %v9319_v8  ;;  %7712 = vmatprep.subr.bf16.mxu1 %v9322_v19  ;;  %v5390_v28 = vrot.slane %v5389_v53, 2  ;;  %v5446_v22 = vrot.slane %v5445_v7, 2  ;;  %v5502_v27 = vrot.slane %v5501_v6, 2  ;;  %v5558_v17 = vrot.slane %v5557_v34, 2 }
 0x6dd   :  { %v5167_v31 = vmax.f32 %v5165_v39, %v5166_v58  ;;  %v5223_v59 = vmax.f32 %v5221_v33, %v5222_v46  ;;  %v5279_v14 = vmax.f32 %v5277_v26, %v5278_v4  ;;  %v5335_v2 = vmax.f32 %v5333_v30, %v5334_v21  ;;  %v9334_v58 = vld [vmem:[#allocation7 + $0xc8] sm:$0xff]   ;;  %v8135_v21 = vld [vmem:[%s12583_s7 + $0x1] ss:$2 sm:$0xf] }
 0x6de   :  { %v5391_v38 = vmax.f32 %v5389_v53, %v5390_v28  ;;  %v5447_v63 = vmax.f32 %v5445_v7, %v5446_v22  ;;  %v5503_v20 = vmax.f32 %v5501_v6, %v5502_v27  ;;  %v5559_v47 = vmax.f32 %v5557_v34, %v5558_v17  ;;  %v9329_v53 = vld [vmem:[#allocation7 + $0x40] sm:$0xff]   ;;  %v9335_v46 = vld [vmem:[#allocation7 + $0x8] sm:$0xff]   ;;  %v13279_v22 = vld [vmem:[#allocation28_spill] sm:$0xff] }
 0x6df   :  { %7549 = vmatpush1.bf16.msra.mxu0 %v9317_v29  ;;  %7713 = vmatpush1.bf16.msra.mxu1 %v9320_v40  ;;  %v5168_v61 = vrot.slane %v5167_v31, 1  ;;  %v5224_v43 = vrot.slane %v5223_v59, 1  ;;  %v5280_v12 = vrot.slane %v5279_v14, 1  ;;  %v5336_v57 = vrot.slane %v5335_v2, 1  ;;  %v9330_v7 = vld [vmem:[#allocation7 + $0xc0] sm:$0xff]   ;;  %v9336_v4 = vld [vmem:[#allocation7 + $0x88] sm:$0xff]  }
 0x6e0   :  { %7550 = vmatprep.subr.bf16.mxu0 %v9325_v15  ;;  %7714 = vmatprep.subr.bf16.mxu1 %v9328_v37  ;;  %v5392_v52 = vrot.slane %v5391_v38, 1  ;;  %v5448_v13 = vrot.slane %v5447_v63, 1  ;;  %v5504_v54 = vrot.slane %v5503_v20, 1  ;;  %v5560_v62 = vrot.slane %v5559_v47, 1  ;;  %v9331_v6 = vld [vmem:[#allocation7] sm:$0xff]   ;;  %v9333_v15 = vld [vmem:[#allocation7 + $0x48] sm:$0xff]  }
 0x6e1   :  { %v5169_v56 = vmax.f32 %v5167_v31, %v5168_v61  ;;  %v5225_v48 = vmax.f32 %v5223_v59, %v5224_v43  ;;  %v5281_v60 = vmax.f32 %v5279_v14, %v5280_v12  ;;  %v5337_v36 = vmax.f32 %v5335_v2, %v5336_v57  ;;  %v9332_v34 = vld [vmem:[#allocation7 + $0x80] sm:$0xff]   ;;  %v13280_v17 = vld [vmem:[#allocation27_spill] sm:$0xff]  ;;  %v13281_v59 = vld [vmem:[#allocation29_spill] sm:$0xff] }
 0x6e2   :  { %v5393_v23 = vmax.f32 %v5391_v38, %v5392_v52  ;;  %v5449_v16 = vmax.f32 %v5447_v63, %v5448_v13  ;;  %v5505_v1 = vmax.f32 %v5503_v20, %v5504_v54  ;;  %v5561_v25 = vmax.f32 %v5559_v47, %v5560_v62  ;;  %v13278_v37 = vld [vmem:[#allocation26_spill] sm:$0xff] }
 0x6e3   :  { %7551 = vmatpush1.bf16.msra.mxu0 %v9323_v41  ;;  %7715 = vmatpush1.bf16.msra.mxu1 %v9326_v9  ;;  %v5575_v50 = vpack.c.bf16 %v5169_v56, %v5169_v56  ;;  %v5583_v10 = vpack.c.bf16 %v5225_v48, %v5225_v48  ;;  %v5591_v45 = vpack.c.bf16 %v5281_v60, %v5281_v60 }
 0x6e4   :  { %v5599_v5 = vpack.c.bf16 %v5337_v36, %v5337_v36  ;;  %v5607_v44 = vpack.c.bf16 %v5393_v23, %v5393_v23  ;;  %v5615_v55 = vpack.c.bf16 %v5449_v16, %v5449_v16  ;;  %v5623_v35 = vpack.c.bf16 %v5505_v1, %v5505_v1  ;;  %8715 = vmatprep.subr.bf16.mxu0 %v9329_v53  ;;  %v9358_v53 = vld [vmem:[#allocation7 + $0xf8] sm:$0xff]  }
 0x6e5   :  { %v5631_v18 = vpack.c.bf16 %v5561_v25, %v5561_v25  ;;  %v5980_v8 = vunpack.c.l.b16 %v5575_v50  ;;  %v5988_v11 = vunpack.c.l.b16 %v5583_v10  ;;  %v5996_v49 = vunpack.c.l.b16 %v5591_v45  ;;  %8737 = vmatprep.subr.bf16.mxu1 %v9330_v7  ;;  %v9359_v7 = vld [vmem:[#allocation7 + $0x38] sm:$0xff]  }
 0x6e6   :  { %v6004_v24 = vunpack.c.l.b16 %v5599_v5  ;;  %v6012_v51 = vunpack.c.l.b16 %v5607_v44  ;;  %v6020_v19 = vunpack.c.l.b16 %v5615_v55  ;;  %v6028_v32 = vunpack.c.l.b16 %v5623_v35  ;;  %v9337_v5 = vld [vmem:[#allocation7 + $0x50] sm:$0xff]  }
 0x6e7   :  { %v6087_v0 = vsel %vm6038_vm2, %v5988_v11, %v5980_v8  ;;  %v6036_v42 = vunpack.c.l.b16 %v5631_v18  ;;  %v5893_v28 = vrot.slane %v8135_v21, %v13278_v37  ;;  %v5901_v27 = vrot.slane %v8135_v21, %v13279_v22  ;;  %v9338_v44 = vld [vmem:[#allocation7 + $0xd0] sm:$0xff]   ;;  %v9341_v18 = vld [vmem:[#allocation7 + $0x58] sm:$0xff]  }
 0x6e8   :  { %v6088_v3 = vsel %vm6040_vm3, %v5996_v49, %v6087_v0  ;;  %v5897_v31 = vrot.slane %v8135_v21, %v13280_v17  ;;  %v5905_v14 = vrot.slane %v8135_v21, %v13281_v59  ;;  %v9339_v55 = vld [vmem:[#allocation7 + $0x10] sm:$0xff]   ;;  %v9342_v8 = vld [vmem:[#allocation7 + $0xd8] sm:$0xff]   ;;  %v9348_v0 = vld [vmem:[#allocation7 + $0xa0] sm:$0xff]  }
 0x6e9   :  { %v6089_v39 = vsel %vm6042_vm4, %v6004_v24, %v6088_v3  ;;  %v9340_v35 = vld [vmem:[#allocation7 + $0x90] sm:$0xff]   ;;  %v9343_v11 = vld [vmem:[#allocation7 + $0x18] sm:$0xff]   ;;  %v9345_v24 = vld [vmem:[#allocation7 + $0x60] sm:$0xff]  }
 0x6ea   :  { %v6090_v33 = vsel %vm6044_vm5, %v6012_v51, %v6089_v39  ;;  %v9344_v49 = vld [vmem:[#allocation7 + $0x98] sm:$0xff]   ;;  %v9346_v51 = vld [vmem:[#allocation7 + $0xe0] sm:$0xff]   ;;  %v9350_v3 = vld [vmem:[#allocation7 + $0xe8] sm:$0xff]  }
 0x6eb   :  { %v6091_v26 = vsel %vm6046_vm6, %v6020_v19, %v6090_v33  ;;  %v9347_v19 = vld [vmem:[#allocation7 + $0x20] sm:$0xff]   ;;  %v9352_v39 = vld [vmem:[#allocation7 + $0xa8] sm:$0xff]   ;;  %v9353_v33 = vld [vmem:[#allocation7 + $0x70] sm:$0xff]  }
 0x6ec   :  { %v6092_v30 = vsel %vm6048_vm7, %v6028_v32, %v6091_v26  ;;  %v9349_v32 = vld [vmem:[#allocation7 + $0x68] sm:$0xff]   ;;  %v9354_v26 = vld [vmem:[#allocation7 + $0xf0] sm:$0xff]  }
 0x6ed   :  { %v6093_v29 = vsel %vm6050_vm8, %v6036_v42, %v6092_v30  ;;  %v9351_v42 = vld [vmem:[#allocation7 + $0x28] sm:$0xff]   ;;  %v9355_v30 = vld [vmem:[#allocation7 + $0x30] sm:$0xff]  }
 0x6ee   :  { %v6107_v40 = vpack.c.b16 %v6093_v29, %v6093_v29  ;;  %v9356_v29 = vld [vmem:[#allocation7 + $0xb0] sm:$0xff]  }
 0x6f0   :  { %7553 = vmatmul.mubr.bf16.vlgmr.msra.gmra.mrb[192].mxu0 %v6107_v40  ;;  %7717 = vmatmul.mubr.bf16.vlgmr.msra.gmra.mrb[192].mxu1 %v6107_v40  ;;  %v9357_v40 = vld [vmem:[#allocation7 + $0x78] sm:$0xff]  }
 0x6f1   :  { %8716 = vmatpush3.bf16.msra.mxu0 %v9331_v6  ;;  %8738 = vmatpush3.bf16.msra.mxu1 %v9332_v34  ;;  %v9360_v6 = vld [vmem:[#allocation7 + $0xb8] sm:$0xff]  }
 0x6f2   :  { %8717 = vmatprep.subr.bf16.mxu0 %v9333_v15  ;;  %8739 = vmatprep.subr.bf16.mxu1 %v9334_v58 }
 0x6f5   :  { %8718 = vmatpush3.bf16.msra.mxu0 %v9335_v46  ;;  %8740 = vmatpush3.bf16.msra.mxu1 %v9336_v4 }
 0x6f6   :  { %8719 = vmatprep.subr.bf16.mxu0 %v9337_v5  ;;  %8741 = vmatprep.subr.bf16.mxu1 %v9338_v44 }
 0x6f9   :  { %8720 = vmatpush3.bf16.msra.mxu0 %v9339_v55  ;;  %8742 = vmatpush3.bf16.msra.mxu1 %v9340_v35 }
 0x6fa   :  { %8721 = vmatprep.subr.bf16.mxu0 %v9341_v18  ;;  %8743 = vmatprep.subr.bf16.mxu1 %v9342_v8 }
 0x6fd   :  { %8722 = vmatpush3.bf16.msra.mxu0 %v9343_v11  ;;  %8744 = vmatpush3.bf16.msra.mxu1 %v9344_v49 }
 0x6fe   :  { %8723 = vmatprep.subr.bf16.mxu0 %v9345_v24  ;;  %8745 = vmatprep.subr.bf16.mxu1 %v9346_v51 }
 0x701   :  { %8724 = vmatpush3.bf16.msra.mxu0 %v9347_v19  ;;  %8746 = vmatpush3.bf16.msra.mxu1 %v9348_v0 }
 0x702   :  { %8725 = vmatprep.subr.bf16.mxu0 %v9349_v32  ;;  %8747 = vmatprep.subr.bf16.mxu1 %v9350_v3 }
 0x705   :  { %8726 = vmatpush3.bf16.msra.mxu0 %v9351_v42  ;;  %8748 = vmatpush3.bf16.msra.mxu1 %v9352_v39 }
 0x706   :  { %8727 = vmatprep.subr.bf16.mxu0 %v9353_v33  ;;  %8749 = vmatprep.subr.bf16.mxu1 %v9354_v26 }
 0x709   :  { %8728 = vmatpush3.bf16.msra.mxu0 %v9355_v30  ;;  %8750 = vmatpush3.bf16.msra.mxu1 %v9356_v29 }
 0x70a   :  { %8729 = vmatprep.subr.bf16.mxu0 %v9357_v40  ;;  %8751 = vmatprep.subr.bf16.mxu1 %v9358_v53 }
 0x70d   :  { %8730 = vmatpush3.bf16.msra.mxu0 %v9359_v7  ;;  %8752 = vmatpush3.bf16.msra.mxu1 %v9360_v6 }
 0x7c3   :  { %v7554_v2 = vpop.f32.mrb[192].mxu0  ;;  %v7718_v41 = vpop.f32.mrb[192].mxu1 }
 0x7c4   :  { %v8759_v38 = vadd.f32 %v7554_v2, %v5893_v28  ;;  %v8761_v63 = vadd.f32 %v7718_v41, %v5901_v27  ;;  %v7556_v20 = vpop.f32.mrb[193].mxu0  ;;  %v7720_v47 = vpop.f32.mrb[193].mxu1 }
 0x7c5   :  { %v8760_v9 = vadd.f32 %v7556_v20, %v5897_v31  ;;  %v8762_v61 = vadd.f32 %v7720_v47, %v5905_v14  ;;  %v7558_v43 = vpop.f32.mrb[194].mxu0  ;;  %v7722_v12 = vpop.f32.mrb[194].mxu1 }
 0x7c6   :  { %v12537_v57 = vmax.f32 %v8759_v38, 0.0  ;;  %v7559_v52 = vpop.f32.mrb[195].mxu0  ;;  %v7723_v13 = vpop.f32.mrb[195].mxu1  ;;  %v12539_v54 = vmax.f32 %v8761_v63, 0.0  ;;  %v8682_v12 = vld [vmem:[%s12584_s8] ss:$0 sm:$0xff] }
 0x7c7   :  { %v12541_v62 = vmax.f32 %v8760_v9, 0.0  ;;  %v12547_v60 = vmax.f32 %v8762_v61, 0.0  ;;  %s9539_s8 = smov [#allocation10]  }
 0x7c8   :  { %v7736_v56 = vmul.f32 %v12537_v57, %v12537_v57  ;;  %v7738_v16 = vmul.f32 %v12539_v54, %v12539_v54  ;;  %s8124_s6 = sshll.u32 %s9539_s8, 4  ;;  %s8125_s6 = int_to_ptr.vmem [resolvable:$true] %s8124_s6 }
 0x7c9   :  { %v7737_v48 = vmul.f32 %v12541_v62, %v12541_v62  ;;  %v7729_v36 = vadd.f32 %v12541_v62, %v12537_v57  ;;  %v7739_v50 = vmul.f32 %v12547_v60, %v12547_v60  ;;  %s9497_s17 = scalar_lea.vmem %s8125_s6, 128  ;;  %p9502_p5 = scmp.lt.s32.totalorder %s8125_s6, %s8125_s6 }
 0x7ca   :  { %p9498_p4 = scmp.ne.s32.totalorder %s8125_s6, %s9497_s17  ;;  %p9503_p6 = scmp.lt.s32.totalorder %s9497_s17, %s9497_s17 }
 0x7cb   :  { %v7730_v23 = vadd.f32 %v7729_v36, %v12539_v54  ;;  %v7740_v1 = vadd.f32 %v7737_v48, %v7736_v56 }
 0x7cc   :  { %p9504_p7 = por %p9503_p6, %p9502_p5 }
 0x7cd   :  { %v7731_v25 = vadd.f32 %v7730_v23, %v12547_v60  ;;  %v7741_v10 = vadd.f32 %v7740_v1, %v7738_v16 }
 0x7ce   :  { %p9505_p8 = pnand %p9504_p7, %p9498_p4 }
 0x7cf   :  { %7732 = vadd.xlane.f32.xlu0 %v7731_v25  ;;  %v7742_v45 = vadd.f32 %v7741_v10, %v7739_v50 }
 0x7d1   :  { %7743 = vadd.xlane.f32.xlu1 %v7742_v45 }
 0x85c   :  { %v7733_v34 = vpop.xlane.xlu0 %7732 }
 0x85d   :  { %v7735_v15 = vmul.f32 0.001953125, %v7733_v34 }
 0x85e   :  { %v7744_v58 = vpop.xlane.xlu1 %7743 }
 0x85f   :  { %v7745_v46 = vmul.f32 0.001953125, %v7744_v58  ;;  %v7746_v4 = vmul.f32 %v7735_v15, %v7735_v15  ;;  %v7750_v22 = vsub.f32 %v12541_v62, %v7735_v15  ;;  %v7752_v27 = vsub.f32 %v12547_v60, %v7735_v15 }
 0x860   :  { %v7749_v17 = vsub.f32 %v12537_v57, %v7735_v15  ;;  %v7751_v31 = vsub.f32 %v12539_v54, %v7735_v15 }
 0x861   :  { %v7747_v21 = vsub.f32 %v7745_v46, %v7746_v4 }
 0x863   :  { %v7748_v37 = vmax.f32 %v7747_v21, 0.0 }
 0x865   :  { %v7753_v28 = vadd.f32 1e-05, %v7748_v37 }
 0x867   :  { %9393 = vrsqrt.f32 %v7753_v28 }
 0x871   :  { %v9394_v59 = vpop.eup %9393 }
 0x872   :  { %v7756_v14 = vmul.f32 %v9394_v59, %v7750_v22  ;;  %v7758_v2 = vmul.f32 %v9394_v59, %v7752_v27  ;;  %v7755_v41 = vmul.f32 %v9394_v59, %v7749_v17  ;;  %v7757_v38 = vmul.f32 %v9394_v59, %v7751_v31 }
 0x874   :  { %v7760_v63 = vpack.c.bf16 %v7756_v14, %v7756_v14  ;;  %v7762_v20 = vpack.c.bf16 %v7758_v2, %v7758_v2  ;;  %v7759_v47 = vpack.c.bf16 %v7755_v41, %v7755_v41  ;;  %v7761_v9 = vpack.c.bf16 %v7757_v38, %v7757_v38 }
 0x876   :  { %8058 = vmatprep.mubr.bf16.mxu0 %v7760_v63  ;;  %8098 = vmatprep.mubr.bf16.mxu1 %v7762_v20 }
 0x877   :  { %8059 = vmatmul.mubr.bf16.vlgmr.msra.gmra.mrb[196].mxu0 %v7759_v47  ;;  %8099 = vmatmul.mubr.bf16.vlgmr.msra.gmra.mrb[196].mxu1 %v7761_v9 }
 0x94a   :  { %v8731_v61 = vpop.f32.mrb[196].mxu0  ;;  %v8753_v43 = vpop.f32.mrb[196].mxu1 }
 0x94b   :  { %v8732_v57 = vpop.f32.mrb[197].mxu0  ;;  %v8754_v52 = vpop.f32.mrb[197].mxu1 }
 0x94c   :  { %v8733_v13 = vadd.f32 %v8732_v57, %v8731_v61  ;;  %v8755_v54 = vadd.f32 %v8754_v52, %v8753_v43  ;;  %v8734_v62 = vpop.f32.mrb[198].mxu0  ;;  %v8756_v56 = vpop.f32.mrb[198].mxu1 }
 0x94d   :  { %v8735_v48 = vpop.f32.mrb[199].mxu0  ;;  %v8757_v60 = vpop.f32.mrb[199].mxu1 }
 0x94e   :  { %v8061_v36 = vadd.f32 %v8733_v13, %v8682_v12 }
 0x950   :  { %v8101_v23 = vadd.f32 %v8755_v54, %v8061_v36 }
 0x952   :  { %8106 = vmax.xlane.f32.xlu0 %v8101_v23 }
 0x9df   :  { %v8107_v16 = vpop.xlane.xlu0 %8106 }
 0x9e0   :  { %v8108_v1 = vsub.f32 %v8101_v23, %v8107_v16 }
 0x9e2   :  { %v8109_v25 = vmul.f32 1.442695, %v8108_v1 }
 0x9e4   :  { %9395 = vpow2.f32 %v8109_v25 }
 0x9ee   :  { %v9396_v50 = vpop.eup %9395 }
 0x9ef   :  { %8111 = vadd.xlane.f32.xlu1 %v9396_v50 }
 0xa7c   :  { %v8112_v10 = vpop.xlane.xlu1 %8111 }
 0xa7d   :  { %9397 = vlog2.f32 %v8112_v10 }
 0xa87   :  { %v9398_v45 = vpop.eup %9397 }
 0xa88   :  { %v8114_v5 = vmul.f32 0.6931472, %v9398_v45 }
 0xa8a   :  { %v8115_v44 = vadd.f32 %v8114_v5, %v8107_v16 }
 0xa8c   :  { %v8116_v55 = vsub.f32 %v8101_v23, %v8115_v44 }
 0xa8e   :  { %8117 = vst [vmem:[#allocation10] sm:$0xff] %v8116_v55 }
 0xa8f   :  { %9508 = shalt.err (!%p9505_p8)
}
 0xa90   :  { %s9509_s19 = scalar_lea.hbm %s12585_s9, 128 }
 0xa91   :  { %p9510_p9 = scmp.ne.s32.totalorder %s12585_s9, %s9509_s19  ;;  %p9513_p10 = scmp.lt.u32.totalorder %s9509_s19, %s12585_s9 }
 0xa93   :  { %p9515_p11 = pnand %p9513_p10, %p9510_p9 }
 0xa95   :  { %9518 = shalt.err (!%p9515_p11)
}
 0xa96   :  { %8127 = dma.vmem_to_hbm [thread:$0]  %s8125_s6, 128, %s12585_s9, [#allocation4]  }
 0xa97   :  { %9525 = dma.done.wait [#allocation4], 128  }
 0xa98   :  { %9526 = vsyncadd [#allocation4], 4294967168 }
 0xa99   :  { %8131 = vsyncpa [#allocation3], 1 }
 0xa9a   :  { %8132 = vsyncpa [#allocation6], 1 }
 0xa9b   :  { %8133 = vsyncpa [#allocation9], 1 }
 0xa9c   :  { %8134 = vsyncpa [#allocation4], 1 }

</bundles_post_ra>
